<compile_context>
chip_gen: v5e
topology: v5e:2x2
jax: 0.10.0
libtpu: 0.0.40
codegen_flags: <defaults>
</compile_context>

<pallas_src>
import functools

import jax
import jax.numpy as jnp
from jax.experimental import pallas as pl
from jax.experimental.pallas import tpu as pltpu

BN_EPS = 1e-5


# ---------------------------------------------------------------------------
# Fused kernel: GC-weight construction + grouped causal conv (im2col) + output
# head, for all subsets and block_b batch elements per grid step.
# ---------------------------------------------------------------------------
def _unit_gcgcn_kernel(x4_ref, xf_ref, w12_ref, b12_ref, a_ref, wh_ref, bias_ref,
                       alpha_ref,
                       o_ref, loss_ref, ridge_ref,
                       taps_ref, zx_ref, *, mxu_dtype):
    Bb, C, T, V = x4_ref.shape
    S = a_ref.shape[0]
    ts = w12_ref.shape[0] // (2 * S)

    alpha = alpha_ref[0]                               # traced scalar from SMEM
    w12 = w12_ref[...]                                 # (2*S*ts, C)
    b12 = b12_ref[...]                                 # (2*S*ts, 1)
    wh = wh_ref[...]                                   # (OC, (S+1)*C)  BN-folded head
    bias = bias_ref[...]                               # (OC, 1)

    for b in range(Bb):
        x3 = x4_ref[b]                                 # (C, T, V)
        x2 = x3.reshape(C * T, V)                      # loss target, rows = (c, t)
        xm = jnp.mean(x3, axis=1)                      # (C, V)

        # Causal left pad (ts-1 zeros) applied in VMEM, then the shared im2col taps slab:
        # taps[(c,t), (s,p)] = x_pad[c, t+s, p].  Built with masked sub-tile stores into a
        # VMEM scratch (robust; no lane concat / minor-dim reshape) and reused by all subsets.
        xpad = jnp.concatenate(
            [jnp.zeros((C, ts - 1, V), jnp.float32), x3], axis=1)          # (C, T+ts-1, V)
        for s in range(ts):
            taps_ref[:, s * V:(s + 1) * V] = (
                xpad[:, s:s + T, :].reshape(C * T, V).astype(mxu_dtype))
        taps = taps_ref[...]                           # (C*T, ts*V)  bf16 MXU operand

        # All conv1/conv2 1x1 convs of all subsets (mean over T folded) in ONE matmul.
        c12 = jnp.dot(w12, xm, preferred_element_type=jnp.float32) + b12    # (2*S*ts, V)

        loss_rows = []
        ridge_rows = []
        for i in range(S):
            # --- Granger-causality weights (kept entirely on-chip) ------------------
            c1 = c12[i * ts:(i + 1) * ts]                       # (ts, V)
            c2 = c12[(S + i) * ts:(S + i + 1) * ts]             # (ts, V)
            d3 = jnp.tanh(c1[:, :, None] - c2[:, None, :])      # (ts, V, V), f32
            ridge_rows.append(jnp.sum(d3 * d3, axis=(0, 1))[None, :])       # (1, V)
            # W[(s,p), q] = alpha * d + A_i[p, q]  (A broadcast over the ts taps)
            w_gc = (alpha * d3 + a_ref[i]).reshape(ts * V, V).astype(mxu_dtype)

            # --- grouped causal temporal conv: single fused im2col contraction ------
            z = jnp.dot(taps, w_gc, preferred_element_type=jnp.float32)     # (C*T, V) f32

            diff = z - x2                                       # prediction residual (f32)
            loss_rows.append(jnp.sum(diff * diff, axis=0)[None, :])         # (1, V)

            # Relayout (c,t)-rows x q-lanes -> c-rows x (t,q)-lanes so the output head and
            # the final store are lane-dense; done with plain masked sub-tile VMEM stores.
            z3 = z.reshape(C, T, V)
            for t in range(T):
                zx_ref[i * C:(i + 1) * C, t * V:(t + 1) * V] = z3[:, t, :]

        # Down-branch rows: x already arrives pre-flattened as (C, T*V) — no relayout.
        zx_ref[S * C:(S + 1) * C, :] = xf_ref[b]

        # Output head: sum_i BN(conv3_i(z_i)) + BN_down(conv_down(x)) as ONE matmul over
        # the stacked ((S+1)*C, T*V) slab; stored lane-dense (last dim T*V = 256).
        y = jnp.dot(wh, zx_ref[...], preferred_element_type=jnp.float32) + bias   # (OC, T*V)
        o_ref[b] = jnp.maximum(y, 0.0).astype(o_ref.dtype)

        # One store per output per batch element (register-accumulated partials).
        loss_ref[b] = jnp.concatenate(loss_rows, axis=0)        # (S, V)
        ridge_ref[b] = jnp.concatenate(ridge_rows, axis=0)      # (S, V)


# ---------------------------------------------------------------------------
# Wrapper
# ---------------------------------------------------------------------------
def _bn_affine(bn):
    # TODO(synk): BatchNorm2d is reproduced in eval mode (running stats);
    # training-mode batch statistics are not computed.
    scale = bn["gamma"] / jnp.sqrt(bn["rv"] + BN_EPS)
    shift = bn["beta"] - bn["rm"] * scale
    return scale.reshape(-1, 1), shift.reshape(-1, 1)


def prepare_params(params):
    """Hoisted parameter packing (call once; reused across forward calls)."""
    gc = params["gcgc"]
    bn_s, bn_t = _bn_affine(params["bn"])
    dn_s, dn_t = _bn_affine(params["down_bn"])

    w12 = jnp.concatenate([g["w1"] for g in gc] + [g["w2"] for g in gc], axis=0)
    b12 = jnp.concatenate([g["b1"] for g in gc] + [g["b2"] for g in gc], axis=0)

    # BN folded into conv3_i / down; stacked along the contraction dim of the head matmul.
    whead = jnp.concatenate([bn_s * g["w3"] for g in gc] + [dn_s * params["down_w"]], axis=1)
    b3_sum = sum(g["b3"] for g in gc).reshape(-1, 1)
    bias = bn_s * b3_sum + bn_t + dn_s * params["down_b"].reshape(-1, 1) + dn_t
    return {"A": params["A"], "w12": w12, "b12": b12, "whead": whead, "bias": bias}


def unit_gcgcn_forward(x, packed, alpha, *, block_b=None, mxu_dtype=jnp.bfloat16):
    # TODO(synk): stride != 1 (unit_tcn downsample) and the in_channels == out_channels
    # identity-down path are not implemented; stride == 1, in_ch != out_ch is assumed.
    B, C, T, V = x.shape
    A = packed["A"]
    S = A.shape[0]
    w12, b12 = packed["w12"], packed["b12"]
    whead, bias = packed["whead"], packed["bias"]
    OC = whead.shape[0]
    ts = w12.shape[0] // (2 * S)

    if block_b is None:
        block_b = 2 if B % 2 == 0 else 1
    assert B % block_b == 0, "batch must be divisible by block_b"
    grid = (B // block_b,)

    x_flat = x.reshape(B, C, T * V)                      # same bytes, lane-dense layout
    alpha_arr = jnp.full((1,), alpha, jnp.float32)       # traced scalar (no recompile)

    kernel = functools.partial(_unit_gcgcn_kernel, mxu_dtype=mxu_dtype)
    out_flat, loss_parts, ridge_parts = pl.pallas_call(
        kernel,
        out_shape=(
            jax.ShapeDtypeStruct((B, OC, T * V), jnp.float32),   # relu output, lane-dense
            jax.ShapeDtypeStruct((B, S, V), jnp.float32),        # loss partials (per lane)
            jax.ShapeDtypeStruct((B, S, V), jnp.float32),        # ridge partials (per lane)
        ),
        grid=grid,
        in_specs=[
            pl.BlockSpec((block_b, C, T, V), lambda g: (g, 0, 0, 0)),
            pl.BlockSpec((block_b, C, T * V), lambda g: (g, 0, 0)),
            pl.BlockSpec((2 * S * ts, C), lambda g: (0, 0)),
            pl.BlockSpec((2 * S * ts, 1), lambda g: (0, 0)),
            pl.BlockSpec((S, V, V), lambda g: (0, 0, 0)),
            pl.BlockSpec((OC, (S + 1) * C), lambda g: (0, 0)),
            pl.BlockSpec((OC, 1), lambda g: (0, 0)),
            pl.BlockSpec(memory_space=pltpu.MemorySpace.SMEM),   # alpha scalar
        ],
        out_specs=(
            pl.BlockSpec((block_b, OC, T * V), lambda g: (g, 0, 0)),
            pl.BlockSpec((block_b, S, V), lambda g: (g, 0, 0)),
            pl.BlockSpec((block_b, S, V), lambda g: (g, 0, 0)),
        ),
        scratch_shapes=[
            pltpu.VMEM((C * T, ts * V), mxu_dtype),              # shared im2col taps slab
            pltpu.VMEM(((S + 1) * C, T * V), jnp.float32),       # stacked head input slab
        ],
        compiler_params=pltpu.CompilerParams(dimension_semantics=("parallel",)),
    )(x, x_flat, w12, b12, A, whead, bias, alpha_arr)

    out = out_flat.reshape(B, OC, T, V)
    # torch MSELoss(reduction='mean') over the whole (B, V, C*T) tensor per subset.
    loss_tot = jnp.sum(loss_parts, axis=(0, 2)) / (B * C * T * V)
    ridge_tot = jnp.sum(ridge_parts, axis=-1)                    # (B, S)
    losses = [loss_tot[i] for i in range(S)]
    ridges = [ridge_tot[:, i] for i in range(S)]
    return out, losses, ridges


if __name__ == "__main__":
    B, C_in, C_out, T, V = 4, 4, 8, 16, 16
    S = 3          # num_subset == A.shape[0]
    TS = 9         # GCGC default time_step

    key = jax.random.PRNGKey(0)
    _keys = iter(jax.random.split(key, 64))

    def nrm(shape, scale=0.1):
        return (scale * jax.random.normal(next(_keys), shape)).astype(jnp.float32)

    params = {
        "time_step": TS,
        "A": nrm((S, V, V)),
        "gcgc": [
            dict(w1=nrm((TS, C_in)), b1=nrm((TS, 1)),
                 w2=nrm((TS, C_in)), b2=nrm((TS, 1)),
                 w3=nrm((C_out, C_in)), b3=nrm((C_out,)))
            for _ in range(S)
        ],
        "bn": dict(gamma=1.0 + nrm((C_out,)), beta=nrm((C_out,)),
                   rm=nrm((C_out,)), rv=1.0 + jnp.abs(nrm((C_out,)))),
        # down branch (in_channels != out_channels): Conv2d(in, out, 1) + BatchNorm2d
        "down_w": nrm((C_out, C_in)),
        "down_b": nrm((C_out,)),
        "down_bn": dict(gamma=1.0 + nrm((C_out,)), beta=nrm((C_out,)),
                        rm=nrm((C_out,)), rv=1.0 + jnp.abs(nrm((C_out,)))),
    }
    # torch initializes alpha = zeros(1); nonzero here so the tanh path contributes.
    alpha = 0.5

    x = jax.random.normal(next(_keys), (B, C_in, T, V), dtype=jnp.float32)

    packed = prepare_params(params)                      # hoisted out of the forward path
    fwd = jax.jit(functools.partial(unit_gcgcn_forward, block_b=2))

    out, losses, ridges = fwd(x, packed, alpha)
    out = jax.block_until_ready(out)
    losses = [jax.block_until_ready(l) for l in losses]
    ridges = [jax.block_until_ready(r) for r in ridges]

    assert out.shape == (B, C_out, T, V)
    assert len(losses) == S and len(ridges) == S
    assert all(r.shape == (B,) for r in ridges)
    assert bool(jnp.all(jnp.isfinite(out)))
    assert bool(jnp.all(out >= 0.0))                     # relu output
    assert all(bool(jnp.isfinite(l)) for l in losses)
    assert all(bool(jnp.all(jnp.isfinite(r))) for r in ridges)
    print("KERNEL_OK")
</pallas_src>

<mosaic_0001>
module attributes {stable_mosaic.version = 11 : i64} {
  func.func @_unit_gcgcn_kernel(%arg0: i32, %arg1: memref<2x4x16x16xf32, #tpu.memory_space<vmem>>, %arg2: memref<2x4x256xf32, #tpu.memory_space<vmem>>, %arg3: memref<54x4xf32, #tpu.memory_space<vmem>>, %arg4: memref<54x1xf32, #tpu.memory_space<vmem>>, %arg5: memref<3x16x16xf32, #tpu.memory_space<vmem>>, %arg6: memref<8x16xf32, #tpu.memory_space<vmem>>, %arg7: memref<8x1xf32, #tpu.memory_space<vmem>>, %arg8: memref<1xf32, #tpu.memory_space<smem>>, %arg9: memref<2x8x256xf32, #tpu.memory_space<vmem>>, %arg10: memref<2x3x16xf32, #tpu.memory_space<vmem>>, %arg11: memref<2x3x16xf32, #tpu.memory_space<vmem>>, %arg12: memref<64x144xbf16, #tpu.memory_space<vmem>>, %arg13: memref<16x256xf32, #tpu.memory_space<vmem>>) attributes {dimension_semantics = [#tpu.dimension_semantics<parallel>], iteration_bounds = array<i64: 2>, scalar_prefetch = 0 : i64, scratch_operands = 2 : i64, tpu.core_type = #tpu.core_type<tc>, window_params = [{transform_indices = @transform_0, window_bounds = array<i64: 2, 4, 16, 16>}, {transform_indices = @transform_1, window_bounds = array<i64: 2, 4, 256>}, {pipeline_mode = #tpu.pipeline_mode<synchronous>, transform_indices = @transform_2, window_bounds = array<i64: 54, 4>}, {pipeline_mode = #tpu.pipeline_mode<synchronous>, transform_indices = @transform_3, window_bounds = array<i64: 54, 1>}, {pipeline_mode = #tpu.pipeline_mode<synchronous>, transform_indices = @transform_4, window_bounds = array<i64: 3, 16, 16>}, {pipeline_mode = #tpu.pipeline_mode<synchronous>, transform_indices = @transform_5, window_bounds = array<i64: 8, 16>}, {pipeline_mode = #tpu.pipeline_mode<synchronous>, transform_indices = @transform_6, window_bounds = array<i64: 8, 1>}, {transform_indices = @transform_7, window_bounds = array<i64: 1>}, {transform_indices = @transform_8, window_bounds = array<i64: 2, 8, 256>}, {transform_indices = @transform_9, window_bounds = array<i64: 2, 3, 16>}, {transform_indices = @transform_10, window_bounds = array<i64: 2, 3, 16>}]} {
    %c0 = arith.constant 0 : index
    %0 = memref.load %arg8[%c0] : memref<1xf32, #tpu.memory_space<smem>>
    %c0_0 = arith.constant 0 : index
    %c0_1 = arith.constant 0 : index
    %1 = vector.load %arg3[%c0_0, %c0_1] : memref<54x4xf32, #tpu.memory_space<vmem>>, vector<54x4xf32>
    %c0_2 = arith.constant 0 : index
    %c0_3 = arith.constant 0 : index
    %2 = vector.load %arg4[%c0_2, %c0_3] : memref<54x1xf32, #tpu.memory_space<vmem>>, vector<54x1xf32>
    %c0_4 = arith.constant 0 : index
    %c0_5 = arith.constant 0 : index
    %3 = vector.load %arg6[%c0_4, %c0_5] : memref<8x16xf32, #tpu.memory_space<vmem>>, vector<8x16xf32>
    %c0_6 = arith.constant 0 : index
    %c0_7 = arith.constant 0 : index
    %4 = vector.load %arg7[%c0_6, %c0_7] : memref<8x1xf32, #tpu.memory_space<vmem>>, vector<8x1xf32>
    %c0_8 = arith.constant 0 : index
    %c0_9 = arith.constant 0 : index
    %c0_10 = arith.constant 0 : index
    %c0_11 = arith.constant 0 : index
    %5 = vector.load %arg1[%c0_8, %c0_9, %c0_10, %c0_11] : memref<2x4x16x16xf32, #tpu.memory_space<vmem>>, vector<1x4x16x16xf32>
    %6 = vector.shape_cast %5 : vector<1x4x16x16xf32> to vector<4x16x16xf32>
    %7 = vector.shape_cast %6 : vector<4x16x16xf32> to vector<64x16xf32>
    %cst = arith.constant dense<0.000000e+00> : vector<4x16xf32>
    %8 = vector.multi_reduction <add>, %6, %cst [1] : vector<4x16x16xf32> to vector<4x16xf32>
    %cst_12 = arith.constant 1.600000e+01 : f32
    %9 = vector.broadcast %cst_12 : f32 to vector<4x16xf32>
    %10 = arith.divf %8, %9 : vector<4x16xf32>
    %cst_13 = arith.constant 0.000000e+00 : f32
    %11 = vector.broadcast %cst_13 : f32 to vector<4x8x16xf32>
    %12 = tpu.concatenate %11, %6 in 1 : vector<4x8x16xf32>, vector<4x16x16xf32> -> vector<4x24x16xf32>
    %13 = vector.extract_strided_slice %12 {offsets = [0, 0, 0], sizes = [4, 16, 16], strides = [1, 1, 1]} : vector<4x24x16xf32> to vector<4x16x16xf32>
    %14 = vector.shape_cast %13 : vector<4x16x16xf32> to vector<64x16xf32>
    %15 = arith.truncf %14 : vector<64x16xf32> to vector<64x16xbf16>
    %c0_14 = arith.constant 0 : index
    %c0_15 = arith.constant 0 : index
    %16 = vector.load %arg12[%c0_14, %c0_15] : memref<64x144xbf16, #tpu.memory_space<vmem>>, vector<64x16xbf16>
    tpu.vector_store %arg12[%c0_14, %c0_15], %15 {strides = array<i32>} : memref<64x144xbf16, #tpu.memory_space<vmem>>, vector<64x16xbf16>,
    %17 = vector.extract_strided_slice %12 {offsets = [0, 1, 0], sizes = [4, 16, 16], strides = [1, 1, 1]} : vector<4x24x16xf32> to vector<4x16x16xf32>
    %18 = vector.shape_cast %17 : vector<4x16x16xf32> to vector<64x16xf32>
    %19 = arith.truncf %18 : vector<64x16xf32> to vector<64x16xbf16>
    %c0_16 = arith.constant 0 : index
    %c16 = arith.constant 16 : index
    %20 = vector.load %arg12[%c0_16, %c16] : memref<64x144xbf16, #tpu.memory_space<vmem>>, vector<64x16xbf16>
    tpu.vector_store %arg12[%c0_16, %c16], %19 {strides = array<i32>} : memref<64x144xbf16, #tpu.memory_space<vmem>>, vector<64x16xbf16>,
    %21 = vector.extract_strided_slice %12 {offsets = [0, 2, 0], sizes = [4, 16, 16], strides = [1, 1, 1]} : vector<4x24x16xf32> to vector<4x16x16xf32>
    %22 = vector.shape_cast %21 : vector<4x16x16xf32> to vector<64x16xf32>
    %23 = arith.truncf %22 : vector<64x16xf32> to vector<64x16xbf16>
    %c0_17 = arith.constant 0 : index
    %c32 = arith.constant 32 : index
    %24 = vector.load %arg12[%c0_17, %c32] : memref<64x144xbf16, #tpu.memory_space<vmem>>, vector<64x16xbf16>
    tpu.vector_store %arg12[%c0_17, %c32], %23 {strides = array<i32>} : memref<64x144xbf16, #tpu.memory_space<vmem>>, vector<64x16xbf16>,
    %25 = vector.extract_strided_slice %12 {offsets = [0, 3, 0], sizes = [4, 16, 16], strides = [1, 1, 1]} : vector<4x24x16xf32> to vector<4x16x16xf32>
    %26 = vector.shape_cast %25 : vector<4x16x16xf32> to vector<64x16xf32>
    %27 = arith.truncf %26 : vector<64x16xf32> to vector<64x16xbf16>
    %c0_18 = arith.constant 0 : index
    %c48 = arith.constant 48 : index
    %28 = vector.load %arg12[%c0_18, %c48] : memref<64x144xbf16, #tpu.memory_space<vmem>>, vector<64x16xbf16>
    tpu.vector_store %arg12[%c0_18, %c48], %27 {strides = array<i32>} : memref<64x144xbf16, #tpu.memory_space<vmem>>, vector<64x16xbf16>,
    %29 = vector.extract_strided_slice %12 {offsets = [0, 4, 0], sizes = [4, 16, 16], strides = [1, 1, 1]} : vector<4x24x16xf32> to vector<4x16x16xf32>
    %30 = vector.shape_cast %29 : vector<4x16x16xf32> to vector<64x16xf32>
    %31 = arith.truncf %30 : vector<64x16xf32> to vector<64x16xbf16>
    %c0_19 = arith.constant 0 : index
    %c64 = arith.constant 64 : index
    %32 = vector.load %arg12[%c0_19, %c64] : memref<64x144xbf16, #tpu.memory_space<vmem>>, vector<64x16xbf16>
    tpu.vector_store %arg12[%c0_19, %c64], %31 {strides = array<i32>} : memref<64x144xbf16, #tpu.memory_space<vmem>>, vector<64x16xbf16>,
    %33 = vector.extract_strided_slice %12 {offsets = [0, 5, 0], sizes = [4, 16, 16], strides = [1, 1, 1]} : vector<4x24x16xf32> to vector<4x16x16xf32>
    %34 = vector.shape_cast %33 : vector<4x16x16xf32> to vector<64x16xf32>
    %35 = arith.truncf %34 : vector<64x16xf32> to vector<64x16xbf16>
    %c0_20 = arith.constant 0 : index
    %c80 = arith.constant 80 : index
    %36 = vector.load %arg12[%c0_20, %c80] : memref<64x144xbf16, #tpu.memory_space<vmem>>, vector<64x16xbf16>
    tpu.vector_store %arg12[%c0_20, %c80], %35 {strides = array<i32>} : memref<64x144xbf16, #tpu.memory_space<vmem>>, vector<64x16xbf16>,
    %37 = vector.extract_strided_slice %12 {offsets = [0, 6, 0], sizes = [4, 16, 16], strides = [1, 1, 1]} : vector<4x24x16xf32> to vector<4x16x16xf32>
    %38 = vector.shape_cast %37 : vector<4x16x16xf32> to vector<64x16xf32>
    %39 = arith.truncf %38 : vector<64x16xf32> to vector<64x16xbf16>
    %c0_21 = arith.constant 0 : index
    %c96 = arith.constant 96 : index
    %40 = vector.load %arg12[%c0_21, %c96] : memref<64x144xbf16, #tpu.memory_space<vmem>>, vector<64x16xbf16>
    tpu.vector_store %arg12[%c0_21, %c96], %39 {strides = array<i32>} : memref<64x144xbf16, #tpu.memory_space<vmem>>, vector<64x16xbf16>,
    %41 = vector.extract_strided_slice %12 {offsets = [0, 7, 0], sizes = [4, 16, 16], strides = [1, 1, 1]} : vector<4x24x16xf32> to vector<4x16x16xf32>
    %42 = vector.shape_cast %41 : vector<4x16x16xf32> to vector<64x16xf32>
    %43 = arith.truncf %42 : vector<64x16xf32> to vector<64x16xbf16>
    %c0_22 = arith.constant 0 : index
    %c112 = arith.constant 112 : index
    %44 = vector.load %arg12[%c0_22, %c112] : memref<64x144xbf16, #tpu.memory_space<vmem>>, vector<64x16xbf16>
    tpu.vector_store %arg12[%c0_22, %c112], %43 {strides = array<i32>} : memref<64x144xbf16, #tpu.memory_space<vmem>>, vector<64x16xbf16>,
    %45 = vector.extract_strided_slice %12 {offsets = [0, 8, 0], sizes = [4, 16, 16], strides = [1, 1, 1]} : vector<4x24x16xf32> to vector<4x16x16xf32>
    %46 = vector.shape_cast %45 : vector<4x16x16xf32> to vector<64x16xf32>
    %47 = arith.truncf %46 : vector<64x16xf32> to vector<64x16xbf16>
    %c0_23 = arith.constant 0 : index
    %c128 = arith.constant 128 : index
    %48 = vector.load %arg12[%c0_23, %c128] : memref<64x144xbf16, #tpu.memory_space<vmem>>, vector<64x16xbf16>
    tpu.vector_store %arg12[%c0_23, %c128], %47 {strides = array<i32>} : memref<64x144xbf16, #tpu.memory_space<vmem>>, vector<64x16xbf16>,
    %c0_24 = arith.constant 0 : index
    %c0_25 = arith.constant 0 : index
    %49 = vector.load %arg12[%c0_24, %c0_25] : memref<64x144xbf16, #tpu.memory_space<vmem>>, vector<64x144xbf16>
    %cst_26 = arith.constant dense<0.000000e+00> : vector<54x16xf32>
    %50 = tpu.matmul %1, %10, %cst_26 {dimension_numbers = #tpu.dot_dimension_numbers<[1], [0], [0], [1], [0, 0, 1, 1], [], []>} : vector<54x4xf32>, vector<4x16xf32>, vector<54x16xf32> -> vector<54x16xf32>
    %51 = vector.broadcast %2 : vector<54x1xf32> to vector<54x16xf32>
    %52 = arith.addf %50, %51 : vector<54x16xf32>
    %53 = vector.extract_strided_slice %52 {offsets = [0, 0], sizes = [9, 16], strides = [1, 1]} : vector<54x16xf32> to vector<9x16xf32>
    %54 = vector.extract_strided_slice %52 {offsets = [27, 0], sizes = [9, 16], strides = [1, 1]} : vector<54x16xf32> to vector<9x16xf32>
    %55 = vector.shape_cast %53 : vector<9x16xf32> to vector<9x16x1xf32>
    %56 = vector.shape_cast %54 : vector<9x16xf32> to vector<9x1x16xf32>
    %57 = vector.broadcast %55 : vector<9x16x1xf32> to vector<9x16x16xf32>
    %58 = vector.broadcast %56 : vector<9x1x16xf32> to vector<9x16x16xf32>
    %59 = arith.subf %57, %58 : vector<9x16x16xf32>
    %60 = math.tanh %59 : vector<9x16x16xf32>
    %61 = arith.mulf %60, %60 : vector<9x16x16xf32>
    %cst_27 = arith.constant dense<0.000000e+00> : vector<16xf32>
    %62 = vector.multi_reduction <add>, %61, %cst_27 [0, 1] : vector<9x16x16xf32> to vector<16xf32>
    %63 = vector.shape_cast %62 : vector<16xf32> to vector<1x16xf32>
    %64 = vector.broadcast %0 : f32 to vector<9x16x16xf32>
    %65 = arith.mulf %64, %60 : vector<9x16x16xf32>
    %c0_28 = arith.constant 0 : index
    %c0_29 = arith.constant 0 : index
    %c0_30 = arith.constant 0 : index
    %66 = vector.load %arg5[%c0_28, %c0_29, %c0_30] : memref<3x16x16xf32, #tpu.memory_space<vmem>>, vector<1x16x16xf32>
    %67 = vector.shape_cast %66 : vector<1x16x16xf32> to vector<16x16xf32>
    %68 = vector.shape_cast %67 : vector<16x16xf32> to vector<1x16x16xf32>
    %69 = vector.broadcast %68 : vector<1x16x16xf32> to vector<9x16x16xf32>
    %70 = arith.addf %65, %69 : vector<9x16x16xf32>
    %71 = vector.shape_cast %70 : vector<9x16x16xf32> to vector<144x16xf32>
    %72 = arith.truncf %71 : vector<144x16xf32> to vector<144x16xbf16>
    %cst_31 = arith.constant dense<0.000000e+00> : vector<64x16xf32>
    %73 = tpu.matmul %49, %72, %cst_31 {dimension_numbers = #tpu.dot_dimension_numbers<[1], [0], [0], [1], [0, 0, 1, 1], [], []>} : vector<64x144xbf16>, vector<144x16xbf16>, vector<64x16xf32> -> vector<64x16xf32>
    %74 = arith.subf %73, %7 : vector<64x16xf32>
    %75 = arith.mulf %74, %74 : vector<64x16xf32>
    %cst_32 = arith.constant dense<0.000000e+00> : vector<16xf32>
    %76 = vector.multi_reduction <add>, %75, %cst_32 [0] : vector<64x16xf32> to vector<16xf32>
    %77 = vector.shape_cast %76 : vector<16xf32> to vector<1x16xf32>
    %78 = vector.shape_cast %73 : vector<64x16xf32> to vector<4x16x16xf32>
    %79 = vector.extract_strided_slice %78 {offsets = [0, 0, 0], sizes = [4, 1, 16], strides = [1, 1, 1]} : vector<4x16x16xf32> to vector<4x1x16xf32>
    %80 = vector.shape_cast %79 : vector<4x1x16xf32> to vector<4x16xf32>
    %c0_33 = arith.constant 0 : index
    %c0_34 = arith.constant 0 : index
    %81 = vector.load %arg13[%c0_33, %c0_34] : memref<16x256xf32, #tpu.memory_space<vmem>>, vector<4x16xf32>
    tpu.vector_store %arg13[%c0_33, %c0_34], %80 {strides = array<i32>} : memref<16x256xf32, #tpu.memory_space<vmem>>, vector<4x16xf32>,
    %82 = vector.extract_strided_slice %78 {offsets = [0, 1, 0], sizes = [4, 1, 16], strides = [1, 1, 1]} : vector<4x16x16xf32> to vector<4x1x16xf32>
    %83 = vector.shape_cast %82 : vector<4x1x16xf32> to vector<4x16xf32>
    %c0_35 = arith.constant 0 : index
    %c16_36 = arith.constant 16 : index
    %84 = vector.load %arg13[%c0_35, %c16_36] : memref<16x256xf32, #tpu.memory_space<vmem>>, vector<4x16xf32>
    tpu.vector_store %arg13[%c0_35, %c16_36], %83 {strides = array<i32>} : memref<16x256xf32, #tpu.memory_space<vmem>>, vector<4x16xf32>,
    %85 = vector.extract_strided_slice %78 {offsets = [0, 2, 0], sizes = [4, 1, 16], strides = [1, 1, 1]} : vector<4x16x16xf32> to vector<4x1x16xf32>
    %86 = vector.shape_cast %85 : vector<4x1x16xf32> to vector<4x16xf32>
    %c0_37 = arith.constant 0 : index
    %c32_38 = arith.constant 32 : index
    %87 = vector.load %arg13[%c0_37, %c32_38] : memref<16x256xf32, #tpu.memory_space<vmem>>, vector<4x16xf32>
    tpu.vector_store %arg13[%c0_37, %c32_38], %86 {strides = array<i32>} : memref<16x256xf32, #tpu.memory_space<vmem>>, vector<4x16xf32>,
    %88 = vector.extract_strided_slice %78 {offsets = [0, 3, 0], sizes = [4, 1, 16], strides = [1, 1, 1]} : vector<4x16x16xf32> to vector<4x1x16xf32>
    %89 = vector.shape_cast %88 : vector<4x1x16xf32> to vector<4x16xf32>
    %c0_39 = arith.constant 0 : index
    %c48_40 = arith.constant 48 : index
    %90 = vector.load %arg13[%c0_39, %c48_40] : memref<16x256xf32, #tpu.memory_space<vmem>>, vector<4x16xf32>
    tpu.vector_store %arg13[%c0_39, %c48_40], %89 {strides = array<i32>} : memref<16x256xf32, #tpu.memory_space<vmem>>, vector<4x16xf32>,
    %91 = vector.extract_strided_slice %78 {offsets = [0, 4, 0], sizes = [4, 1, 16], strides = [1, 1, 1]} : vector<4x16x16xf32> to vector<4x1x16xf32>
    %92 = vector.shape_cast %91 : vector<4x1x16xf32> to vector<4x16xf32>
    %c0_41 = arith.constant 0 : index
    %c64_42 = arith.constant 64 : index
    %93 = vector.load %arg13[%c0_41, %c64_42] : memref<16x256xf32, #tpu.memory_space<vmem>>, vector<4x16xf32>
    tpu.vector_store %arg13[%c0_41, %c64_42], %92 {strides = array<i32>} : memref<16x256xf32, #tpu.memory_space<vmem>>, vector<4x16xf32>,
    %94 = vector.extract_strided_slice %78 {offsets = [0, 5, 0], sizes = [4, 1, 16], strides = [1, 1, 1]} : vector<4x16x16xf32> to vector<4x1x16xf32>
    %95 = vector.shape_cast %94 : vector<4x1x16xf32> to vector<4x16xf32>
    %c0_43 = arith.constant 0 : index
    %c80_44 = arith.constant 80 : index
    %96 = vector.load %arg13[%c0_43, %c80_44] : memref<16x256xf32, #tpu.memory_space<vmem>>, vector<4x16xf32>
    tpu.vector_store %arg13[%c0_43, %c80_44], %95 {strides = array<i32>} : memref<16x256xf32, #tpu.memory_space<vmem>>, vector<4x16xf32>,
    %97 = vector.extract_strided_slice %78 {offsets = [0, 6, 0], sizes = [4, 1, 16], strides = [1, 1, 1]} : vector<4x16x16xf32> to vector<4x1x16xf32>
    %98 = vector.shape_cast %97 : vector<4x1x16xf32> to vector<4x16xf32>
    %c0_45 = arith.constant 0 : index
    %c96_46 = arith.constant 96 : index
    %99 = vector.load %arg13[%c0_45, %c96_46] : memref<16x256xf32, #tpu.memory_space<vmem>>, vector<4x16xf32>
    tpu.vector_store %arg13[%c0_45, %c96_46], %98 {strides = array<i32>} : memref<16x256xf32, #tpu.memory_space<vmem>>, vector<4x16xf32>,
    %100 = vector.extract_strided_slice %78 {offsets = [0, 7, 0], sizes = [4, 1, 16], strides = [1, 1, 1]} : vector<4x16x16xf32> to vector<4x1x16xf32>
    %101 = vector.shape_cast %100 : vector<4x1x16xf32> to vector<4x16xf32>
    %c0_47 = arith.constant 0 : index
    %c112_48 = arith.constant 112 : index
    %102 = vector.load %arg13[%c0_47, %c112_48] : memref<16x256xf32, #tpu.memory_space<vmem>>, vector<4x16xf32>
    tpu.vector_store %arg13[%c0_47, %c112_48], %101 {strides = array<i32>} : memref<16x256xf32, #tpu.memory_space<vmem>>, vector<4x16xf32>,
    %103 = vector.extract_strided_slice %78 {offsets = [0, 8, 0], sizes = [4, 1, 16], strides = [1, 1, 1]} : vector<4x16x16xf32> to vector<4x1x16xf32>
    %104 = vector.shape_cast %103 : vector<4x1x16xf32> to vector<4x16xf32>
    %c0_49 = arith.constant 0 : index
    %c128_50 = arith.constant 128 : index
    %105 = vector.load %arg13[%c0_49, %c128_50] : memref<16x256xf32, #tpu.memory_space<vmem>>, vector<4x16xf32>
    tpu.vector_store %arg13[%c0_49, %c128_50], %104 {strides = array<i32>} : memref<16x256xf32, #tpu.memory_space<vmem>>, vector<4x16xf32>,
    %106 = vector.extract_strided_slice %78 {offsets = [0, 9, 0], sizes = [4, 1, 16], strides = [1, 1, 1]} : vector<4x16x16xf32> to vector<4x1x16xf32>
    %107 = vector.shape_cast %106 : vector<4x1x16xf32> to vector<4x16xf32>
    %c0_51 = arith.constant 0 : index
    %c144 = arith.constant 144 : index
    %108 = vector.load %arg13[%c0_51, %c144] : memref<16x256xf32, #tpu.memory_space<vmem>>, vector<4x16xf32>
    tpu.vector_store %arg13[%c0_51, %c144], %107 {strides = array<i32>} : memref<16x256xf32, #tpu.memory_space<vmem>>, vector<4x16xf32>,
    %109 = vector.extract_strided_slice %78 {offsets = [0, 10, 0], sizes = [4, 1, 16], strides = [1, 1, 1]} : vector<4x16x16xf32> to vector<4x1x16xf32>
    %110 = vector.shape_cast %109 : vector<4x1x16xf32> to vector<4x16xf32>
    %c0_52 = arith.constant 0 : index
    %c160 = arith.constant 160 : index
    %111 = vector.load %arg13[%c0_52, %c160] : memref<16x256xf32, #tpu.memory_space<vmem>>, vector<4x16xf32>
    tpu.vector_store %arg13[%c0_52, %c160], %110 {strides = array<i32>} : memref<16x256xf32, #tpu.memory_space<vmem>>, vector<4x16xf32>,
    %112 = vector.extract_strided_slice %78 {offsets = [0, 11, 0], sizes = [4, 1, 16], strides = [1, 1, 1]} : vector<4x16x16xf32> to vector<4x1x16xf32>
    %113 = vector.shape_cast %112 : vector<4x1x16xf32> to vector<4x16xf32>
    %c0_53 = arith.constant 0 : index
    %c176 = arith.constant 176 : index
    %114 = vector.load %arg13[%c0_53, %c176] : memref<16x256xf32, #tpu.memory_space<vmem>>, vector<4x16xf32>
    tpu.vector_store %arg13[%c0_53, %c176], %113 {strides = array<i32>} : memref<16x256xf32, #tpu.memory_space<vmem>>, vector<4x16xf32>,
    %115 = vector.extract_strided_slice %78 {offsets = [0, 12, 0], sizes = [4, 1, 16], strides = [1, 1, 1]} : vector<4x16x16xf32> to vector<4x1x16xf32>
    %116 = vector.shape_cast %115 : vector<4x1x16xf32> to vector<4x16xf32>
    %c0_54 = arith.constant 0 : index
    %c192 = arith.constant 192 : index
    %117 = vector.load %arg13[%c0_54, %c192] : memref<16x256xf32, #tpu.memory_space<vmem>>, vector<4x16xf32>
    tpu.vector_store %arg13[%c0_54, %c192], %116 {strides = array<i32>} : memref<16x256xf32, #tpu.memory_space<vmem>>, vector<4x16xf32>,
    %118 = vector.extract_strided_slice %78 {offsets = [0, 13, 0], sizes = [4, 1, 16], strides = [1, 1, 1]} : vector<4x16x16xf32> to vector<4x1x16xf32>
    %119 = vector.shape_cast %118 : vector<4x1x16xf32> to vector<4x16xf32>
    %c0_55 = arith.constant 0 : index
    %c208 = arith.constant 208 : index
    %120 = vector.load %arg13[%c0_55, %c208] : memref<16x256xf32, #tpu.memory_space<vmem>>, vector<4x16xf32>
    tpu.vector_store %arg13[%c0_55, %c208], %119 {strides = array<i32>} : memref<16x256xf32, #tpu.memory_space<vmem>>, vector<4x16xf32>,
    %121 = vector.extract_strided_slice %78 {offsets = [0, 14, 0], sizes = [4, 1, 16], strides = [1, 1, 1]} : vector<4x16x16xf32> to vector<4x1x16xf32>
    %122 = vector.shape_cast %121 : vector<4x1x16xf32> to vector<4x16xf32>
    %c0_56 = arith.constant 0 : index
    %c224 = arith.constant 224 : index
    %123 = vector.load %arg13[%c0_56, %c224] : memref<16x256xf32, #tpu.memory_space<vmem>>, vector<4x16xf32>
    tpu.vector_store %arg13[%c0_56, %c224], %122 {strides = array<i32>} : memref<16x256xf32, #tpu.memory_space<vmem>>, vector<4x16xf32>,
    %124 = vector.extract_strided_slice %78 {offsets = [0, 15, 0], sizes = [4, 1, 16], strides = [1, 1, 1]} : vector<4x16x16xf32> to vector<4x1x16xf32>
    %125 = vector.shape_cast %124 : vector<4x1x16xf32> to vector<4x16xf32>
    %c0_57 = arith.constant 0 : index
    %c240 = arith.constant 240 : index
    %126 = vector.load %arg13[%c0_57, %c240] : memref<16x256xf32, #tpu.memory_space<vmem>>, vector<4x16xf32>
    tpu.vector_store %arg13[%c0_57, %c240], %125 {strides = array<i32>} : memref<16x256xf32, #tpu.memory_space<vmem>>, vector<4x16xf32>,
    %127 = vector.extract_strided_slice %52 {offsets = [9, 0], sizes = [9, 16], strides = [1, 1]} : vector<54x16xf32> to vector<9x16xf32>
    %128 = vector.extract_strided_slice %52 {offsets = [36, 0], sizes = [9, 16], strides = [1, 1]} : vector<54x16xf32> to vector<9x16xf32>
    %129 = vector.shape_cast %127 : vector<9x16xf32> to vector<9x16x1xf32>
    %130 = vector.shape_cast %128 : vector<9x16xf32> to vector<9x1x16xf32>
    %131 = vector.broadcast %129 : vector<9x16x1xf32> to vector<9x16x16xf32>
    %132 = vector.broadcast %130 : vector<9x1x16xf32> to vector<9x16x16xf32>
    %133 = arith.subf %131, %132 : vector<9x16x16xf32>
    %134 = math.tanh %133 : vector<9x16x16xf32>
    %135 = arith.mulf %134, %134 : vector<9x16x16xf32>
    %cst_58 = arith.constant dense<0.000000e+00> : vector<16xf32>
    %136 = vector.multi_reduction <add>, %135, %cst_58 [0, 1] : vector<9x16x16xf32> to vector<16xf32>
    %137 = vector.shape_cast %136 : vector<16xf32> to vector<1x16xf32>
    %138 = vector.broadcast %0 : f32 to vector<9x16x16xf32>
    %139 = arith.mulf %138, %134 : vector<9x16x16xf32>
    %c1 = arith.constant 1 : index
    %c0_59 = arith.constant 0 : index
    %c0_60 = arith.constant 0 : index
    %140 = vector.load %arg5[%c1, %c0_59, %c0_60] : memref<3x16x16xf32, #tpu.memory_space<vmem>>, vector<1x16x16xf32>
    %141 = vector.shape_cast %140 : vector<1x16x16xf32> to vector<16x16xf32>
    %142 = vector.shape_cast %141 : vector<16x16xf32> to vector<1x16x16xf32>
    %143 = vector.broadcast %142 : vector<1x16x16xf32> to vector<9x16x16xf32>
    %144 = arith.addf %139, %143 : vector<9x16x16xf32>
    %145 = vector.shape_cast %144 : vector<9x16x16xf32> to vector<144x16xf32>
    %146 = arith.truncf %145 : vector<144x16xf32> to vector<144x16xbf16>
    %cst_61 = arith.constant dense<0.000000e+00> : vector<64x16xf32>
    %147 = tpu.matmul %49, %146, %cst_61 {dimension_numbers = #tpu.dot_dimension_numbers<[1], [0], [0], [1], [0, 0, 1, 1], [], []>} : vector<64x144xbf16>, vector<144x16xbf16>, vector<64x16xf32> -> vector<64x16xf32>
    %148 = arith.subf %147, %7 : vector<64x16xf32>
    %149 = arith.mulf %148, %148 : vector<64x16xf32>
    %cst_62 = arith.constant dense<0.000000e+00> : vector<16xf32>
    %150 = vector.multi_reduction <add>, %149, %cst_62 [0] : vector<64x16xf32> to vector<16xf32>
    %151 = vector.shape_cast %150 : vector<16xf32> to vector<1x16xf32>
    %152 = vector.shape_cast %147 : vector<64x16xf32> to vector<4x16x16xf32>
    %153 = vector.extract_strided_slice %152 {offsets = [0, 0, 0], sizes = [4, 1, 16], strides = [1, 1, 1]} : vector<4x16x16xf32> to vector<4x1x16xf32>
    %154 = vector.shape_cast %153 : vector<4x1x16xf32> to vector<4x16xf32>
    %c4 = arith.constant 4 : index
    %c0_63 = arith.constant 0 : index
    %155 = vector.load %arg13[%c4, %c0_63] : memref<16x256xf32, #tpu.memory_space<vmem>>, vector<4x16xf32>
    tpu.vector_store %arg13[%c4, %c0_63], %154 {strides = array<i32>} : memref<16x256xf32, #tpu.memory_space<vmem>>, vector<4x16xf32>,
    %156 = vector.extract_strided_slice %152 {offsets = [0, 1, 0], sizes = [4, 1, 16], strides = [1, 1, 1]} : vector<4x16x16xf32> to vector<4x1x16xf32>
    %157 = vector.shape_cast %156 : vector<4x1x16xf32> to vector<4x16xf32>
    %c4_64 = arith.constant 4 : index
    %c16_65 = arith.constant 16 : index
    %158 = vector.load %arg13[%c4_64, %c16_65] : memref<16x256xf32, #tpu.memory_space<vmem>>, vector<4x16xf32>
    tpu.vector_store %arg13[%c4_64, %c16_65], %157 {strides = array<i32>} : memref<16x256xf32, #tpu.memory_space<vmem>>, vector<4x16xf32>,
    %159 = vector.extract_strided_slice %152 {offsets = [0, 2, 0], sizes = [4, 1, 16], strides = [1, 1, 1]} : vector<4x16x16xf32> to vector<4x1x16xf32>
    %160 = vector.shape_cast %159 : vector<4x1x16xf32> to vector<4x16xf32>
    %c4_66 = arith.constant 4 : index
    %c32_67 = arith.constant 32 : index
    %161 = vector.load %arg13[%c4_66, %c32_67] : memref<16x256xf32, #tpu.memory_space<vmem>>, vector<4x16xf32>
    tpu.vector_store %arg13[%c4_66, %c32_67], %160 {strides = array<i32>} : memref<16x256xf32, #tpu.memory_space<vmem>>, vector<4x16xf32>,
    %162 = vector.extract_strided_slice %152 {offsets = [0, 3, 0], sizes = [4, 1, 16], strides = [1, 1, 1]} : vector<4x16x16xf32> to vector<4x1x16xf32>
    %163 = vector.shape_cast %162 : vector<4x1x16xf32> to vector<4x16xf32>
    %c4_68 = arith.constant 4 : index
    %c48_69 = arith.constant 48 : index
    %164 = vector.load %arg13[%c4_68, %c48_69] : memref<16x256xf32, #tpu.memory_space<vmem>>, vector<4x16xf32>
    tpu.vector_store %arg13[%c4_68, %c48_69], %163 {strides = array<i32>} : memref<16x256xf32, #tpu.memory_space<vmem>>, vector<4x16xf32>,
    %165 = vector.extract_strided_slice %152 {offsets = [0, 4, 0], sizes = [4, 1, 16], strides = [1, 1, 1]} : vector<4x16x16xf32> to vector<4x1x16xf32>
    %166 = vector.shape_cast %165 : vector<4x1x16xf32> to vector<4x16xf32>
    %c4_70 = arith.constant 4 : index
    %c64_71 = arith.constant 64 : index
    %167 = vector.load %arg13[%c4_70, %c64_71] : memref<16x256xf32, #tpu.memory_space<vmem>>, vector<4x16xf32>
    tpu.vector_store %arg13[%c4_70, %c64_71], %166 {strides = array<i32>} : memref<16x256xf32, #tpu.memory_space<vmem>>, vector<4x16xf32>,
    %168 = vector.extract_strided_slice %152 {offsets = [0, 5, 0], sizes = [4, 1, 16], strides = [1, 1, 1]} : vector<4x16x16xf32> to vector<4x1x16xf32>
    %169 = vector.shape_cast %168 : vector<4x1x16xf32> to vector<4x16xf32>
    %c4_72 = arith.constant 4 : index
    %c80_73 = arith.constant 80 : index
    %170 = vector.load %arg13[%c4_72, %c80_73] : memref<16x256xf32, #tpu.memory_space<vmem>>, vector<4x16xf32>
    tpu.vector_store %arg13[%c4_72, %c80_73], %169 {strides = array<i32>} : memref<16x256xf32, #tpu.memory_space<vmem>>, vector<4x16xf32>,
    %171 = vector.extract_strided_slice %152 {offsets = [0, 6, 0], sizes = [4, 1, 16], strides = [1, 1, 1]} : vector<4x16x16xf32> to vector<4x1x16xf32>
    %172 = vector.shape_cast %171 : vector<4x1x16xf32> to vector<4x16xf32>
    %c4_74 = arith.constant 4 : index
    %c96_75 = arith.constant 96 : index
    %173 = vector.load %arg13[%c4_74, %c96_75] : memref<16x256xf32, #tpu.memory_space<vmem>>, vector<4x16xf32>
    tpu.vector_store %arg13[%c4_74, %c96_75], %172 {strides = array<i32>} : memref<16x256xf32, #tpu.memory_space<vmem>>, vector<4x16xf32>,
    %174 = vector.extract_strided_slice %152 {offsets = [0, 7, 0], sizes = [4, 1, 16], strides = [1, 1, 1]} : vector<4x16x16xf32> to vector<4x1x16xf32>
    %175 = vector.shape_cast %174 : vector<4x1x16xf32> to vector<4x16xf32>
    %c4_76 = arith.constant 4 : index
    %c112_77 = arith.constant 112 : index
    %176 = vector.load %arg13[%c4_76, %c112_77] : memref<16x256xf32, #tpu.memory_space<vmem>>, vector<4x16xf32>
    tpu.vector_store %arg13[%c4_76, %c112_77], %175 {strides = array<i32>} : memref<16x256xf32, #tpu.memory_space<vmem>>, vector<4x16xf32>,
    %177 = vector.extract_strided_slice %152 {offsets = [0, 8, 0], sizes = [4, 1, 16], strides = [1, 1, 1]} : vector<4x16x16xf32> to vector<4x1x16xf32>
    %178 = vector.shape_cast %177 : vector<4x1x16xf32> to vector<4x16xf32>
    %c4_78 = arith.constant 4 : index
    %c128_79 = arith.constant 128 : index
    %179 = vector.load %arg13[%c4_78, %c128_79] : memref<16x256xf32, #tpu.memory_space<vmem>>, vector<4x16xf32>
    tpu.vector_store %arg13[%c4_78, %c128_79], %178 {strides = array<i32>} : memref<16x256xf32, #tpu.memory_space<vmem>>, vector<4x16xf32>,
    %180 = vector.extract_strided_slice %152 {offsets = [0, 9, 0], sizes = [4, 1, 16], strides = [1, 1, 1]} : vector<4x16x16xf32> to vector<4x1x16xf32>
    %181 = vector.shape_cast %180 : vector<4x1x16xf32> to vector<4x16xf32>
    %c4_80 = arith.constant 4 : index
    %c144_81 = arith.constant 144 : index
    %182 = vector.load %arg13[%c4_80, %c144_81] : memref<16x256xf32, #tpu.memory_space<vmem>>, vector<4x16xf32>
    tpu.vector_store %arg13[%c4_80, %c144_81], %181 {strides = array<i32>} : memref<16x256xf32, #tpu.memory_space<vmem>>, vector<4x16xf32>,
    %183 = vector.extract_strided_slice %152 {offsets = [0, 10, 0], sizes = [4, 1, 16], strides = [1, 1, 1]} : vector<4x16x16xf32> to vector<4x1x16xf32>
    %184 = vector.shape_cast %183 : vector<4x1x16xf32> to vector<4x16xf32>
    %c4_82 = arith.constant 4 : index
    %c160_83 = arith.constant 160 : index
    %185 = vector.load %arg13[%c4_82, %c160_83] : memref<16x256xf32, #tpu.memory_space<vmem>>, vector<4x16xf32>
    tpu.vector_store %arg13[%c4_82, %c160_83], %184 {strides = array<i32>} : memref<16x256xf32, #tpu.memory_space<vmem>>, vector<4x16xf32>,
    %186 = vector.extract_strided_slice %152 {offsets = [0, 11, 0], sizes = [4, 1, 16], strides = [1, 1, 1]} : vector<4x16x16xf32> to vector<4x1x16xf32>
    %187 = vector.shape_cast %186 : vector<4x1x16xf32> to vector<4x16xf32>
    %c4_84 = arith.constant 4 : index
    %c176_85 = arith.constant 176 : index
    %188 = vector.load %arg13[%c4_84, %c176_85] : memref<16x256xf32, #tpu.memory_space<vmem>>, vector<4x16xf32>
    tpu.vector_store %arg13[%c4_84, %c176_85], %187 {strides = array<i32>} : memref<16x256xf32, #tpu.memory_space<vmem>>, vector<4x16xf32>,
    %189 = vector.extract_strided_slice %152 {offsets = [0, 12, 0], sizes = [4, 1, 16], strides = [1, 1, 1]} : vector<4x16x16xf32> to vector<4x1x16xf32>
    %190 = vector.shape_cast %189 : vector<4x1x16xf32> to vector<4x16xf32>
    %c4_86 = arith.constant 4 : index
    %c192_87 = arith.constant 192 : index
    %191 = vector.load %arg13[%c4_86, %c192_87] : memref<16x256xf32, #tpu.memory_space<vmem>>, vector<4x16xf32>
    tpu.vector_store %arg13[%c4_86, %c192_87], %190 {strides = array<i32>} : memref<16x256xf32, #tpu.memory_space<vmem>>, vector<4x16xf32>,
    %192 = vector.extract_strided_slice %152 {offsets = [0, 13, 0], sizes = [4, 1, 16], strides = [1, 1, 1]} : vector<4x16x16xf32> to vector<4x1x16xf32>
    %193 = vector.shape_cast %192 : vector<4x1x16xf32> to vector<4x16xf32>
    %c4_88 = arith.constant 4 : index
    %c208_89 = arith.constant 208 : index
    %194 = vector.load %arg13[%c4_88, %c208_89] : memref<16x256xf32, #tpu.memory_space<vmem>>, vector<4x16xf32>
    tpu.vector_store %arg13[%c4_88, %c208_89], %193 {strides = array<i32>} : memref<16x256xf32, #tpu.memory_space<vmem>>, vector<4x16xf32>,
    %195 = vector.extract_strided_slice %152 {offsets = [0, 14, 0], sizes = [4, 1, 16], strides = [1, 1, 1]} : vector<4x16x16xf32> to vector<4x1x16xf32>
    %196 = vector.shape_cast %195 : vector<4x1x16xf32> to vector<4x16xf32>
    %c4_90 = arith.constant 4 : index
    %c224_91 = arith.constant 224 : index
    %197 = vector.load %arg13[%c4_90, %c224_91] : memref<16x256xf32, #tpu.memory_space<vmem>>, vector<4x16xf32>
    tpu.vector_store %arg13[%c4_90, %c224_91], %196 {strides = array<i32>} : memref<16x256xf32, #tpu.memory_space<vmem>>, vector<4x16xf32>,
    %198 = vector.extract_strided_slice %152 {offsets = [0, 15, 0], sizes = [4, 1, 16], strides = [1, 1, 1]} : vector<4x16x16xf32> to vector<4x1x16xf32>
    %199 = vector.shape_cast %198 : vector<4x1x16xf32> to vector<4x16xf32>
    %c4_92 = arith.constant 4 : index
    %c240_93 = arith.constant 240 : index
    %200 = vector.load %arg13[%c4_92, %c240_93] : memref<16x256xf32, #tpu.memory_space<vmem>>, vector<4x16xf32>
    tpu.vector_store %arg13[%c4_92, %c240_93], %199 {strides = array<i32>} : memref<16x256xf32, #tpu.memory_space<vmem>>, vector<4x16xf32>,
    %201 = vector.extract_strided_slice %52 {offsets = [18, 0], sizes = [9, 16], strides = [1, 1]} : vector<54x16xf32> to vector<9x16xf32>
    %202 = vector.extract_strided_slice %52 {offsets = [45, 0], sizes = [9, 16], strides = [1, 1]} : vector<54x16xf32> to vector<9x16xf32>
    %203 = vector.shape_cast %201 : vector<9x16xf32> to vector<9x16x1xf32>
    %204 = vector.shape_cast %202 : vector<9x16xf32> to vector<9x1x16xf32>
    %205 = vector.broadcast %203 : vector<9x16x1xf32> to vector<9x16x16xf32>
    %206 = vector.broadcast %204 : vector<9x1x16xf32> to vector<9x16x16xf32>
    %207 = arith.subf %205, %206 : vector<9x16x16xf32>
    %208 = math.tanh %207 : vector<9x16x16xf32>
    %209 = arith.mulf %208, %208 : vector<9x16x16xf32>
    %cst_94 = arith.constant dense<0.000000e+00> : vector<16xf32>
    %210 = vector.multi_reduction <add>, %209, %cst_94 [0, 1] : vector<9x16x16xf32> to vector<16xf32>
    %211 = vector.shape_cast %210 : vector<16xf32> to vector<1x16xf32>
    %212 = vector.broadcast %0 : f32 to vector<9x16x16xf32>
    %213 = arith.mulf %212, %208 : vector<9x16x16xf32>
    %c2 = arith.constant 2 : index
    %c0_95 = arith.constant 0 : index
    %c0_96 = arith.constant 0 : index
    %214 = vector.load %arg5[%c2, %c0_95, %c0_96] : memref<3x16x16xf32, #tpu.memory_space<vmem>>, vector<1x16x16xf32>
    %215 = vector.shape_cast %214 : vector<1x16x16xf32> to vector<16x16xf32>
    %216 = vector.shape_cast %215 : vector<16x16xf32> to vector<1x16x16xf32>
    %217 = vector.broadcast %216 : vector<1x16x16xf32> to vector<9x16x16xf32>
    %218 = arith.addf %213, %217 : vector<9x16x16xf32>
    %219 = vector.shape_cast %218 : vector<9x16x16xf32> to vector<144x16xf32>
    %220 = arith.truncf %219 : vector<144x16xf32> to vector<144x16xbf16>
    %cst_97 = arith.constant dense<0.000000e+00> : vector<64x16xf32>
    %221 = tpu.matmul %49, %220, %cst_97 {dimension_numbers = #tpu.dot_dimension_numbers<[1], [0], [0], [1], [0, 0, 1, 1], [], []>} : vector<64x144xbf16>, vector<144x16xbf16>, vector<64x16xf32> -> vector<64x16xf32>
    %222 = arith.subf %221, %7 : vector<64x16xf32>
    %223 = arith.mulf %222, %222 : vector<64x16xf32>
    %cst_98 = arith.constant dense<0.000000e+00> : vector<16xf32>
    %224 = vector.multi_reduction <add>, %223, %cst_98 [0] : vector<64x16xf32> to vector<16xf32>
    %225 = vector.shape_cast %224 : vector<16xf32> to vector<1x16xf32>
    %226 = vector.shape_cast %221 : vector<64x16xf32> to vector<4x16x16xf32>
    %227 = vector.extract_strided_slice %226 {offsets = [0, 0, 0], sizes = [4, 1, 16], strides = [1, 1, 1]} : vector<4x16x16xf32> to vector<4x1x16xf32>
    %228 = vector.shape_cast %227 : vector<4x1x16xf32> to vector<4x16xf32>
    %c8 = arith.constant 8 : index
    %c0_99 = arith.constant 0 : index
    %229 = vector.load %arg13[%c8, %c0_99] : memref<16x256xf32, #tpu.memory_space<vmem>>, vector<4x16xf32>
    tpu.vector_store %arg13[%c8, %c0_99], %228 {strides = array<i32>} : memref<16x256xf32, #tpu.memory_space<vmem>>, vector<4x16xf32>,
    %230 = vector.extract_strided_slice %226 {offsets = [0, 1, 0], sizes = [4, 1, 16], strides = [1, 1, 1]} : vector<4x16x16xf32> to vector<4x1x16xf32>
    %231 = vector.shape_cast %230 : vector<4x1x16xf32> to vector<4x16xf32>
    %c8_100 = arith.constant 8 : index
    %c16_101 = arith.constant 16 : index
    %232 = vector.load %arg13[%c8_100, %c16_101] : memref<16x256xf32, #tpu.memory_space<vmem>>, vector<4x16xf32>
    tpu.vector_store %arg13[%c8_100, %c16_101], %231 {strides = array<i32>} : memref<16x256xf32, #tpu.memory_space<vmem>>, vector<4x16xf32>,
    %233 = vector.extract_strided_slice %226 {offsets = [0, 2, 0], sizes = [4, 1, 16], strides = [1, 1, 1]} : vector<4x16x16xf32> to vector<4x1x16xf32>
    %234 = vector.shape_cast %233 : vector<4x1x16xf32> to vector<4x16xf32>
    %c8_102 = arith.constant 8 : index
    %c32_103 = arith.constant 32 : index
    %235 = vector.load %arg13[%c8_102, %c32_103] : memref<16x256xf32, #tpu.memory_space<vmem>>, vector<4x16xf32>
    tpu.vector_store %arg13[%c8_102, %c32_103], %234 {strides = array<i32>} : memref<16x256xf32, #tpu.memory_space<vmem>>, vector<4x16xf32>,
    %236 = vector.extract_strided_slice %226 {offsets = [0, 3, 0], sizes = [4, 1, 16], strides = [1, 1, 1]} : vector<4x16x16xf32> to vector<4x1x16xf32>
    %237 = vector.shape_cast %236 : vector<4x1x16xf32> to vector<4x16xf32>
    %c8_104 = arith.constant 8 : index
    %c48_105 = arith.constant 48 : index
    %238 = vector.load %arg13[%c8_104, %c48_105] : memref<16x256xf32, #tpu.memory_space<vmem>>, vector<4x16xf32>
    tpu.vector_store %arg13[%c8_104, %c48_105], %237 {strides = array<i32>} : memref<16x256xf32, #tpu.memory_space<vmem>>, vector<4x16xf32>,
    %239 = vector.extract_strided_slice %226 {offsets = [0, 4, 0], sizes = [4, 1, 16], strides = [1, 1, 1]} : vector<4x16x16xf32> to vector<4x1x16xf32>
    %240 = vector.shape_cast %239 : vector<4x1x16xf32> to vector<4x16xf32>
    %c8_106 = arith.constant 8 : index
    %c64_107 = arith.constant 64 : index
    %241 = vector.load %arg13[%c8_106, %c64_107] : memref<16x256xf32, #tpu.memory_space<vmem>>, vector<4x16xf32>
    tpu.vector_store %arg13[%c8_106, %c64_107], %240 {strides = array<i32>} : memref<16x256xf32, #tpu.memory_space<vmem>>, vector<4x16xf32>,
    %242 = vector.extract_strided_slice %226 {offsets = [0, 5, 0], sizes = [4, 1, 16], strides = [1, 1, 1]} : vector<4x16x16xf32> to vector<4x1x16xf32>
    %243 = vector.shape_cast %242 : vector<4x1x16xf32> to vector<4x16xf32>
    %c8_108 = arith.constant 8 : index
    %c80_109 = arith.constant 80 : index
    %244 = vector.load %arg13[%c8_108, %c80_109] : memref<16x256xf32, #tpu.memory_space<vmem>>, vector<4x16xf32>
    tpu.vector_store %arg13[%c8_108, %c80_109], %243 {strides = array<i32>} : memref<16x256xf32, #tpu.memory_space<vmem>>, vector<4x16xf32>,
    %245 = vector.extract_strided_slice %226 {offsets = [0, 6, 0], sizes = [4, 1, 16], strides = [1, 1, 1]} : vector<4x16x16xf32> to vector<4x1x16xf32>
    %246 = vector.shape_cast %245 : vector<4x1x16xf32> to vector<4x16xf32>
    %c8_110 = arith.constant 8 : index
    %c96_111 = arith.constant 96 : index
    %247 = vector.load %arg13[%c8_110, %c96_111] : memref<16x256xf32, #tpu.memory_space<vmem>>, vector<4x16xf32>
    tpu.vector_store %arg13[%c8_110, %c96_111], %246 {strides = array<i32>} : memref<16x256xf32, #tpu.memory_space<vmem>>, vector<4x16xf32>,
    %248 = vector.extract_strided_slice %226 {offsets = [0, 7, 0], sizes = [4, 1, 16], strides = [1, 1, 1]} : vector<4x16x16xf32> to vector<4x1x16xf32>
    %249 = vector.shape_cast %248 : vector<4x1x16xf32> to vector<4x16xf32>
    %c8_112 = arith.constant 8 : index
    %c112_113 = arith.constant 112 : index
    %250 = vector.load %arg13[%c8_112, %c112_113] : memref<16x256xf32, #tpu.memory_space<vmem>>, vector<4x16xf32>
    tpu.vector_store %arg13[%c8_112, %c112_113], %249 {strides = array<i32>} : memref<16x256xf32, #tpu.memory_space<vmem>>, vector<4x16xf32>,
    %251 = vector.extract_strided_slice %226 {offsets = [0, 8, 0], sizes = [4, 1, 16], strides = [1, 1, 1]} : vector<4x16x16xf32> to vector<4x1x16xf32>
    %252 = vector.shape_cast %251 : vector<4x1x16xf32> to vector<4x16xf32>
    %c8_114 = arith.constant 8 : index
    %c128_115 = arith.constant 128 : index
    %253 = vector.load %arg13[%c8_114, %c128_115] : memref<16x256xf32, #tpu.memory_space<vmem>>, vector<4x16xf32>
    tpu.vector_store %arg13[%c8_114, %c128_115], %252 {strides = array<i32>} : memref<16x256xf32, #tpu.memory_space<vmem>>, vector<4x16xf32>,
    %254 = vector.extract_strided_slice %226 {offsets = [0, 9, 0], sizes = [4, 1, 16], strides = [1, 1, 1]} : vector<4x16x16xf32> to vector<4x1x16xf32>
    %255 = vector.shape_cast %254 : vector<4x1x16xf32> to vector<4x16xf32>
    %c8_116 = arith.constant 8 : index
    %c144_117 = arith.constant 144 : index
    %256 = vector.load %arg13[%c8_116, %c144_117] : memref<16x256xf32, #tpu.memory_space<vmem>>, vector<4x16xf32>
    tpu.vector_store %arg13[%c8_116, %c144_117], %255 {strides = array<i32>} : memref<16x256xf32, #tpu.memory_space<vmem>>, vector<4x16xf32>,
    %257 = vector.extract_strided_slice %226 {offsets = [0, 10, 0], sizes = [4, 1, 16], strides = [1, 1, 1]} : vector<4x16x16xf32> to vector<4x1x16xf32>
    %258 = vector.shape_cast %257 : vector<4x1x16xf32> to vector<4x16xf32>
    %c8_118 = arith.constant 8 : index
    %c160_119 = arith.constant 160 : index
    %259 = vector.load %arg13[%c8_118, %c160_119] : memref<16x256xf32, #tpu.memory_space<vmem>>, vector<4x16xf32>
    tpu.vector_store %arg13[%c8_118, %c160_119], %258 {strides = array<i32>} : memref<16x256xf32, #tpu.memory_space<vmem>>, vector<4x16xf32>,
    %260 = vector.extract_strided_slice %226 {offsets = [0, 11, 0], sizes = [4, 1, 16], strides = [1, 1, 1]} : vector<4x16x16xf32> to vector<4x1x16xf32>
    %261 = vector.shape_cast %260 : vector<4x1x16xf32> to vector<4x16xf32>
    %c8_120 = arith.constant 8 : index
    %c176_121 = arith.constant 176 : index
    %262 = vector.load %arg13[%c8_120, %c176_121] : memref<16x256xf32, #tpu.memory_space<vmem>>, vector<4x16xf32>
    tpu.vector_store %arg13[%c8_120, %c176_121], %261 {strides = array<i32>} : memref<16x256xf32, #tpu.memory_space<vmem>>, vector<4x16xf32>,
    %263 = vector.extract_strided_slice %226 {offsets = [0, 12, 0], sizes = [4, 1, 16], strides = [1, 1, 1]} : vector<4x16x16xf32> to vector<4x1x16xf32>
    %264 = vector.shape_cast %263 : vector<4x1x16xf32> to vector<4x16xf32>
    %c8_122 = arith.constant 8 : index
    %c192_123 = arith.constant 192 : index
    %265 = vector.load %arg13[%c8_122, %c192_123] : memref<16x256xf32, #tpu.memory_space<vmem>>, vector<4x16xf32>
    tpu.vector_store %arg13[%c8_122, %c192_123], %264 {strides = array<i32>} : memref<16x256xf32, #tpu.memory_space<vmem>>, vector<4x16xf32>,
    %266 = vector.extract_strided_slice %226 {offsets = [0, 13, 0], sizes = [4, 1, 16], strides = [1, 1, 1]} : vector<4x16x16xf32> to vector<4x1x16xf32>
    %267 = vector.shape_cast %266 : vector<4x1x16xf32> to vector<4x16xf32>
    %c8_124 = arith.constant 8 : index
    %c208_125 = arith.constant 208 : index
    %268 = vector.load %arg13[%c8_124, %c208_125] : memref<16x256xf32, #tpu.memory_space<vmem>>, vector<4x16xf32>
    tpu.vector_store %arg13[%c8_124, %c208_125], %267 {strides = array<i32>} : memref<16x256xf32, #tpu.memory_space<vmem>>, vector<4x16xf32>,
    %269 = vector.extract_strided_slice %226 {offsets = [0, 14, 0], sizes = [4, 1, 16], strides = [1, 1, 1]} : vector<4x16x16xf32> to vector<4x1x16xf32>
    %270 = vector.shape_cast %269 : vector<4x1x16xf32> to vector<4x16xf32>
    %c8_126 = arith.constant 8 : index
    %c224_127 = arith.constant 224 : index
    %271 = vector.load %arg13[%c8_126, %c224_127] : memref<16x256xf32, #tpu.memory_space<vmem>>, vector<4x16xf32>
    tpu.vector_store %arg13[%c8_126, %c224_127], %270 {strides = array<i32>} : memref<16x256xf32, #tpu.memory_space<vmem>>, vector<4x16xf32>,
    %272 = vector.extract_strided_slice %226 {offsets = [0, 15, 0], sizes = [4, 1, 16], strides = [1, 1, 1]} : vector<4x16x16xf32> to vector<4x1x16xf32>
    %273 = vector.shape_cast %272 : vector<4x1x16xf32> to vector<4x16xf32>
    %c8_128 = arith.constant 8 : index
    %c240_129 = arith.constant 240 : index
    %274 = vector.load %arg13[%c8_128, %c240_129] : memref<16x256xf32, #tpu.memory_space<vmem>>, vector<4x16xf32>
    tpu.vector_store %arg13[%c8_128, %c240_129], %273 {strides = array<i32>} : memref<16x256xf32, #tpu.memory_space<vmem>>, vector<4x16xf32>,
    %c0_130 = arith.constant 0 : index
    %c0_131 = arith.constant 0 : index
    %c0_132 = arith.constant 0 : index
    %275 = vector.load %arg2[%c0_130, %c0_131, %c0_132] : memref<2x4x256xf32, #tpu.memory_space<vmem>>, vector<1x4x256xf32>
    %276 = vector.shape_cast %275 : vector<1x4x256xf32> to vector<4x256xf32>
    %c12 = arith.constant 12 : index
    %c0_133 = arith.constant 0 : index
    %277 = vector.load %arg13[%c12, %c0_133] : memref<16x256xf32, #tpu.memory_space<vmem>>, vector<4x256xf32>
    tpu.vector_store %arg13[%c12, %c0_133], %276 {strides = array<i32>} : memref<16x256xf32, #tpu.memory_space<vmem>>, vector<4x256xf32>,
    %c0_134 = arith.constant 0 : index
    %c0_135 = arith.constant 0 : index
    %278 = vector.load %arg13[%c0_134, %c0_135] : memref<16x256xf32, #tpu.memory_space<vmem>>, vector<16x256xf32>
    %cst_136 = arith.constant dense<0.000000e+00> : vector<8x256xf32>
    %279 = tpu.matmul %3, %278, %cst_136 {dimension_numbers = #tpu.dot_dimension_numbers<[1], [0], [0], [1], [0, 0, 1, 1], [], []>} : vector<8x16xf32>, vector<16x256xf32>, vector<8x256xf32> -> vector<8x256xf32>
    %280 = vector.broadcast %4 : vector<8x1xf32> to vector<8x256xf32>
    %281 = arith.addf %279, %280 : vector<8x256xf32>
    %cst_137 = arith.constant 0.000000e+00 : f32
    %282 = vector.broadcast %cst_137 : f32 to vector<8x256xf32>
    %283 = arith.maximumf %281, %282 : vector<8x256xf32>
    %c0_138 = arith.constant 0 : index
    %c0_139 = arith.constant 0 : index
    %c0_140 = arith.constant 0 : index
    %284 = vector.load %arg9[%c0_138, %c0_139, %c0_140] : memref<2x8x256xf32, #tpu.memory_space<vmem>>, vector<1x8x256xf32>
    %285 = vector.shape_cast %284 : vector<1x8x256xf32> to vector<8x256xf32>
    %286 = vector.shape_cast %283 : vector<8x256xf32> to vector<1x8x256xf32>
    tpu.vector_store %arg9[%c0_138, %c0_139, %c0_140], %286 {strides = array<i32>} : memref<2x8x256xf32, #tpu.memory_space<vmem>>, vector<1x8x256xf32>,
    %287 = tpu.concatenate %77, %151, %225 in 0 : vector<1x16xf32>, vector<1x16xf32>, vector<1x16xf32> -> vector<3x16xf32>
    %c0_141 = arith.constant 0 : index
    %c0_142 = arith.constant 0 : index
    %c0_143 = arith.constant 0 : index
    %288 = vector.load %arg10[%c0_141, %c0_142, %c0_143] : memref<2x3x16xf32, #tpu.memory_space<vmem>>, vector<1x3x16xf32>
    %289 = vector.shape_cast %288 : vector<1x3x16xf32> to vector<3x16xf32>
    %290 = vector.shape_cast %287 : vector<3x16xf32> to vector<1x3x16xf32>
    tpu.vector_store %arg10[%c0_141, %c0_142, %c0_143], %290 {strides = array<i32>} : memref<2x3x16xf32, #tpu.memory_space<vmem>>, vector<1x3x16xf32>,
    %291 = tpu.concatenate %63, %137, %211 in 0 : vector<1x16xf32>, vector<1x16xf32>, vector<1x16xf32> -> vector<3x16xf32>
    %c0_144 = arith.constant 0 : index
    %c0_145 = arith.constant 0 : index
    %c0_146 = arith.constant 0 : index
    %292 = vector.load %arg11[%c0_144, %c0_145, %c0_146] : memref<2x3x16xf32, #tpu.memory_space<vmem>>, vector<1x3x16xf32>
    %293 = vector.shape_cast %292 : vector<1x3x16xf32> to vector<3x16xf32>
    %294 = vector.shape_cast %291 : vector<3x16xf32> to vector<1x3x16xf32>
    tpu.vector_store %arg11[%c0_144, %c0_145, %c0_146], %294 {strides = array<i32>} : memref<2x3x16xf32, #tpu.memory_space<vmem>>, vector<1x3x16xf32>,
    %c1_147 = arith.constant 1 : index
    %c0_148 = arith.constant 0 : index
    %c0_149 = arith.constant 0 : index
    %c0_150 = arith.constant 0 : index
    %295 = vector.load %arg1[%c1_147, %c0_148, %c0_149, %c0_150] : memref<2x4x16x16xf32, #tpu.memory_space<vmem>>, vector<1x4x16x16xf32>
    %296 = vector.shape_cast %295 : vector<1x4x16x16xf32> to vector<4x16x16xf32>
    %297 = vector.shape_cast %296 : vector<4x16x16xf32> to vector<64x16xf32>
    %cst_151 = arith.constant dense<0.000000e+00> : vector<4x16xf32>
    %298 = vector.multi_reduction <add>, %296, %cst_151 [1] : vector<4x16x16xf32> to vector<4x16xf32>
    %cst_152 = arith.constant 1.600000e+01 : f32
    %299 = vector.broadcast %cst_152 : f32 to vector<4x16xf32>
    %300 = arith.divf %298, %299 : vector<4x16xf32>
    %cst_153 = arith.constant 0.000000e+00 : f32
    %301 = vector.broadcast %cst_153 : f32 to vector<4x8x16xf32>
    %302 = tpu.concatenate %301, %296 in 1 : vector<4x8x16xf32>, vector<4x16x16xf32> -> vector<4x24x16xf32>
    %303 = vector.extract_strided_slice %302 {offsets = [0, 0, 0], sizes = [4, 16, 16], strides = [1, 1, 1]} : vector<4x24x16xf32> to vector<4x16x16xf32>
    %304 = vector.shape_cast %303 : vector<4x16x16xf32> to vector<64x16xf32>
    %305 = arith.truncf %304 : vector<64x16xf32> to vector<64x16xbf16>
    %c0_154 = arith.constant 0 : index
    %c0_155 = arith.constant 0 : index
    %306 = vector.load %arg12[%c0_154, %c0_155] : memref<64x144xbf16, #tpu.memory_space<vmem>>, vector<64x16xbf16>
    tpu.vector_store %arg12[%c0_154, %c0_155], %305 {strides = array<i32>} : memref<64x144xbf16, #tpu.memory_space<vmem>>, vector<64x16xbf16>,
    %307 = vector.extract_strided_slice %302 {offsets = [0, 1, 0], sizes = [4, 16, 16], strides = [1, 1, 1]} : vector<4x24x16xf32> to vector<4x16x16xf32>
    %308 = vector.shape_cast %307 : vector<4x16x16xf32> to vector<64x16xf32>
    %309 = arith.truncf %308 : vector<64x16xf32> to vector<64x16xbf16>
    %c0_156 = arith.constant 0 : index
    %c16_157 = arith.constant 16 : index
    %310 = vector.load %arg12[%c0_156, %c16_157] : memref<64x144xbf16, #tpu.memory_space<vmem>>, vector<64x16xbf16>
    tpu.vector_store %arg12[%c0_156, %c16_157], %309 {strides = array<i32>} : memref<64x144xbf16, #tpu.memory_space<vmem>>, vector<64x16xbf16>,
    %311 = vector.extract_strided_slice %302 {offsets = [0, 2, 0], sizes = [4, 16, 16], strides = [1, 1, 1]} : vector<4x24x16xf32> to vector<4x16x16xf32>
    %312 = vector.shape_cast %311 : vector<4x16x16xf32> to vector<64x16xf32>
    %313 = arith.truncf %312 : vector<64x16xf32> to vector<64x16xbf16>
    %c0_158 = arith.constant 0 : index
    %c32_159 = arith.constant 32 : index
    %314 = vector.load %arg12[%c0_158, %c32_159] : memref<64x144xbf16, #tpu.memory_space<vmem>>, vector<64x16xbf16>
    tpu.vector_store %arg12[%c0_158, %c32_159], %313 {strides = array<i32>} : memref<64x144xbf16, #tpu.memory_space<vmem>>, vector<64x16xbf16>,
    %315 = vector.extract_strided_slice %302 {offsets = [0, 3, 0], sizes = [4, 16, 16], strides = [1, 1, 1]} : vector<4x24x16xf32> to vector<4x16x16xf32>
    %316 = vector.shape_cast %315 : vector<4x16x16xf32> to vector<64x16xf32>
    %317 = arith.truncf %316 : vector<64x16xf32> to vector<64x16xbf16>
    %c0_160 = arith.constant 0 : index
    %c48_161 = arith.constant 48 : index
    %318 = vector.load %arg12[%c0_160, %c48_161] : memref<64x144xbf16, #tpu.memory_space<vmem>>, vector<64x16xbf16>
    tpu.vector_store %arg12[%c0_160, %c48_161], %317 {strides = array<i32>} : memref<64x144xbf16, #tpu.memory_space<vmem>>, vector<64x16xbf16>,
    %319 = vector.extract_strided_slice %302 {offsets = [0, 4, 0], sizes = [4, 16, 16], strides = [1, 1, 1]} : vector<4x24x16xf32> to vector<4x16x16xf32>
    %320 = vector.shape_cast %319 : vector<4x16x16xf32> to vector<64x16xf32>
    %321 = arith.truncf %320 : vector<64x16xf32> to vector<64x16xbf16>
    %c0_162 = arith.constant 0 : index
    %c64_163 = arith.constant 64 : index
    %322 = vector.load %arg12[%c0_162, %c64_163] : memref<64x144xbf16, #tpu.memory_space<vmem>>, vector<64x16xbf16>
    tpu.vector_store %arg12[%c0_162, %c64_163], %321 {strides = array<i32>} : memref<64x144xbf16, #tpu.memory_space<vmem>>, vector<64x16xbf16>,
    %323 = vector.extract_strided_slice %302 {offsets = [0, 5, 0], sizes = [4, 16, 16], strides = [1, 1, 1]} : vector<4x24x16xf32> to vector<4x16x16xf32>
    %324 = vector.shape_cast %323 : vector<4x16x16xf32> to vector<64x16xf32>
    %325 = arith.truncf %324 : vector<64x16xf32> to vector<64x16xbf16>
    %c0_164 = arith.constant 0 : index
    %c80_165 = arith.constant 80 : index
    %326 = vector.load %arg12[%c0_164, %c80_165] : memref<64x144xbf16, #tpu.memory_space<vmem>>, vector<64x16xbf16>
    tpu.vector_store %arg12[%c0_164, %c80_165], %325 {strides = array<i32>} : memref<64x144xbf16, #tpu.memory_space<vmem>>, vector<64x16xbf16>,
    %327 = vector.extract_strided_slice %302 {offsets = [0, 6, 0], sizes = [4, 16, 16], strides = [1, 1, 1]} : vector<4x24x16xf32> to vector<4x16x16xf32>
    %328 = vector.shape_cast %327 : vector<4x16x16xf32> to vector<64x16xf32>
    %329 = arith.truncf %328 : vector<64x16xf32> to vector<64x16xbf16>
    %c0_166 = arith.constant 0 : index
    %c96_167 = arith.constant 96 : index
    %330 = vector.load %arg12[%c0_166, %c96_167] : memref<64x144xbf16, #tpu.memory_space<vmem>>, vector<64x16xbf16>
    tpu.vector_store %arg12[%c0_166, %c96_167], %329 {strides = array<i32>} : memref<64x144xbf16, #tpu.memory_space<vmem>>, vector<64x16xbf16>,
    %331 = vector.extract_strided_slice %302 {offsets = [0, 7, 0], sizes = [4, 16, 16], strides = [1, 1, 1]} : vector<4x24x16xf32> to vector<4x16x16xf32>
    %332 = vector.shape_cast %331 : vector<4x16x16xf32> to vector<64x16xf32>
    %333 = arith.truncf %332 : vector<64x16xf32> to vector<64x16xbf16>
    %c0_168 = arith.constant 0 : index
    %c112_169 = arith.constant 112 : index
    %334 = vector.load %arg12[%c0_168, %c112_169] : memref<64x144xbf16, #tpu.memory_space<vmem>>, vector<64x16xbf16>
    tpu.vector_store %arg12[%c0_168, %c112_169], %333 {strides = array<i32>} : memref<64x144xbf16, #tpu.memory_space<vmem>>, vector<64x16xbf16>,
    %335 = vector.extract_strided_slice %302 {offsets = [0, 8, 0], sizes = [4, 16, 16], strides = [1, 1, 1]} : vector<4x24x16xf32> to vector<4x16x16xf32>
    %336 = vector.shape_cast %335 : vector<4x16x16xf32> to vector<64x16xf32>
    %337 = arith.truncf %336 : vector<64x16xf32> to vector<64x16xbf16>
    %c0_170 = arith.constant 0 : index
    %c128_171 = arith.constant 128 : index
    %338 = vector.load %arg12[%c0_170, %c128_171] : memref<64x144xbf16, #tpu.memory_space<vmem>>, vector<64x16xbf16>
    tpu.vector_store %arg12[%c0_170, %c128_171], %337 {strides = array<i32>} : memref<64x144xbf16, #tpu.memory_space<vmem>>, vector<64x16xbf16>,
    %c0_172 = arith.constant 0 : index
    %c0_173 = arith.constant 0 : index
    %339 = vector.load %arg12[%c0_172, %c0_173] : memref<64x144xbf16, #tpu.memory_space<vmem>>, vector<64x144xbf16>
    %cst_174 = arith.constant dense<0.000000e+00> : vector<54x16xf32>
    %340 = tpu.matmul %1, %300, %cst_174 {dimension_numbers = #tpu.dot_dimension_numbers<[1], [0], [0], [1], [0, 0, 1, 1], [], []>} : vector<54x4xf32>, vector<4x16xf32>, vector<54x16xf32> -> vector<54x16xf32>
    %341 = vector.broadcast %2 : vector<54x1xf32> to vector<54x16xf32>
    %342 = arith.addf %340, %341 : vector<54x16xf32>
    %343 = vector.extract_strided_slice %342 {offsets = [0, 0], sizes = [9, 16], strides = [1, 1]} : vector<54x16xf32> to vector<9x16xf32>
    %344 = vector.extract_strided_slice %342 {offsets = [27, 0], sizes = [9, 16], strides = [1, 1]} : vector<54x16xf32> to vector<9x16xf32>
    %345 = vector.shape_cast %343 : vector<9x16xf32> to vector<9x16x1xf32>
    %346 = vector.shape_cast %344 : vector<9x16xf32> to vector<9x1x16xf32>
    %347 = vector.broadcast %345 : vector<9x16x1xf32> to vector<9x16x16xf32>
    %348 = vector.broadcast %346 : vector<9x1x16xf32> to vector<9x16x16xf32>
    %349 = arith.subf %347, %348 : vector<9x16x16xf32>
    %350 = math.tanh %349 : vector<9x16x16xf32>
    %351 = arith.mulf %350, %350 : vector<9x16x16xf32>
    %cst_175 = arith.constant dense<0.000000e+00> : vector<16xf32>
    %352 = vector.multi_reduction <add>, %351, %cst_175 [0, 1] : vector<9x16x16xf32> to vector<16xf32>
    %353 = vector.shape_cast %352 : vector<16xf32> to vector<1x16xf32>
    %354 = vector.broadcast %0 : f32 to vector<9x16x16xf32>
    %355 = arith.mulf %354, %350 : vector<9x16x16xf32>
    %c0_176 = arith.constant 0 : index
    %c0_177 = arith.constant 0 : index
    %c0_178 = arith.constant 0 : index
    %356 = vector.load %arg5[%c0_176, %c0_177, %c0_178] : memref<3x16x16xf32, #tpu.memory_space<vmem>>, vector<1x16x16xf32>
    %357 = vector.shape_cast %356 : vector<1x16x16xf32> to vector<16x16xf32>
    %358 = vector.shape_cast %357 : vector<16x16xf32> to vector<1x16x16xf32>
    %359 = vector.broadcast %358 : vector<1x16x16xf32> to vector<9x16x16xf32>
    %360 = arith.addf %355, %359 : vector<9x16x16xf32>
    %361 = vector.shape_cast %360 : vector<9x16x16xf32> to vector<144x16xf32>
    %362 = arith.truncf %361 : vector<144x16xf32> to vector<144x16xbf16>
    %cst_179 = arith.constant dense<0.000000e+00> : vector<64x16xf32>
    %363 = tpu.matmul %339, %362, %cst_179 {dimension_numbers = #tpu.dot_dimension_numbers<[1], [0], [0], [1], [0, 0, 1, 1], [], []>} : vector<64x144xbf16>, vector<144x16xbf16>, vector<64x16xf32> -> vector<64x16xf32>
    %364 = arith.subf %363, %297 : vector<64x16xf32>
    %365 = arith.mulf %364, %364 : vector<64x16xf32>
    %cst_180 = arith.constant dense<0.000000e+00> : vector<16xf32>
    %366 = vector.multi_reduction <add>, %365, %cst_180 [0] : vector<64x16xf32> to vector<16xf32>
    %367 = vector.shape_cast %366 : vector<16xf32> to vector<1x16xf32>
    %368 = vector.shape_cast %363 : vector<64x16xf32> to vector<4x16x16xf32>
    %369 = vector.extract_strided_slice %368 {offsets = [0, 0, 0], sizes = [4, 1, 16], strides = [1, 1, 1]} : vector<4x16x16xf32> to vector<4x1x16xf32>
    %370 = vector.shape_cast %369 : vector<4x1x16xf32> to vector<4x16xf32>
    %c0_181 = arith.constant 0 : index
    %c0_182 = arith.constant 0 : index
    %371 = vector.load %arg13[%c0_181, %c0_182] : memref<16x256xf32, #tpu.memory_space<vmem>>, vector<4x16xf32>
    tpu.vector_store %arg13[%c0_181, %c0_182], %370 {strides = array<i32>} : memref<16x256xf32, #tpu.memory_space<vmem>>, vector<4x16xf32>,
    %372 = vector.extract_strided_slice %368 {offsets = [0, 1, 0], sizes = [4, 1, 16], strides = [1, 1, 1]} : vector<4x16x16xf32> to vector<4x1x16xf32>
    %373 = vector.shape_cast %372 : vector<4x1x16xf32> to vector<4x16xf32>
    %c0_183 = arith.constant 0 : index
    %c16_184 = arith.constant 16 : index
    %374 = vector.load %arg13[%c0_183, %c16_184] : memref<16x256xf32, #tpu.memory_space<vmem>>, vector<4x16xf32>
    tpu.vector_store %arg13[%c0_183, %c16_184], %373 {strides = array<i32>} : memref<16x256xf32, #tpu.memory_space<vmem>>, vector<4x16xf32>,
    %375 = vector.extract_strided_slice %368 {offsets = [0, 2, 0], sizes = [4, 1, 16], strides = [1, 1, 1]} : vector<4x16x16xf32> to vector<4x1x16xf32>
    %376 = vector.shape_cast %375 : vector<4x1x16xf32> to vector<4x16xf32>
    %c0_185 = arith.constant 0 : index
    %c32_186 = arith.constant 32 : index
    %377 = vector.load %arg13[%c0_185, %c32_186] : memref<16x256xf32, #tpu.memory_space<vmem>>, vector<4x16xf32>
    tpu.vector_store %arg13[%c0_185, %c32_186], %376 {strides = array<i32>} : memref<16x256xf32, #tpu.memory_space<vmem>>, vector<4x16xf32>,
    %378 = vector.extract_strided_slice %368 {offsets = [0, 3, 0], sizes = [4, 1, 16], strides = [1, 1, 1]} : vector<4x16x16xf32> to vector<4x1x16xf32>
    %379 = vector.shape_cast %378 : vector<4x1x16xf32> to vector<4x16xf32>
    %c0_187 = arith.constant 0 : index
    %c48_188 = arith.constant 48 : index
    %380 = vector.load %arg13[%c0_187, %c48_188] : memref<16x256xf32, #tpu.memory_space<vmem>>, vector<4x16xf32>
    tpu.vector_store %arg13[%c0_187, %c48_188], %379 {strides = array<i32>} : memref<16x256xf32, #tpu.memory_space<vmem>>, vector<4x16xf32>,
    %381 = vector.extract_strided_slice %368 {offsets = [0, 4, 0], sizes = [4, 1, 16], strides = [1, 1, 1]} : vector<4x16x16xf32> to vector<4x1x16xf32>
    %382 = vector.shape_cast %381 : vector<4x1x16xf32> to vector<4x16xf32>
    %c0_189 = arith.constant 0 : index
    %c64_190 = arith.constant 64 : index
    %383 = vector.load %arg13[%c0_189, %c64_190] : memref<16x256xf32, #tpu.memory_space<vmem>>, vector<4x16xf32>
    tpu.vector_store %arg13[%c0_189, %c64_190], %382 {strides = array<i32>} : memref<16x256xf32, #tpu.memory_space<vmem>>, vector<4x16xf32>,
    %384 = vector.extract_strided_slice %368 {offsets = [0, 5, 0], sizes = [4, 1, 16], strides = [1, 1, 1]} : vector<4x16x16xf32> to vector<4x1x16xf32>
    %385 = vector.shape_cast %384 : vector<4x1x16xf32> to vector<4x16xf32>
    %c0_191 = arith.constant 0 : index
    %c80_192 = arith.constant 80 : index
    %386 = vector.load %arg13[%c0_191, %c80_192] : memref<16x256xf32, #tpu.memory_space<vmem>>, vector<4x16xf32>
    tpu.vector_store %arg13[%c0_191, %c80_192], %385 {strides = array<i32>} : memref<16x256xf32, #tpu.memory_space<vmem>>, vector<4x16xf32>,
    %387 = vector.extract_strided_slice %368 {offsets = [0, 6, 0], sizes = [4, 1, 16], strides = [1, 1, 1]} : vector<4x16x16xf32> to vector<4x1x16xf32>
    %388 = vector.shape_cast %387 : vector<4x1x16xf32> to vector<4x16xf32>
    %c0_193 = arith.constant 0 : index
    %c96_194 = arith.constant 96 : index
    %389 = vector.load %arg13[%c0_193, %c96_194] : memref<16x256xf32, #tpu.memory_space<vmem>>, vector<4x16xf32>
    tpu.vector_store %arg13[%c0_193, %c96_194], %388 {strides = array<i32>} : memref<16x256xf32, #tpu.memory_space<vmem>>, vector<4x16xf32>,
    %390 = vector.extract_strided_slice %368 {offsets = [0, 7, 0], sizes = [4, 1, 16], strides = [1, 1, 1]} : vector<4x16x16xf32> to vector<4x1x16xf32>
    %391 = vector.shape_cast %390 : vector<4x1x16xf32> to vector<4x16xf32>
    %c0_195 = arith.constant 0 : index
    %c112_196 = arith.constant 112 : index
    %392 = vector.load %arg13[%c0_195, %c112_196] : memref<16x256xf32, #tpu.memory_space<vmem>>, vector<4x16xf32>
    tpu.vector_store %arg13[%c0_195, %c112_196], %391 {strides = array<i32>} : memref<16x256xf32, #tpu.memory_space<vmem>>, vector<4x16xf32>,
    %393 = vector.extract_strided_slice %368 {offsets = [0, 8, 0], sizes = [4, 1, 16], strides = [1, 1, 1]} : vector<4x16x16xf32> to vector<4x1x16xf32>
    %394 = vector.shape_cast %393 : vector<4x1x16xf32> to vector<4x16xf32>
    %c0_197 = arith.constant 0 : index
    %c128_198 = arith.constant 128 : index
    %395 = vector.load %arg13[%c0_197, %c128_198] : memref<16x256xf32, #tpu.memory_space<vmem>>, vector<4x16xf32>
    tpu.vector_store %arg13[%c0_197, %c128_198], %394 {strides = array<i32>} : memref<16x256xf32, #tpu.memory_space<vmem>>, vector<4x16xf32>,
    %396 = vector.extract_strided_slice %368 {offsets = [0, 9, 0], sizes = [4, 1, 16], strides = [1, 1, 1]} : vector<4x16x16xf32> to vector<4x1x16xf32>
    %397 = vector.shape_cast %396 : vector<4x1x16xf32> to vector<4x16xf32>
    %c0_199 = arith.constant 0 : index
    %c144_200 = arith.constant 144 : index
    %398 = vector.load %arg13[%c0_199, %c144_200] : memref<16x256xf32, #tpu.memory_space<vmem>>, vector<4x16xf32>
    tpu.vector_store %arg13[%c0_199, %c144_200], %397 {strides = array<i32>} : memref<16x256xf32, #tpu.memory_space<vmem>>, vector<4x16xf32>,
    %399 = vector.extract_strided_slice %368 {offsets = [0, 10, 0], sizes = [4, 1, 16], strides = [1, 1, 1]} : vector<4x16x16xf32> to vector<4x1x16xf32>
    %400 = vector.shape_cast %399 : vector<4x1x16xf32> to vector<4x16xf32>
    %c0_201 = arith.constant 0 : index
    %c160_202 = arith.constant 160 : index
    %401 = vector.load %arg13[%c0_201, %c160_202] : memref<16x256xf32, #tpu.memory_space<vmem>>, vector<4x16xf32>
    tpu.vector_store %arg13[%c0_201, %c160_202], %400 {strides = array<i32>} : memref<16x256xf32, #tpu.memory_space<vmem>>, vector<4x16xf32>,
    %402 = vector.extract_strided_slice %368 {offsets = [0, 11, 0], sizes = [4, 1, 16], strides = [1, 1, 1]} : vector<4x16x16xf32> to vector<4x1x16xf32>
    %403 = vector.shape_cast %402 : vector<4x1x16xf32> to vector<4x16xf32>
    %c0_203 = arith.constant 0 : index
    %c176_204 = arith.constant 176 : index
    %404 = vector.load %arg13[%c0_203, %c176_204] : memref<16x256xf32, #tpu.memory_space<vmem>>, vector<4x16xf32>
    tpu.vector_store %arg13[%c0_203, %c176_204], %403 {strides = array<i32>} : memref<16x256xf32, #tpu.memory_space<vmem>>, vector<4x16xf32>,
    %405 = vector.extract_strided_slice %368 {offsets = [0, 12, 0], sizes = [4, 1, 16], strides = [1, 1, 1]} : vector<4x16x16xf32> to vector<4x1x16xf32>
    %406 = vector.shape_cast %405 : vector<4x1x16xf32> to vector<4x16xf32>
    %c0_205 = arith.constant 0 : index
    %c192_206 = arith.constant 192 : index
    %407 = vector.load %arg13[%c0_205, %c192_206] : memref<16x256xf32, #tpu.memory_space<vmem>>, vector<4x16xf32>
    tpu.vector_store %arg13[%c0_205, %c192_206], %406 {strides = array<i32>} : memref<16x256xf32, #tpu.memory_space<vmem>>, vector<4x16xf32>,
    %408 = vector.extract_strided_slice %368 {offsets = [0, 13, 0], sizes = [4, 1, 16], strides = [1, 1, 1]} : vector<4x16x16xf32> to vector<4x1x16xf32>
    %409 = vector.shape_cast %408 : vector<4x1x16xf32> to vector<4x16xf32>
    %c0_207 = arith.constant 0 : index
    %c208_208 = arith.constant 208 : index
    %410 = vector.load %arg13[%c0_207, %c208_208] : memref<16x256xf32, #tpu.memory_space<vmem>>, vector<4x16xf32>
    tpu.vector_store %arg13[%c0_207, %c208_208], %409 {strides = array<i32>} : memref<16x256xf32, #tpu.memory_space<vmem>>, vector<4x16xf32>,
    %411 = vector.extract_strided_slice %368 {offsets = [0, 14, 0], sizes = [4, 1, 16], strides = [1, 1, 1]} : vector<4x16x16xf32> to vector<4x1x16xf32>
    %412 = vector.shape_cast %411 : vector<4x1x16xf32> to vector<4x16xf32>
    %c0_209 = arith.constant 0 : index
    %c224_210 = arith.constant 224 : index
    %413 = vector.load %arg13[%c0_209, %c224_210] : memref<16x256xf32, #tpu.memory_space<vmem>>, vector<4x16xf32>
    tpu.vector_store %arg13[%c0_209, %c224_210], %412 {strides = array<i32>} : memref<16x256xf32, #tpu.memory_space<vmem>>, vector<4x16xf32>,
    %414 = vector.extract_strided_slice %368 {offsets = [0, 15, 0], sizes = [4, 1, 16], strides = [1, 1, 1]} : vector<4x16x16xf32> to vector<4x1x16xf32>
    %415 = vector.shape_cast %414 : vector<4x1x16xf32> to vector<4x16xf32>
    %c0_211 = arith.constant 0 : index
    %c240_212 = arith.constant 240 : index
    %416 = vector.load %arg13[%c0_211, %c240_212] : memref<16x256xf32, #tpu.memory_space<vmem>>, vector<4x16xf32>
    tpu.vector_store %arg13[%c0_211, %c240_212], %415 {strides = array<i32>} : memref<16x256xf32, #tpu.memory_space<vmem>>, vector<4x16xf32>,
    %417 = vector.extract_strided_slice %342 {offsets = [9, 0], sizes = [9, 16], strides = [1, 1]} : vector<54x16xf32> to vector<9x16xf32>
    %418 = vector.extract_strided_slice %342 {offsets = [36, 0], sizes = [9, 16], strides = [1, 1]} : vector<54x16xf32> to vector<9x16xf32>
    %419 = vector.shape_cast %417 : vector<9x16xf32> to vector<9x16x1xf32>
    %420 = vector.shape_cast %418 : vector<9x16xf32> to vector<9x1x16xf32>
    %421 = vector.broadcast %419 : vector<9x16x1xf32> to vector<9x16x16xf32>
    %422 = vector.broadcast %420 : vector<9x1x16xf32> to vector<9x16x16xf32>
    %423 = arith.subf %421, %422 : vector<9x16x16xf32>
    %424 = math.tanh %423 : vector<9x16x16xf32>
    %425 = arith.mulf %424, %424 : vector<9x16x16xf32>
    %cst_213 = arith.constant dense<0.000000e+00> : vector<16xf32>
    %426 = vector.multi_reduction <add>, %425, %cst_213 [0, 1] : vector<9x16x16xf32> to vector<16xf32>
    %427 = vector.shape_cast %426 : vector<16xf32> to vector<1x16xf32>
    %428 = vector.broadcast %0 : f32 to vector<9x16x16xf32>
    %429 = arith.mulf %428, %424 : vector<9x16x16xf32>
    %c1_214 = arith.constant 1 : index
    %c0_215 = arith.constant 0 : index
    %c0_216 = arith.constant 0 : index
    %430 = vector.load %arg5[%c1_214, %c0_215, %c0_216] : memref<3x16x16xf32, #tpu.memory_space<vmem>>, vector<1x16x16xf32>
    %431 = vector.shape_cast %430 : vector<1x16x16xf32> to vector<16x16xf32>
    %432 = vector.shape_cast %431 : vector<16x16xf32> to vector<1x16x16xf32>
    %433 = vector.broadcast %432 : vector<1x16x16xf32> to vector<9x16x16xf32>
    %434 = arith.addf %429, %433 : vector<9x16x16xf32>
    %435 = vector.shape_cast %434 : vector<9x16x16xf32> to vector<144x16xf32>
    %436 = arith.truncf %435 : vector<144x16xf32> to vector<144x16xbf16>
    %cst_217 = arith.constant dense<0.000000e+00> : vector<64x16xf32>
    %437 = tpu.matmul %339, %436, %cst_217 {dimension_numbers = #tpu.dot_dimension_numbers<[1], [0], [0], [1], [0, 0, 1, 1], [], []>} : vector<64x144xbf16>, vector<144x16xbf16>, vector<64x16xf32> -> vector<64x16xf32>
    %438 = arith.subf %437, %297 : vector<64x16xf32>
    %439 = arith.mulf %438, %438 : vector<64x16xf32>
    %cst_218 = arith.constant dense<0.000000e+00> : vector<16xf32>
    %440 = vector.multi_reduction <add>, %439, %cst_218 [0] : vector<64x16xf32> to vector<16xf32>
    %441 = vector.shape_cast %440 : vector<16xf32> to vector<1x16xf32>
    %442 = vector.shape_cast %437 : vector<64x16xf32> to vector<4x16x16xf32>
    %443 = vector.extract_strided_slice %442 {offsets = [0, 0, 0], sizes = [4, 1, 16], strides = [1, 1, 1]} : vector<4x16x16xf32> to vector<4x1x16xf32>
    %444 = vector.shape_cast %443 : vector<4x1x16xf32> to vector<4x16xf32>
    %c4_219 = arith.constant 4 : index
    %c0_220 = arith.constant 0 : index
    %445 = vector.load %arg13[%c4_219, %c0_220] : memref<16x256xf32, #tpu.memory_space<vmem>>, vector<4x16xf32>
    tpu.vector_store %arg13[%c4_219, %c0_220], %444 {strides = array<i32>} : memref<16x256xf32, #tpu.memory_space<vmem>>, vector<4x16xf32>,
    %446 = vector.extract_strided_slice %442 {offsets = [0, 1, 0], sizes = [4, 1, 16], strides = [1, 1, 1]} : vector<4x16x16xf32> to vector<4x1x16xf32>
    %447 = vector.shape_cast %446 : vector<4x1x16xf32> to vector<4x16xf32>
    %c4_221 = arith.constant 4 : index
    %c16_222 = arith.constant 16 : index
    %448 = vector.load %arg13[%c4_221, %c16_222] : memref<16x256xf32, #tpu.memory_space<vmem>>, vector<4x16xf32>
    tpu.vector_store %arg13[%c4_221, %c16_222], %447 {strides = array<i32>} : memref<16x256xf32, #tpu.memory_space<vmem>>, vector<4x16xf32>,
    %449 = vector.extract_strided_slice %442 {offsets = [0, 2, 0], sizes = [4, 1, 16], strides = [1, 1, 1]} : vector<4x16x16xf32> to vector<4x1x16xf32>
    %450 = vector.shape_cast %449 : vector<4x1x16xf32> to vector<4x16xf32>
    %c4_223 = arith.constant 4 : index
    %c32_224 = arith.constant 32 : index
    %451 = vector.load %arg13[%c4_223, %c32_224] : memref<16x256xf32, #tpu.memory_space<vmem>>, vector<4x16xf32>
    tpu.vector_store %arg13[%c4_223, %c32_224], %450 {strides = array<i32>} : memref<16x256xf32, #tpu.memory_space<vmem>>, vector<4x16xf32>,
    %452 = vector.extract_strided_slice %442 {offsets = [0, 3, 0], sizes = [4, 1, 16], strides = [1, 1, 1]} : vector<4x16x16xf32> to vector<4x1x16xf32>
    %453 = vector.shape_cast %452 : vector<4x1x16xf32> to vector<4x16xf32>
    %c4_225 = arith.constant 4 : index
    %c48_226 = arith.constant 48 : index
    %454 = vector.load %arg13[%c4_225, %c48_226] : memref<16x256xf32, #tpu.memory_space<vmem>>, vector<4x16xf32>
    tpu.vector_store %arg13[%c4_225, %c48_226], %453 {strides = array<i32>} : memref<16x256xf32, #tpu.memory_space<vmem>>, vector<4x16xf32>,
    %455 = vector.extract_strided_slice %442 {offsets = [0, 4, 0], sizes = [4, 1, 16], strides = [1, 1, 1]} : vector<4x16x16xf32> to vector<4x1x16xf32>
    %456 = vector.shape_cast %455 : vector<4x1x16xf32> to vector<4x16xf32>
    %c4_227 = arith.constant 4 : index
    %c64_228 = arith.constant 64 : index
    %457 = vector.load %arg13[%c4_227, %c64_228] : memref<16x256xf32, #tpu.memory_space<vmem>>, vector<4x16xf32>
    tpu.vector_store %arg13[%c4_227, %c64_228], %456 {strides = array<i32>} : memref<16x256xf32, #tpu.memory_space<vmem>>, vector<4x16xf32>,
    %458 = vector.extract_strided_slice %442 {offsets = [0, 5, 0], sizes = [4, 1, 16], strides = [1, 1, 1]} : vector<4x16x16xf32> to vector<4x1x16xf32>
    %459 = vector.shape_cast %458 : vector<4x1x16xf32> to vector<4x16xf32>
    %c4_229 = arith.constant 4 : index
    %c80_230 = arith.constant 80 : index
    %460 = vector.load %arg13[%c4_229, %c80_230] : memref<16x256xf32, #tpu.memory_space<vmem>>, vector<4x16xf32>
    tpu.vector_store %arg13[%c4_229, %c80_230], %459 {strides = array<i32>} : memref<16x256xf32, #tpu.memory_space<vmem>>, vector<4x16xf32>,
    %461 = vector.extract_strided_slice %442 {offsets = [0, 6, 0], sizes = [4, 1, 16], strides = [1, 1, 1]} : vector<4x16x16xf32> to vector<4x1x16xf32>
    %462 = vector.shape_cast %461 : vector<4x1x16xf32> to vector<4x16xf32>
    %c4_231 = arith.constant 4 : index
    %c96_232 = arith.constant 96 : index
    %463 = vector.load %arg13[%c4_231, %c96_232] : memref<16x256xf32, #tpu.memory_space<vmem>>, vector<4x16xf32>
    tpu.vector_store %arg13[%c4_231, %c96_232], %462 {strides = array<i32>} : memref<16x256xf32, #tpu.memory_space<vmem>>, vector<4x16xf32>,
    %464 = vector.extract_strided_slice %442 {offsets = [0, 7, 0], sizes = [4, 1, 16], strides = [1, 1, 1]} : vector<4x16x16xf32> to vector<4x1x16xf32>
    %465 = vector.shape_cast %464 : vector<4x1x16xf32> to vector<4x16xf32>
    %c4_233 = arith.constant 4 : index
    %c112_234 = arith.constant 112 : index
    %466 = vector.load %arg13[%c4_233, %c112_234] : memref<16x256xf32, #tpu.memory_space<vmem>>, vector<4x16xf32>
    tpu.vector_store %arg13[%c4_233, %c112_234], %465 {strides = array<i32>} : memref<16x256xf32, #tpu.memory_space<vmem>>, vector<4x16xf32>,
    %467 = vector.extract_strided_slice %442 {offsets = [0, 8, 0], sizes = [4, 1, 16], strides = [1, 1, 1]} : vector<4x16x16xf32> to vector<4x1x16xf32>
    %468 = vector.shape_cast %467 : vector<4x1x16xf32> to vector<4x16xf32>
    %c4_235 = arith.constant 4 : index
    %c128_236 = arith.constant 128 : index
    %469 = vector.load %arg13[%c4_235, %c128_236] : memref<16x256xf32, #tpu.memory_space<vmem>>, vector<4x16xf32>
    tpu.vector_store %arg13[%c4_235, %c128_236], %468 {strides = array<i32>} : memref<16x256xf32, #tpu.memory_space<vmem>>, vector<4x16xf32>,
    %470 = vector.extract_strided_slice %442 {offsets = [0, 9, 0], sizes = [4, 1, 16], strides = [1, 1, 1]} : vector<4x16x16xf32> to vector<4x1x16xf32>
    %471 = vector.shape_cast %470 : vector<4x1x16xf32> to vector<4x16xf32>
    %c4_237 = arith.constant 4 : index
    %c144_238 = arith.constant 144 : index
    %472 = vector.load %arg13[%c4_237, %c144_238] : memref<16x256xf32, #tpu.memory_space<vmem>>, vector<4x16xf32>
    tpu.vector_store %arg13[%c4_237, %c144_238], %471 {strides = array<i32>} : memref<16x256xf32, #tpu.memory_space<vmem>>, vector<4x16xf32>,
    %473 = vector.extract_strided_slice %442 {offsets = [0, 10, 0], sizes = [4, 1, 16], strides = [1, 1, 1]} : vector<4x16x16xf32> to vector<4x1x16xf32>
    %474 = vector.shape_cast %473 : vector<4x1x16xf32> to vector<4x16xf32>
    %c4_239 = arith.constant 4 : index
    %c160_240 = arith.constant 160 : index
    %475 = vector.load %arg13[%c4_239, %c160_240] : memref<16x256xf32, #tpu.memory_space<vmem>>, vector<4x16xf32>
    tpu.vector_store %arg13[%c4_239, %c160_240], %474 {strides = array<i32>} : memref<16x256xf32, #tpu.memory_space<vmem>>, vector<4x16xf32>,
    %476 = vector.extract_strided_slice %442 {offsets = [0, 11, 0], sizes = [4, 1, 16], strides = [1, 1, 1]} : vector<4x16x16xf32> to vector<4x1x16xf32>
    %477 = vector.shape_cast %476 : vector<4x1x16xf32> to vector<4x16xf32>
    %c4_241 = arith.constant 4 : index
    %c176_242 = arith.constant 176 : index
    %478 = vector.load %arg13[%c4_241, %c176_242] : memref<16x256xf32, #tpu.memory_space<vmem>>, vector<4x16xf32>
    tpu.vector_store %arg13[%c4_241, %c176_242], %477 {strides = array<i32>} : memref<16x256xf32, #tpu.memory_space<vmem>>, vector<4x16xf32>,
    %479 = vector.extract_strided_slice %442 {offsets = [0, 12, 0], sizes = [4, 1, 16], strides = [1, 1, 1]} : vector<4x16x16xf32> to vector<4x1x16xf32>
    %480 = vector.shape_cast %479 : vector<4x1x16xf32> to vector<4x16xf32>
    %c4_243 = arith.constant 4 : index
    %c192_244 = arith.constant 192 : index
    %481 = vector.load %arg13[%c4_243, %c192_244] : memref<16x256xf32, #tpu.memory_space<vmem>>, vector<4x16xf32>
    tpu.vector_store %arg13[%c4_243, %c192_244], %480 {strides = array<i32>} : memref<16x256xf32, #tpu.memory_space<vmem>>, vector<4x16xf32>,
    %482 = vector.extract_strided_slice %442 {offsets = [0, 13, 0], sizes = [4, 1, 16], strides = [1, 1, 1]} : vector<4x16x16xf32> to vector<4x1x16xf32>
    %483 = vector.shape_cast %482 : vector<4x1x16xf32> to vector<4x16xf32>
    %c4_245 = arith.constant 4 : index
    %c208_246 = arith.constant 208 : index
    %484 = vector.load %arg13[%c4_245, %c208_246] : memref<16x256xf32, #tpu.memory_space<vmem>>, vector<4x16xf32>
    tpu.vector_store %arg13[%c4_245, %c208_246], %483 {strides = array<i32>} : memref<16x256xf32, #tpu.memory_space<vmem>>, vector<4x16xf32>,
    %485 = vector.extract_strided_slice %442 {offsets = [0, 14, 0], sizes = [4, 1, 16], strides = [1, 1, 1]} : vector<4x16x16xf32> to vector<4x1x16xf32>
    %486 = vector.shape_cast %485 : vector<4x1x16xf32> to vector<4x16xf32>
    %c4_247 = arith.constant 4 : index
    %c224_248 = arith.constant 224 : index
    %487 = vector.load %arg13[%c4_247, %c224_248] : memref<16x256xf32, #tpu.memory_space<vmem>>, vector<4x16xf32>
    tpu.vector_store %arg13[%c4_247, %c224_248], %486 {strides = array<i32>} : memref<16x256xf32, #tpu.memory_space<vmem>>, vector<4x16xf32>,
    %488 = vector.extract_strided_slice %442 {offsets = [0, 15, 0], sizes = [4, 1, 16], strides = [1, 1, 1]} : vector<4x16x16xf32> to vector<4x1x16xf32>
    %489 = vector.shape_cast %488 : vector<4x1x16xf32> to vector<4x16xf32>
    %c4_249 = arith.constant 4 : index
    %c240_250 = arith.constant 240 : index
    %490 = vector.load %arg13[%c4_249, %c240_250] : memref<16x256xf32, #tpu.memory_space<vmem>>, vector<4x16xf32>
    tpu.vector_store %arg13[%c4_249, %c240_250], %489 {strides = array<i32>} : memref<16x256xf32, #tpu.memory_space<vmem>>, vector<4x16xf32>,
    %491 = vector.extract_strided_slice %342 {offsets = [18, 0], sizes = [9, 16], strides = [1, 1]} : vector<54x16xf32> to vector<9x16xf32>
    %492 = vector.extract_strided_slice %342 {offsets = [45, 0], sizes = [9, 16], strides = [1, 1]} : vector<54x16xf32> to vector<9x16xf32>
    %493 = vector.shape_cast %491 : vector<9x16xf32> to vector<9x16x1xf32>
    %494 = vector.shape_cast %492 : vector<9x16xf32> to vector<9x1x16xf32>
    %495 = vector.broadcast %493 : vector<9x16x1xf32> to vector<9x16x16xf32>
    %496 = vector.broadcast %494 : vector<9x1x16xf32> to vector<9x16x16xf32>
    %497 = arith.subf %495, %496 : vector<9x16x16xf32>
    %498 = math.tanh %497 : vector<9x16x16xf32>
    %499 = arith.mulf %498, %498 : vector<9x16x16xf32>
    %cst_251 = arith.constant dense<0.000000e+00> : vector<16xf32>
    %500 = vector.multi_reduction <add>, %499, %cst_251 [0, 1] : vector<9x16x16xf32> to vector<16xf32>
    %501 = vector.shape_cast %500 : vector<16xf32> to vector<1x16xf32>
    %502 = vector.broadcast %0 : f32 to vector<9x16x16xf32>
    %503 = arith.mulf %502, %498 : vector<9x16x16xf32>
    %c2_252 = arith.constant 2 : index
    %c0_253 = arith.constant 0 : index
    %c0_254 = arith.constant 0 : index
    %504 = vector.load %arg5[%c2_252, %c0_253, %c0_254] : memref<3x16x16xf32, #tpu.memory_space<vmem>>, vector<1x16x16xf32>
    %505 = vector.shape_cast %504 : vector<1x16x16xf32> to vector<16x16xf32>
    %506 = vector.shape_cast %505 : vector<16x16xf32> to vector<1x16x16xf32>
    %507 = vector.broadcast %506 : vector<1x16x16xf32> to vector<9x16x16xf32>
    %508 = arith.addf %503, %507 : vector<9x16x16xf32>
    %509 = vector.shape_cast %508 : vector<9x16x16xf32> to vector<144x16xf32>
    %510 = arith.truncf %509 : vector<144x16xf32> to vector<144x16xbf16>
    %cst_255 = arith.constant dense<0.000000e+00> : vector<64x16xf32>
    %511 = tpu.matmul %339, %510, %cst_255 {dimension_numbers = #tpu.dot_dimension_numbers<[1], [0], [0], [1], [0, 0, 1, 1], [], []>} : vector<64x144xbf16>, vector<144x16xbf16>, vector<64x16xf32> -> vector<64x16xf32>
    %512 = arith.subf %511, %297 : vector<64x16xf32>
    %513 = arith.mulf %512, %512 : vector<64x16xf32>
    %cst_256 = arith.constant dense<0.000000e+00> : vector<16xf32>
    %514 = vector.multi_reduction <add>, %513, %cst_256 [0] : vector<64x16xf32> to vector<16xf32>
    %515 = vector.shape_cast %514 : vector<16xf32> to vector<1x16xf32>
    %516 = vector.shape_cast %511 : vector<64x16xf32> to vector<4x16x16xf32>
    %517 = vector.extract_strided_slice %516 {offsets = [0, 0, 0], sizes = [4, 1, 16], strides = [1, 1, 1]} : vector<4x16x16xf32> to vector<4x1x16xf32>
    %518 = vector.shape_cast %517 : vector<4x1x16xf32> to vector<4x16xf32>
    %c8_257 = arith.constant 8 : index
    %c0_258 = arith.constant 0 : index
    %519 = vector.load %arg13[%c8_257, %c0_258] : memref<16x256xf32, #tpu.memory_space<vmem>>, vector<4x16xf32>
    tpu.vector_store %arg13[%c8_257, %c0_258], %518 {strides = array<i32>} : memref<16x256xf32, #tpu.memory_space<vmem>>, vector<4x16xf32>,
    %520 = vector.extract_strided_slice %516 {offsets = [0, 1, 0], sizes = [4, 1, 16], strides = [1, 1, 1]} : vector<4x16x16xf32> to vector<4x1x16xf32>
    %521 = vector.shape_cast %520 : vector<4x1x16xf32> to vector<4x16xf32>
    %c8_259 = arith.constant 8 : index
    %c16_260 = arith.constant 16 : index
    %522 = vector.load %arg13[%c8_259, %c16_260] : memref<16x256xf32, #tpu.memory_space<vmem>>, vector<4x16xf32>
    tpu.vector_store %arg13[%c8_259, %c16_260], %521 {strides = array<i32>} : memref<16x256xf32, #tpu.memory_space<vmem>>, vector<4x16xf32>,
    %523 = vector.extract_strided_slice %516 {offsets = [0, 2, 0], sizes = [4, 1, 16], strides = [1, 1, 1]} : vector<4x16x16xf32> to vector<4x1x16xf32>
    %524 = vector.shape_cast %523 : vector<4x1x16xf32> to vector<4x16xf32>
    %c8_261 = arith.constant 8 : index
    %c32_262 = arith.constant 32 : index
    %525 = vector.load %arg13[%c8_261, %c32_262] : memref<16x256xf32, #tpu.memory_space<vmem>>, vector<4x16xf32>
    tpu.vector_store %arg13[%c8_261, %c32_262], %524 {strides = array<i32>} : memref<16x256xf32, #tpu.memory_space<vmem>>, vector<4x16xf32>,
    %526 = vector.extract_strided_slice %516 {offsets = [0, 3, 0], sizes = [4, 1, 16], strides = [1, 1, 1]} : vector<4x16x16xf32> to vector<4x1x16xf32>
    %527 = vector.shape_cast %526 : vector<4x1x16xf32> to vector<4x16xf32>
    %c8_263 = arith.constant 8 : index
    %c48_264 = arith.constant 48 : index
    %528 = vector.load %arg13[%c8_263, %c48_264] : memref<16x256xf32, #tpu.memory_space<vmem>>, vector<4x16xf32>
    tpu.vector_store %arg13[%c8_263, %c48_264], %527 {strides = array<i32>} : memref<16x256xf32, #tpu.memory_space<vmem>>, vector<4x16xf32>,
    %529 = vector.extract_strided_slice %516 {offsets = [0, 4, 0], sizes = [4, 1, 16], strides = [1, 1, 1]} : vector<4x16x16xf32> to vector<4x1x16xf32>
    %530 = vector.shape_cast %529 : vector<4x1x16xf32> to vector<4x16xf32>
    %c8_265 = arith.constant 8 : index
    %c64_266 = arith.constant 64 : index
    %531 = vector.load %arg13[%c8_265, %c64_266] : memref<16x256xf32, #tpu.memory_space<vmem>>, vector<4x16xf32>
    tpu.vector_store %arg13[%c8_265, %c64_266], %530 {strides = array<i32>} : memref<16x256xf32, #tpu.memory_space<vmem>>, vector<4x16xf32>,
    %532 = vector.extract_strided_slice %516 {offsets = [0, 5, 0], sizes = [4, 1, 16], strides = [1, 1, 1]} : vector<4x16x16xf32> to vector<4x1x16xf32>
    %533 = vector.shape_cast %532 : vector<4x1x16xf32> to vector<4x16xf32>
    %c8_267 = arith.constant 8 : index
    %c80_268 = arith.constant 80 : index
    %534 = vector.load %arg13[%c8_267, %c80_268] : memref<16x256xf32, #tpu.memory_space<vmem>>, vector<4x16xf32>
    tpu.vector_store %arg13[%c8_267, %c80_268], %533 {strides = array<i32>} : memref<16x256xf32, #tpu.memory_space<vmem>>, vector<4x16xf32>,
    %535 = vector.extract_strided_slice %516 {offsets = [0, 6, 0], sizes = [4, 1, 16], strides = [1, 1, 1]} : vector<4x16x16xf32> to vector<4x1x16xf32>
    %536 = vector.shape_cast %535 : vector<4x1x16xf32> to vector<4x16xf32>
    %c8_269 = arith.constant 8 : index
    %c96_270 = arith.constant 96 : index
    %537 = vector.load %arg13[%c8_269, %c96_270] : memref<16x256xf32, #tpu.memory_space<vmem>>, vector<4x16xf32>
    tpu.vector_store %arg13[%c8_269, %c96_270], %536 {strides = array<i32>} : memref<16x256xf32, #tpu.memory_space<vmem>>, vector<4x16xf32>,
    %538 = vector.extract_strided_slice %516 {offsets = [0, 7, 0], sizes = [4, 1, 16], strides = [1, 1, 1]} : vector<4x16x16xf32> to vector<4x1x16xf32>
    %539 = vector.shape_cast %538 : vector<4x1x16xf32> to vector<4x16xf32>
    %c8_271 = arith.constant 8 : index
    %c112_272 = arith.constant 112 : index
    %540 = vector.load %arg13[%c8_271, %c112_272] : memref<16x256xf32, #tpu.memory_space<vmem>>, vector<4x16xf32>
    tpu.vector_store %arg13[%c8_271, %c112_272], %539 {strides = array<i32>} : memref<16x256xf32, #tpu.memory_space<vmem>>, vector<4x16xf32>,
    %541 = vector.extract_strided_slice %516 {offsets = [0, 8, 0], sizes = [4, 1, 16], strides = [1, 1, 1]} : vector<4x16x16xf32> to vector<4x1x16xf32>
    %542 = vector.shape_cast %541 : vector<4x1x16xf32> to vector<4x16xf32>
    %c8_273 = arith.constant 8 : index
    %c128_274 = arith.constant 128 : index
    %543 = vector.load %arg13[%c8_273, %c128_274] : memref<16x256xf32, #tpu.memory_space<vmem>>, vector<4x16xf32>
    tpu.vector_store %arg13[%c8_273, %c128_274], %542 {strides = array<i32>} : memref<16x256xf32, #tpu.memory_space<vmem>>, vector<4x16xf32>,
    %544 = vector.extract_strided_slice %516 {offsets = [0, 9, 0], sizes = [4, 1, 16], strides = [1, 1, 1]} : vector<4x16x16xf32> to vector<4x1x16xf32>
    %545 = vector.shape_cast %544 : vector<4x1x16xf32> to vector<4x16xf32>
    %c8_275 = arith.constant 8 : index
    %c144_276 = arith.constant 144 : index
    %546 = vector.load %arg13[%c8_275, %c144_276] : memref<16x256xf32, #tpu.memory_space<vmem>>, vector<4x16xf32>
    tpu.vector_store %arg13[%c8_275, %c144_276], %545 {strides = array<i32>} : memref<16x256xf32, #tpu.memory_space<vmem>>, vector<4x16xf32>,
    %547 = vector.extract_strided_slice %516 {offsets = [0, 10, 0], sizes = [4, 1, 16], strides = [1, 1, 1]} : vector<4x16x16xf32> to vector<4x1x16xf32>
    %548 = vector.shape_cast %547 : vector<4x1x16xf32> to vector<4x16xf32>
    %c8_277 = arith.constant 8 : index
    %c160_278 = arith.constant 160 : index
    %549 = vector.load %arg13[%c8_277, %c160_278] : memref<16x256xf32, #tpu.memory_space<vmem>>, vector<4x16xf32>
    tpu.vector_store %arg13[%c8_277, %c160_278], %548 {strides = array<i32>} : memref<16x256xf32, #tpu.memory_space<vmem>>, vector<4x16xf32>,
    %550 = vector.extract_strided_slice %516 {offsets = [0, 11, 0], sizes = [4, 1, 16], strides = [1, 1, 1]} : vector<4x16x16xf32> to vector<4x1x16xf32>
    %551 = vector.shape_cast %550 : vector<4x1x16xf32> to vector<4x16xf32>
    %c8_279 = arith.constant 8 : index
    %c176_280 = arith.constant 176 : index
    %552 = vector.load %arg13[%c8_279, %c176_280] : memref<16x256xf32, #tpu.memory_space<vmem>>, vector<4x16xf32>
    tpu.vector_store %arg13[%c8_279, %c176_280], %551 {strides = array<i32>} : memref<16x256xf32, #tpu.memory_space<vmem>>, vector<4x16xf32>,
    %553 = vector.extract_strided_slice %516 {offsets = [0, 12, 0], sizes = [4, 1, 16], strides = [1, 1, 1]} : vector<4x16x16xf32> to vector<4x1x16xf32>
    %554 = vector.shape_cast %553 : vector<4x1x16xf32> to vector<4x16xf32>
    %c8_281 = arith.constant 8 : index
    %c192_282 = arith.constant 192 : index
    %555 = vector.load %arg13[%c8_281, %c192_282] : memref<16x256xf32, #tpu.memory_space<vmem>>, vector<4x16xf32>
    tpu.vector_store %arg13[%c8_281, %c192_282], %554 {strides = array<i32>} : memref<16x256xf32, #tpu.memory_space<vmem>>, vector<4x16xf32>,
    %556 = vector.extract_strided_slice %516 {offsets = [0, 13, 0], sizes = [4, 1, 16], strides = [1, 1, 1]} : vector<4x16x16xf32> to vector<4x1x16xf32>
    %557 = vector.shape_cast %556 : vector<4x1x16xf32> to vector<4x16xf32>
    %c8_283 = arith.constant 8 : index
    %c208_284 = arith.constant 208 : index
    %558 = vector.load %arg13[%c8_283, %c208_284] : memref<16x256xf32, #tpu.memory_space<vmem>>, vector<4x16xf32>
    tpu.vector_store %arg13[%c8_283, %c208_284], %557 {strides = array<i32>} : memref<16x256xf32, #tpu.memory_space<vmem>>, vector<4x16xf32>,
    %559 = vector.extract_strided_slice %516 {offsets = [0, 14, 0], sizes = [4, 1, 16], strides = [1, 1, 1]} : vector<4x16x16xf32> to vector<4x1x16xf32>
    %560 = vector.shape_cast %559 : vector<4x1x16xf32> to vector<4x16xf32>
    %c8_285 = arith.constant 8 : index
    %c224_286 = arith.constant 224 : index
    %561 = vector.load %arg13[%c8_285, %c224_286] : memref<16x256xf32, #tpu.memory_space<vmem>>, vector<4x16xf32>
    tpu.vector_store %arg13[%c8_285, %c224_286], %560 {strides = array<i32>} : memref<16x256xf32, #tpu.memory_space<vmem>>, vector<4x16xf32>,
    %562 = vector.extract_strided_slice %516 {offsets = [0, 15, 0], sizes = [4, 1, 16], strides = [1, 1, 1]} : vector<4x16x16xf32> to vector<4x1x16xf32>
    %563 = vector.shape_cast %562 : vector<4x1x16xf32> to vector<4x16xf32>
    %c8_287 = arith.constant 8 : index
    %c240_288 = arith.constant 240 : index
    %564 = vector.load %arg13[%c8_287, %c240_288] : memref<16x256xf32, #tpu.memory_space<vmem>>, vector<4x16xf32>
    tpu.vector_store %arg13[%c8_287, %c240_288], %563 {strides = array<i32>} : memref<16x256xf32, #tpu.memory_space<vmem>>, vector<4x16xf32>,
    %c1_289 = arith.constant 1 : index
    %c0_290 = arith.constant 0 : index
    %c0_291 = arith.constant 0 : index
    %565 = vector.load %arg2[%c1_289, %c0_290, %c0_291] : memref<2x4x256xf32, #tpu.memory_space<vmem>>, vector<1x4x256xf32>
    %566 = vector.shape_cast %565 : vector<1x4x256xf32> to vector<4x256xf32>
    %c12_292 = arith.constant 12 : index
    %c0_293 = arith.constant 0 : index
    %567 = vector.load %arg13[%c12_292, %c0_293] : memref<16x256xf32, #tpu.memory_space<vmem>>, vector<4x256xf32>
    tpu.vector_store %arg13[%c12_292, %c0_293], %566 {strides = array<i32>} : memref<16x256xf32, #tpu.memory_space<vmem>>, vector<4x256xf32>,
    %c0_294 = arith.constant 0 : index
    %c0_295 = arith.constant 0 : index
    %568 = vector.load %arg13[%c0_294, %c0_295] : memref<16x256xf32, #tpu.memory_space<vmem>>, vector<16x256xf32>
    %cst_296 = arith.constant dense<0.000000e+00> : vector<8x256xf32>
    %569 = tpu.matmul %3, %568, %cst_296 {dimension_numbers = #tpu.dot_dimension_numbers<[1], [0], [0], [1], [0, 0, 1, 1], [], []>} : vector<8x16xf32>, vector<16x256xf32>, vector<8x256xf32> -> vector<8x256xf32>
    %570 = vector.broadcast %4 : vector<8x1xf32> to vector<8x256xf32>
    %571 = arith.addf %569, %570 : vector<8x256xf32>
    %cst_297 = arith.constant 0.000000e+00 : f32
    %572 = vector.broadcast %cst_297 : f32 to vector<8x256xf32>
    %573 = arith.maximumf %571, %572 : vector<8x256xf32>
    %c1_298 = arith.constant 1 : index
    %c0_299 = arith.constant 0 : index
    %c0_300 = arith.constant 0 : index
    %574 = vector.load %arg9[%c1_298, %c0_299, %c0_300] : memref<2x8x256xf32, #tpu.memory_space<vmem>>, vector<1x8x256xf32>
    %575 = vector.shape_cast %574 : vector<1x8x256xf32> to vector<8x256xf32>
    %576 = vector.shape_cast %573 : vector<8x256xf32> to vector<1x8x256xf32>
    tpu.vector_store %arg9[%c1_298, %c0_299, %c0_300], %576 {strides = array<i32>} : memref<2x8x256xf32, #tpu.memory_space<vmem>>, vector<1x8x256xf32>,
    %577 = tpu.concatenate %367, %441, %515 in 0 : vector<1x16xf32>, vector<1x16xf32>, vector<1x16xf32> -> vector<3x16xf32>
    %c1_301 = arith.constant 1 : index
    %c0_302 = arith.constant 0 : index
    %c0_303 = arith.constant 0 : index
    %578 = vector.load %arg10[%c1_301, %c0_302, %c0_303] : memref<2x3x16xf32, #tpu.memory_space<vmem>>, vector<1x3x16xf32>
    %579 = vector.shape_cast %578 : vector<1x3x16xf32> to vector<3x16xf32>
    %580 = vector.shape_cast %577 : vector<3x16xf32> to vector<1x3x16xf32>
    tpu.vector_store %arg10[%c1_301, %c0_302, %c0_303], %580 {strides = array<i32>} : memref<2x3x16xf32, #tpu.memory_space<vmem>>, vector<1x3x16xf32>,
    %581 = tpu.concatenate %353, %427, %501 in 0 : vector<1x16xf32>, vector<1x16xf32>, vector<1x16xf32> -> vector<3x16xf32>
    %c1_304 = arith.constant 1 : index
    %c0_305 = arith.constant 0 : index
    %c0_306 = arith.constant 0 : index
    %582 = vector.load %arg11[%c1_304, %c0_305, %c0_306] : memref<2x3x16xf32, #tpu.memory_space<vmem>>, vector<1x3x16xf32>
    %583 = vector.shape_cast %582 : vector<1x3x16xf32> to vector<3x16xf32>
    %584 = vector.shape_cast %581 : vector<3x16xf32> to vector<1x3x16xf32>
    tpu.vector_store %arg11[%c1_304, %c0_305, %c0_306], %584 {strides = array<i32>} : memref<2x3x16xf32, #tpu.memory_space<vmem>>, vector<1x3x16xf32>,
    return
  }
  func.func @transform_0(%arg0: i32) -> (i32, i32, i32, i32) {
    %c0_i32 = arith.constant 0 : i32
    %c0_i32_0 = arith.constant 0 : i32
    %c0_i32_1 = arith.constant 0 : i32
    %c0_i32_2 = arith.constant 0 : i32
    return %arg0, %c0_i32, %c0_i32_0, %c0_i32_1 : i32, i32, i32, i32
  }
  func.func @transform_1(%arg0: i32) -> (i32, i32, i32) {
    %c0_i32 = arith.constant 0 : i32
    %c0_i32_0 = arith.constant 0 : i32
    %c0_i32_1 = arith.constant 0 : i32
    return %arg0, %c0_i32, %c0_i32_0 : i32, i32, i32
  }
  func.func @transform_2(%arg0: i32) -> (i32, i32) {
    %c0_i32 = arith.constant 0 : i32
    %c0_i32_0 = arith.constant 0 : i32
    %c0_i32_1 = arith.constant 0 : i32
    return %c0_i32, %c0_i32_0 : i32, i32
  }
  func.func @transform_3(%arg0: i32) -> (i32, i32) {
    %c0_i32 = arith.constant 0 : i32
    %c0_i32_0 = arith.constant 0 : i32
    %c0_i32_1 = arith.constant 0 : i32
    return %c0_i32, %c0_i32_0 : i32, i32
  }
  func.func @transform_4(%arg0: i32) -> (i32, i32, i32) {
    %c0_i32 = arith.constant 0 : i32
    %c0_i32_0 = arith.constant 0 : i32
    %c0_i32_1 = arith.constant 0 : i32
    %c0_i32_2 = arith.constant 0 : i32
    return %c0_i32, %c0_i32_0, %c0_i32_1 : i32, i32, i32
  }
  func.func @transform_5(%arg0: i32) -> (i32, i32) {
    %c0_i32 = arith.constant 0 : i32
    %c0_i32_0 = arith.constant 0 : i32
    %c0_i32_1 = arith.constant 0 : i32
    return %c0_i32, %c0_i32_0 : i32, i32
  }
  func.func @transform_6(%arg0: i32) -> (i32, i32) {
    %c0_i32 = arith.constant 0 : i32
    %c0_i32_0 = arith.constant 0 : i32
    %c0_i32_1 = arith.constant 0 : i32
    return %c0_i32, %c0_i32_0 : i32, i32
  }
  func.func @transform_7(%arg0: i32) -> i32 {
    %c0_i32 = arith.constant 0 : i32
    %c0_i32_0 = arith.constant 0 : i32
    return %c0_i32 : i32
  }
  func.func @transform_8(%arg0: i32) -> (i32, i32, i32) {
    %c0_i32 = arith.constant 0 : i32
    %c0_i32_0 = arith.constant 0 : i32
    %c0_i32_1 = arith.constant 0 : i32
    return %arg0, %c0_i32, %c0_i32_0 : i32, i32, i32
  }
  func.func @transform_9(%arg0: i32) -> (i32, i32, i32) {
    %c0_i32 = arith.constant 0 : i32
    %c0_i32_0 = arith.constant 0 : i32
    %c0_i32_1 = arith.constant 0 : i32
    return %arg0, %c0_i32, %c0_i32_0 : i32, i32, i32
  }
  func.func @transform_10(%arg0: i32) -> (i32, i32, i32) {
    %c0_i32 = arith.constant 0 : i32
    %c0_i32_0 = arith.constant 0 : i32
    %c0_i32_1 = arith.constant 0 : i32
    return %arg0, %c0_i32, %c0_i32_0 : i32, i32, i32
  }
}

</mosaic_0001>

<bundles_post_ra>
// kernel: unit_gcgcn_forward.1
= control target key start
LH: loop header
LB: loop body
LE: loop exit
PB: predicated region body
PF: predicated region fallthrough
CT: control target
= control target key end

     0   :  { %s6160_s15 = smov 0   ;;  %s9836_s0 = inlined_call_operand.vmem [shape: f32[4,4,16,16], index: 0, kind: input, shape index: {}]   ;;  %s9837_s1 = inlined_call_operand.vmem [shape: f32[4,4,256], index: 1, kind: input, shape index: {}]   ;;  %s9838_s2 = inlined_call_operand.vmem [shape: f32[54,4], index: 2, kind: input, shape index: {}]   ;;  %s9839_s3 = inlined_call_operand.vmem [shape: f32[54,1], index: 3, kind: input, shape index: {}]   ;;  %s9840_s4 = inlined_call_operand.vmem [shape: f32[3,16,16], index: 4, kind: input, shape index: {}]   ;;  %s9841_s5 = inlined_call_operand.vmem [shape: f32[8,16], index: 5, kind: input, shape index: {}]   ;;  %s9842_s6 = inlined_call_operand.vmem [shape: f32[8,1], index: 6, kind: input, shape index: {}]   ;;  %s9843_s7 = inlined_call_operand.<no memory space> [shape: f32[1], index: 7, kind: input, shape index: {}]   ;;  %s9844_s8 = inlined_call_operand.vmem [shape: f32[4,8,256], index: 8, kind: output, shape index: {0}]   ;;  %s9845_s9 = inlined_call_operand.vmem [shape: f32[4,3,16], index: 9, kind: output, shape index: {1}]   ;;  %s9846_s10 = inlined_call_operand.vmem [shape: f32[4,3,16], index: 10, kind: output, shape index: {2}]  }
   0x1   :  { %16 = sst [smem:[#allocation4]] %s9843_s7 }
   0x2 LB: > { %s5579_s16 = sadd.s32 4294967295, %s6089_s15   ;;  %p5583_p0 = scmp.ge.s32.totalorder %s6089_s15, 1  ;;  %s6089_s15 = sphi %s6160_s15, %s22_s15  }
   0x3   : > { %p332_p1 = scmp.lt.s32.totalorder %s6089_s15, 3 }
   0x5   : > { %p333_p2 = pnand %p5583_p0, %p332_p1 }
   0x7   : > { %336 = sbr.rel (%p333_p2) target bundleno = 2102 (0x836), region = 52 }
   0xc   : > { %s5584_s17 = sshll.u32 %s5579_s16, 1  ;;  %v6091_v0 = vmov 0.0   ;;  %vm9895_vm0 = vcmask 1046528   ;;  %s6092_s21 = smov 16   ;;  %vm9893_vm1 = vcmask 1045504   ;;  %vm9850_vm2 = vcmask 1044480  }
   0xd   : > { %p389_p3 = scmp.lt.s32.totalorder %s5584_s17, 3  ;;  %v6177_v1 = vrot.slane %v6091_v0, 1  ;;  %v6222_v28 = vrot.slane %v6091_v0, 2  ;;  %s6093_s22 = smov 32   ;;  %v6254_v51 = vrot.slane %v6091_v0, 3  ;;  %vm447_vm3 = vcmask 130048  }
   0xe   : > { %v6094_v63 = vmov 16.0   ;;  %s6095_s23 = smov 48   ;;  %vm1102_vm5 = vcmask 1041409   ;;  %vm1104_vm6 = vcmask 1042434   ;;  %vm9849_vm7 = vcmask 1043456   ;;  %s6097_s26 = smov 64  }
   0xf   : > { %s10170_s17 = smov (!%p389_p3, %s5584_s17), 3  ;;  %9937 = vst [vmem:[#allocation5_spill] sm:$0xff] %v6177_v1  ;;  %5829 = vrcp.f32 %v6094_v63  ;;  %vm1106_vm8 = vcmask 1043459   ;;  %vm9848_vm9 = vcmask 31744   ;;  %vm9903_vm10 = vcmask 125952   ;;  %s6098_s11 = smov 80  }
  0x10   : > { %s5728_s7 = sshll.u32 %s10170_s17, 6  ;;  %9938 = vst [vmem:[#allocation6_spill] sm:$0xff] %v6222_v28  ;;  %vm9847_vm11 = vcmask 1042432   ;;  %vm584_vm12 = vcmask 257152   ;;  %vm893_vm13 = vcmask 1041408   ;;  %s6099_s19 = smov 96  }
  0x11   : > { %s6174_s20 = scalar_lea.vmem %s9836_s0, %s5728_s7  ;;  %9939 = vst [vmem:[#allocation7_spill] sm:$0xff] %v6254_v51  ;;  %vm659_vm14 = vcmask 388352   ;;  %vm9904_vm15 = vcmask 1040384   ;;  %s6101_s24 = smov 112  }
  0x12   : > { %v6180_v2 = vld [vmem:[%s6174_s20 + $0x20] sm:$0xff]  ;;  %v6184_v4 = vld [vmem:[%s6174_s20 + $0x10] sm:$0xff]  ;;  %v6190_v6 = vld [vmem:[%s6174_s20 + $0x28] sm:$0xff]  ;;  %s5729_s12 = sshll.u32 %s10170_s17, 3  ;;  %s422_s7 = sld [smem:[#allocation4]] }
  0x13   : > { %v528_v3 = vrot.slane %v6180_v2, 1  ;;  %v6187_v5 = vld [vmem:[%s6174_s20] sm:$0xff]  ;;  %v524_v7 = vrot.slane %v6184_v4, 1  ;;  %v6195_v9 = vld [vmem:[%s6174_s20 + $0x18] sm:$0xff]  ;;  %v6198_v10 = vld [vmem:[%s6174_s20 + $0x8] sm:$0xff]  ;;  %v530_v12 = vrot.slane %v6190_v6, 1  ;;  %s6730_s16 = scalar_lea.vmem %s9837_s1, %s5729_s12 }
  0x14   : > { %v520_v8 = vrot.slane %v6187_v5, 1  ;;  %v526_v13 = vrot.slane %v6195_v9, 1  ;;  %v522_v17 = vrot.slane %v6198_v10, 1  ;;  %v6216_v23 = vld [vmem:[%s6174_s20 + $0x30] sm:$0xff]  ;;  %v6219_v24 = vld [vmem:[%s6174_s20 + $0x38] sm:$0xff]  ;;  %v595_v29 = vrot.slane %v6187_v5, 2 }
  0x15   : > { %v529_v11 = vsel %vm9895_vm0, %v6177_v1, %v528_v3  ;;  %v525_v15 = vsel %vm9895_vm0, %v6177_v1, %v524_v7  ;;  %v531_v20 = vsel %vm9895_vm0, %v528_v3, %v530_v12  ;;  %v532_v30 = vrot.slane %v6216_v23, 1  ;;  %s5594_s27 = sshll.u32 %s10170_s17, 2  ;;  %s5730_s25 = sshll.u32 %s10170_s17, 4 }
  0x16   : > { %v548_v14 = vpack.c.bf16 %v529_v11, %v529_v11  ;;  %v521_v16 = vsel %vm9895_vm0, %v6177_v1, %v520_v8  ;;  %v546_v18 = vpack.c.bf16 %v525_v15, %v525_v15  ;;  %v527_v21 = vsel %vm9895_vm0, %v524_v7, %v526_v13  ;;  %s7551_s30 = scalar_lea.vmem %s9846_s10, %s5594_s27  ;;  %s7864_s14 = scalar_lea.vmem %s9845_s9, %s5594_s27 }
  0x17   : > { %v544_v19 = vpack.c.bf16 %v521_v16, %v521_v16  ;;  %v523_v22 = vsel %vm9895_vm0, %v520_v8, %v522_v17  ;;  %v549_v25 = vpack.c.bf16 %v531_v20, %v531_v20  ;;  %v547_v26 = vpack.c.bf16 %v527_v21, %v527_v21  ;;  %s8386_s29 = scalar_lea.vmem %s9844_s8, %s5730_s25 }
  0x18   : > { %568 = vrot.lane.b32.xlu2 %v548_v14, %s6092_s21  ;;  %564 = vrot.lane.b32.xlu1 %v546_v18, %s6092_s21  ;;  %v545_v27 = vpack.c.bf16 %v523_v22, %v523_v22  ;;  %v534_v31 = vrot.slane %v6219_v24, 1  ;;  %v596_v32 = vsel %vm9893_vm1, %v6222_v28, %v595_v29  ;;  %v533_v34 = vsel %vm9895_vm0, %v6177_v1, %v532_v30 }
  0x19   : > { %560 = vrot.lane.b32.xlu0 %v544_v19, %s6092_s21  ;;  %v619_v35 = vpack.c.bf16 %v596_v32, %v596_v32  ;;  %v550_v37 = vpack.c.bf16 %v533_v34, %v533_v34  ;;  %v599_v38 = vrot.slane %v6184_v4, 2  ;;  %v601_v39 = vrot.slane %v6195_v9, 2 }
  0x1a   : > { %v535_v33 = vsel %vm9895_vm0, %v532_v30, %v534_v31  ;;  %v597_v40 = vrot.slane %v6198_v10, 2  ;;  %v607_v47 = vrot.slane %v6216_v23, 2  ;;  %v603_v48 = vrot.slane %v6180_v2, 2  ;;  %v5830_v31 = vpop.eup %5829 }
  0x1b   : > { %v551_v36 = vpack.c.bf16 %v535_v33, %v535_v33  ;;  %v602_v41 = vsel %vm9893_vm1, %v599_v38, %v601_v39  ;;  %v600_v42 = vsel %vm9893_vm1, %v6222_v28, %v599_v38  ;;  %v605_v49 = vrot.slane %v6190_v6, 2 }
  0x1c   : > { %v598_v43 = vsel %vm9893_vm1, %v595_v29, %v597_v40  ;;  %v622_v44 = vpack.c.bf16 %v602_v41, %v602_v41  ;;  %v621_v45 = vpack.c.bf16 %v600_v42, %v600_v42  ;;  %v608_v50 = vsel %vm9893_vm1, %v6222_v28, %v607_v47 }
  0x1d   : > { %v620_v46 = vpack.c.bf16 %v598_v43, %v598_v43  ;;  %v670_v52 = vrot.slane %v6187_v5, 3  ;;  %v606_v53 = vsel %vm9893_vm1, %v603_v48, %v605_v49  ;;  %v604_v54 = vsel %vm9893_vm1, %v6222_v28, %v603_v48 }
  0x1e   : > { %v625_v55 = vpack.c.bf16 %v608_v50, %v608_v50  ;;  %v672_v56 = vrot.slane %v6198_v10, 3  ;;  %v624_v57 = vpack.c.bf16 %v606_v53, %v606_v53  ;;  %v623_v58 = vpack.c.bf16 %v604_v54, %v604_v54 }
  0x1f   : > { %v671_v59 = vsel %vm9850_vm2, %v6254_v51, %v670_v52  ;;  %v609_v60 = vrot.slane %v6219_v24, 2  ;;  %v448_v7 = vsel %vm447_vm3, %v6187_v5, 0.0  ;;  %v449_v8 = vsel %vm447_vm3, %v6198_v10, 0.0 }
  0x20   : > { %570 = vrot.lane.b32.xlu2 %v549_v25, %s6092_s21  ;;  %566 = vrot.lane.b32.xlu1 %v547_v26, %s6092_s21  ;;  %v694_v61 = vpack.c.bf16 %v671_v59, %v671_v59  ;;  %v673_v62 = vsel %vm9850_vm2, %v670_v52, %v672_v56  ;;  %v457_v11 = vsel %vm447_vm3, %v6184_v4, 0.0  ;;  %v450_v12 = vadd.f32 %v449_v8, %v448_v7 }
  0x21   : > { %562 = vrot.lane.b32.xlu0 %v545_v27, %s6092_s21  ;;  %v610_v3 = vsel %vm9893_vm1, %v607_v47, %v609_v60  ;;  %v458_v13 = vsel %vm447_vm3, %v6195_v9, 0.0  ;;  %v466_v14 = vsel %vm447_vm3, %v6180_v2, 0.0  ;;  %v467_v15 = vsel %vm447_vm3, %v6190_v6, 0.0 }
  0x22   : > { %v674_v16 = vrot.slane %v6184_v4, 3  ;;  %v459_v17 = vadd.f32 %v458_v13, %v457_v11  ;;  %v468_v18 = vadd.f32 %v467_v15, %v466_v14  ;;  %v475_v19 = vsel %vm447_vm3, %v6216_v23, 0.0 }
  0x23   : > { %v695_v20 = vpack.c.bf16 %v673_v62, %v673_v62  ;;  %v626_v21 = vpack.c.bf16 %v610_v3, %v610_v3  ;;  %v676_v22 = vrot.slane %v6195_v9, 3  ;;  %v451_v25 = vrot.slane %v450_v12, 4 }
  0x24   : > { %v678_v26 = vrot.slane %v6180_v2, 3  ;;  %v460_v27 = vrot.slane %v459_v17, 4  ;;  %v469_v29 = vrot.slane %v468_v18, 4  ;;  %v476_v30 = vsel %vm447_vm3, %v6219_v24, 0.0 }
  0x25   : > { %v452_v32 = vadd.f32 %v451_v25, %v450_v12  ;;  %v477_v33 = vadd.f32 %v476_v30, %v475_v19  ;;  %v485_v39 = vmul.f32 16.0, %v5830_v31  ;;  %v675_v41 = vsel %vm9850_vm2, %v6254_v51, %v674_v16 }
  0x26   : > { %v461_v34 = vadd.f32 %v460_v27, %v459_v17  ;;  %v679_v40 = vsel %vm9850_vm2, %v6254_v51, %v678_v26  ;;  %v682_v48 = vrot.slane %v6216_v23, 3  ;;  %v696_v53 = vpack.c.bf16 %v675_v41, %v675_v41 }
  0x27   : > { %v478_v38 = vrot.slane %v477_v33, 4  ;;  %v698_v52 = vpack.c.bf16 %v679_v40, %v679_v40  ;;  %v684_v54 = vrot.slane %v6219_v24, 3  ;;  %v680_v56 = vrot.slane %v6190_v6, 3 }
  0x28   : > { %635 = vrot.lane.b32.xlu2 %v619_v35, %s6093_s22  ;;  %574 = vrot.lane.b32.xlu1 %v551_v36, %s6092_s21  ;;  %v470_v35 = vadd.f32 %v469_v29, %v468_v18  ;;  %v677_v36 = vsel %vm9850_vm2, %v674_v16, %v676_v22  ;;  %v462_v42 = vrot.slane %v461_v34, 2  ;;  %vm489_vm4 = vweird.f32 %v5830_v31 }
  0x29   : > { %572 = vrot.lane.b32.xlu0 %v550_v37, %s6092_s21  ;;  %v453_v37 = vrot.slane %v452_v32, 2  ;;  %v697_v47 = vpack.c.bf16 %v677_v36, %v677_v36  ;;  %v685_v11 = vsel %vm9850_vm2, %v682_v48, %v684_v54  ;;  %v681_v12 = vsel %vm9850_vm2, %v678_v26, %v680_v56 }
  0x2a   : > { %v471_v43 = vrot.slane %v470_v35, 2  ;;  %v463_v49 = vadd.f32 %v462_v42, %v461_v34  ;;  %v701_v19 = vpack.c.bf16 %v685_v11, %v685_v11  ;;  %v6312_v22 = vrot.slane %v6091_v0, 4  ;;  %v426_v11 = vld [vmem:[%s9838_s2 + $0x18] sm:$0xff] }
  0x2b   : > { %v749_v25 = vrot.slane %v6184_v4, 4  ;;  %v745_v27 = vrot.slane %v6187_v5, 4  ;;  %v747_v29 = vrot.slane %v6198_v10, 4  ;;  %v753_v41 = vrot.slane %v6180_v2, 4 }
  0x2c   : > { %v472_v50 = vadd.f32 %v471_v43, %v470_v35  ;;  %9941 = vst [vmem:[#allocation9_spill] sm:$0xff] %v6312_v22  ;;  %v755_v42 = vrot.slane %v6190_v6, 4  ;;  %v751_v43 = vrot.slane %v6195_v9, 4  ;;  %v820_v54 = vrot.slane %v6187_v5, 5 }
  0x2d   : > { %v750_v34 = vsel %vm9849_vm7, %v6312_v22, %v749_v25  ;;  %v748_v35 = vsel %vm9849_vm7, %v745_v27, %v747_v29  ;;  %v746_v36 = vsel %vm9849_vm7, %v6312_v22, %v745_v27  ;;  %v759_v56 = vrot.slane %v6219_v24, 4 }
  0x2e   : > { %v769_v40 = vpack.c.bf16 %v746_v36, %v746_v36  ;;  %v6415_v36 = vrot.slane %v6091_v0, 6  ;;  %vm9897_vm1 = vcmask 124928   ;;  %vm9900_vm0 = vcmask 1046534  }
  0x30   : > { %641 = vrot.lane.b32.xlu2 %v622_v44, %s6093_s22  ;;  %639 = vrot.lane.b32.xlu1 %v621_v45, %s6093_s22  ;;  %v454_v44 = vadd.f32 %v453_v37, %v452_v32  ;;  %v479_v45 = vadd.f32 %v478_v38, %v477_v33  ;;  %v423_v33 = vld [vmem:[%s9838_s2] sm:$0xff]  ;;  %v6096_v37 = vmov 0.0|0.0   ;;  %v771_v38 = vpack.c.bf16 %v750_v34, %v750_v34 }
  0x31   : > { %637 = vrot.lane.b32.xlu0 %v620_v46, %s6093_s22  ;;  %v486_v46 = vsub.f32 1.0, %v485_v39  ;;  %505 = vst.msk [vmem:[#allocation2 + $0x20] sm:$0xf] %vm9903_vm10, %v6096_v37  ;;  %v770_v39 = vpack.c.bf16 %v748_v35, %v748_v35  ;;  %v496_v34 = vpack.c.bf16 %v6187_v5, %v6187_v5 }
  0x32   : > { %v480_v59 = vrot.slane %v479_v45, 2  ;;  %501 = vst.msk [vmem:[#allocation2] sm:$0xf] %vm9903_vm10, %v6096_v37 }
  0x33   : > { %v487_v60 = vmul.f32 %v5830_v31, %v486_v46  ;;  %503 = vst.msk [vmem:[#allocation2 + $0x10] sm:$0xf] %vm9903_vm10, %v6096_v37  ;;  %v498_v46 = vpack.c.bf16 %v6180_v2, %v6180_v2 }
  0x34   : > { %v481_v7 = vadd.f32 %v480_v59, %v479_v45  ;;  %507 = vst.msk [vmem:[#allocation2 + $0x30] sm:$0xf] %vm9903_vm10, %v6096_v37  ;;  %v756_v45 = vsel %vm9849_vm7, %v753_v41, %v755_v42 }
  0x35   : > { %v488_v8 = vadd.f32 %v5830_v31, %v487_v60  ;;  %506 = vst.msk [vmem:[#allocation2 + $0x28] sm:$0xf] %vm9903_vm10, %v498_v46 }
  0x36   : > { %v482_v14 = vrot.slane %v481_v7, 1  ;;  %1051 = vst.msk [vmem:[#allocation2 + $0x24] sm:$0xf] %vm9903_vm10, %v498_v46 }
  0x37   : > { %v6306_v15 = vsel %vm489_vm4, %v5830_v31, %v488_v8  ;;  %v822_v8 = vrot.slane %v6198_v10, 5  ;;  %9943 = vst [vmem:[#allocation11_spill] sm:$0xff] %v6415_v36  ;;  %vm9896_vm4 = vcmask 519552  }
  0x38   : > { %647 = vrot.lane.b32.xlu2 %v625_v55, %s6093_s22  ;;  %645 = vrot.lane.b32.xlu1 %v624_v57, %s6093_s22  ;;  %v455_v55 = vrot.slane %v454_v44, 1  ;;  %v464_v57 = vrot.slane %v463_v49, 1  ;;  %9940 = vst [vmem:[#allocation8_spill] sm:$0xff] %v6306_v15 }
  0x39   : > { %643 = vrot.lane.b32.xlu0 %v623_v58, %s6093_s22  ;;  %v473_v58 = vrot.slane %v472_v50, 1  ;;  %502 = vst.msk [vmem:[#allocation2 + $0x8] sm:$0xf] %vm9903_vm10, %v496_v34 }
  0x3a   : > { %v456_v62 = vadd.f32 %v455_v55, %v454_v44  ;;  %v465_v63 = vadd.f32 %v464_v57, %v463_v49  ;;  %v424_v44 = vld [vmem:[%s9838_s2 + $0x8] sm:$0xff]  ;;  %v774_v49 = vpack.c.bf16 %v756_v45, %v756_v45  ;;  %v757_v55 = vrot.slane %v6216_v23, 4  ;;  %v425_v57 = vld [vmem:[%s9838_s2 + $0x10] sm:$0xff]  ;;  %1047 = vst.msk [vmem:[#allocation2 + $0x4] sm:$0xf] %vm9903_vm10, %v496_v34 }
  0x3b   : > { %v474_v3 = vadd.f32 %v473_v58, %v472_v50  ;;  %v980_v34 = vrot.slane %v6190_v6, 7 }
  0x3c   : > { %v491_v16 = vmul.f32 %v6306_v15, %v456_v62  ;;  %v492_v17 = vmul.f32 %v6306_v15, %v465_v63  ;;  %v760_v59 = vsel %vm9849_vm7, %v757_v55, %v759_v56  ;;  %v758_v60 = vsel %vm9849_vm7, %v6312_v22, %v757_v55 }
  0x3d   : > { %v493_v18 = vmul.f32 %v6306_v15, %v474_v3  ;;  %v776_v62 = vpack.c.bf16 %v760_v59, %v760_v59  ;;  %v775_v63 = vpack.c.bf16 %v758_v60, %v758_v60  ;;  %v824_v3 = vrot.slane %v6184_v4, 5 }
  0x3e   : > { %v1103_v26 = vsel %vm1102_vm5, %v492_v17, %v491_v16 }
  0x3f   : > { %v1105_v31 = vsel %vm1104_vm6, %v493_v18, %v1103_v26 }
  0x40   : > { %712 = vrot.lane.b32.xlu2 %v695_v20, %s6095_s23  ;;  %710 = vrot.lane.b32.xlu1 %v694_v61, %s6095_s23  ;;  %v683_v61 = vsel %vm9850_vm2, %v6254_v51, %v682_v48  ;;  %v699_v20 = vpack.c.bf16 %v681_v12, %v681_v12  ;;  %v752_v48 = vsel %vm9849_vm7, %v749_v25, %v751_v43  ;;  %v427_v25 = vld [vmem:[%s9838_s2 + $0x20] sm:$0xff]  ;;  %vm9894_vm2 = vcmask 1044352  }
  0x41   : > { %649 = vrot.lane.b32.xlu0 %v626_v21, %s6093_s22  ;;  %v700_v13 = vpack.c.bf16 %v683_v61, %v683_v61  ;;  %v483_v21 = vadd.f32 %v482_v14, %v481_v7  ;;  %v826_v7 = vrot.slane %v6195_v9, 5  ;;  %v823_v14 = vsel %vm9847_vm11, %v820_v54, %v822_v8 }
  0x42   : > { %v845_v18 = vpack.c.bf16 %v823_v14, %v823_v14 }
  0x43   : > { %v494_v30 = vmul.f32 %v6306_v15, %v483_v21  ;;  %v832_v21 = vrot.slane %v6216_v23, 5 }
  0x45   : > { %v1107_v32 = vsel %vm1106_vm8, %v494_v30, %v1105_v31  ;;  %v497_v31 = vpack.c.bf16 %v6184_v4, %v6184_v4 }
  0x46   : > { %5597 = vmatpush.msk.msra.mxu0 %vm9849_vm7, %v1107_v32  ;;  %5747 = vmatpush.msk.msra.mxu2 %vm9849_vm7, %v1107_v32 }
  0x47   : > { %5598 = vmatmul.msk.f32.vlgmr.msra.gmra.mxu0 %vm9848_vm9, %v423_v33  ;;  %504 = vst.msk [vmem:[#allocation2 + $0x18] sm:$0xf] %vm9903_vm10, %v497_v31 }
  0x48   : > { %718 = vrot.lane.b32.xlu2 %v698_v52, %s6095_s23  ;;  %716 = vrot.lane.b32.xlu1 %v697_v47, %s6095_s23  ;;  %v754_v47 = vsel %vm9849_vm7, %v6312_v22, %v753_v41  ;;  %v772_v52 = vpack.c.bf16 %v752_v48, %v752_v48  ;;  %1049 = vst.msk [vmem:[#allocation2 + $0x14] sm:$0xf] %vm9903_vm10, %v497_v31  ;;  %v428_v41 = vld [vmem:[%s9838_s2 + $0x28] sm:$0xff]  ;;  %vm959_vm7 = vcmask 913152  }
  0x49   : > { %714 = vrot.lane.b32.xlu0 %v696_v53, %s6095_s23  ;;  %v773_v50 = vpack.c.bf16 %v754_v47, %v754_v47  ;;  %v6362_v53 = vrot.slane %v6091_v0, 5 }
  0x4b   : > { %9942 = vst [vmem:[#allocation10_spill] sm:$0xff] %v6362_v53  ;;  %v821_v58 = vsel %vm9847_vm11, %v6362_v53, %v820_v54  ;;  %v825_v12 = vsel %vm9847_vm11, %v6362_v53, %v824_v3  ;;  %v833_v27 = vsel %vm9847_vm11, %v6362_v53, %v832_v21  ;;  %v903_v54 = vrot.slane %v6180_v2, 6 }
  0x4c   : > { %v844_v61 = vpack.c.bf16 %v821_v58, %v821_v58  ;;  %v846_v16 = vpack.c.bf16 %v825_v12, %v825_v12  ;;  %v850_v33 = vpack.c.bf16 %v833_v27, %v833_v27 }
  0x4d   : > { %v904_v56 = vsel %vm893_vm13, %v6415_v36, %v903_v54 }
  0x4e   : > { %v923_v60 = vpack.c.bf16 %v904_v56, %v904_v56 }
  0x4f   : > { %5599 = vmatmul.msk.f32.gmra.mxu0 %vm9848_vm9, %v424_v44  ;;  %v499_v44 = vpack.c.bf16 %v6216_v23, %v6216_v23 }
  0x50   : > { %724 = vrot.lane.b32.xlu2 %v701_v19, %s6095_s23  ;;  %722 = vrot.lane.b32.xlu1 %v700_v13, %s6095_s23  ;;  %v827_v13 = vsel %vm9847_vm11, %v824_v3, %v826_v7  ;;  %v828_v19 = vrot.slane %v6180_v2, 5  ;;  %v905_v3 = vrot.slane %v6190_v6, 6  ;;  %v9851_v7 = vmov 0  }
  0x51   : > { %720 = vrot.lane.b32.xlu0 %v699_v20, %s6095_s23  ;;  %v847_v17 = vpack.c.bf16 %v827_v13, %v827_v13  ;;  %v830_v20 = vrot.slane %v6190_v6, 5  ;;  %508 = vst.msk [vmem:[#allocation2 + $0x38] sm:$0xf] %vm9903_vm10, %v499_v44  ;;  %5768 = vset.pattern.permute.xlu2 %v9851_v7 }
  0x52   : > { %v829_v30 = vsel %vm9847_vm11, %v6362_v53, %v828_v19  ;;  %1053 = vst.msk [vmem:[#allocation2 + $0x34] sm:$0xf] %vm9903_vm10, %v499_v44  ;;  %5770 = vset.pattern.permute.xlu1 %v9851_v7  ;;  %5769 = vset.pattern.permute.xlu0 %v9851_v7  ;;  %v906_v13 = vsel %vm893_vm13, %v903_v54, %v905_v3  ;;  %v429_v44 = vld [vmem:[%s9838_s2 + $0x30] sm:$0x3f]  ;;  %v435_v3 = vld [vmem:[%s9839_s3 + $0x28] sm:$0xff] }
  0x53   : > { %v831_v26 = vsel %vm9847_vm11, %v828_v19, %v830_v20  ;;  %v848_v35 = vpack.c.bf16 %v829_v30, %v829_v30  ;;  %v924_v19 = vpack.c.bf16 %v906_v13, %v906_v13  ;;  %v6466_v20 = vrot.slane %v6091_v0, 7  ;;  %5604 = vmatmul.msk.f32.vlgmr.msra.gmra.mxu2 %vm9848_vm9, %v429_v44 }
  0x54   : > { %v849_v32 = vpack.c.bf16 %v831_v26, %v831_v26  ;;  %v972_v26 = vrot.slane %v6198_v10, 7 }
  0x55   : > { %9944 = vst [vmem:[#allocation12_spill] sm:$0xff] %v6466_v20 }
  0x57   : > { %5600 = vmatmul.msk.f32.gmra.mxu0 %vm9848_vm9, %v425_v57 }
  0x58   : > { %789 = vrot.lane.b32.xlu2 %v771_v38, %s6097_s26  ;;  %787 = vrot.lane.b32.xlu1 %v770_v39, %s6097_s26  ;;  %v895_v38 = vrot.slane %v6187_v5, 6  ;;  %v897_v39 = vrot.slane %v6198_v10, 6 }
  0x59   : > { %785 = vrot.lane.b32.xlu0 %v769_v40, %s6097_s26  ;;  %v834_v40 = vrot.slane %v6219_v24, 5 }
  0x5a   : > { %v896_v42 = vsel %vm893_vm13, %v6415_v36, %v895_v38  ;;  %v898_v43 = vsel %vm893_vm13, %v895_v38, %v897_v39 }
  0x5b   : > { %v835_v46 = vsel %vm9847_vm11, %v832_v21, %v834_v40  ;;  %v919_v47 = vpack.c.bf16 %v896_v42, %v896_v42  ;;  %v920_v48 = vpack.c.bf16 %v898_v43, %v898_v43  ;;  %v974_v21 = vrot.slane %v6184_v4, 7 }
  0x5c   : > { %vm809_vm11 = vcmask 650752  }
  0x5d   : > { %v975_v27 = vsel %vm9904_vm15, %v6466_v20, %v974_v21 }
  0x5e   : > { %v996_v10 = vpack.c.bf16 %v975_v27, %v975_v27 }
  0x5f   : > { %5601 = vmatmul.msk.f32.gmra.mxu0 %vm9848_vm9, %v426_v11 }
  0x60   : > { %795 = vrot.lane.b32.xlu2 %v774_v49, %s6097_s26  ;;  %793 = vrot.lane.b32.xlu1 %v773_v50, %s6097_s26  ;;  %v851_v49 = vpack.c.bf16 %v835_v46, %v835_v46  ;;  %v899_v50 = vrot.slane %v6184_v4, 6  ;;  %v984_v46 = vrot.slane %v6219_v24, 7 }
  0x61   : > { %791 = vrot.lane.b32.xlu0 %v772_v52, %s6097_s26  ;;  %v901_v52 = vrot.slane %v6195_v9, 6 }
  0x62   : > { %v900_v58 = vsel %vm893_vm13, %v6415_v36, %v899_v50 }
  0x63   : > { %v902_v55 = vsel %vm893_vm13, %v899_v50, %v901_v52 }
  0x64   : > { %v922_v59 = vpack.c.bf16 %v902_v55, %v902_v55 }
  0x67   : > { %5602 = vmatmul.msk.f32.gmra.mxu0 %vm9848_vm9, %v427_v25  ;;  %v970_v25 = vrot.slane %v6187_v5, 7 }
  0x68   : > { %860 = vrot.lane.b32.xlu2 %v844_v61, %s6098_s11  ;;  %799 = vrot.lane.b32.xlu1 %v776_v62, %s6097_s26  ;;  %v921_v61 = vpack.c.bf16 %v900_v58, %v900_v58  ;;  %v907_v62 = vrot.slane %v6216_v23, 6  ;;  %v433_v58 = vld [vmem:[%s9839_s3 + $0x18] sm:$0xff] }
  0x69   : > { %797 = vrot.lane.b32.xlu0 %v775_v63, %s6097_s26  ;;  %v909_v63 = vrot.slane %v6219_v24, 6  ;;  %v971_v4 = vsel %vm9904_vm15, %v6466_v20, %v970_v25  ;;  %v430_v24 = vld [vmem:[%s9839_s3] sm:$0xff] }
  0x6a   : > { %v908_v12 = vsel %vm893_vm13, %v6415_v36, %v907_v62  ;;  %v6793_v36 = vstv %s422_s7 }
  0x6b   : > { %v910_v8 = vsel %vm893_vm13, %v907_v62, %v909_v63 }
  0x6f   : > { %5603 = vmatmul.msk.f32.gmra.mxu0 %vm9848_vm9, %v428_v41  ;;  %vm884_vm9 = vcmask 781952  }
  0x70   : > { %866 = vrot.lane.b32.xlu2 %v847_v17, %s6098_s11  ;;  %864 = vrot.lane.b32.xlu1 %v846_v16, %s6098_s11  ;;  %v926_v17 = vpack.c.bf16 %v910_v8, %v910_v8  ;;  %v434_v8 = vld [vmem:[%s9839_s3 + $0x20] sm:$0xff] }
  0x71   : > { %862 = vrot.lane.b32.xlu0 %v845_v18, %s6098_s11  ;;  %v925_v18 = vpack.c.bf16 %v908_v12, %v908_v12 }
  0x72   : > { %v569_v29 = vpop.permute.xlu2 %568 }
  0x73   : > { %589 = vst.msk [vmem:[#allocation2 + $0x20] sm:$0xf] %vm584_vm12, %v569_v29  ;;  %v973_v29 = vsel %vm9904_vm15, %v970_v25, %v972_v26 }
  0x74   : > { %v995_v31 = vpack.c.bf16 %v973_v29, %v973_v29 }
  0x78   : > { %872 = vrot.lane.b32.xlu2 %v850_v33, %s6098_s11  ;;  %870 = vrot.lane.b32.xlu1 %v849_v32, %s6098_s11  ;;  %v994_v32 = vpack.c.bf16 %v971_v4, %v971_v4  ;;  %v978_v33 = vrot.slane %v6180_v2, 7 }
  0x79   : > { %868 = vrot.lane.b32.xlu0 %v848_v35, %s6098_s11  ;;  %v976_v35 = vrot.slane %v6195_v9, 7 }
  0x7a   : > { %v571_v45 = vpop.permute.xlu2 %570  ;;  %v981_v38 = vsel %vm9904_vm15, %v978_v33, %v980_v34  ;;  %v979_v40 = vsel %vm9904_vm15, %v6466_v20, %v978_v33 }
  0x7b   : > { %590 = vst.msk [vmem:[#allocation2 + $0x28] sm:$0xf] %vm584_vm12, %v571_v45  ;;  %v977_v2 = vsel %vm9904_vm15, %v974_v21, %v976_v35  ;;  %v999_v9 = vpack.c.bf16 %v981_v38, %v981_v38  ;;  %v998_v42 = vpack.c.bf16 %v979_v40, %v979_v40  ;;  %v982_v45 = vrot.slane %v6216_v23, 7 }
  0x7c   : > { %v997_v43 = vpack.c.bf16 %v977_v2, %v977_v2 }
  0x80   : > { %937 = vrot.lane.b32.xlu2 %v920_v48, %s6099_s19  ;;  %935 = vrot.lane.b32.xlu1 %v919_v47, %s6099_s19  ;;  %v985_v48 = vsel %vm9904_vm15, %v982_v45, %v984_v46 }
  0x81   : > { %874 = vrot.lane.b32.xlu0 %v851_v49, %s6098_s11  ;;  %v983_v49 = vsel %vm9904_vm15, %v6466_v20, %v982_v45  ;;  %v1001_v23 = vpack.c.bf16 %v985_v48, %v985_v48 }
  0x82   : > { %v636_v57 = vpop.permute.xlu2 %635  ;;  %v1000_v54 = vpack.c.bf16 %v983_v49, %v983_v49 }
  0x88   : > { %943 = vrot.lane.b32.xlu2 %v923_v60, %s6099_s19  ;;  %941 = vrot.lane.b32.xlu1 %v922_v59, %s6099_s19  ;;  %v432_v59 = vld [vmem:[%s9839_s3 + $0x10] sm:$0xff]  ;;  %v431_v60 = vld [vmem:[%s9839_s3 + $0x8] sm:$0xff] }
  0x89   : > { %939 = vrot.lane.b32.xlu0 %v921_v61, %s6099_s19 }
  0x8a   : > { %v642_v11 = vpop.permute.xlu2 %641  ;;  %v565_v14 = vpop.permute.xlu1 %564 }
  0x8b   : > { %v561_v16 = vpop.permute.xlu0 %560  ;;  %587 = vst.msk [vmem:[#allocation2 + $0x10] sm:$0xf] %vm584_vm12, %v565_v14 }
  0x8c   : > { %585 = vst.msk [vmem:[#allocation2] sm:$0xf] %vm584_vm12, %v561_v16 }
  0x8d   : > { %660 = vst.msk [vmem:[#allocation2] sm:$0xf] %vm659_vm14, %v636_v57 }
  0x90   : > { %949 = vrot.lane.b32.xlu2 %v926_v17, %s6099_s19  ;;  %947 = vrot.lane.b32.xlu1 %v925_v18, %s6099_s19 }
  0x91   : > { %945 = vrot.lane.b32.xlu0 %v924_v19, %s6099_s19 }
  0x92   : > { %v648_v0 = vpop.permute.xlu2 %647  ;;  %v567_v5 = vpop.permute.xlu1 %566 }
  0x93   : > { %v563_v30 = vpop.permute.xlu0 %562  ;;  %588 = vst.msk [vmem:[#allocation2 + $0x18] sm:$0xf] %vm584_vm12, %v567_v5 }
  0x94   : > { %586 = vst.msk [vmem:[#allocation2 + $0x8] sm:$0xf] %vm584_vm12, %v563_v30  ;;  %v1171_v30 = vlaneseq }
  0x95   : > { %663 = vst.msk [vmem:[#allocation2 + $0x18] sm:$0xf] %vm659_vm14, %v642_v11  ;;  %v436_v11 = vld [vmem:[%s9839_s3 + $0x30] sm:$0x3f] }
  0x98   : > { %1014 = vrot.lane.b32.xlu2 %v996_v10, %s6101_s24  ;;  %1012 = vrot.lane.b32.xlu1 %v995_v31, %s6101_s24  ;;  %v6554_v10 = vshrl.u32 %v1171_v30, 7 }
  0x99   : > { %1010 = vrot.lane.b32.xlu0 %v994_v32, %s6101_s24 }
  0x9a   : > { %v713_v39 = vpop.permute.xlu2 %712  ;;  %v575_v6 = vpop.permute.xlu1 %574  ;;  %9945 = vst [vmem:[#allocation13_spill] sm:$0xff] %v6554_v10  ;;  %v6559_v31 = vadd.s32 8, %v6554_v10 }
  0x9b   : > { %v573_v41 = vpop.permute.xlu0 %572  ;;  %592 = vst.msk [vmem:[#allocation2 + $0x38] sm:$0xf] %vm584_vm12, %v575_v6 }
  0x9c   : > { %591 = vst.msk [vmem:[#allocation2 + $0x30] sm:$0xf] %vm584_vm12, %v573_v41 }
  0x9d   : > { %666 = vst.msk [vmem:[#allocation2 + $0x30] sm:$0xf] %vm659_vm14, %v648_v0 }
  0x9e   : > { %9946 = vst [vmem:[#allocation14_spill] sm:$0xff] %v6559_v31 }
  0xa0   : > { %1020 = vrot.lane.b32.xlu2 %v999_v9, %s6101_s24  ;;  %1018 = vrot.lane.b32.xlu1 %v998_v42, %s6101_s24 }
  0xa1   : > { %1016 = vrot.lane.b32.xlu0 %v997_v43, %s6101_s24 }
  0xa2   : > { %v719_v47 = vpop.permute.xlu2 %718  ;;  %v640_v50 = vpop.permute.xlu1 %639 }
  0xa3   : > { %v638_v52 = vpop.permute.xlu0 %637  ;;  %662 = vst.msk [vmem:[#allocation2 + $0x10] sm:$0xf] %vm659_vm14, %v640_v50 }
  0xa4   : > { %661 = vst.msk [vmem:[#allocation2 + $0x8] sm:$0xf] %vm659_vm14, %v638_v52 }
  0xa5   : > { %736 = vst.msk [vmem:[#allocation2 + $0x8] sm:$0xf] %vm9896_vm4, %v713_v39 }
  0xa8   : > { %1065 = vperm.xlu2 %5768, %v430_v24   ;;  %1024 = vrot.lane.b32.xlu1 %v1001_v23, %s6101_s24 }
  0xa9   : > { %1022 = vrot.lane.b32.xlu0 %v1000_v54, %s6101_s24 }
  0xaa   : > { %v725_v55 = vpop.permute.xlu2 %724  ;;  %v646_v56 = vpop.permute.xlu1 %645 }
  0xab   : > { %v644_v57 = vpop.permute.xlu0 %643  ;;  %665 = vst.msk [vmem:[#allocation2 + $0x28] sm:$0xf] %vm659_vm14, %v646_v56 }
  0xac   : > { %664 = vst.msk [vmem:[#allocation2 + $0x20] sm:$0xf] %vm659_vm14, %v644_v57 }
  0xad   : > { %739 = vst.msk [vmem:[#allocation2 + $0x20] sm:$0xf] %vm9896_vm4, %v719_v47 }
  0xb0   : > { %1080 = vperm.xlu2 %5768, %v433_v58   ;;  %1075 = vperm.xlu1 %5770, %v432_v59  }
  0xb1   : > { %1070 = vperm.xlu0 %5769, %v431_v60   ;;  %v5655_v60 = vld [vmem:[%s6174_s20 + $0x40] sm:$0xff] }
  0xb2   : > { %v790_v61 = vpop.permute.xlu2 %789  ;;  %v711_v62 = vpop.permute.xlu1 %710 }
  0xb3   : > { %v650_v63 = vpop.permute.xlu0 %649  ;;  %735 = vst.msk [vmem:[#allocation2] sm:$0xf] %vm9896_vm4, %v711_v62 }
  0xb4   : > { %667 = vst.msk [vmem:[#allocation2 + $0x38] sm:$0xf] %vm659_vm14, %v650_v63 }
  0xb5   : > { %742 = vst.msk [vmem:[#allocation2 + $0x38] sm:$0xf] %vm9896_vm4, %v725_v55 }
  0xb8   : > { %1090 = vperm.xlu2 %5768, %v435_v3   ;;  %1085 = vperm.xlu1 %5770, %v434_v8  }
  0xb9   : > { %1095 = vperm.xlu0 %5769, %v436_v11  }
  0xba   : > { %v796_v12 = vpop.permute.xlu2 %795  ;;  %v717_v13 = vpop.permute.xlu1 %716 }
  0xbb   : > { %v715_v14 = vpop.permute.xlu0 %714  ;;  %738 = vst.msk [vmem:[#allocation2 + $0x18] sm:$0xf] %vm9896_vm4, %v717_v13 }
  0xbc   : > { %737 = vst.msk [vmem:[#allocation2 + $0x10] sm:$0xf] %vm9896_vm4, %v715_v14 }
  0xbd   : > { %812 = vst.msk [vmem:[#allocation2 + $0x10] sm:$0xf] %vm809_vm11, %v790_v61  ;;  %v6604_v61 = vpack.c.bf16 %v5655_v60, %v5655_v60 }
  0xc0   : > { %5771 = vset.pattern.permute.xlu1 %v6554_v10  ;;  %5772 = vset.pattern.permute.xlu2 %v6559_v31 }
  0xc1   : > { %5773 = vset.pattern.permute.xlu0 %v6554_v10 }
  0xc2   : > { %v861_v16 = vpop.permute.xlu2 %860  ;;  %v723_v17 = vpop.permute.xlu1 %722 }
  0xc3   : > { %v721_v18 = vpop.permute.xlu0 %720  ;;  %741 = vst.msk [vmem:[#allocation2 + $0x30] sm:$0xf] %vm9896_vm4, %v723_v17 }
  0xc4   : > { %740 = vst.msk [vmem:[#allocation2 + $0x28] sm:$0xf] %vm9896_vm4, %v721_v18  ;;  %v1149_v40 = vpop.f32.mrf.mxu0 }
  0xc5   : > { %815 = vst.msk [vmem:[#allocation2 + $0x28] sm:$0xf] %vm809_vm11, %v796_v12  ;;  %v5657_v12 = vld [vmem:[%s6174_s20 + $0x50] sm:$0xff] }
  0xc6   : > { %v6619_v14 = vpack.c.bf16 %v5657_v12, %v5657_v12 }
  0xca   : > { %v867_v19 = vpop.permute.xlu2 %866  ;;  %v788_v21 = vpop.permute.xlu1 %787 }
  0xcb   : > { %v786_v25 = vpop.permute.xlu0 %785  ;;  %811 = vst.msk [vmem:[#allocation2 + $0x8] sm:$0xf] %vm809_vm11, %v788_v21  ;;  %v5661_v21 = vld [vmem:[%s6174_s20 + $0x70] sm:$0xff] }
  0xcc   : > { %810 = vst.msk [vmem:[#allocation2] sm:$0xf] %vm809_vm11, %v786_v25  ;;  %v6572_v9 = vpop.f32.mrf.mxu0  ;;  %v6634_v25 = vpack.c.bf16 %v5661_v21, %v5661_v21 }
  0xcd   : > { %885 = vst.msk [vmem:[#allocation2] sm:$0xf] %vm884_vm9, %v861_v16 }
  0xd2   : > { %v873_v26 = vpop.permute.xlu2 %872  ;;  %v794_v27 = vpop.permute.xlu1 %793 }
  0xd3   : > { %v792_v0 = vpop.permute.xlu0 %791  ;;  %814 = vst.msk [vmem:[#allocation2 + $0x20] sm:$0xf] %vm809_vm11, %v794_v27 }
  0xd4   : > { %813 = vst.msk [vmem:[#allocation2 + $0x18] sm:$0xf] %vm809_vm11, %v792_v0  ;;  %v6577_v45 = vpop.f32.mrf.mxu0 }
  0xd5   : > { %888 = vst.msk [vmem:[#allocation2 + $0x18] sm:$0xf] %vm884_vm9, %v867_v19 }
  0xd6   : > { %v1167_v12 = vpop.f32.mrf.mxu2 }
  0xda   : > { %v938_v29 = vpop.permute.xlu2 %937  ;;  %v800_v4 = vpop.permute.xlu1 %799 }
  0xdb   : > { %v798_v5 = vpop.permute.xlu0 %797  ;;  %817 = vst.msk [vmem:[#allocation2 + $0x38] sm:$0xf] %vm809_vm11, %v800_v4 }
  0xdc   : > { %816 = vst.msk [vmem:[#allocation2 + $0x30] sm:$0xf] %vm809_vm11, %v798_v5  ;;  %v1158_v24 = vpop.f32.mrf.mxu0 }
  0xdd   : > { %891 = vst.msk [vmem:[#allocation2 + $0x30] sm:$0xf] %vm884_vm9, %v873_v26 }
  0xe2   : > { %v944_v32 = vpop.permute.xlu2 %943  ;;  %v865_v33 = vpop.permute.xlu1 %864 }
  0xe3   : > { %v863_v34 = vpop.permute.xlu0 %862  ;;  %887 = vst.msk [vmem:[#allocation2 + $0x10] sm:$0xf] %vm884_vm9, %v865_v33 }
  0xe4   : > { %886 = vst.msk [vmem:[#allocation2 + $0x8] sm:$0xf] %vm884_vm9, %v863_v34 }
  0xe5   : > { %961 = vst.msk [vmem:[#allocation2 + $0x8] sm:$0xf] %vm959_vm7, %v938_v29  ;;  %v1161_v29 = vpop.f32.mrf.mxu0 }
  0xea   : > { %v950_v35 = vpop.permute.xlu2 %949  ;;  %v871_v38 = vpop.permute.xlu1 %870 }
  0xeb   : > { %v869_v39 = vpop.permute.xlu0 %868  ;;  %890 = vst.msk [vmem:[#allocation2 + $0x28] sm:$0xf] %vm884_vm9, %v871_v38 }
  0xec   : > { %889 = vst.msk [vmem:[#allocation2 + $0x20] sm:$0xf] %vm884_vm9, %v869_v39 }
  0xed   : > { %964 = vst.msk [vmem:[#allocation2 + $0x20] sm:$0xf] %vm959_vm7, %v944_v32 }
  0xf2   : > { %v1015_v2 = vpop.permute.xlu2 %1014  ;;  %v936_v6 = vpop.permute.xlu1 %935 }
  0xf3   : > { %v875_v41 = vpop.permute.xlu0 %874  ;;  %960 = vst.msk [vmem:[#allocation2] sm:$0xf] %vm959_vm7, %v936_v6 }
  0xf4   : > { %892 = vst.msk [vmem:[#allocation2 + $0x38] sm:$0xf] %vm884_vm9, %v875_v41 }
  0xf5   : > { %967 = vst.msk [vmem:[#allocation2 + $0x38] sm:$0xf] %vm959_vm7, %v950_v35 }
  0xfa   : > { %v1021_v42 = vpop.permute.xlu2 %1020  ;;  %v942_v43 = vpop.permute.xlu1 %941 }
  0xfb   : > { %v940_v44 = vpop.permute.xlu0 %939  ;;  %963 = vst.msk [vmem:[#allocation2 + $0x18] sm:$0xf] %vm959_vm7, %v942_v43 }
  0xfc   : > { %962 = vst.msk [vmem:[#allocation2 + $0x10] sm:$0xf] %vm959_vm7, %v940_v44 }
  0xfd   : > { %1037 = vst.msk [vmem:[#allocation2 + $0x10] sm:$0xf] %vm9894_vm2, %v1015_v2 }
 0x102   : > { %v6579_v46 = vpop.permute.xlu2 %1065  ;;  %v948_v47 = vpop.permute.xlu1 %947 }
 0x103   : > { %9947 = vst [vmem:[#allocation15_spill] sm:$0xff] %v6579_v46  ;;  %v6582_v48 = vadd.f32 %v1149_v40, %v6579_v46  ;;  %v946_v49 = vpop.permute.xlu0 %945 }
 0x104   : > { %966 = vst.msk [vmem:[#allocation2 + $0x30] sm:$0xf] %vm959_vm7, %v948_v47  ;;  %v6589_v23 = vld [vmem:[#allocation2 + $0x10] sm:$0xf]  ;;  %v1164_v47 = vpop.f32.mrf.mxu0 }
 0x105   : > { %965 = vst.msk [vmem:[#allocation2 + $0x28] sm:$0xf] %vm959_vm7, %v946_v49  ;;  %v1183_v50 = vperm.slane %v6582_v48, 1  ;;  %v1170_v52 = vperm.slane %v6582_v48, 0  ;;  %v1235_v58 = vperm.slane %v6582_v48, 5  ;;  %v1261_v59 = vperm.slane %v6582_v48, 7 }
 0x106   : > { %1040 = vst.msk [vmem:[#allocation2 + $0x28] sm:$0xf] %vm9894_vm2, %v1021_v42  ;;  %v1248_v8 = vperm.slane %v6582_v48, 6  ;;  %v1222_v18 = vperm.slane %v6582_v48, 4  ;;  %v1209_v2 = vperm.slane %v6582_v48, 3 }
 0x107   : > { %1188 = vperm.xlu0 %5773, %v1183_v50   ;;  %1181 = vperm.xlu2 %5772, %v1170_v52   ;;  %3050 = vst.msk [vmem:[#allocation2 + $0x10] sm:$0xf] %vm9903_vm10, %v6096_v37 }
 0x108   : > { %1175 = vperm.xlu1 %5771, %v1170_v52  }
 0x10a   : > { %v6593_v54 = vpop.permute.xlu2 %1080  ;;  %v1013_v55 = vpop.permute.xlu1 %1012 }
 0x10b   : > { %9948 = vst [vmem:[#allocation16_spill] sm:$0xff] %v6593_v54  ;;  %v6596_v56 = vadd.f32 %v1158_v24, %v6593_v54  ;;  %v1011_v57 = vpop.permute.xlu0 %1010 }
 0x10c   : > { %1036 = vst.msk [vmem:[#allocation2 + $0x8] sm:$0xf] %vm9894_vm2, %v1013_v55 }
 0x10d   : > { %1289 = vst [vmem:[#allocation1] sm:$0xff] %v6596_v56  ;;  %v2436_v33 = vperm.slane %v6596_v56, 0 }
 0x10e   : > { %1035 = vst.msk [vmem:[#allocation2] sm:$0xf] %vm9894_vm2, %v1011_v57 }
 0x10f   : > { %1240 = vperm.xlu0 %5773, %v1235_v58   ;;  %1272 = vperm.xlu2 %5772, %v1261_v59  }
 0x110   : > { %1266 = vperm.xlu1 %5771, %v1261_v59  }
 0x112   : > { %v1019_v63 = vpop.permute.xlu1 %1018 }
 0x113   : > { %v6606_v62 = vld [vmem:[#allocation2 + $0x4] sm:$0xf0]  ;;  %v1017_v3 = vpop.permute.xlu0 %1016  ;;  %1039 = vst.msk [vmem:[#allocation2 + $0x20] sm:$0xf] %vm9894_vm2, %v1019_v63 }
 0x114   : > { %3049 = vst.msk [vmem:[#allocation2 + $0x8] sm:$0xf] %vm9903_vm10, %v6604_v61  ;;  %v6649_v5 = vld [vmem:[#allocation1 + $0x3] ss:$9 sm:$0xff]  ;;  %v6657_v35 = vld [vmem:[#allocation1 + $0x5] ss:$9 sm:$0xff] }
 0x115   : > { %v6611_v11 = vld [vmem:[#allocation2] sm:$0xf]  ;;  %1038 = vst.msk [vmem:[#allocation2 + $0x18] sm:$0xf] %vm9894_vm2, %v1017_v3 }
 0x116   : > { %3048 = vst.msk [vmem:[#allocation2] sm:$0xf] %vm9903_vm10, %v6096_v37  ;;  %v6651_v30 = vld [vmem:[#allocation1 + $0x4] ss:$9 sm:$0xff]  ;;  %v6659_v38 = vld [vmem:[#allocation1 + $0x6] ss:$9 sm:$0xff] }
 0x117   : > { %5776 = vset.pattern.permute.xlu0 %v6559_v31  ;;  %1259 = vperm.xlu2 %5772, %v1248_v8   ;;  %v6661_v39 = vld [vmem:[#allocation1 + $0x7] ss:$9 sm:$0xff] }
 0x118   : > { %1253 = vperm.xlu1 %5771, %v1248_v8  }
 0x11a   : > { %v1025_v13 = vpop.permute.xlu1 %1024  ;;  %v6622_v17 = vld [vmem:[#allocation2 + $0x20] sm:$0xf] }
 0x11b   : > { %1042 = vst.msk [vmem:[#allocation2 + $0x38] sm:$0xf] %vm9894_vm2, %v1025_v13  ;;  %v1023_v16 = vpop.permute.xlu0 %1022  ;;  %v2449_v13 = vperm.slane %v6596_v56, 1 }
 0x11c   : > { %1041 = vst.msk [vmem:[#allocation2 + $0x30] sm:$0xf] %vm9894_vm2, %v1023_v16  ;;  %v6628_v19 = vld [vmem:[#allocation2 + $0x14] sm:$0xf0] }
 0x11d   : > { %3052 = vst.msk [vmem:[#allocation2 + $0x20] sm:$0xf] %vm9903_vm10, %v6096_v37 }
 0x11e   : > { %3051 = vst.msk [vmem:[#allocation2 + $0x18] sm:$0xf] %vm9903_vm10, %v6619_v14 }
 0x11f   : > { %1233 = vperm.xlu0 %5776, %v1222_v18   ;;  %5775 = vset.pattern.permute.xlu2 %v6554_v10 }
 0x120   : > { %5774 = vset.pattern.permute.xlu1 %v6559_v31 }
 0x122   : > { %v6637_v26 = vld [vmem:[#allocation2 + $0x34] sm:$0xf0]  ;;  %v6639_v27 = vpop.permute.xlu1 %1075 }
 0x123   : > { %9949 = vst [vmem:[#allocation17_spill] sm:$0xff] %v6639_v27  ;;  %v6643_v0 = vld [vmem:[#allocation2 + $0x30] sm:$0xf]  ;;  %v6655_v34 = vpop.permute.xlu0 %1070  ;;  %v6683_v44 = vadd.f32 %v6577_v45, %v6639_v27 }
 0x124   : > { %3055 = vst.msk [vmem:[#allocation2 + $0x38] sm:$0xf] %vm9903_vm10, %v6634_v25 }
 0x125   : > { %3054 = vst.msk [vmem:[#allocation2 + $0x30] sm:$0xf] %vm9903_vm10, %v6096_v37  ;;  %v6668_v37 = vadd.f32 %v6572_v9, %v6655_v34  ;;  %v6687_v9 = vpop.permute.xlu2 %1090  ;;  %v9852_v49 = vperm.slane %v6683_v44, 3  ;;  %v2410_v54 = vperm.slane %v6683_v44, 6 }
 0x126   : > { %9951 = vst [vmem:[#allocation19_spill] sm:$0xff] %v6655_v34  ;;  %v1165_v52 = vadd.f32 %v1164_v47, %v6687_v9  ;;  %v2922_v47 = vld [vmem:[%s6730_s16] sm:$0xff] }
 0x127   : > { %1194 = vperm.xlu0 %5776, %v1183_v50   ;;  %1227 = vperm.xlu2 %5775, %v1222_v18   ;;  %v9853_v40 = vperm.slane %v6668_v37, 5  ;;  %9952 = vst [vmem:[#allocation20_spill] sm:$0xff] %v6687_v9  ;;  %v1196_v50 = vperm.slane %v6582_v48, 2 }
 0x128   : > { %1246 = vperm.xlu1 %5774, %v1235_v58   ;;  %v1274_v58 = vperm.slane %v6668_v37, 0 }
 0x12a   : > { %v6647_v4 = vpop.permute.xlu1 %1085 }
 0x12b   : > { %9950 = vst [vmem:[#allocation18_spill] sm:$0xff] %v6647_v4  ;;  %v1162_v32 = vadd.f32 %v1161_v29, %v6647_v4  ;;  %v6714_v8 = vpop.permute.xlu0 %1095 }
 0x12c   : > { %9957 = vst [vmem:[#allocation25_spill] sm:$0xff] %v6714_v8  ;;  %v1168_v16 = vadd.f32 %v1167_v12, %v6714_v8  ;;  %v9863_v8 = vperm.slane %v6651_v30, 0 }
 0x12d   : > { %1300 = vst [vmem:[#allocation1] sm:$0xff] %v1162_v32 }
 0x12f   : > { %2447 = vperm.xlu0 %5776, %v2436_v33   ;;  %5778 = vset.pattern.permute.xlu2 %v6559_v31 }
 0x130   : > { %5777 = vset.pattern.permute.xlu1 %v6554_v10 }
 0x134   : > { %v6673_v6 = vld [vmem:[#allocation1] ss:$9 sm:$0xff]  ;;  %v6677_v42 = vld [vmem:[#allocation1 + $0x2] ss:$9 sm:$0xff] }
 0x135   : > { %v6675_v41 = vld [vmem:[#allocation1 + $0x1] ss:$9 sm:$0xff]  ;;  %v6679_v43 = vld [vmem:[#allocation1 + $0x3] ss:$9 sm:$0xff]  ;;  %v1312_v15 = vperm.slane %v6673_v6, 0  ;;  %v9964_v6 = vperm.slane %v6651_v30, 0 }
 0x136   : > { %1901 = vst [vmem:[#allocation1] sm:$0xff] %v1162_v32  ;;  %v9855_v32 = vperm.slane %v6668_v37, 6 }
 0x137   : > { %1846 = vperm.xlu0 %5776, %v9853_v40   ;;  %1220 = vperm.xlu2 %5778, %v1209_v2  }
 0x138   : > { %1214 = vperm.xlu1 %5777, %v1209_v2   ;;  %v1874_v2 = vperm.slane %v6683_v44, 0 }
 0x13d   : > { %v6692_v24 = vld [vmem:[#allocation1 + $0x4] ss:$9 sm:$0xff]  ;;  %v6696_v45 = vld [vmem:[#allocation1 + $0x6] ss:$9 sm:$0xff] }
 0x13e   : > { %9953 = vst [vmem:[#allocation21_spill] sm:$0xff] %v6692_v24  ;;  %v6694_v55 = vld [vmem:[#allocation1 + $0x5] ss:$9 sm:$0xff]  ;;  %v6698_v57 = vld [vmem:[#allocation1 + $0x7] ss:$9 sm:$0xff] }
 0x13f   : > { %9954 = vst [vmem:[#allocation22_spill] sm:$0xff] %v6694_v55  ;;  %2382 = vperm.xlu0 %5776, %v9852_v49   ;;  %1207 = vperm.xlu2 %5778, %v1196_v50   ;;  %v9854_v49 = vperm.slane %v6683_v44, 4 }
 0x140   : > { %9955 = vst [vmem:[#allocation23_spill] sm:$0xff] %v6696_v45  ;;  %1201 = vperm.xlu1 %5777, %v1196_v50  }
 0x141   : > { %1910 = vst [vmem:[#allocation1] sm:$0xff] %v1165_v52 }
 0x147   : > { %5789 = vset.pattern.permute.xlu0 %v6554_v10  ;;  %1285 = vperm.xlu2 %5778, %v1274_v58  }
 0x148   : > { %v6703_v59 = vld [vmem:[#allocation1 + $0x1] ss:$9 sm:$0xff]  ;;  %v6707_v60 = vld [vmem:[#allocation1 + $0x3] ss:$9 sm:$0xff]  ;;  %1279 = vperm.xlu1 %5777, %v1274_v58  }
 0x149   : > { %v6705_v48 = vld [vmem:[#allocation1 + $0x2] ss:$9 sm:$0xff]  ;;  %v6710_v63 = vld [vmem:[#allocation1 + $0x4] ss:$9 sm:$0xff] }
 0x14a   : > { %9956 = vst [vmem:[#allocation24_spill] sm:$0xff] %v6710_v63  ;;  %v6712_v3 = vld [vmem:[#allocation1] ss:$9 sm:$0xff] }
 0x14b   : > { %2476 = vst [vmem:[#allocation1] sm:$0xff] %v1165_v52 }
 0x14f   : > { %2454 = vperm.xlu0 %5789, %v2449_v13   ;;  %5780 = vset.pattern.permute.xlu2 %v6554_v10 }
 0x150   : > { %5779 = vset.pattern.permute.xlu1 %v6559_v31 }
 0x152   : > { %v6720_v18 = vld [vmem:[#allocation1 + $0x5] ss:$9 sm:$0xff]  ;;  %v6724_v29 = vld [vmem:[#allocation1 + $0x7] ss:$9 sm:$0xff] }
 0x153   : > { %9958 = vst [vmem:[#allocation26_spill] sm:$0xff] %v6720_v18  ;;  %v6722_v21 = vld [vmem:[#allocation1 + $0x6] ss:$9 sm:$0xff] }
 0x154   : > { %9959 = vst [vmem:[#allocation27_spill] sm:$0xff] %v6722_v21  ;;  %v6870_v21 = vld [vmem:[#allocation2 + $0x4] sm:$0xf] }
 0x155   : > { %9960 = vst [vmem:[#allocation28_spill] sm:$0xff] %v6724_v29 }
 0x156   : > { %2483 = vst [vmem:[#allocation1] sm:$0xff] %v1168_v16 }
 0x157   : > { %1853 = vperm.xlu0 %5789, %v9855_v32   ;;  %1879 = vperm.xlu2 %5780, %v1874_v2   ;;  %v2423_v32 = vperm.slane %v6683_v44, 7  ;;  %3572 = vst.msk [vmem:[#allocation2 + $0x4] sm:$0xf] %vm9903_vm10, %v6604_v61 }
 0x158   : > { %2460 = vperm.xlu1 %5779, %v2449_v13   ;;  %v9856_v13 = vperm.slane %v6668_v37, 1 }
 0x15d   : > { %v6737_v50 = vld [vmem:[#allocation1 + $0x3] ss:$9 sm:$0xff]  ;;  %v6743_v12 = vld [vmem:[#allocation1 + $0x1] ss:$9 sm:$0xff] }
 0x15e   : > { %v6739_v52 = vld [vmem:[#allocation1 + $0x4] ss:$9 sm:$0xff]  ;;  %v6741_v58 = vld [vmem:[#allocation1 + $0x2] ss:$9 sm:$0xff] }
 0x15f   : > { %v6745_v16 = vld [vmem:[#allocation1] ss:$9 sm:$0xff]  ;;  %2389 = vperm.xlu0 %5789, %v9854_v49   ;;  %2441 = vperm.xlu2 %5780, %v2436_v33   ;;  %v1307_v49 = vperm.slane %v6649_v5, 0 }
 0x160   : > { %v6747_v7 = vld [vmem:[#allocation1 + $0x5] ss:$9 sm:$0xff]  ;;  %1885 = vperm.xlu1 %5779, %v1874_v2   ;;  %v9862_v2 = vperm.slane %v6683_v44, 1 }
 0x161   : > { %9961 = vst [vmem:[#allocation29_spill] sm:$0xff] %v6747_v7  ;;  %v1182_v40 = vpop.permute.xlu2 %1181 }
 0x162   : > { %2925 = vst [vmem:[#allocation1 + $0x1] ss:$2 sm:$0xff] %v2922_v47  ;;  %v1861_v47 = vperm.slane %v6668_v37, 7  ;;  %v1326_v33 = vsub.f32 %v1182_v40, %v1307_v49  ;;  %v1314_v40 = vperm.slane %v6677_v42, 0  ;;  %v1313_v42 = vperm.slane %v6675_v41, 0 }
 0x164   : > { %5831 = vtanh.f32 %v1326_v33 }
 0x167   : > { %1788 = vperm.xlu0 %5789, %v9856_v13   ;;  %5782 = vset.pattern.permute.xlu2 %v6559_v31 }
 0x168   : > { %5781 = vset.pattern.permute.xlu1 %v6554_v10 }
 0x169   : > { %v1273_v13 = vpop.permute.xlu2 %1272 }
 0x16a   : > { %v1340_v4 = vsub.f32 %v1273_v13, %v1314_v40  ;;  %v6770_v34 = vpop.eup %5831  ;;  %v2926_v13 = vld.sshfl [vmem:[#allocation1] sm:$0xff pattern:$0x75316420] }
 0x16b   : > { %v1362_v33 = vmul.f32 %v6770_v34, %v6770_v34  ;;  %2930 = vst [vmem:[#allocation3 + $0x10] sm:$0xf0] %v2926_v13 }
 0x16f   : > { %5794 = vset.pattern.permute.xlu0 %v6559_v31  ;;  %1872 = vperm.xlu2 %5782, %v1861_v47  }
 0x170   : > { %1866 = vperm.xlu1 %5781, %v1861_v47  }
 0x177   : > { %1898 = vperm.xlu0 %5794, %v9862_v2   ;;  %2434 = vperm.xlu2 %5782, %v2423_v32  }
 0x178   : > { %2428 = vperm.xlu1 %5781, %v2423_v32  }
 0x179   : > { %v1189_v9 = vpop.permute.xlu0 %1188 }
 0x17a   : > { %v1327_v47 = vsub.f32 %v1189_v9, %v9863_v8  ;;  %v1176_v27 = vpop.permute.xlu1 %1175  ;;  %v1260_v9 = vpop.permute.xlu2 %1259 }
 0x17b   : > { %v1325_v5 = vsub.f32 %v1176_v27, %v1307_v49  ;;  %v1338_v8 = vsub.f32 %v1260_v9, %v1313_v42 }
 0x17c   : > { %5833 = vtanh.f32 %v1327_v47 }
 0x17d   : > { %5835 = vtanh.f32 %v1325_v5 }
 0x17e   : > { %5837 = vtanh.f32 %v1340_v4  ;;  %v1380_v4 = vsel %vm447_vm3, %v1362_v33, 0.0 }
 0x17f   : > { %5784 = vset.pattern.permute.xlu2 %v6554_v10 }
 0x180   : > { %5783 = vset.pattern.permute.xlu1 %v6559_v31 }
 0x181   : > { %v1241_v20 = vpop.permute.xlu0 %1240 }
 0x182   : > { %v6774_v32 = vpop.eup %5833  ;;  %v1267_v2 = vpop.permute.xlu1 %1266  ;;  %v1335_v28 = vsub.f32 %v1241_v20, %v1312_v15 }
 0x183   : > { %v6778_v27 = vpop.eup %5835  ;;  %v1339_v49 = vsub.f32 %v1267_v2, %v1314_v40  ;;  %v1363_v47 = vmul.f32 %v6774_v32, %v6774_v32  ;;  %v9962_v40 = vperm.slane %v6668_v37, 6 }
 0x184   : > { %v1361_v5 = vmul.f32 %v6778_v27, %v6778_v27  ;;  %v6788_v41 = vpop.eup %5837 }
 0x185   : > { %5839 = vtanh.f32 %v1339_v49  ;;  %v1382_v2 = vsel %vm447_vm3, %v1363_v47, 0.0  ;;  %v1436_v33 = vmul.f32 %v6788_v41, %v6793_v36  ;;  %v6804_v47 = vld [vmem:[%s9840_s4] sm:$0xff] }
 0x186   : > { %v1379_v46 = vsel %vm447_vm3, %v1361_v5, 0.0  ;;  %5841 = vtanh.f32 %v1338_v8 }
 0x187   : > { %v1381_v53 = vadd.f32 %v1380_v4, %v1379_v46  ;;  %2415 = vperm.xlu2 %5784, %v2410_v54  }
 0x188   : > { %1859 = vperm.xlu1 %5783, %v9962_v40  }
 0x189   : > { %v1383_v13 = vadd.f32 %v1382_v2, %v1381_v53  ;;  %v6809_v53 = vld [vmem:[%s9840_s4 + $0x8] sm:$0xff] }
 0x18a   : > { %v1254_v9 = vpop.permute.xlu1 %1253  ;;  %v1456_v5 = vadd.f32 %v6809_v53, %v1436_v33 }
 0x18b   : > { %v1337_v22 = vsub.f32 %v1254_v9, %v1313_v42  ;;  %v6797_v49 = vpop.eup %5839  ;;  %v9963_v42 = vperm.slane %v6668_v37, 5 }
 0x18c   : > { %v1435_v46 = vmul.f32 %v6797_v49, %v6793_v36  ;;  %v6811_v8 = vpop.eup %5841 }
 0x18d   : > { %5843 = vtanh.f32 %v1337_v22  ;;  %v1434_v40 = vmul.f32 %v6811_v8, %v6793_v36 }
 0x18e   : > { %v1455_v22 = vadd.f32 %v6804_v47, %v1435_v46  ;;  %v1228_v46 = vpop.permute.xlu2 %1227  ;;  %5845 = vtanh.f32 %v1335_v28 }
 0x18f   : > { %1840 = vperm.xlu2 %5784, %v9963_v42   ;;  %v1311_v42 = vperm.slane %v6661_v39, 0 }
 0x190   : > { %2421 = vperm.xlu1 %5783, %v2410_v54   ;;  %v1466_v2 = vpack.c.bf16 %v1456_v5, %v1455_v22  ;;  %v1454_v54 = vadd.f32 %v6809_v53, %v1434_v40 }
 0x191   : > { %v1234_v4 = vpop.permute.xlu0 %1233 }
 0x192   : > { %1516 = vmatpush.bf16.msra.mxu1 %v1466_v2  ;;  %v1334_v22 = vsub.f32 %v1234_v4, %v1311_v42  ;;  %v1333_v2 = vsub.f32 %v1228_v46, %v1311_v42 }
 0x193   : > { %v6819_v9 = vpop.eup %5843 }
 0x194   : > { %v1433_v51 = vmul.f32 %v6819_v9, %v6793_v36  ;;  %5847 = vtanh.f32 %v1334_v22  ;;  %v6832_v40 = vpop.eup %5845 }
 0x196   : > { %v1453_v33 = vadd.f32 %v6804_v47, %v1433_v51  ;;  %v2397_v51 = vperm.slane %v6683_v44, 5  ;;  %v1221_v4 = vpop.permute.xlu2 %1220 }
 0x197   : > { %5786 = vset.pattern.permute.xlu2 %v6559_v31 }
 0x198   : > { %5785 = vset.pattern.permute.xlu1 %v6554_v10  ;;  %v1465_v5 = vpack.c.bf16 %v1454_v54, %v1453_v33  ;;  %v1822_v33 = vperm.slane %v6668_v37, 4 }
 0x199   : > { %v1195_v1 = vpop.permute.xlu0 %1194 }
 0x19a   : > { %v1328_v7 = vsub.f32 %v1195_v1, %v9964_v6  ;;  %1517 = vmatpush.bf16.msra.mxu1 %v1465_v5  ;;  %v1247_v39 = vpop.permute.xlu1 %1246  ;;  %v6834_v42 = vpop.eup %5847  ;;  %v1310_v1 = vperm.slane %v6659_v38, 0 }
 0x19b   : > { %v1336_v20 = vsub.f32 %v1247_v39, %v1312_v15 }
 0x19c   : > { %5849 = vtanh.f32 %v1328_v7  ;;  %v1431_v7 = vmul.f32 %v6832_v40, %v6793_v36  ;;  %v1332_v54 = vsub.f32 %v1221_v4, %v1310_v1  ;;  %v6862_v4 = vld [vmem:[%s6174_s20 + $0x8] sm:$0xff] }
 0x19d   : > { %5851 = vtanh.f32 %v1333_v2  ;;  %v1430_v2 = vmul.f32 %v6834_v42, %v6793_v36  ;;  %9965 = vst [vmem:[#allocation30_spill] sm:$0xff] %v6862_v4 }
 0x19e   : > { %5853 = vtanh.f32 %v1336_v20  ;;  %v1451_v39 = vadd.f32 %v6804_v47, %v1431_v7  ;;  %v1208_v24 = vpop.permute.xlu2 %1207  ;;  %v1309_v7 = vperm.slane %v6657_v35, 0 }
 0x19f   : > { %2408 = vperm.xlu2 %5786, %v2397_v51   ;;  %5855 = vtanh.f32 %v1332_v54 }
 0x1a0   : > { %2402 = vperm.xlu1 %5785, %v2397_v51   ;;  %v1330_v55 = vsub.f32 %v1208_v24, %v1309_v7 }
 0x1a1   : > { %v6855_v6 = vpop.permute.xlu0 %2447 }
 0x1a2   : > { %v6836_v28 = vpop.eup %5849 }
 0x1a3   : > { %v6838_v30 = vpop.eup %5851  ;;  %v1364_v15 = vmul.f32 %v6836_v28, %v6836_v28 }
 0x1a4   : > { %v6845_v46 = vpop.eup %5853  ;;  %v1429_v51 = vmul.f32 %v6838_v30, %v6793_v36 }
 0x1a5   : > { %v1384_v22 = vsel %vm447_vm3, %v1364_v15, 0.0  ;;  %v1432_v5 = vmul.f32 %v6845_v46, %v6793_v36  ;;  %v1043_v15 = vpack.c.bf16 %v6862_v4, %v6862_v4  ;;  %v5856_v4 = vpop.eup %5855 }
 0x1a6   : > { %v6853_v38 = vadd.f32 %v1384_v22, %v1383_v13  ;;  %v1450_v22 = vadd.f32 %v6809_v53, %v1430_v2  ;;  %v1449_v63 = vadd.f32 %v6804_v47, %v1429_v51  ;;  %v1428_v24 = vmul.f32 %v5856_v4, %v6793_v36 }
 0x1a7   : > { %1833 = vperm.xlu2 %5786, %v1822_v33   ;;  %v1452_v20 = vadd.f32 %v6809_v53, %v1432_v5  ;;  %1048 = vst.msk [vmem:[#allocation2 + $0xc] sm:$0xf] %vm9903_vm10, %v1043_v15 }
 0x1a8   : > { %1827 = vperm.xlu1 %5785, %v1822_v33   ;;  %v1463_v45 = vpack.c.bf16 %v1450_v22, %v1449_v63  ;;  %v1315_v33 = vperm.slane %v6679_v43, 0  ;;  %v1448_v51 = vadd.f32 %v6809_v53, %v1428_v24  ;;  %v9967_v43 = vperm.slane %v6683_v44, 4 }
 0x1a9   : > { %v1464_v13 = vpack.c.bf16 %v1452_v20, %v1451_v39  ;;  %v6876_v35 = vpop.permute.xlu0 %1846  ;;  %v1809_v39 = vperm.slane %v6668_v37, 3  ;;  %v6883_v20 = vld [vmem:[%s6174_s20 + $0x18] sm:$0xff]  ;;  %v1424_v24 = vmul.f32 %v6836_v28, %v6793_v36 }
 0x1aa   : > { %v1215_v18 = vpop.permute.xlu1 %1214  ;;  %9966 = vst [vmem:[#allocation31_spill] sm:$0xff] %v6883_v20  ;;  %v1044_v61 = vpack.c.bf16 %v6883_v20, %v6883_v20  ;;  %v1368_v20 = vmul.f32 %v5856_v4, %v5856_v4 }
 0x1ab   : > { %1518 = vmatpush.bf16.msra.mxu1 %v1464_v13  ;;  %v1331_v5 = vsub.f32 %v1215_v18, %v1310_v1  ;;  %v1286_v18 = vpop.permute.xlu2 %1285 }
 0x1ac   : > { %v1342_v2 = vsub.f32 %v1286_v18, %v1315_v33  ;;  %1050 = vst.msk [vmem:[#allocation2 + $0x1c] sm:$0xf] %vm9903_vm10, %v1044_v61 }
 0x1ad   : > { %5857 = vtanh.f32 %v1331_v5 }
 0x1ae   : > { %5859 = vtanh.f32 %v1330_v55 }
 0x1af   : > { %1519 = vmatpush.bf16.msra.mxu1 %v1463_v45  ;;  %5788 = vset.pattern.permute.xlu2 %v6554_v10 }
 0x1b0   : > { %5787 = vset.pattern.permute.xlu1 %v6559_v31 }
 0x1b1   : > { %v6893_v5 = vpop.permute.xlu0 %2382 }
 0x1b2   : > { %v1202_v1 = vpop.permute.xlu1 %1201  ;;  %9968 = vst [vmem:[#allocation32_spill] sm:$0xff] %v6893_v5 }
 0x1b3   : > { %v5858_v63 = vpop.eup %5857  ;;  %v1329_v54 = vsub.f32 %v1202_v1, %v1309_v7  ;;  %v6895_v18 = vpop.permute.xlu2 %1879 }
 0x1b4   : > { %v1427_v45 = vmul.f32 %v5858_v63, %v6793_v36  ;;  %v5860_v15 = vpop.eup %5859 }
 0x1b5   : > { %5861 = vtanh.f32 %v1329_v54  ;;  %v1426_v7 = vmul.f32 %v5860_v15, %v6793_v36  ;;  %v1366_v61 = vmul.f32 %v5860_v15, %v5860_v15  ;;  %v9969_v15 = vperm.slane %v6683_v44, 3 }
 0x1b6   : > { %v1447_v55 = vadd.f32 %v6804_v47, %v1427_v45  ;;  %5863 = vtanh.f32 %v1342_v2  ;;  %v1421_v45 = vmul.f32 %v6778_v27, %v6793_v36 }
 0x1b7   : > { %1814 = vperm.xlu2 %5788, %v1809_v39  }
 0x1b8   : > { %2395 = vperm.xlu1 %5787, %v9967_v43   ;;  %v1462_v13 = vpack.c.bf16 %v1448_v51, %v1447_v55  ;;  %v1446_v51 = vadd.f32 %v6809_v53, %v1426_v7  ;;  %v1423_v43 = vmul.f32 %v6774_v32, %v6793_v36  ;;  %v6049_v7 = vld [vmem:[%s6174_s20 + $0x28] sm:$0xff] }
 0x1b9   : > { %v1045_v32 = vpack.c.bf16 %v6049_v7, %v6049_v7 }
 0x1ba   : > { %1520 = vmatpush.bf16.msra.mxu1 %v1462_v13  ;;  %v1280_v22 = vpop.permute.xlu1 %1279  ;;  %v6907_v13 = vld [vmem:[#allocation2 + $0x14] sm:$0xf]  ;;  %v1443_v4 = vadd.f32 %v6804_v47, %v1423_v43 }
 0x1bb   : > { %v1341_v1 = vsub.f32 %v1280_v22, %v1315_v33  ;;  %v5862_v54 = vpop.eup %5861  ;;  %v1422_v33 = vmul.f32 %v6770_v34, %v6793_v36  ;;  %v1367_v22 = vmul.f32 %v5858_v63, %v5858_v63  ;;  %3574 = vst.msk [vmem:[#allocation2 + $0x14] sm:$0xf] %vm9903_vm10, %v6619_v14  ;;  %v1441_v34 = vadd.f32 %v6804_v47, %v1421_v45 }
 0x1bc   : > { %v1365_v55 = vmul.f32 %v5862_v54, %v5862_v54  ;;  %v1425_v2 = vmul.f32 %v5862_v54, %v6793_v36  ;;  %v6909_v28 = vpop.eup %5863  ;;  %v1388_v63 = vsel %vm447_vm3, %v1366_v61, 0.0  ;;  %1052 = vst.msk [vmem:[#allocation2 + $0x2c] sm:$0xf] %vm9903_vm10, %v1045_v32  ;;  %v1370_v61 = vmul.f32 %v6834_v42, %v6834_v42  ;;  %v5609_v42 = vld [vmem:[#allocation2 + $0x8] sm:$0xf0] }
 0x1bd   : > { %5865 = vtanh.f32 %v1341_v1 }
 0x1be   : > { %v1386_v27 = vsel %vm447_vm3, %v1365_v55, 0.0  ;;  %v1445_v1 = vadd.f32 %v6804_v47, %v1425_v2  ;;  %v1444_v55 = vadd.f32 %v6809_v53, %v1424_v24  ;;  %v1438_v2 = vmul.f32 %v6909_v28, %v6793_v36 }
 0x1bf   : > { %2376 = vperm.xlu2 %5788, %v9969_v15   ;;  %v1387_v54 = vadd.f32 %v1386_v27, %v6853_v38  ;;  %v1369_v38 = vmul.f32 %v6838_v30, %v6838_v30  ;;  %v1442_v24 = vadd.f32 %v6809_v53, %v1422_v33  ;;  %v2501_v27 = vperm.slane %v6739_v52, 0 }
 0x1c0   : > { %1820 = vperm.xlu1 %5787, %v1809_v39   ;;  %v1461_v5 = vpack.c.bf16 %v1446_v51, %v1445_v1  ;;  %v1390_v39 = vsel %vm447_vm3, %v1367_v22, 0.0  ;;  %v1392_v30 = vsel %vm447_vm3, %v1368_v20, 0.0  ;;  %v2500_v22 = vperm.slane %v6737_v50, 0 }
 0x1c1   : > { %v1389_v15 = vadd.f32 %v1388_v63, %v1387_v54  ;;  %v2455_v45 = vpop.permute.xlu0 %2454  ;;  %v1460_v7 = vpack.c.bf16 %v1444_v55, %v1443_v4  ;;  %v1459_v43 = vpack.c.bf16 %v1442_v24, %v1441_v34  ;;  %v1458_v63 = vadd.f32 %v6809_v53, %v1438_v2  ;;  %v5735_v53 = vld [vmem:[#allocation2 + $0x24] sm:$0xf]  ;;  %v6956_v24 = vld [vmem:[#allocation2 + $0x18] sm:$0xf0] }
 0x1c2   : > { %1521 = vmatpush.bf16.msra.mxu1 %v1461_v5  ;;  %v2442_v5 = vpop.permute.xlu2 %2441  ;;  %v2526_v54 = vsub.f32 %v2455_v45, %v2501_v27  ;;  %v1371_v52 = vmul.f32 %v6832_v40, %v6832_v40  ;;  %v1394_v29 = vsel %vm447_vm3, %v1369_v38, 0.0  ;;  %v1396_v34 = vsel %vm447_vm3, %v1370_v61, 0.0 }
 0x1c3   : > { %v6925_v14 = vpop.eup %5865  ;;  %v1391_v51 = vadd.f32 %v1390_v39, %v1389_v15  ;;  %v5656_v15 = vld [vmem:[%s6174_s20 + $0x48] sm:$0xff]  ;;  %v5658_v39 = vld [vmem:[%s6174_s20 + $0x58] sm:$0xff]  ;;  %v2524_v45 = vsub.f32 %v2442_v5, %v2500_v22  ;;  %v5625_v2 = vld [vmem:[#allocation2 + $0x28] sm:$0xf0]  ;;  %v1372_v4 = vmul.f32 %v6845_v46, %v6845_v46  ;;  %v2525_v40 = vsub.f32 %v6855_v6, %v2500_v22 }
 0x1c4   : > { %v1437_v1 = vmul.f32 %v6925_v14, %v6793_v36  ;;  %v3568_v50 = vpack.c.bf16 %v5656_v15, %v5656_v15  ;;  %v3569_v20 = vpack.c.bf16 %v5658_v39, %v5658_v39  ;;  %v6953_v38 = vor.u32 %v6870_v21, %v5609_v42  ;;  %v6050_v42 = vld [vmem:[%s6174_s20 + $0x38] sm:$0xff] }
 0x1c5   : > { %v1393_v32 = vadd.f32 %v1392_v30, %v1391_v51  ;;  %v6958_v61 = vor.u32 %v5735_v53, %v5625_v2  ;;  %5867 = vtanh.f32 %v2526_v54  ;;  %v1398_v46 = vsel %vm447_vm3, %v1371_v52, 0.0 }
 0x1c6   : > { %v1457_v33 = vadd.f32 %v6804_v47, %v1437_v1  ;;  %1522 = vmatpush.bf16.msra.mxu1 %v1460_v7  ;;  %3573 = vst.msk [vmem:[#allocation2 + $0xc] sm:$0xf] %vm9903_vm10, %v3568_v50  ;;  %v1373_v6 = vmul.f32 %v6819_v9, %v6819_v9  ;;  %v1926_v1 = vperm.slane %v6707_v60, 0  ;;  %5869 = vtanh.f32 %v2524_v45 }
 0x1c7   : > { %5791 = vset.pattern.permute.xlu2 %v6559_v31  ;;  %v1395_v55 = vadd.f32 %v1394_v29, %v1393_v32  ;;  %3575 = vst.msk [vmem:[#allocation2 + $0x1c] sm:$0xf] %vm9903_vm10, %v3569_v20  ;;  %v6967_v22 = vor.u32 %v6606_v62, %v6611_v11  ;;  %v1374_v5 = vmul.f32 %v6811_v8, %v6811_v8  ;;  %v1400_v7 = vsel %vm447_vm3, %v1372_v4, 0.0  ;;  %v5659_v62 = vld [vmem:[%s6174_s20 + $0x60] sm:$0xff]  ;;  %v5660_v11 = vld [vmem:[%s6174_s20 + $0x68] sm:$0xff] }
 0x1c8   : > { %5790 = vset.pattern.permute.xlu1 %v6554_v10  ;;  %v1467_v47 = vpack.c.bf16 %v1458_v63, %v1457_v33  ;;  %5871 = vtanh.f32 %v2525_v40  ;;  %v1796_v9 = vperm.slane %v6668_v37, 2  ;;  %v1951_v60 = vsub.f32 %v6895_v18, %v1926_v1  ;;  %v6994_v20 = vld [vmem:[#allocation2 + $0x24] sm:$0xf0] }
 0x1c9   : > { %v1397_v29 = vadd.f32 %v1396_v34, %v1395_v55  ;;  %v1375_v8 = vmul.f32 %v6797_v49, %v6797_v49  ;;  %v3046_v32 = vpack.c.bf16 %v5659_v62, %v5659_v62  ;;  %v3570_v54 = vpack.c.bf16 %v5660_v11, %v5660_v11 }
 0x1ca   : > { %1552 = vmatpush.bf16.msrb.mxu2 %v1467_v47  ;;  %5748 = vmatpush.bf16.msra.mxu3 %v1467_v47  ;;  %v2461_v51 = vpop.permute.xlu1 %2460  ;;  %v1046_v18 = vpack.c.bf16 %v6050_v42, %v6050_v42  ;;  %v1376_v15 = vmul.f32 %v6788_v41, %v6788_v41  ;;  %v1404_v39 = vsel %vm447_vm3, %v1374_v5, 0.0  ;;  %v1377_v41 = vmul.f32 %v6925_v14, %v6925_v14  ;;  %v1873_v62 = vpop.permute.xlu2 %1872 }
 0x1cb   : > { %1523 = vmatpush.bf16.msra.mxu1 %v1459_v43  ;;  %v2527_v21 = vsub.f32 %v2461_v51, %v2501_v27  ;;  %v1399_v30 = vadd.f32 %v1398_v46, %v1397_v29  ;;  %v1402_v43 = vsel %vm447_vm3, %v1373_v6, 0.0  ;;  %v6984_v33 = vpop.eup %5867  ;;  %3576 = vst.msk [vmem:[#allocation2 + $0x24] sm:$0xf] %vm9903_vm10, %v3046_v32  ;;  %v1406_v55 = vsel %vm447_vm3, %v1375_v8, 0.0  ;;  %v7018_v6 = vld [vmem:[%s9840_s4 + $0x20] sm:$0xff] }
 0x1cc   : > { %v6991_v52 = vpop.eup %5869  ;;  %3577 = vst.msk [vmem:[#allocation2 + $0x2c] sm:$0xf] %vm9903_vm10, %v3570_v54  ;;  %v2621_v45 = vmul.f32 %v6984_v33, %v6793_v36  ;;  %v2358_v4 = vperm.slane %v6683_v44, 2  ;;  %v1408_v40 = vsel %vm447_vm3, %v1376_v15, 0.0  ;;  %v1378_v29 = vmul.f32 %v6909_v28, %v6909_v28 }
 0x1cd   : > { %5637 = vmatmul.msk.bf16.vlgmr.msrb.gmra.mxu2 %vm447_vm3, %v6953_v38  ;;  %5639 = vmatmul.msk.bf16.vlgmr.msra.gmra.mxu3 %vm447_vm3, %v6958_v61  ;;  %v1401_v27 = vadd.f32 %v1400_v7, %v1399_v30  ;;  %5873 = vtanh.f32 %v2527_v21  ;;  %3053 = vst.msk [vmem:[#allocation2 + $0x28] sm:$0xf] %vm9903_vm10, %v3046_v32  ;;  %v2619_v51 = vmul.f32 %v6991_v52, %v6793_v36  ;;  %v7023_v21 = vld [vmem:[%s9840_s4 + $0x28] sm:$0xff]  ;;  %v1410_v28 = vsel %vm447_vm3, %v1377_v41, 0.0  ;;  %v5737_v7 = vld [vmem:[#allocation2 + $0x34] sm:$0xf] }
 0x1ce   : > { %1524 = vmatmul.bf16.vlgmr.msra.gmra.mxu1 %v6967_v22  ;;  %5875 = vtanh.f32 %v1951_v60  ;;  %v6996_v34 = vpop.eup %5871  ;;  %1054 = vst.msk [vmem:[#allocation2 + $0x3c] sm:$0xf] %vm9903_vm10, %v1046_v18  ;;  %v1412_v8 = vsel %vm447_vm3, %v1378_v29, 0.0  ;;  %v7038_v32 = vor.u32 %v6907_v13, %v6956_v24  ;;  %v1925_v42 = vperm.slane %v6705_v48, 0  ;;  %v7056_v13 = vld [vmem:[%s9840_s4 + $0x10] sm:$0xff] }
 0x1cf   : > { %1807 = vperm.xlu2 %5791, %v1796_v9   ;;  %v1403_v63 = vadd.f32 %v1402_v43, %v1401_v27  ;;  %v2620_v5 = vmul.f32 %v6996_v34, %v6793_v36  ;;  %3578 = vst.msk [vmem:[#allocation2 + $0x34] sm:$0xf] %vm9903_vm10, %v6634_v25  ;;  %v2640_v54 = vadd.f32 %v7018_v6, %v2619_v51  ;;  %v2462_v29 = vperm.slane %v6596_v56, 2 }
 0x1d0   : > { %1801 = vperm.xlu1 %5790, %v1796_v9   ;;  %v5662_v9 = vld [vmem:[%s6174_s20 + $0x78] sm:$0xff]  ;;  %v1950_v48 = vsub.f32 %v1873_v62, %v1925_v42 }
 0x1d1   : > { %v1405_v49 = vadd.f32 %v1404_v39, %v1403_v63  ;;  %v3571_v11 = vpack.c.bf16 %v5662_v9, %v5662_v9  ;;  %v2641_v18 = vadd.f32 %v7023_v21, %v2620_v5 }
 0x1d2   : > { %v1886_v50 = vpop.permute.xlu1 %1885 }
 0x1d3   : > { %v1952_v47 = vsub.f32 %v1886_v50, %v1926_v1  ;;  %v7004_v53 = vpop.eup %5873  ;;  %v1407_v2 = vadd.f32 %v1406_v55, %v1405_v49  ;;  %v2642_v1 = vadd.f32 %v7018_v6, %v2621_v45  ;;  %v7051_v49 = vor.u32 %v6628_v19, %v6589_v23  ;;  %v7069_v23 = vld [vmem:[%s9840_s4 + $0x18] sm:$0xff] }
 0x1d4   : > { %v2622_v14 = vmul.f32 %v7004_v53, %v6793_v36  ;;  %v7031_v60 = vpop.eup %5875  ;;  %v2652_v50 = vpack.c.bf16 %v2641_v18, %v2640_v54 }
 0x1d5   : > { %v1409_v46 = vadd.f32 %v1408_v40, %v1407_v2  ;;  %5877 = vtanh.f32 %v1952_v47  ;;  %v2046_v15 = vmul.f32 %v7031_v60, %v6793_v36  ;;  %v5633_v25 = vld [vmem:[#allocation2 + $0x38] sm:$0xf0]  ;;  %v2435_v47 = vpop.permute.xlu2 %2434  ;;  %v2499_v40 = vperm.slane %v6741_v58, 0 }
 0x1d6   : > { %v2643_v30 = vadd.f32 %v7023_v21, %v2622_v14  ;;  %v7058_v24 = vor.u32 %v5737_v7, %v5633_v25  ;;  %3579 = vst.msk [vmem:[#allocation2 + $0x3c] sm:$0xf] %vm9903_vm10, %v3571_v11  ;;  %5879 = vtanh.f32 %v1950_v48  ;;  %v7089_v58 = vor.u32 %v6994_v20, %v6622_v17 }
 0x1d7   : > { %2369 = vperm.xlu2 %5791, %v2358_v4   ;;  %v1411_v27 = vadd.f32 %v1410_v28, %v1409_v46  ;;  %v2067_v19 = vadd.f32 %v7056_v13, %v2046_v15  ;;  %v2523_v14 = vsub.f32 %v2435_v47, %v2499_v40  ;;  %v9971_v46 = vperm.slane %v6668_v37, 1 }
 0x1d8   : > { %2363 = vperm.xlu1 %5790, %v2358_v4   ;;  %v2653_v43 = vpack.c.bf16 %v2643_v30, %v2642_v1  ;;  %9970 = vst [vmem:[#allocation33_spill] sm:$0xff] %v7058_v24  ;;  %v1924_v17 = vperm.slane %v6703_v59, 0 }
 0x1d9   : > { %v7041_v63 = vadd.f32 %v1412_v8, %v1411_v27  ;;  %v9972_v27 = vperm.slane %v6683_v44, 1  ;;  %v1854_v8 = vpop.permute.xlu0 %1853 }
 0x1da   : > { %2655 = vmatpush.bf16.msra.mxu2 %v2653_v43  ;;  %v1947_v18 = vsub.f32 %v1854_v8, %v1924_v17  ;;  %v2497_v8 = vperm.slane %v6745_v16, 0 }
 0x1db   : > { %v7047_v39 = vpop.eup %5877 }
 0x1dc   : > { %v2047_v55 = vmul.f32 %v7047_v39, %v6793_v36  ;;  %v7079_v51 = vpop.eup %5879 }
 0x1dd   : > { %5638 = vmatmul.msk.bf16.gmra.mxu2 %vm447_vm3, %v7038_v32  ;;  %5640 = vmatmul.msk.bf16.gmra.mxu3 %vm447_vm3, %v7058_v24  ;;  %v2045_v30 = vmul.f32 %v7079_v51, %v6793_v36  ;;  %v7258_v24 = vld [vmem:[%s6174_s20] sm:$0xff] }
 0x1de   : > { %1529 = vmatmul.bf16.gmra.mxu1 %v7051_v49  ;;  %2656 = vmatpush.bf16.msra.mxu2 %v2652_v50  ;;  %v2068_v41 = vadd.f32 %v7069_v23, %v2047_v55  ;;  %v9973_v50 = vmov 0  }
 0x1df   : > { %5793 = vset.pattern.permute.xlu2 %v6554_v10  ;;  %v2066_v9 = vadd.f32 %v7069_v23, %v2045_v30 }
 0x1e0   : > { %5792 = vset.pattern.permute.xlu1 %v6559_v31  ;;  %v2078_v45 = vpack.c.bf16 %v2068_v41, %v2067_v19 }
 0x1e1   : > { %v2416_v28 = vpop.permute.xlu2 %2415 }
 0x1e2   : > { %v1867_v2 = vpop.permute.xlu1 %1866  ;;  %2080 = vmatpush.bf16.msrb.mxu3 %v2078_v45  ;;  %v7116_v45 = vor.u32 %v6637_v26, %v6643_v0 }
 0x1e3   : > { %v1949_v4 = vsub.f32 %v1867_v2, %v1925_v42  ;;  %v1923_v42 = vperm.slane %v6712_v3, 0  ;;  %v2498_v3 = vperm.slane %v6743_v12, 0 }
 0x1e4   : > { %9974 = vst [vmem:[#allocation34_spill] sm:$0xff] %v7116_v45 }
 0x1e5   : > { %5881 = vtanh.f32 %v1949_v4  ;;  %v1946_v59 = vsub.f32 %v6876_v35, %v1923_v42  ;;  %v2520_v47 = vsub.f32 %v2416_v28, %v2498_v3 }
 0x1e6   : > { %5883 = vtanh.f32 %v2523_v14 }
 0x1e7   : > { %2467 = vperm.xlu2 %5793, %v2462_v29  }
 0x1e8   : > { %1794 = vperm.xlu1 %5792, %v9971_v46  }
 0x1e9   : > { %v1841_v54 = vpop.permute.xlu2 %1840 }
 0x1ea   : > { %v2429_v1 = vpop.permute.xlu1 %2428  ;;  %v1945_v15 = vsub.f32 %v1841_v54, %v1923_v42 }
 0x1eb   : > { %v7085_v5 = vpop.eup %5881  ;;  %v2522_v7 = vsub.f32 %v2429_v1, %v2499_v40 }
 0x1ec   : > { %v2044_v56 = vmul.f32 %v7085_v5, %v6793_v36  ;;  %v7098_v62 = vpop.eup %5883 }
 0x1ed   : > { %5885 = vtanh.f32 %v2522_v7  ;;  %v2618_v20 = vmul.f32 %v7098_v62, %v6793_v36 }
 0x1ee   : > { %1534 = vmatmul.bf16.gmra.mxu1 %v7089_v58  ;;  %v2065_v37 = vadd.f32 %v7056_v13, %v2044_v56  ;;  %5887 = vtanh.f32 %v1947_v18 }
 0x1ef   : > { %1892 = vperm.xlu2 %5793, %v9972_v27   ;;  %v2639_v48 = vadd.f32 %v7023_v21, %v2618_v20  ;;  %5889 = vtanh.f32 %v1945_v15 }
 0x1f0   : > { %2473 = vperm.xlu1 %5792, %v2462_v29   ;;  %v2077_v11 = vpack.c.bf16 %v2066_v9, %v2065_v37  ;;  %5891 = vtanh.f32 %v1946_v59 }
 0x1f2   : > { %2081 = vmatpush.bf16.msrb.mxu3 %v2077_v11 }
 0x1f3   : > { %v7103_v43 = vpop.eup %5885 }
 0x1f4   : > { %v2617_v44 = vmul.f32 %v7103_v43, %v6793_v36  ;;  %v7119_v35 = vpop.eup %5887 }
 0x1f5   : > { %v7121_v2 = vpop.eup %5889  ;;  %v2042_v40 = vmul.f32 %v7119_v35, %v6793_v36 }
 0x1f6   : > { %v2638_v25 = vadd.f32 %v7018_v6, %v2617_v44  ;;  %v7123_v4 = vpop.eup %5891  ;;  %v2040_v0 = vmul.f32 %v7121_v2, %v6793_v36 }
 0x1f7   : > { %5795 = vset.pattern.permute.xlu2 %v9973_v50  ;;  %v2063_v46 = vadd.f32 %v7056_v13, %v2042_v40  ;;  %v2041_v1 = vmul.f32 %v7123_v4, %v6793_v36 }
 0x1f8   : > { %5797 = vset.pattern.permute.xlu1 %v6554_v10  ;;  %v2651_v55 = vpack.c.bf16 %v2639_v48, %v2638_v25  ;;  %v2061_v37 = vadd.f32 %v7056_v13, %v2040_v0  ;;  %v1922_v48 = vperm.slane %v6698_v57, 0  ;;  %v2390_v0 = vpop.permute.xlu0 %2389 }
 0x1f9   : > { %v2409_v7 = vpop.permute.xlu2 %2408  ;;  %v2062_v9 = vadd.f32 %v7069_v23, %v2041_v1  ;;  %v9975_v1 = vld [vmem:[#allocation28_spill] sm:$0xff] }
 0x1fa   : > { %v1860_v19 = vpop.permute.xlu1 %1859  ;;  %2657 = vmatpush.bf16.msra.mxu2 %v2651_v55  ;;  %v2519_v54 = vsub.f32 %v2409_v7, %v2497_v8  ;;  %v2496_v7 = vperm.slane %v9975_v1, 0 }
 0x1fb   : > { %v1948_v41 = vsub.f32 %v1860_v19, %v1924_v17  ;;  %v2075_v17 = vpack.c.bf16 %v2062_v9, %v2061_v37  ;;  %v9976_v9 = vld [vmem:[#allocation27_spill] sm:$0xff] }
 0x1fd   : > { %5893 = vtanh.f32 %v1948_v41 }
 0x1fe   : > { %1539 = vmatmul.bf16.gmra.mxu1 %v7116_v45  ;;  %5895 = vtanh.f32 %v2520_v47 }
 0x201   : > { %v1834_v15 = vpop.permute.xlu2 %1833 }
 0x202   : > { %v2422_v12 = vpop.permute.xlu1 %2421  ;;  %v1944_v59 = vsub.f32 %v1834_v15, %v1922_v48 }
 0x203   : > { %v7127_v29 = vpop.eup %5893  ;;  %v2521_v14 = vsub.f32 %v2422_v12, %v2498_v3 }
 0x204   : > { %v2043_v26 = vmul.f32 %v7127_v29, %v6793_v36  ;;  %v7137_v30 = vpop.eup %5895 }
 0x205   : > { %5897 = vtanh.f32 %v2521_v14  ;;  %v2615_v27 = vmul.f32 %v7137_v30, %v6793_v36 }
 0x206   : > { %v2064_v28 = vadd.f32 %v7069_v23, %v2043_v26  ;;  %5899 = vtanh.f32 %v2519_v54 }
 0x207   : > { %v2636_v42 = vadd.f32 %v7018_v6, %v2615_v27  ;;  %v2495_v27 = vperm.slane %v9976_v9, 0 }
 0x208   : > { %v2076_v56 = vpack.c.bf16 %v2064_v28, %v2063_v46 }
 0x20a   : > { %2082 = vmatpush.bf16.msrb.mxu3 %v2076_v56 }
 0x20b   : > { %v7143_v11 = vpop.eup %5897 }
 0x20c   : > { %v2616_v20 = vmul.f32 %v7143_v11, %v6793_v36  ;;  %v7151_v16 = vpop.eup %5899 }
 0x20d   : > { %v2614_v3 = vmul.f32 %v7151_v16, %v6793_v36 }
 0x20e   : > { %2083 = vmatpush.bf16.msrb.mxu3 %v2075_v17  ;;  %v2637_v18 = vadd.f32 %v7023_v21, %v2616_v20 }
 0x20f   : > { %v2635_v40 = vadd.f32 %v7023_v21, %v2614_v3 }
 0x210   : > { %v2650_v44 = vpack.c.bf16 %v2637_v18, %v2636_v42  ;;  %v9977_v42 = vld [vmem:[#allocation32_spill] sm:$0xff] }
 0x211   : > { %v1815_v55 = vpop.permute.xlu2 %1814  ;;  %v2515_v18 = vsub.f32 %v9977_v42, %v2495_v27 }
 0x212   : > { %2658 = vmatpush.bf16.msra.mxu2 %v2650_v44  ;;  %v2403_v25 = vpop.permute.xlu1 %2402 }
 0x213   : > { %v2518_v50 = vsub.f32 %v2403_v25, %v2497_v8  ;;  %v2516_v8 = vsub.f32 %v2390_v0, %v2496_v7  ;;  %v9978_v25 = vld [vmem:[#allocation23_spill] sm:$0xff] }
 0x215   : > { %5901 = vtanh.f32 %v2518_v50 }
 0x216   : > { %5903 = vtanh.f32 %v1944_v59 }
 0x219   : > { %v2377_v56 = vpop.permute.xlu2 %2376 }
 0x21a   : > { %v1828_v19 = vpop.permute.xlu1 %1827  ;;  %v2514_v54 = vsub.f32 %v2377_v56, %v2495_v27 }
 0x21b   : > { %v7155_v41 = vpop.eup %5901  ;;  %v1943_v47 = vsub.f32 %v1828_v19, %v1922_v48  ;;  %v1921_v48 = vperm.slane %v9978_v25, 0 }
 0x21c   : > { %v2613_v12 = vmul.f32 %v7155_v41, %v6793_v36  ;;  %v7161_v14 = vpop.eup %5903 }
 0x21d   : > { %5905 = vtanh.f32 %v1943_v47  ;;  %v2039_v46 = vmul.f32 %v7161_v14, %v6793_v36  ;;  %v1941_v59 = vsub.f32 %v1815_v55, %v1921_v48 }
 0x21e   : > { %v2634_v57 = vadd.f32 %v7018_v6, %v2613_v12  ;;  %5907 = vtanh.f32 %v2516_v8  ;;  %v1789_v8 = vpop.permute.xlu0 %1788 }
 0x21f   : > { %v2060_v20 = vadd.f32 %v7069_v23, %v2039_v46  ;;  %5909 = vtanh.f32 %v2514_v54 }
 0x220   : > { %v2649_v26 = vpack.c.bf16 %v2635_v40, %v2634_v57  ;;  %5911 = vtanh.f32 %v2515_v18  ;;  %v9979_v18 = vld [vmem:[#allocation22_spill] sm:$0xff] }
 0x222   : > { %2659 = vmatpush.bf16.msra.mxu2 %v2649_v26 }
 0x223   : > { %v7165_v28 = vpop.eup %5905 }
 0x224   : > { %v2038_v37 = vmul.f32 %v7165_v28, %v6793_v36  ;;  %v7175_v19 = vpop.eup %5907 }
 0x225   : > { %v7177_v47 = vpop.eup %5909  ;;  %v2611_v40 = vmul.f32 %v7175_v19, %v6793_v36 }
 0x226   : > { %v2059_v17 = vadd.f32 %v7056_v13, %v2038_v37  ;;  %v7179_v12 = vpop.eup %5911  ;;  %v2609_v55 = vmul.f32 %v7177_v47, %v6793_v36 }
 0x227   : > { %v2632_v1 = vadd.f32 %v7018_v6, %v2611_v40  ;;  %v2610_v56 = vmul.f32 %v7179_v12, %v6793_v36  ;;  %v1899_v40 = vpop.permute.xlu0 %1898 }
 0x228   : > { %v2074_v44 = vpack.c.bf16 %v2060_v20, %v2059_v17  ;;  %v2630_v27 = vadd.f32 %v7018_v6, %v2609_v55 }
 0x229   : > { %v1808_v3 = vpop.permute.xlu2 %1807  ;;  %v2631_v20 = vadd.f32 %v7023_v21, %v2610_v56 }
 0x22a   : > { %2084 = vmatpush.bf16.msrb.mxu3 %v2074_v44  ;;  %v2396_v15 = vpop.permute.xlu1 %2395  ;;  %v1920_v44 = vperm.slane %v9979_v18, 0 }
 0x22b   : > { %v2517_v50 = vsub.f32 %v2396_v15, %v2496_v7  ;;  %v2647_v15 = vpack.c.bf16 %v2631_v20, %v2630_v27 }
 0x22d   : > { %5913 = vtanh.f32 %v2517_v50 }
 0x22e   : > { %5915 = vtanh.f32 %v1941_v59 }
 0x231   : > { %v2370_v17 = vpop.permute.xlu2 %2369 }
 0x232   : > { %v1821_v57 = vpop.permute.xlu1 %1820 }
 0x233   : > { %v7183_v26 = vpop.eup %5913  ;;  %v1942_v0 = vsub.f32 %v1821_v57, %v1921_v48  ;;  %v1940_v48 = vsub.f32 %v1808_v3, %v1920_v44 }
 0x234   : > { %v2612_v46 = vmul.f32 %v7183_v26, %v6793_v36  ;;  %v7193_v37 = vpop.eup %5915 }
 0x235   : > { %5917 = vtanh.f32 %v1942_v0  ;;  %v2036_v54 = vmul.f32 %v7193_v37, %v6793_v36 }
 0x236   : > { %v2633_v7 = vadd.f32 %v7023_v21, %v2612_v46  ;;  %5919 = vtanh.f32 %v1940_v48  ;;  %v9980_v46 = vld [vmem:[#allocation24_spill] sm:$0xff] }
 0x237   : > { %v2057_v50 = vadd.f32 %v7056_v13, %v2036_v54  ;;  %v1927_v55 = vperm.slane %v9980_v46, 0 }
 0x238   : > { %v2648_v9 = vpack.c.bf16 %v2633_v7, %v2632_v1  ;;  %v9981_v7 = vld [vmem:[#allocation26_spill] sm:$0xff] }
 0x239   : > { %v2494_v56 = vperm.slane %v9981_v7, 0  ;;  %v1954_v27 = vsub.f32 %v1899_v40, %v1927_v55 }
 0x23a   : > { %2660 = vmatpush.bf16.msra.mxu2 %v2648_v9 }
 0x23b   : > { %v7199_v42 = vpop.eup %5917  ;;  %v2513_v20 = vsub.f32 %v2370_v17, %v2494_v56 }
 0x23c   : > { %v2037_v25 = vmul.f32 %v7199_v42, %v6793_v36  ;;  %v7210_v3 = vpop.eup %5919 }
 0x23e   : > { %2661 = vmatpush.bf16.msra.mxu2 %v2647_v15  ;;  %v2058_v59 = vadd.f32 %v7069_v23, %v2037_v25  ;;  %v2035_v25 = vmul.f32 %v7210_v3, %v6793_v36 }
 0x240   : > { %v2073_v57 = vpack.c.bf16 %v2058_v59, %v2057_v50  ;;  %v2056_v40 = vadd.f32 %v7069_v23, %v2035_v25 }
 0x241   : > { %v7206_v0 = vpop.permute.xlu2 %2467 }
 0x242   : > { %2085 = vmatpush.bf16.msrb.mxu3 %v2073_v57  ;;  %v1802_v1 = vpop.permute.xlu1 %1801 }
 0x243   : > { %v1939_v9 = vsub.f32 %v1802_v1, %v1920_v44 }
 0x245   : > { %5921 = vtanh.f32 %v1939_v9 }
 0x246   : > { %5923 = vtanh.f32 %v1954_v27 }
 0x247   : > { %5925 = vtanh.f32 %v2513_v20  ;;  %v9983_v20 = vld [vmem:[#allocation29_spill] sm:$0xff] }
 0x249   : > { %v1893_v54 = vpop.permute.xlu2 %1892 }
 0x24a   : > { %v1953_v18 = vsub.f32 %v1893_v54, %v1927_v55  ;;  %v2364_v15 = vpop.permute.xlu1 %2363  ;;  %v9982_v55 = vld [vmem:[#allocation21_spill] sm:$0xff] }
 0x24b   : > { %v7214_v48 = vpop.eup %5921  ;;  %v1525_v50 = vpop.f32.mrf.mxu1  ;;  %v2512_v59 = vsub.f32 %v2364_v15, %v2494_v56  ;;  %v1919_v1 = vperm.slane %v9982_v55, 0  ;;  %v2561_v15 = vmul.f32 %v6996_v34, %v6996_v34 }
 0x24c   : > { %5927 = vtanh.f32 %v1953_v18  ;;  %v2034_v44 = vmul.f32 %v7214_v48, %v6793_v36  ;;  %v7218_v17 = vpop.eup %5923 }
 0x24d   : > { %5929 = vtanh.f32 %v2512_v59  ;;  %v5926_v46 = vpop.eup %5925  ;;  %v1937_v27 = vsub.f32 %v1789_v8, %v1919_v1  ;;  %v2049_v56 = vmul.f32 %v7218_v17, %v6793_v36  ;;  %v1982_v59 = vmul.f32 %v7123_v4, %v7123_v4 }
 0x24e   : > { %v2055_v57 = vadd.f32 %v7056_v13, %v2034_v44  ;;  %v2549_v25 = vmul.f32 %v5926_v46, %v5926_v46  ;;  %v2608_v44 = vmul.f32 %v5926_v46, %v6793_v36  ;;  %v2551_v8 = vmul.f32 %v7179_v12, %v7179_v12 }
 0x24f   : > { %v2560_v4 = vmul.f32 %v6991_v52, %v6991_v52  ;;  %v2550_v46 = vmul.f32 %v7177_v47, %v7177_v47  ;;  %v2562_v12 = vmul.f32 %v6984_v33, %v6984_v33  ;;  %5931 = vtanh.f32 %v1937_v27 }
 0x250   : > { %v1554_v7 = vpop.f32.mrf.mxu2  ;;  %v2072_v9 = vpack.c.bf16 %v2056_v40, %v2055_v57  ;;  %v1987_v57 = vmul.f32 %v7031_v60, %v7031_v60  ;;  %v2629_v45 = vadd.f32 %v7023_v21, %v2608_v44  ;;  %v7255_v47 = vsel %vm447_vm3, %v2561_v15, 0.0 }
 0x251   : > { %v7237_v40 = vadd.f32 %v1554_v7, %v1525_v50  ;;  %v2070_v50 = vadd.f32 %v7069_v23, %v2049_v56  ;;  %v2567_v7 = vsel %vm447_vm3, %v2549_v25, 0.0  ;;  %v7263_v56 = vsel %vm447_vm3, %v1982_v59, 0.0 }
 0x252   : > { %v7226_v18 = vpop.eup %5927  ;;  %2086 = vmatpush.bf16.msrb.mxu3 %v2072_v9  ;;  %v2552_v25 = vmul.f32 %v7175_v19, %v7175_v19  ;;  %v2571_v15 = vsel %vm447_vm3, %v2551_v8, 0.0  ;;  %v7278_v59 = vsel %vm447_vm3, %v2562_v12, 0.0  ;;  %v2563_v19 = vmul.f32 %v7004_v53, %v7004_v53 }
 0x253   : > { %v5930_v55 = vpop.eup %5929  ;;  %v1527_v54 = vpop.f32.mrf.mxu1  ;;  %v2048_v34 = vmul.f32 %v7226_v18, %v6793_v36  ;;  %v1574_v33 = vsub.f32 %v7237_v40, %v7258_v24  ;;  %v7288_v12 = vmul.f32 %v7119_v35, %v7119_v35  ;;  %v7292_v53 = vmul.f32 %v7079_v51, %v7079_v51 }
 0x254   : > { %v2548_v9 = vmul.f32 %v5930_v55, %v5930_v55  ;;  %v2607_v31 = vmul.f32 %v5930_v55, %v6793_v36  ;;  %v7304_v51 = vsel %vm447_vm3, %v2563_v19, 0.0  ;;  %v2556_v19 = vmul.f32 %v7137_v30, %v7137_v30 }
 0x255   : > { %v2069_v60 = vadd.f32 %v7056_v13, %v2048_v34  ;;  %v2557_v30 = vmul.f32 %v7143_v11, %v7143_v11  ;;  %v1975_v11 = vmul.f32 %v7214_v48, %v7214_v48 }
 0x256   : > { %v2566_v10 = vsel %vm447_vm3, %v2548_v9, 0.0  ;;  %v2628_v52 = vadd.f32 %v7018_v6, %v2607_v31  ;;  %v2569_v31 = vsel %vm447_vm3, %v2550_v46, 0.0 }
 0x257   : > { %v2568_v55 = vadd.f32 %v2567_v7, %v2566_v10  ;;  %v2079_v27 = vpack.c.bf16 %v2070_v50, %v2069_v60  ;;  %v7270_v10 = vsel %vm447_vm3, %v1987_v57, 0.0  ;;  %v7275_v60 = vsel %vm447_vm3, %v2560_v4, 0.0  ;;  %v5932_v57 = vpop.eup %5931 }
 0x258   : > { %v1556_v34 = vpop.f32.mrf.mxu2  ;;  %v2646_v44 = vpack.c.bf16 %v2629_v45, %v2628_v52  ;;  %v2553_v45 = vmul.f32 %v7183_v26, %v7183_v26  ;;  %v1582_v50 = vmul.f32 %v1574_v33, %v1574_v33  ;;  %v2573_v26 = vsel %vm447_vm3, %v2552_v25, 0.0 }
 0x259   : > { %v2570_v9 = vadd.f32 %v2569_v31, %v2568_v55  ;;  %v7272_v7 = vadd.f32 %v1556_v34, %v1527_v54  ;;  %2116 = vmatpush.bf16.msrb.mxu0 %v2079_v27  ;;  %v9984_v54 = vld [vmem:[#allocation30_spill] sm:$0xff]  ;;  %v2554_v27 = vmul.f32 %v7155_v41, %v7155_v41  ;;  %v9985_v33 = vperm.slane %v9983_v20, 0 }
 0x25a   : > { %2662 = vmatpush.bf16.msra.mxu2 %v2646_v44  ;;  %v1795_v8 = vpop.permute.xlu1 %1794  ;;  %v1973_v35 = vmul.f32 %v5932_v57, %v5932_v57  ;;  %v2555_v25 = vmul.f32 %v7151_v16, %v7151_v16  ;;  %v2575_v41 = vsel %vm447_vm3, %v2553_v45, 0.0  ;;  %v1414_v44 = vrot.slane %v7041_v63, 4 }
 0x25b   : > { %v2572_v46 = vadd.f32 %v2571_v15, %v2570_v9  ;;  %v1575_v52 = vsub.f32 %v7272_v7, %v9984_v54  ;;  %v1530_v55 = vpop.f32.mrf.mxu1  ;;  %v1938_v4 = vsub.f32 %v1795_v8, %v1919_v1  ;;  %v2528_v1 = vsub.f32 %v7206_v0, %v9985_v33 }
 0x25c   : > { %5643 = vmatmul.msk.bf16.vlgmr.msrb.gmra.mxu0 %vm447_vm3, %v6953_v38  ;;  %v1590_v9 = vsel %vm447_vm3, %v1582_v50, 0.0  ;;  %v2559_v8 = vmul.f32 %v7098_v62, %v7098_v62  ;;  %v7322_v50 = vmul.f32 %v7047_v39, %v7047_v39  ;;  %v1991_v62 = vsel %vm447_vm3, %v1973_v35, 0.0 }
 0x25d   : > { %v2574_v31 = vadd.f32 %v2573_v26, %v2572_v46  ;;  %v1583_v34 = vmul.f32 %v1575_v52, %v1575_v52  ;;  %5933 = vtanh.f32 %v1938_v4  ;;  %2663 = vmatmul.bf16.vlgmr.msra.gmra.mxu2 %v6967_v22  ;;  %v2577_v46 = vsel %vm447_vm3, %v2554_v27, 0.0 }
 0x25e   : > { %5935 = vtanh.f32 %v2528_v1  ;;  %v2032_v4 = vmul.f32 %v5932_v57, %v6793_v36  ;;  %v2579_v26 = vsel %vm447_vm3, %v2555_v25, 0.0  ;;  %v2558_v1 = vmul.f32 %v7103_v43, %v7103_v43 }
 0x25f   : > { %v2576_v15 = vadd.f32 %v2575_v41, %v2574_v31  ;;  %v1591_v0 = vsel %vm447_vm3, %v1583_v34, 0.0  ;;  %v7331_v31 = vld [vmem:[%s6174_s20 + $0x10] sm:$0xff]  ;;  %v9986_v34 = vperm.slane %v9983_v20, 0  ;;  %v1564_v41 = vpop.f32.mrf.mxu3  ;;  %v2581_v25 = vsel %vm447_vm3, %v2556_v19, 0.0 }
 0x260   : > { %v1592_v54 = vadd.f32 %v1591_v0, %v1590_v9  ;;  %v1559_v16 = vpop.f32.mrf.mxu2  ;;  %v1976_v20 = vmul.f32 %v7210_v3, %v7210_v3  ;;  %v2585_v48 = vsel %vm447_vm3, %v2558_v1, 0.0  ;;  %v1415_v3 = vadd.f32 %v1414_v44, %v7041_v63  ;;  %v9987_v44 = vld [vmem:[#allocation31_spill] sm:$0xff] }
 0x261   : > { %v2578_v45 = vadd.f32 %v2577_v46, %v2576_v15  ;;  %v7317_v52 = vadd.f32 %v1559_v16, %v1530_v55  ;;  %v2053_v46 = vadd.f32 %v7056_v13, %v2032_v4  ;;  %v2583_v16 = vsel %vm447_vm3, %v2557_v30, 0.0 }
 0x262   : > { %v2474_v27 = vpop.permute.xlu1 %2473  ;;  %v1994_v13 = vsel %vm447_vm3, %v1975_v11, 0.0  ;;  %v2587_v1 = vsel %vm447_vm3, %v2559_v8, 0.0 }
 0x263   : > { %v5934_v33 = vpop.eup %5933  ;;  %v2580_v55 = vadd.f32 %v2579_v26, %v2578_v45  ;;  %v1576_v57 = vsub.f32 %v7317_v52, %v7331_v31  ;;  %v1532_v39 = vpop.f32.mrf.mxu1  ;;  %v2529_v35 = vsub.f32 %v2474_v27, %v9986_v34 }
 0x264   : > { %v1974_v15 = vmul.f32 %v5934_v33, %v5934_v33  ;;  %v2033_v9 = vmul.f32 %v5934_v33, %v6793_v36  ;;  %v5936_v26 = vpop.eup %5935 }
 0x265   : > { %v2582_v43 = vadd.f32 %v2581_v25, %v2580_v55  ;;  %v1584_v0 = vmul.f32 %v1576_v57, %v1576_v57  ;;  %5937 = vtanh.f32 %v2529_v35  ;;  %v1977_v57 = vmul.f32 %v7193_v37, %v7193_v37 }
 0x266   : > { %v1992_v45 = vsel %vm447_vm3, %v1974_v15, 0.0  ;;  %v2054_v19 = vadd.f32 %v7069_v23, %v2033_v9  ;;  %v1978_v15 = vmul.f32 %v7199_v42, %v7199_v42  ;;  %v2623_v37 = vmul.f32 %v5936_v26, %v6793_v36 }
 0x267   : > { %v1993_v27 = vadd.f32 %v1992_v45, %v1991_v62  ;;  %v1593_v33 = vsel %vm447_vm3, %v1584_v0, 0.0  ;;  %v2584_v55 = vadd.f32 %v2583_v16, %v2582_v43  ;;  %v1996_v62 = vsel %vm447_vm3, %v1976_v20, 0.0 }
 0x268   : > { %v1594_v4 = vadd.f32 %v1593_v33, %v1592_v54  ;;  %v1561_v30 = vpop.f32.mrf.mxu2  ;;  %v2071_v34 = vpack.c.bf16 %v2054_v19, %v2053_v46  ;;  %v1980_v54 = vmul.f32 %v7161_v14, %v7161_v14  ;;  %v1998_v8 = vsel %vm447_vm3, %v1977_v57, 0.0  ;;  %v1566_v19 = vpop.f32.mrf.mxu3 }
 0x269   : > { %v1995_v35 = vadd.f32 %v1994_v13, %v1993_v27  ;;  %v2586_v25 = vadd.f32 %v2585_v48, %v2584_v55  ;;  %v7353_v23 = vadd.f32 %v1561_v30, %v1532_v39  ;;  %v1979_v0 = vmul.f32 %v7165_v28, %v7165_v28  ;;  %v7377_v28 = vld [vmem:[%s6174_s20 + $0x20] sm:$0xff] }
 0x26a   : > { %2087 = vmatpush.bf16.msrb.mxu3 %v2071_v34  ;;  %v1416_v14 = vrot.slane %v1415_v3, 2  ;;  %v2000_v48 = vsel %vm447_vm3, %v1978_v15, 0.0  ;;  %v2644_v27 = vadd.f32 %v7018_v6, %v2623_v37  ;;  %v1990_v6 = vmul.f32 %v7218_v17, %v7218_v17 }
 0x26b   : > { %v5938_v11 = vpop.eup %5937  ;;  %v1997_v9 = vadd.f32 %v1996_v62, %v1995_v35  ;;  %v2588_v63 = vadd.f32 %v2587_v1, %v2586_v25  ;;  %v1577_v39 = vsub.f32 %v7353_v23, %v9987_v44  ;;  %v1535_v43 = vpop.f32.mrf.mxu1  ;;  %v2002_v13 = vsel %vm447_vm3, %v1979_v0, 0.0 }
 0x26c   : > { %v7367_v42 = vadd.f32 %v1564_v41, %v1535_v43  ;;  %v2624_v46 = vmul.f32 %v5938_v11, %v6793_v36  ;;  %5644 = vmatmul.msk.bf16.gmra.mxu0 %vm447_vm3, %v7038_v32  ;;  %v1985_v25 = vmul.f32 %v7085_v5, %v7085_v5  ;;  %v2564_v62 = vmul.f32 %v5936_v26, %v5936_v26  ;;  %v7422_v43 = vld [vmem:[%s6174_s20 + $0x28] sm:$0xff] }
 0x26d   : > { %v1999_v16 = vadd.f32 %v1998_v8, %v1997_v9  ;;  %v2590_v20 = vadd.f32 %v7275_v60, %v2588_v63  ;;  %v1585_v45 = vmul.f32 %v1577_v39, %v1577_v39  ;;  %2088 = vmatmul.bf16.vlgmr.msrb.gmra.mxu3 %v6967_v22  ;;  %2668 = vmatmul.bf16.gmra.mxu2 %v7051_v49  ;;  %v7413_v44 = vsel %vm447_vm3, %v1990_v6, 0.0 }
 0x26e   : > { %v1578_v41 = vsub.f32 %v7367_v42, %v7377_v28  ;;  %v2645_v33 = vadd.f32 %v7023_v21, %v2624_v46  ;;  %v1981_v60 = vmul.f32 %v7121_v2, %v7121_v2  ;;  %v1984_v2 = vmul.f32 %v7127_v29, %v7127_v29 }
 0x26f   : > { %v2001_v55 = vadd.f32 %v2000_v48, %v1999_v16  ;;  %v2592_v22 = vadd.f32 %v7255_v47, %v2590_v20  ;;  %v1595_v57 = vsel %vm447_vm3, %v1585_v45, 0.0  ;;  %v2004_v47 = vsel %vm447_vm3, %v1980_v54, 0.0 }
 0x270   : > { %v1596_v30 = vadd.f32 %v1595_v57, %v1594_v4  ;;  %v1586_v34 = vmul.f32 %v1578_v41, %v1578_v41  ;;  %v2654_v35 = vpack.c.bf16 %v2645_v33, %v2644_v27  ;;  %v2010_v4 = vsel %vm447_vm3, %v7288_v12, 0.0  ;;  %v1569_v46 = vpop.f32.mrf.mxu3 }
 0x271   : > { %v2003_v21 = vadd.f32 %v2002_v13, %v2001_v55  ;;  %v2594_v1 = vadd.f32 %v7278_v59, %v2592_v22  ;;  %v2016_v59 = vsel %vm447_vm3, %v7292_v53, 0.0  ;;  %v7404_v29 = vsel %vm447_vm3, %v7322_v50, 0.0 }
 0x272   : > { %v1597_v15 = vsel %vm447_vm3, %v1586_v34, 0.0  ;;  %2691 = vmatpush.bf16.msrb.mxu1 %v2654_v35  ;;  %v2006_v26 = vsel %vm447_vm3, %v1981_v60, 0.0  ;;  %v7409_v63 = vadd.f32 %v1416_v14, %v1415_v3  ;;  %v2014_v12 = vsel %vm447_vm3, %v1985_v25, 0.0 }
 0x273   : > { %v2005_v37 = vadd.f32 %v2004_v47, %v2003_v21  ;;  %v2596_v5 = vadd.f32 %v7304_v51, %v2594_v1  ;;  %v1598_v17 = vadd.f32 %v1597_v15, %v1596_v30  ;;  %v1537_v9 = vpop.f32.mrf.mxu1  ;;  %v2012_v53 = vsel %vm447_vm3, %v1984_v2, 0.0 }
 0x274   : > { %v7407_v54 = vadd.f32 %v1566_v19, %v1537_v9  ;;  %v2597_v50 = vsel %vm447_vm3, %v2564_v62, 0.0  ;;  %v1989_v39 = vmul.f32 %v7226_v18, %v7226_v18  ;;  %v2565_v0 = vmul.f32 %v5938_v11, %v5938_v11  ;;  %v7452_v62 = vld [vmem:[%s6174_s20 + $0x30] sm:$0xff] }
 0x275   : > { %v2007_v51 = vadd.f32 %v2006_v26, %v2005_v37  ;;  %5649 = vmatmul.msk.bf16.vlgmr.msrb.gmra.mxu1 %vm447_vm3, %v6953_v38  ;;  %v1643_v14 = vrot.slane %v7237_v40, 3  ;;  %v1664_v38 = vrot.slane %v7237_v40, 5  ;;  %v2598_v16 = vadd.f32 %v2597_v50, %v2596_v5 }
 0x276   : > { %v1579_v3 = vsub.f32 %v7407_v54, %v7422_v43  ;;  %v1644_v45 = vrot.slane %v7317_v52, 2  ;;  %v1665_v19 = vrot.slane %v7317_v52, 4  ;;  %v1646_v48 = vrot.slane %v7367_v42, 1 }
 0x277   : > { %v2009_v8 = vadd.f32 %v7263_v56, %v2007_v51  ;;  %v1633_v41 = vrot.slane %v7237_v40, 2  ;;  %v1634_v27 = vrot.slane %v7317_v52, 1  ;;  %v2022_v56 = vsel %vm447_vm3, %v1989_v39, 0.0 }
 0x278   : > { %v1587_v20 = vmul.f32 %v1579_v3, %v1579_v3  ;;  %v1623_v33 = vrot.slane %v7237_v40, 1  ;;  %v1653_v60 = vrot.slane %v7237_v40, 4  ;;  %v2599_v22 = vsel %vm447_vm3, %v2565_v0, 0.0 }
 0x279   : > { %v2011_v18 = vadd.f32 %v2010_v4, %v2009_v8  ;;  %v1667_v30 = vrot.slane %v7367_v42, 3  ;;  %v2600_v34 = vadd.f32 %v2599_v22, %v2598_v16  ;;  %v1645_v25 = vsel %vm1102_vm5, %v1644_v45, %v1643_v14 }
 0x27a   : > { %v1599_v11 = vsel %vm447_vm3, %v1587_v20, 0.0  ;;  %v1666_v6 = vsel %vm1102_vm5, %v1665_v19, %v1664_v38  ;;  %v1647_v1 = vsel %vm1104_vm6, %v1646_v48, %v1645_v25  ;;  %v1635_v2 = vsel %vm1102_vm5, %v1634_v27, %v1633_v41 }
 0x27b   : > { %v2013_v55 = vadd.f32 %v2012_v53, %v2011_v18  ;;  %v1600_v57 = vadd.f32 %v1599_v11, %v1598_v17  ;;  %v1540_v13 = vpop.f32.mrf.mxu1  ;;  %v1675_v47 = vrot.slane %v7237_v40, 6  ;;  %v1668_v17 = vsel %vm1104_vm6, %v1667_v30, %v1666_v6 }
 0x27c   : > { %v7440_v35 = vadd.f32 %v1569_v46, %v1540_v13  ;;  %5645 = vmatmul.msk.bf16.gmra.mxu0 %vm447_vm3, %v6958_v61  ;;  %v1636_v9 = vsel %vm1104_vm6, %v7367_v42, %v1635_v2  ;;  %v1654_v26 = vrot.slane %v7317_v52, 3  ;;  %v1624_v3 = vsel %vm1102_vm5, %v7317_v52, %v1623_v33 }
 0x27d   : > { %v2015_v21 = vadd.f32 %v2014_v12, %v2013_v55  ;;  %2093 = vmatmul.bf16.gmra.mxu3 %v7051_v49  ;;  %2673 = vmatmul.bf16.gmra.mxu2 %v7089_v58  ;;  %v2601_v12 = vrot.slane %v2600_v34, 4  ;;  %v1625_v8 = vrot.slane %v7367_v42, 7  ;;  %v1686_v0 = vrot.slane %v7237_v40, 7 }
 0x27e   : > { %v1580_v15 = vsub.f32 %v7440_v35, %v7452_v62  ;;  %v1648_v4 = vsel %vm1106_vm8, %v7440_v35, %v1647_v1  ;;  %v1669_v37 = vrot.slane %v7440_v35, 2  ;;  %v1637_v49 = vrot.slane %v7440_v35, 7 }
 0x27f   : > { %v2017_v5 = vadd.f32 %v2016_v59, %v2015_v21  ;;  %1649 = vrot.lane.b32.xlu1 %v1648_v4, %s6095_s23  ;;  %v1571_v59 = vpop.f32.mrf.mxu3  ;;  %v1627_v14 = vrot.slane %v7440_v35, 6  ;;  %v1676_v38 = vrot.slane %v7317_v52, 5  ;;  %v1655_v19 = vsel %vm1102_vm5, %v1654_v26, %v1653_v60  ;;  %v7491_v60 = vld [vmem:[%s6174_s20 + $0x38] sm:$0xff] }
 0x280   : > { %v1588_v51 = vmul.f32 %v1580_v15, %v1580_v15  ;;  %v1670_v53 = vsel %vm1106_vm8, %v1669_v37, %v1668_v17  ;;  %v1638_v50 = vsel %vm1106_vm8, %v1637_v49, %v1636_v9  ;;  %v1656_v18 = vrot.slane %v7367_v42, 2 }
 0x281   : > { %v2019_v39 = vadd.f32 %v7270_v10, %v2017_v5  ;;  %1671 = vrot.lane.b32.xlu0 %v1670_v53, %s6098_s11  ;;  %1639 = vrot.lane.b32.xlu2 %v1638_v50, %s6093_s22  ;;  %v1687_v10 = vrot.slane %v7317_v52, 6  ;;  %v2602_v48 = vadd.f32 %v2601_v12, %v2600_v34  ;;  %v1658_v27 = vrot.slane %v7440_v35, 1 }
 0x282   : > { %v1601_v46 = vsel %vm447_vm3, %v1588_v51, 0.0  ;;  %v1615_v11 = vrot.slane %v7317_v52, 7  ;;  %v1626_v55 = vsel %vm1104_vm6, %v1625_v8, %v1624_v3  ;;  %v1617_v22 = vrot.slane %v7367_v42, 6 }
 0x283   : > { %v2021_v16 = vadd.f32 %v7404_v29, %v2019_v39  ;;  %v1602_v20 = vadd.f32 %v1601_v46, %v1600_v57  ;;  %v1542_v45 = vpop.f32.mrf.mxu1  ;;  %v1678_v29 = vrot.slane %v7367_v42, 4  ;;  %v1628_v13 = vsel %vm1106_vm8, %v1627_v14, %v1626_v55  ;;  %v9989_v46 = vld [vmem:[#allocation34_spill] sm:$0xff] }
 0x284   : > { %v7481_v41 = vadd.f32 %v1571_v59, %v1542_v45  ;;  %v1619_v30 = vrot.slane %v7440_v35, 5  ;;  %v1701_v52 = vrot.slane %v7353_v23, 7  ;;  %v1689_v34 = vrot.slane %v7367_v42, 5  ;;  %v9988_v59 = vld [vmem:[#allocation33_spill] sm:$0xff] }
 0x285   : > { %v2023_v33 = vadd.f32 %v2022_v56, %v2021_v16  ;;  %5650 = vmatmul.msk.bf16.gmra.mxu1 %vm447_vm3, %v7038_v32  ;;  %v1657_v32 = vsel %vm1104_vm6, %v1656_v18, %v1655_v19  ;;  %v1703_v25 = vrot.slane %v7407_v54, 6  ;;  %v2603_v6 = vrot.slane %v2602_v48, 2 }
 0x286   : > { %v1581_v57 = vsub.f32 %v7481_v41, %v7491_v60  ;;  %v1659_v1 = vsel %vm1106_vm8, %v1658_v27, %v1657_v32  ;;  %v1616_v2 = vsel %vm1102_vm5, %v1615_v11, %v7237_v40  ;;  %v1772_v37 = vrot.slane %v7272_v7, 7 }
 0x287   : > { %v2025_v56 = vadd.f32 %v7413_v44, %v2023_v33  ;;  %1629 = vrot.lane.b32.xlu1 %v1628_v13, %s6092_s21  ;;  %v1680_v44 = vrot.slane %v7440_v35, 3  ;;  %v1618_v4 = vsel %vm1104_vm6, %v1617_v22, %v1616_v2  ;;  %v1702_v5 = vsel %vm1102_vm5, %v1701_v52, %v7272_v7 }
 0x288   : > { %v1589_v21 = vmul.f32 %v1581_v57, %v1581_v57  ;;  %v1620_v49 = vsel %vm1106_vm8, %v1619_v30, %v1618_v4  ;;  %v1705_v17 = vrot.slane %v7481_v41, 5  ;;  %v1704_v12 = vsel %vm1104_vm6, %v1703_v25, %v1702_v5 }
 0x289   : > { %v2026_v15 = vrot.slane %v2025_v56, 4  ;;  %1660 = vrot.lane.b32.xlu2 %v1659_v1, %s6097_s26  ;;  %1622 = vst.msk [vmem:[#allocation3] sm:$0xf] %vm9903_vm10, %v1620_v49  ;;  %v1773_v51 = vrot.slane %v7353_v23, 6  ;;  %v2604_v53 = vadd.f32 %v2603_v6, %v2602_v48  ;;  %v1677_v50 = vsel %vm1102_vm5, %v1676_v38, %v1675_v47 }
 0x28a   : > { %v1603_v42 = vsel %vm447_vm3, %v1589_v21, 0.0  ;;  %v1691_v39 = vrot.slane %v7440_v35, 4  ;;  %v1706_v3 = vsel %vm1106_vm8, %v1705_v17, %v1704_v12  ;;  %v1679_v14 = vsel %vm1104_vm6, %v1678_v29, %v1677_v50 }
 0x28b   : > { %v2027_v9 = vadd.f32 %v2026_v15, %v2025_v56  ;;  %v7515_v26 = vadd.f32 %v1603_v42, %v1602_v20  ;;  %1708 = vst.msk [vmem:[#allocation3 + $0x8] sm:$0xf] %vm9903_vm10, %v1706_v3  ;;  %v1774_v40 = vsel %vm1102_vm5, %v1773_v51, %v1772_v37  ;;  %v1681_v47 = vsel %vm1106_vm8, %v1680_v44, %v1679_v14 }
 0x28c   : > { %5646 = vmatmul.msk.bf16.gmra.mxu0 %vm447_vm3, %v9988_v59  ;;  %v1688_v35 = vsel %vm1102_vm5, %v1687_v10, %v1686_v0  ;;  %v1418_v38 = vrot.slane %v7409_v63, 1  ;;  %v1775_v20 = vrot.slane %v7407_v54, 5  ;;  %v2605_v45 = vrot.slane %v2604_v53, 1 }
 0x28d   : > { %v2028_v8 = vrot.slane %v2027_v9, 2  ;;  %2098 = vmatmul.bf16.gmra.mxu3 %v7089_v58  ;;  %2678 = vmatmul.bf16.gmra.mxu2 %v9989_v46  ;;  %v1690_v58 = vsel %vm1104_vm6, %v1689_v34, %v1688_v35  ;;  %v1730_v18 = vrot.slane %v7353_v23, 2  ;;  %v1732_v0 = vrot.slane %v7407_v54, 1 }
 0x28e   : > { %v1692_v19 = vsel %vm1106_vm8, %v1691_v39, %v1690_v58  ;;  %v1776_v10 = vsel %vm1104_vm6, %v1775_v20, %v1774_v40  ;;  %v1729_v27 = vrot.slane %v7272_v7, 3  ;;  %v1419_v11 = vadd.f32 %v1418_v38, %v7409_v63 }
 0x28f   : > { %v2029_v16 = vadd.f32 %v2028_v8, %v2027_v9  ;;  %1682 = vrot.lane.b32.xlu1 %v1681_v47, %s6099_s19  ;;  %v2606_v55 = vadd.f32 %v2605_v45, %v2604_v53  ;;  %v1711_v30 = vrot.slane %v7407_v54, 7  ;;  %v1709_v52 = vrot.slane %v7272_v7, 1 }
 0x290   : > { %v1731_v29 = vsel %vm1102_vm5, %v1730_v18, %v1729_v27  ;;  %v1713_v56 = vrot.slane %v7481_v41, 6  ;;  %v1777_v25 = vrot.slane %v7481_v41, 4  ;;  %v1720_v6 = vrot.slane %v7353_v23, 1 }
 0x291   : > { %v2030_v48 = vrot.slane %v2029_v16, 1  ;;  %1693 = vrot.lane.b32.xlu2 %v1692_v19, %s6101_s24  ;;  %v1733_v57 = vsel %vm1104_vm6, %v1732_v0, %v1731_v29  ;;  %v1719_v1 = vrot.slane %v7272_v7, 2  ;;  %v1723_v2 = vrot.slane %v7481_v41, 7 }
 0x292   : > { %v1734_v13 = vsel %vm1106_vm8, %v7481_v41, %v1733_v57  ;;  %v7576_v21 = vsel %vm1106_vm8, %v1777_v25, %v1776_v10  ;;  %v1740_v37 = vrot.slane %v7353_v23, 3  ;;  %v1742_v42 = vrot.slane %v7407_v54, 2 }
 0x293   : > { %v2031_v33 = vadd.f32 %v2030_v48, %v2029_v16  ;;  %v1721_v15 = vsel %vm1102_vm5, %v1720_v6, %v1719_v1  ;;  %v1739_v49 = vrot.slane %v7272_v7, 4  ;;  %v1744_v5 = vrot.slane %v7481_v41, 1 }
 0x294   : > { %v1722_v44 = vsel %vm1104_vm6, %v7407_v54, %v1721_v15  ;;  %v1751_v51 = vrot.slane %v7353_v23, 4  ;;  %v1753_v53 = vrot.slane %v7407_v54, 3  ;;  %v1750_v50 = vrot.slane %v7272_v7, 5 }
 0x295   : > { %v2992_v22 = vsel %vm9904_vm15, %v1419_v11, %v2031_v33  ;;  %5651 = vmatmul.msk.bf16.gmra.mxu1 %vm447_vm3, %v6958_v61  ;;  %v1710_v61 = vsel %vm1102_vm5, %v7353_v23, %v1709_v52  ;;  %v1724_v4 = vsel %vm1106_vm8, %v1723_v2, %v1722_v44  ;;  %v1741_v17 = vsel %vm1102_vm5, %v1740_v37, %v1739_v49  ;;  %v6057_v49 = vld [vmem:[%s6174_s20 + $0x8] sm:$0xff] }
 0x296   : > { %v2993_v63 = vsel %vm893_vm13, %v2992_v22, %v2606_v55  ;;  %v1712_v32 = vsel %vm1104_vm6, %v1711_v30, %v1710_v61  ;;  %v1743_v9 = vsel %vm1104_vm6, %v1742_v42, %v1741_v17  ;;  %v1755_v39 = vrot.slane %v7481_v41, 2 }
 0x297   : > { %2994 = vst.msk [vmem:[%s7551_s30] sm:$0x7] %vm9897_vm1, %v2993_v63  ;;  %1735 = vrot.lane.b32.xlu1 %v1734_v13, %s6095_s23  ;;  %v1714_v34 = vsel %vm1106_vm8, %v1713_v56, %v1712_v32  ;;  %v1745_v12 = vsel %vm1106_vm8, %v1744_v5, %v1743_v9  ;;  %v1764_v14 = vrot.slane %v7407_v54, 4  ;;  %v1761_v40 = vrot.slane %v7272_v7, 6 }
 0x298   : > { %v1766_v47 = vrot.slane %v7481_v41, 3  ;;  %v1605_v33 = vrot.slane %v7515_v26, 4 }
 0x29a   : > { %v1606_v29 = vadd.f32 %v1605_v33, %v7515_v26 }
 0x29c   : > { %v1607_v56 = vrot.slane %v1606_v29, 2 }
 0x29d   : > { %2103 = vmatmul.bf16.gmra.mxu3 %v9989_v46  ;;  %v1762_v46 = vrot.slane %v7353_v23, 5 }
 0x29e   : > { %v1608_v61 = vadd.f32 %v1607_v56, %v1606_v29 }
 0x29f   : > { %1715 = vrot.lane.b32.xlu1 %v1714_v34, %s6092_s21  ;;  %v1763_v35 = vsel %vm1102_vm5, %v1762_v46, %v1761_v40 }
 0x2a0   : > { %v1765_v38 = vsel %vm1104_vm6, %v1764_v14, %v1763_v35  ;;  %v1609_v44 = vrot.slane %v1608_v61, 1 }
 0x2a1   : > { %v1767_v16 = vsel %vm1106_vm8, %v1766_v47, %v1765_v38 }
 0x2a5   : > { %5652 = vmatmul.msk.bf16.gmra.mxu1 %vm447_vm3, %v9988_v59  ;;  %v1752_v59 = vsel %vm1102_vm5, %v1751_v51, %v1750_v50 }
 0x2a6   : > { %v1754_v3 = vsel %vm1104_vm6, %v1753_v53, %v1752_v59 }
 0x2a7   : > { %1725 = vrot.lane.b32.xlu1 %v1724_v4, %s6093_s22  ;;  %v1756_v8 = vsel %vm1106_vm8, %v1755_v39, %v1754_v3 }
 0x2af   : > { %1746 = vrot.lane.b32.xlu1 %v1745_v12, %s6097_s26  ;;  %v7641_v12 = vadd.f32 %v1609_v44, %v1608_v61 }
 0x2b7   : > { %1757 = vrot.lane.b32.xlu1 %v1756_v8, %s6098_s11 }
 0x2bf   : > { %1768 = vrot.lane.b32.xlu1 %v1767_v16, %s6099_s19 }
 0x2d9   : > { %v2118_v58 = vpop.f32.mrf.mxu0 }
 0x2db   : > { %v1640_v19 = vpop.permute.xlu2 %1639 }
 0x2e0   : > { %v2664_v20 = vpop.f32.mrf.mxu2 }
 0x2e1   : > { %v2120_v45 = vpop.f32.mrf.mxu0 }
 0x2e3   : > { %v1661_v7 = vpop.permute.xlu2 %1660 }
 0x2e8   : > { %v2666_v18 = vpop.f32.mrf.mxu2 }
 0x2e9   : > { %v2123_v0 = vpop.f32.mrf.mxu0 }
 0x2eb   : > { %v1694_v63 = vpop.permute.xlu2 %1693 }
 0x2f0   : > { %v2089_v23 = vpop.f32.mrf.mxu3  ;;  %v2669_v10 = vpop.f32.mrf.mxu2 }
 0x2f1   : > { %v1650_v48 = vpop.permute.xlu1 %1649  ;;  %v2125_v57 = vpop.f32.mrf.mxu0  ;;  %v7620_v32 = vadd.f32 %v2118_v58, %v2089_v23 }
 0x2f2   : > { %v2693_v54 = vpop.f32.mrf.mxu1 }
 0x2f3   : > { %v1672_v55 = vpop.permute.xlu0 %1671  ;;  %v7622_v25 = vadd.f32 %v2693_v54, %v2664_v20  ;;  %v2138_v4 = vsub.f32 %v7620_v32, %v7258_v24  ;;  %v2261_v8 = vrot.slane %v7620_v32, 3  ;;  %v2192_v40 = vrot.slane %v7620_v32, 5 }
 0x2f4   : > { %v2204_v47 = vrot.slane %v7620_v32, 6  ;;  %v2250_v35 = vrot.slane %v7620_v32, 2  ;;  %v2239_v16 = vrot.slane %v7620_v32, 1 }
 0x2f5   : > { %v2713_v42 = vsub.f32 %v7622_v25, %v7258_v24  ;;  %v2146_v51 = vmul.f32 %v2138_v4, %v2138_v4  ;;  %v2216_v24 = vrot.slane %v7620_v32, 7  ;;  %v2782_v58 = vrot.slane %v7622_v25, 3 }
 0x2f6   : > { %v2772_v20 = vrot.slane %v7622_v25, 2 }
 0x2f7   : > { %v2721_v39 = vmul.f32 %v2713_v42, %v2713_v42 }
 0x2f8   : > { %v2091_v41 = vpop.f32.mrf.mxu3  ;;  %v2671_v30 = vpop.f32.mrf.mxu2 }
 0x2f9   : > { %v1630_v27 = vpop.permute.xlu1 %1629  ;;  %v7624_v6 = vadd.f32 %v2120_v45, %v2091_v41  ;;  %v2128_v2 = vpop.f32.mrf.mxu0  ;;  %v2154_v45 = vsel %vm447_vm3, %v2146_v51, 0.0  ;;  %v2729_v54 = vsel %vm447_vm3, %v2721_v39, 0.0 }
 0x2fa   : > { %1632 = vst.msk [vmem:[#allocation3] sm:$0xf] %vm584_vm12, %v1630_v27  ;;  %v2695_v11 = vpop.f32.mrf.mxu1 }
 0x2fb   : > { %1642 = vst.msk [vmem:[#allocation3] sm:$0xf] %vm659_vm14, %v1640_v19  ;;  %v7628_v1 = vadd.f32 %v2695_v11, %v2666_v18  ;;  %v2139_v5 = vsub.f32 %v7624_v6, %v6057_v49  ;;  %v2296_v61 = vrot.slane %v7624_v6, 6 }
 0x2fc   : > { %1652 = vst.msk [vmem:[#allocation3] sm:$0xf] %vm9896_vm4, %v1650_v48  ;;  %v2762_v48 = vrot.slane %v7622_v25, 1 }
 0x2fd   : > { %1663 = vst.msk [vmem:[#allocation3] sm:$0xf] %vm809_vm11, %v1661_v7  ;;  %v2714_v17 = vsub.f32 %v7628_v1, %v6057_v49  ;;  %v2147_v59 = vmul.f32 %v2139_v5, %v2139_v5 }
 0x2fe   : > { %1674 = vst.msk [vmem:[#allocation3] sm:$0xf] %vm884_vm9, %v1672_v55 }
 0x2ff   : > { %v2722_v46 = vmul.f32 %v2714_v17, %v2714_v17 }
 0x300   : > { %v2094_v22 = vpop.f32.mrf.mxu3  ;;  %v7632_v37 = vpop.f32.mrf.mxu2 }
 0x301   : > { %v1683_v13 = vpop.permute.xlu1 %1682  ;;  %v7639_v9 = vadd.f32 %v2123_v0, %v2094_v22  ;;  %v2130_v23 = vpop.f32.mrf.mxu0  ;;  %v2155_v0 = vsel %vm447_vm3, %v2147_v59, 0.0  ;;  %v2730_v41 = vsel %vm447_vm3, %v2722_v46, 0.0 }
 0x302   : > { %1685 = vst.msk [vmem:[#allocation3] sm:$0xf] %vm959_vm7, %v1683_v13  ;;  %v2698_v52 = vpop.f32.mrf.mxu1 }
 0x303   : > { %1696 = vst.msk [vmem:[#allocation3] sm:$0xf] %vm9894_vm2, %v1694_v63  ;;  %v7643_v53 = vadd.f32 %v2698_v52, %v2669_v10  ;;  %v2140_v38 = vsub.f32 %v7639_v9, %v7331_v31  ;;  %v2825_v10 = vrot.slane %v7622_v25, 7  ;;  %v2262_v11 = vrot.slane %v7639_v9, 2 }
 0x304   : > { %v2193_v33 = vrot.slane %v7639_v9, 4  ;;  %v2205_v29 = vrot.slane %v7639_v9, 5  ;;  %v2251_v22 = vrot.slane %v7639_v9, 1  ;;  %v2156_v63 = vadd.f32 %v2155_v0, %v2154_v45 }
 0x305   : > { %v2715_v19 = vsub.f32 %v7643_v53, %v7331_v31  ;;  %v2217_v31 = vrot.slane %v7639_v9, 6  ;;  %v2148_v55 = vmul.f32 %v2140_v38, %v2140_v38  ;;  %vm9901_vm2 = vcmask 1045509  }
 0x306   : > { %v2228_v4 = vrot.slane %v7639_v9, 7  ;;  %v2263_v5 = vsel %vm9901_vm2, %v2262_v11, %v2261_v8  ;;  %v2194_v51 = vsel %vm9901_vm2, %v2193_v33, %v2192_v40  ;;  %v7689_v59 = vsel %vm9901_vm2, %v2205_v29, %v2204_v47 }
 0x307   : > { %v2723_v13 = vmul.f32 %v2715_v19, %v2715_v19  ;;  %v2218_v17 = vsel %vm9901_vm2, %v2217_v31, %v2216_v24  ;;  %v2157_v39 = vsel %vm447_vm3, %v2148_v55, 0.0  ;;  %v2773_v46 = vrot.slane %v7643_v53, 1 }
 0x308   : > { %v2096_v34 = vpop.f32.mrf.mxu3  ;;  %v2676_v27 = vpop.f32.mrf.mxu2  ;;  %v7706_v47 = vsel %vm9901_vm2, %v7639_v9, %v2239_v16 }
 0x309   : > { %v7626_v26 = vpop.permute.xlu1 %1735  ;;  %v7659_v18 = vadd.f32 %v2125_v57, %v2096_v34  ;;  %v2285_v57 = vrot.slane %v7624_v6, 5  ;;  %v2731_v34 = vadd.f32 %v2730_v41, %v2729_v54  ;;  %v2133_v19 = vpop.f32.mrf.mxu0 }
 0x30a   : > { %v2700_v15 = vpop.f32.mrf.mxu1 }
 0x30b   : > { %v7664_v7 = vadd.f32 %v2700_v15, %v2671_v30  ;;  %v6058_v30 = vld [vmem:[%s6174_s20 + $0x18] sm:$0xff] }
 0x30c   : > { %v2141_v52 = vsub.f32 %v7659_v18, %v6058_v30 }
 0x30d   : > { %v2716_v15 = vsub.f32 %v7664_v7, %v6058_v30 }
 0x30e   : > { %v2149_v8 = vmul.f32 %v2141_v52, %v2141_v52 }
 0x30f   : > { %v2724_v40 = vmul.f32 %v2716_v15, %v2716_v15 }
 0x310   : > { %v2099_v50 = vpop.f32.mrf.mxu3  ;;  %v2159_v0 = vsel %vm447_vm3, %v2149_v8, 0.0  ;;  %v2679_v41 = vpop.f32.mrf.mxu2 }
 0x311   : > { %v1716_v3 = vpop.permute.xlu1 %1715  ;;  %v7679_v42 = vadd.f32 %v2128_v2, %v2099_v50  ;;  %v7692_v2 = vsel %vm9901_vm2, %v2251_v22, %v2250_v35  ;;  %v2783_v50 = vrot.slane %v7643_v53, 2  ;;  %v2158_v35 = vadd.f32 %v2157_v39, %v2156_v63 }
 0x312   : > { %1718 = vst.msk [vmem:[#allocation3 + $0x8] sm:$0xf] %vm584_vm12, %v1716_v3  ;;  %v2703_v14 = vpop.f32.mrf.mxu1  ;;  %v2732_v3 = vsel %vm447_vm3, %v2723_v13, 0.0  ;;  %v2734_v33 = vsel %vm447_vm3, %v2724_v40, 0.0 }
 0x313   : > { %v7697_v24 = vadd.f32 %v2703_v14, %v7632_v37  ;;  %v2142_v45 = vsub.f32 %v7679_v42, %v7377_v28  ;;  %v2264_v37 = vrot.slane %v7679_v42, 1  ;;  %v2733_v14 = vadd.f32 %v2732_v3, %v2731_v34 }
 0x314   : > { %v2219_v31 = vrot.slane %v7679_v42, 5  ;;  %v2195_v22 = vrot.slane %v7679_v42, 3  ;;  %v2207_v30 = vrot.slane %v7679_v42, 4  ;;  %v2160_v8 = vadd.f32 %v2159_v0, %v2158_v35 }
 0x315   : > { %v2717_v16 = vsub.f32 %v7697_v24, %v7377_v28  ;;  %v2150_v63 = vmul.f32 %v2142_v45, %v2142_v45  ;;  %v2735_v45 = vadd.f32 %v2734_v33, %v2733_v14  ;;  %v2253_v0 = vsel %vm9900_vm0, %v7679_v42, %v7692_v2 }
 0x316   : > { %v2196_v3 = vsel %vm9900_vm0, %v2195_v22, %v2194_v51  ;;  %v2208_v35 = vsel %vm9900_vm0, %v2207_v30, %v7689_v59  ;;  %v2241_v2 = vrot.slane %v7679_v42, 7 }
 0x318   : > { %v2101_v56 = vpop.f32.mrf.mxu3 }
 0x319   : > { %v1726_v44 = vpop.permute.xlu1 %1725  ;;  %v7700_v38 = vadd.f32 %v2130_v23, %v2101_v56  ;;  %v7714_v23 = vsel %vm1102_vm5, %v2783_v50, %v2782_v58 }
 0x31a   : > { %1728 = vst.msk [vmem:[#allocation3 + $0x8] sm:$0xf] %vm659_vm14, %v1726_v44  ;;  %v2705_v49 = vpop.f32.mrf.mxu1  ;;  %v2725_v44 = vmul.f32 %v2717_v16, %v2717_v16  ;;  %v2135_v16 = vpop.f32.mrf.mxu0 }
 0x31b   : > { %1738 = vst.msk [vmem:[#allocation3 + $0x8] sm:$0xf] %vm9896_vm4, %v7626_v26  ;;  %v2229_v26 = vsel %vm9901_vm2, %v2228_v4, %v7620_v32  ;;  %v7710_v54 = vadd.f32 %v2705_v49, %v2676_v27  ;;  %vm9899_vm4 = vcmask 1047559   ;;  %v7723_v27 = vsel %vm1102_vm5, %v2773_v46, %v2772_v20 }
 0x31c   : > { %v2143_v58 = vsub.f32 %v7700_v38, %v7422_v43  ;;  %v2265_v20 = vsel %vm9900_vm0, %v2264_v37, %v2263_v5  ;;  %v2230_v49 = vrot.slane %v7679_v42, 6 }
 0x31d   : > { %v2718_v28 = vsub.f32 %v7710_v54, %v7422_v43  ;;  %v2220_v43 = vsel %vm9900_vm0, %v2219_v31, %v2218_v17  ;;  %v2286_v17 = vrot.slane %v7659_v18, 4 }
 0x31e   : > { %v2151_v5 = vmul.f32 %v2143_v58, %v2143_v58  ;;  %v2231_v14 = vsel %vm9900_vm0, %v2230_v49, %v2229_v26 }
 0x31f   : > { %v2726_v46 = vmul.f32 %v2718_v28, %v2718_v28 }
 0x320   : > { %v2104_v11 = vpop.f32.mrf.mxu3 }
 0x321   : > { %v7728_v55 = vadd.f32 %v2133_v19, %v2104_v11  ;;  %v1747_v29 = vpop.permute.xlu1 %1746  ;;  %v2161_v19 = vsel %vm447_vm3, %v2150_v63, 0.0  ;;  %v2163_v11 = vsel %vm447_vm3, %v2151_v5, 0.0  ;;  %v2681_v63 = vpop.f32.mrf.mxu2  ;;  %v2738_v28 = vsel %vm447_vm3, %v2726_v46, 0.0 }
 0x322   : > { %1749 = vst.msk [vmem:[#allocation3 + $0x8] sm:$0xf] %vm809_vm11, %v1747_v29  ;;  %v2708_v13 = vpop.f32.mrf.mxu1  ;;  %v2162_v22 = vadd.f32 %v2161_v19, %v2160_v8  ;;  %v2287_v19 = vsel %vm9901_vm2, %v2286_v17, %v2285_v57 }
 0x323   : > { %v2144_v52 = vsub.f32 %v7728_v55, %v7452_v62  ;;  %v7738_v56 = vadd.f32 %v2708_v13, %v2679_v41  ;;  %v2266_v34 = vsel %vm9899_vm4, %v7728_v55, %v2265_v20  ;;  %v2221_v15 = vrot.slane %v7728_v55, 4 }
 0x324   : > { %2267 = vrot.lane.b32.xlu1 %v2266_v34, %s6101_s24  ;;  %v2197_v4 = vrot.slane %v7728_v55, 2  ;;  %v2736_v41 = vsel %vm447_vm3, %v2725_v44, 0.0  ;;  %v2254_v29 = vrot.slane %v7728_v55, 7  ;;  %v2232_v13 = vrot.slane %v7728_v55, 5 }
 0x325   : > { %v2719_v39 = vsub.f32 %v7738_v56, %v7452_v62  ;;  %v2222_v50 = vsel %vm9899_vm4, %v2221_v15, %v2220_v43  ;;  %v2152_v37 = vmul.f32 %v2144_v52, %v2144_v52  ;;  %v2209_v62 = vrot.slane %v7728_v55, 3 }
 0x326   : > { %2223 = vrot.lane.b32.xlu0 %v2222_v50, %s6095_s23  ;;  %v2198_v40 = vsel %vm9899_vm4, %v2197_v4, %v2196_v3  ;;  %v2737_v34 = vadd.f32 %v2736_v41, %v2735_v45  ;;  %v2164_v15 = vadd.f32 %v2163_v11, %v2162_v22  ;;  %v2288_v44 = vrot.slane %v7700_v38, 3 }
 0x327   : > { %2199 = vrot.lane.b32.xlu2 %v2198_v40, %s6092_s21  ;;  %v2727_v31 = vmul.f32 %v2719_v39, %v2719_v39  ;;  %v2165_v26 = vsel %vm447_vm3, %v2152_v37, 0.0  ;;  %v2210_v52 = vsel %vm9899_vm4, %v2209_v62, %v2208_v35  ;;  %v2785_v43 = vrot.slane %v7697_v24, 1 }
 0x328   : > { %v2106_v51 = vpop.f32.mrf.mxu3  ;;  %v2255_v39 = vsel %vm9899_vm4, %v2254_v29, %v2253_v0  ;;  %v2739_v50 = vadd.f32 %v2738_v28, %v2737_v34  ;;  %v2166_v3 = vadd.f32 %v2165_v26, %v2164_v15  ;;  %v2233_v8 = vsel %vm9899_vm4, %v2232_v13, %v2231_v14 }
 0x329   : > { %v7765_v33 = vadd.f32 %v2135_v16, %v2106_v51  ;;  %v1758_v58 = vpop.permute.xlu1 %1757  ;;  %v2740_v4 = vsel %vm447_vm3, %v2727_v31, 0.0  ;;  %v2243_v46 = vrot.slane %v7728_v55, 6  ;;  %v2242_v41 = vsel %vm9900_vm0, %v2241_v2, %v7706_v47 }
 0x32a   : > { %1760 = vst.msk [vmem:[#allocation3 + $0x8] sm:$0xf] %vm884_vm9, %v1758_v58  ;;  %v2710_v59 = vpop.f32.mrf.mxu1  ;;  %v2741_v37 = vadd.f32 %v2740_v4, %v2739_v50  ;;  %v2786_v0 = vsel %vm1104_vm6, %v2785_v43, %v7714_v23  ;;  %v2299_v14 = vrot.slane %v7700_v38, 4  ;;  %v2764_v11 = vrot.slane %v7697_v24, 7 }
 0x32b   : > { %v2145_v20 = vsub.f32 %v7765_v33, %v7491_v60  ;;  %v7775_v30 = vadd.f32 %v2710_v59, %v2681_v63  ;;  %v2290_v16 = vrot.slane %v7765_v33, 2  ;;  %v2244_v31 = vsel %vm9899_vm4, %v2243_v46, %v2242_v41 }
 0x32c   : > { %2211 = vrot.lane.b32.xlu1 %v2210_v52, %s6093_s22  ;;  %v2289_v47 = vsel %vm9900_vm0, %v2288_v44, %v2287_v19  ;;  %v2787_v58 = vsel %vm1106_vm8, %v7738_v56, %v2786_v0  ;;  %v2776_v29 = vrot.slane %v7738_v56, 7  ;;  %v2826_v22 = vrot.slane %v7643_v53, 6 }
 0x32d   : > { %v2153_v49 = vmul.f32 %v2145_v20, %v2145_v20  ;;  %v2720_v5 = vsub.f32 %v7775_v30, %v7491_v60  ;;  %v2297_v60 = vrot.slane %v7659_v18, 5  ;;  %v2828_v23 = vrot.slane %v7697_v24, 5 }
 0x32e   : > { %2256 = vrot.lane.b32.xlu0 %v2255_v39, %s6099_s19  ;;  %v2291_v59 = vsel %vm9899_vm4, %v2290_v16, %v2289_v47  ;;  %v2830_v13 = vrot.slane %v7738_v56, 4  ;;  %v2827_v2 = vsel %vm1102_vm5, %v2826_v22, %v2825_v10  ;;  %v2900_v26 = vrot.slane %v7628_v1, 6 }
 0x32f   : > { %v2167_v40 = vsel %vm447_vm3, %v2153_v49, 0.0  ;;  %v2728_v45 = vmul.f32 %v2720_v5, %v2720_v5  ;;  %2234 = vrot.lane.b32.xlu2 %v2233_v8, %s6097_s26  ;;  %v2901_v20 = vrot.slane %v7664_v7, 5  ;;  %v2903_v52 = vrot.slane %v7710_v54, 4 }
 0x330   : > { %v2168_v62 = vadd.f32 %v2167_v40, %v2166_v3  ;;  %v2829_v44 = vsel %vm1104_vm6, %v2828_v23, %v2827_v2  ;;  %v2848_v43 = vrot.slane %v7628_v1, 1  ;;  %v2766_v4 = vrot.slane %v7738_v56, 6 }
 0x331   : > { %v2742_v51 = vsel %vm447_vm3, %v2728_v45, 0.0  ;;  %v1769_v35 = vpop.permute.xlu1 %1768  ;;  %v7825_v10 = vsel %vm1106_vm8, %v2830_v13, %v2829_v44  ;;  %v2902_v49 = vsel %vm1102_vm5, %v2901_v20, %v2900_v26  ;;  %v2850_v5 = vrot.slane %v7710_v54, 7 }
 0x332   : > { %v2169_v57 = vrot.slane %v2168_v62, 4  ;;  %v2743_v17 = vadd.f32 %v2742_v51, %v2741_v37  ;;  %1771 = vst.msk [vmem:[#allocation3 + $0x8] sm:$0xf] %vm959_vm7, %v1769_v35  ;;  %v7830_v3 = vsel %vm1104_vm6, %v2903_v52, %v2902_v49  ;;  %v2849_v8 = vsel %vm1102_vm5, %v7664_v7, %v2848_v43 }
 0x333   : > { %v7835_v46 = vsel %vm1104_vm6, %v2850_v5, %v2849_v8  ;;  %v2911_v40 = vrot.slane %v7628_v1, 7  ;;  %v2912_v45 = vrot.slane %v7664_v7, 6  ;;  %v2914_v19 = vrot.slane %v7710_v54, 5 }
 0x334   : > { %v2170_v63 = vadd.f32 %v2169_v57, %v2168_v62  ;;  %v2744_v28 = vrot.slane %v2743_v17, 4  ;;  %2245 = vrot.lane.b32.xlu1 %v2244_v31, %s6098_s11  ;;  %v2775_v41 = vsel %vm1104_vm6, %v7697_v24, %v7723_v27  ;;  %v2301_v16 = vrot.slane %v7765_v33, 3 }
 0x335   : > { %v2777_v51 = vsel %vm1106_vm8, %v2776_v29, %v2775_v41  ;;  %v2298_v35 = vsel %vm9901_vm2, %v2297_v60, %v2296_v61  ;;  %v2763_v0 = vsel %vm1102_vm5, %v7643_v53, %v2762_v48  ;;  %v2913_v57 = vsel %vm1102_vm5, %v2912_v45, %v2911_v40 }
 0x336   : > { %v2171_v34 = vrot.slane %v2170_v63, 2  ;;  %v2745_v15 = vadd.f32 %v2744_v28, %v2743_v17  ;;  %2788 = vrot.lane.b32.xlu0 %v2787_v58, %s6095_s23  ;;  %v2765_v27 = vsel %vm1104_vm6, %v2764_v11, %v2763_v0  ;;  %v2915_v47 = vsel %vm1104_vm6, %v2914_v19, %v2913_v57 }
 0x337   : > { %2292 = vrot.lane.b32.xlu2 %v2291_v59, %s6092_s21  ;;  %v2300_v58 = vsel %vm9900_vm0, %v2299_v14, %v2298_v35  ;;  %v2767_v29 = vsel %vm1106_vm8, %v2766_v4, %v2765_v27  ;;  %v2804_v61 = vrot.slane %v7643_v53, 4  ;;  %v2806_v14 = vrot.slane %v7697_v24, 3 }
 0x338   : > { %v2172_v39 = vadd.f32 %v2171_v34, %v2170_v63  ;;  %v2746_v50 = vrot.slane %v2745_v15, 2  ;;  %v2302_v11 = vsel %vm9899_vm4, %v2301_v16, %v2300_v58  ;;  %v2803_v22 = vrot.slane %v7622_v25, 5 }
 0x339   : > { %v2808_v23 = vrot.slane %v7738_v56, 2  ;;  %v2815_v63 = vrot.slane %v7643_v53, 5  ;;  %v2308_v59 = vrot.slane %v7659_v18, 6  ;;  %v2349_v13 = vrot.slane %v7659_v18, 2 }
 0x33a   : > { %v2173_v37 = vrot.slane %v2172_v39, 1  ;;  %v2747_v62 = vadd.f32 %v2746_v50, %v2745_v15  ;;  %v2805_v2 = vsel %vm1102_vm5, %v2804_v61, %v2803_v22  ;;  %v2310_v26 = vrot.slane %v7700_v38, 5 }
 0x33b   : > { %v2814_v20 = vrot.slane %v7622_v25, 6  ;;  %v2819_v52 = vrot.slane %v7738_v56, 3  ;;  %v2807_v34 = vsel %vm1104_vm6, %v2806_v14, %v2805_v2  ;;  %v2307_v15 = vrot.slane %v7624_v6, 7 }
 0x33c   : > { %v2174_v17 = vadd.f32 %v2173_v37, %v2172_v39  ;;  %v2748_v31 = vrot.slane %v2747_v62, 1  ;;  %2778 = vrot.lane.b32.xlu1 %v2777_v51, %s6093_s22  ;;  %v2312_v44 = vrot.slane %v7765_v33, 4  ;;  %v2348_v43 = vrot.slane %v7624_v6, 3 }
 0x33d   : > { %v2809_v4 = vsel %vm1106_vm8, %v2808_v23, %v2807_v34  ;;  %v2816_v49 = vsel %vm1102_vm5, %v2815_v63, %v2814_v20  ;;  %v2309_v5 = vsel %vm9901_vm2, %v2308_v59, %v2307_v15  ;;  %v2868_v8 = vrot.slane %v7628_v1, 3 }
 0x33e   : > { %v2988_v48 = vsel %vm9904_vm15, %v7641_v12, %v2174_v17  ;;  %v2749_v60 = vadd.f32 %v2748_v31, %v2747_v62  ;;  %2768 = vrot.lane.b32.xlu0 %v2767_v29, %s6092_s21  ;;  %v2817_v12 = vrot.slane %v7697_v24, 4  ;;  %v2350_v50 = vsel %vm9901_vm2, %v2349_v13, %v2348_v43 }
 0x33f   : > { %2303 = vrot.lane.b32.xlu2 %v2302_v11, %s6093_s22  ;;  %v2311_v40 = vsel %vm9900_vm0, %v2310_v26, %v2309_v5  ;;  %v2351_v19 = vrot.slane %v7700_v38, 1  ;;  %v2180_v37 = vrot.slane %v7639_v9, 3  ;;  %v2869_v41 = vrot.slane %v7664_v7, 2 }
 0x340   : > { %v2989_v28 = vsel %vm893_vm13, %v2988_v48, %v2749_v60  ;;  %v2818_v39 = vsel %vm1104_vm6, %v2817_v12, %v2816_v49  ;;  %v2313_v62 = vsel %vm9899_vm4, %v2312_v44, %v2311_v40  ;;  %v2852_v16 = vrot.slane %v7775_v30, 6 }
 0x341   : > { %2991 = vst.msk [vmem:[%s7864_s14] sm:$0x7] %vm9897_vm1, %v2989_v28  ;;  %v2820_v45 = vsel %vm1106_vm8, %v2819_v52, %v2818_v39  ;;  %v2183_v51 = vrot.slane %v7679_v42, 2  ;;  %v2318_v35 = vrot.slane %v7659_v18, 7  ;;  %v2916_v0 = vrot.slane %v7775_v30, 4 }
 0x342   : > { %v2179_v57 = vrot.slane %v7620_v32, 4  ;;  %v2754_v9 = vrot.slane %v7643_v53, 7  ;;  %v2320_v17 = vrot.slane %v7700_v38, 6  ;;  %v2871_v31 = vrot.slane %v7710_v54, 1 }
 0x343   : > { %v7914_v27 = vsel %vm1106_vm8, %v2852_v16, %v7835_v46  ;;  %v2756_v42 = vrot.slane %v7697_v24, 6  ;;  %v2352_v58 = vsel %vm9900_vm0, %v2351_v19, %v2350_v50  ;;  %v7919_v29 = vsel %vm1106_vm8, %v2916_v0, %v2915_v47 }
 0x344   : > { %2810 = vrot.lane.b32.xlu1 %v2809_v4, %s6098_s11  ;;  %v2182_v61 = vsel %vm9901_vm2, %v2180_v37, %v2179_v57  ;;  %v2186_v32 = vrot.slane %v7728_v55, 1  ;;  %v2353_v48 = vsel %vm9899_vm4, %v7765_v33, %v2352_v58  ;;  %v2322_v60 = vrot.slane %v7765_v33, 5 }
 0x345   : > { %v2870_v11 = vsel %vm1102_vm5, %v2869_v41, %v2868_v8  ;;  %v2185_v46 = vsel %vm9900_vm0, %v2183_v51, %v2182_v61  ;;  %vm9898_vm1 = vcmask 130052   ;;  %v2758_v22 = vrot.slane %v7738_v56, 5 }
 0x346   : > { %2821 = vrot.lane.b32.xlu0 %v2820_v45, %s6099_s19  ;;  %v2188_v14 = vsel %vm9899_vm4, %v2186_v32, %v2185_v46  ;;  %v2755_v47 = vsel %vm1102_vm5, %v2754_v9, %v7622_v25  ;;  %v2319_v55 = vsel %vm9901_vm2, %v2318_v35, %v7624_v6  ;;  %v2872_v23 = vsel %vm1104_vm6, %v2871_v31, %v2870_v11 }
 0x347   : > { %2314 = vrot.lane.b32.xlu2 %v2313_v62, %s6095_s23  ;;  %2191 = vst.msk [vmem:[#allocation3] sm:$0xf0] %vm9898_vm1, %v2188_v14  ;;  %v2757_v63 = vsel %vm1104_vm6, %v2756_v42, %v2755_v47  ;;  %v2321_v28 = vsel %vm9900_vm0, %v2320_v17, %v2319_v55  ;;  %v2873_v59 = vsel %vm1106_vm8, %v7775_v30, %v2872_v23  ;;  %v2277_v12 = vrot.slane %v7659_v18, 3 }
 0x348   : > { %v2759_v13 = vsel %vm1106_vm8, %v2758_v22, %v2757_v63  ;;  %v2323_v2 = vsel %vm9899_vm4, %v2322_v60, %v2321_v28  ;;  %v2279_v26 = vrot.slane %v7700_v38, 2  ;;  %v2859_v20 = vrot.slane %v7664_v7, 1 }
 0x349   : > { %2761 = vst.msk [vmem:[#allocation3 + $0x10] sm:$0xf] %vm9903_vm10, %v2759_v13  ;;  %v2276_v52 = vrot.slane %v7624_v6, 4  ;;  %v2840_v34 = vrot.slane %v7664_v7, 7  ;;  %v2858_v15 = vrot.slane %v7628_v1, 2  ;;  %v2842_v44 = vrot.slane %v7710_v54, 6 }
 0x34a   : > { %v2330_v43 = vrot.slane %v7700_v38, 7  ;;  %v2862_v4 = vrot.slane %v7775_v30, 7  ;;  %v2281_v5 = vrot.slane %v7765_v33, 1  ;;  %v2328_v39 = vrot.slane %v7624_v6, 1 }
 0x34b   : > { %v2278_v49 = vsel %vm9901_vm2, %v2277_v12, %v2276_v52  ;;  %v2332_v50 = vrot.slane %v7765_v33, 6  ;;  %v2860_v40 = vsel %vm1102_vm5, %v2859_v20, %v2858_v15  ;;  %v2841_v19 = vsel %vm1102_vm5, %v2840_v34, %v7628_v1 }
 0x34c   : > { %2354 = vrot.lane.b32.xlu1 %v2353_v48, %s6101_s24  ;;  %v2280_v8 = vsel %vm9900_vm0, %v2279_v26, %v2278_v49  ;;  %v2844_v37 = vrot.slane %v7775_v30, 5  ;;  %v2329_v62 = vsel %vm9901_vm2, %v7659_v18, %v2328_v39  ;;  %v2861_v41 = vsel %vm1104_vm6, %v7710_v54, %v2860_v40 }
 0x34d   : > { %v2282_v45 = vsel %vm9899_vm4, %v2281_v5, %v2280_v8  ;;  %v2843_v16 = vsel %vm1104_vm6, %v2842_v44, %v2841_v19  ;;  %v2331_v51 = vsel %vm9900_vm0, %v2330_v43, %v2329_v62  ;;  %v2863_v35 = vsel %vm1106_vm8, %v2862_v4, %v2861_v41  ;;  %v8038_v44 = vld [vmem:[%s6174_s20 + $0x40] sm:$0xff]  ;;  %v8042_v4 = vld [vmem:[%s6174_s20 + $0x48] sm:$0xff] }
 0x34e   : > { %2874 = vrot.lane.b32.xlu0 %v2873_v59, %s6095_s23  ;;  %2284 = vst.msk [vmem:[#allocation3 + $0x8] sm:$0xf0] %vm9898_vm1, %v2282_v45  ;;  %v2845_v0 = vsel %vm1106_vm8, %v2844_v37, %v2843_v16  ;;  %v2333_v57 = vsel %vm9899_vm4, %v2332_v50, %v2331_v51  ;;  %v2879_v9 = vrot.slane %v7664_v7, 3  ;;  %v2339_v17 = vrot.slane %v7659_v18, 1  ;;  %v9992_v50 = vld [vmem:[#allocation5_spill] sm:$0xff]  ;;  %v8049_v62 = vld [vmem:[%s6174_s20 + $0x60] sm:$0xff] }
 0x34f   : > { %2324 = vrot.lane.b32.xlu2 %v2323_v2, %s6097_s26  ;;  %2847 = vst.msk [vmem:[#allocation3 + $0x18] sm:$0xf] %vm9903_vm10, %v2845_v0  ;;  %v2881_v31 = vrot.slane %v7710_v54, 2  ;;  %v2878_v42 = vrot.slane %v7628_v1, 4  ;;  %v2883_v58 = vrot.slane %v7775_v30, 1  ;;  %v2338_v61 = vrot.slane %v7624_v6, 2 }
 0x350   : > { %v2342_v32 = vrot.slane %v7765_v33, 7  ;;  %v2890_v6 = vrot.slane %v7664_v7, 4  ;;  %v2793_v33 = vrot.slane %v7643_v53, 3  ;;  %v2892_v22 = vrot.slane %v7710_v54, 3  ;;  %v8053_v16 = vld [vmem:[%s6174_s20 + $0x50] sm:$0xff] }
 0x351   : > { %v2880_v48 = vsel %vm1102_vm5, %v2879_v9, %v2878_v42  ;;  %v2340_v60 = vsel %vm9901_vm2, %v2339_v17, %v2338_v61  ;;  %v2795_v47 = vrot.slane %v7697_v24, 2  ;;  %v2889_v55 = vrot.slane %v7628_v1, 5 }
 0x352   : > { %v2882_v11 = vsel %vm1104_vm6, %v2881_v31, %v2880_v48  ;;  %v2341_v46 = vsel %vm9900_vm0, %v7700_v38, %v2340_v60  ;;  %v2894_v38 = vrot.slane %v7775_v30, 2  ;;  %v2792_v23 = vrot.slane %v7622_v25, 4  ;;  %v8074_v60 = vld [vmem:[%s6174_s20 + $0x78] sm:$0xff] }
 0x353   : > { %v2884_v18 = vsel %vm1106_vm8, %v2883_v58, %v2882_v11  ;;  %v2343_v14 = vsel %vm9899_vm4, %v2342_v32, %v2341_v46  ;;  %v2797_v63 = vrot.slane %v7738_v56, 1  ;;  %v2891_v28 = vsel %vm1102_vm5, %v2890_v6, %v2889_v55  ;;  %v8070_v32 = vld [vmem:[%s6174_s20 + $0x70] sm:$0xff]  ;;  %v438_v55 = vld [vmem:[%s9842_s6] sm:$0xff] }
 0x354   : > { %v2794_v59 = vsel %vm1102_vm5, %v2793_v33, %v2792_v23  ;;  %v2893_v7 = vsel %vm1104_vm6, %v2892_v22, %v2891_v28  ;;  %v2905_v25 = vrot.slane %v7775_v30, 3  ;;  %vm9902_vm1 = vcmask 261252  }
 0x355   : > { %v2796_v53 = vsel %vm1104_vm6, %v2795_v47, %v2794_v59  ;;  %v2895_v54 = vsel %vm1106_vm8, %v2894_v38, %v2893_v7  ;;  %vm9907_vm4 = vcmask 392452   ;;  %vm9905_vm0 = vcmask 523652  }
 0x356   : > { %2864 = vrot.lane.b32.xlu0 %v2863_v35, %s6093_s22  ;;  %v2798_v24 = vsel %vm1106_vm8, %v2797_v63, %v2796_v53  ;;  %v2906_v1 = vsel %vm1106_vm8, %v2905_v25, %v7830_v3  ;;  %vm9906_vm2 = vcmask 654852   ;;  %vm9909_vm10 = vcmask 917252   ;;  %v8057_v35 = vld [vmem:[%s6174_s20 + $0x58] sm:$0xff]  ;;  %v9998_v63 = vld [vmem:[#allocation6_spill] sm:$0xff] }
 0x357   : > { %2334 = vrot.lane.b32.xlu2 %v2333_v57, %s6098_s11  ;;  %vm9908_vm15 = vcmask 1048452   ;;  %v3064_v43 = vrot.slane %v8038_v44, 1  ;;  %v3066_v49 = vrot.slane %v8042_v4, 1  ;;  %v3072_v41 = vrot.slane %v8049_v62, 1 }
 0x358   : > { %v3068_v51 = vrot.slane %v8053_v16, 1  ;;  %v3070_v0 = vrot.slane %v8057_v35, 1  ;;  %v3076_v48 = vrot.slane %v8070_v32, 1  ;;  %v3078_v11 = vrot.slane %v8074_v60, 1 }
 0x359   : > { %v3140_v47 = vrot.slane %v8053_v16, 2  ;;  %v3136_v38 = vrot.slane %v8038_v44, 2  ;;  %v3138_v23 = vrot.slane %v8042_v4, 2 }
 0x35e   : > { %2885 = vrot.lane.b32.xlu0 %v2884_v18, %s6097_s26 }
 0x35f   : > { %2344 = vrot.lane.b32.xlu2 %v2343_v14, %s6099_s19 }
 0x366   : > { %2896 = vrot.lane.b32.xlu0 %v2895_v54, %s6098_s11 }
 0x367   : > { %2799 = vrot.lane.b32.xlu2 %v2798_v24, %s6097_s26 }
 0x36e   : > { %2907 = vrot.lane.b32.xlu0 %v2906_v1, %s6099_s19  ;;  %v8105_v1 = vld [vmem:[%s9841_s5] sm:$0xff] }
 0x36f   : > { %2832 = vrot.lane.b32.xlu2 %v7825_v10, %s6101_s24 }
 0x376   : > { %2918 = vrot.lane.b32.xlu0 %v7919_v29, %s6101_s24 }
 0x377   : > { %2854 = vrot.lane.b32.xlu2 %v7914_v27, %s6092_s21 }
 0x37e   : > { %1779 = vrot.lane.b32.xlu0 %v7576_v21, %s6101_s24 }
 0x37f   : > { %2938 = vperm.xlu2 %5795, %v438_v55  }
 0x381   : > { %v2200_v56 = vpop.permute.xlu2 %2199 }
 0x382   : > { %2203 = vst.msk [vmem:[#allocation3] sm:$0xf0] %vm9902_vm1, %v2200_v56 }
 0x389   : > { %v2235_v30 = vpop.permute.xlu2 %2234 }
 0x391   : > { %v2293_v3 = vpop.permute.xlu2 %2292 }
 0x392   : > { %2295 = vst.msk [vmem:[#allocation3 + $0x8] sm:$0xf0] %vm9902_vm1, %v2293_v3  ;;  %vm9910_vm1 = vcmask 786052  }
 0x396   : > { %v2268_v12 = vpop.permute.xlu1 %2267 }
 0x398   : > { %v2224_v10 = vpop.permute.xlu0 %2223 }
 0x399   : > { %v2304_v13 = vpop.permute.xlu2 %2303 }
 0x39a   : > { %2306 = vst.msk [vmem:[#allocation3 + $0x8] sm:$0xf0] %vm9907_vm4, %v2304_v13 }
 0x39e   : > { %v2212_v29 = vpop.permute.xlu1 %2211 }
 0x39f   : > { %2215 = vst.msk [vmem:[#allocation3] sm:$0xf0] %vm9907_vm4, %v2212_v29  ;;  %v2927_v29 = vld.sshfl [vmem:[#allocation1 + $0x8] sm:$0xff pattern:$0x75316420] }
 0x3a0   : > { %2227 = vst.msk [vmem:[#allocation3] sm:$0xf0] %vm9905_vm0, %v2224_v10  ;;  %v2257_v21 = vpop.permute.xlu0 %2256  ;;  %v8117_v10 = vld [vmem:[%s6174_s20 + $0x68] sm:$0xff] }
 0x3a1   : > { %v2315_v27 = vpop.permute.xlu2 %2314  ;;  %2238 = vst.msk [vmem:[#allocation3] sm:$0xf0] %vm9906_vm2, %v2235_v30  ;;  %v10001_v30 = vld [vmem:[#allocation13_spill] sm:$0xff]  ;;  %v3146_v13 = vrot.slane %v8117_v10, 2 }
 0x3a2   : > { %2317 = vst.msk [vmem:[#allocation3 + $0x8] sm:$0xf0] %vm9905_vm0, %v2315_v27  ;;  %vm9990_vm0 = vcmask 519552   ;;  %5796 = vset.pattern.permute.xlu2 %v10001_v30 }
 0x3a3   : > { %2931 = vst [vmem:[#allocation3 + $0x18] sm:$0xf0] %v2927_v29 }
 0x3a6   : > { %v2246_v2 = vpop.permute.xlu1 %2245 }
 0x3a7   : > { %2249 = vst.msk [vmem:[#allocation3] sm:$0xf0] %vm9910_vm1, %v2246_v2  ;;  %v3208_v2 = vrot.slane %v8038_v44, 3 }
 0x3a8   : > { %2260 = vst.msk [vmem:[#allocation3] sm:$0xf0] %vm9909_vm10, %v2257_v21  ;;  %v2789_v26 = vpop.permute.xlu0 %2788 }
 0x3a9   : > { %v2325_v20 = vpop.permute.xlu2 %2324  ;;  %2271 = vst.msk [vmem:[#allocation3] sm:$0xf0] %vm9908_vm15, %v2268_v12  ;;  %v3144_v12 = vrot.slane %v8049_v62, 2 }
 0x3aa   : > { %2327 = vst.msk [vmem:[#allocation3 + $0x8] sm:$0xf0] %vm9906_vm2, %v2325_v20  ;;  %vm9991_vm2 = vcmask 1046528  }
 0x3ab   : > { %v3067_v39 = vsel %vm9991_vm2, %v3064_v43, %v3066_v49  ;;  %vm9993_vm4 = vmmov %vm9991_vm2 }
 0x3ac   : > { %v3065_v8 = vsel %vm9993_vm4, %v9992_v50, %v3064_v43  ;;  %v3089_v45 = vpack.c.bf16 %v3067_v39, %v3067_v39  ;;  %v3004_v39 = vsel %vm447_vm3, %v8038_v44, 0.0 }
 0x3ad   : > { %v3088_v19 = vpack.c.bf16 %v3065_v8, %v3065_v8 }
 0x3ae   : > { %v2779_v52 = vpop.permute.xlu1 %2778  ;;  %3106 = vrot.lane.b32.xlu1 %v3089_v45, %s6092_s21  ;;  %v3013_v45 = vsel %vm447_vm3, %v8053_v16, 0.0 }
 0x3af   : > { %3104 = vrot.lane.b32.xlu0 %v3088_v19, %s6092_s21  ;;  %v3014_v19 = vsel %vm447_vm3, %v8057_v35, 0.0 }
 0x3b0   : > { %v2769_v34 = vpop.permute.xlu0 %2768  ;;  %v2932_v56 = vld [vmem:[#allocation3] sm:$0xff] }
 0x3b1   : > { %v2335_v15 = vpop.permute.xlu2 %2334  ;;  %2771 = vst.msk [vmem:[#allocation3 + $0x10] sm:$0xf] %vm584_vm12, %v2769_v34  ;;  %v3148_v34 = vrot.slane %v8070_v32, 2 }
 0x3b2   : > { %2337 = vst.msk [vmem:[#allocation3 + $0x8] sm:$0xf0] %vm9910_vm1, %v2335_v15  ;;  %v3150_v15 = vrot.slane %v8074_v60, 2 }
 0x3b3   : > { %2781 = vst.msk [vmem:[#allocation3 + $0x10] sm:$0xf] %vm659_vm14, %v2779_v52 }
 0x3b4   : > { %2791 = vst.msk [vmem:[#allocation3 + $0x10] sm:$0xf] %vm9990_vm0, %v2789_v26  ;;  %vm9994_vm0 = vmmov %vm9991_vm2  ;;  %v3074_v26 = vrot.slane %v8117_v10, 1 }
 0x3b5   : > { %v3073_v57 = vsel %vm9994_vm0, %v9992_v50, %v3072_v41  ;;  %vm9995_vm2 = vmmov %vm9994_vm0  ;;  %v3077_v18 = vsel %vm9994_vm0, %v9992_v50, %v3076_v48 }
 0x3b6   : > { %v2811_v5 = vpop.permute.xlu1 %2810  ;;  %v3071_v9 = vsel %vm9995_vm2, %v3068_v51, %v3070_v0  ;;  %v3092_v31 = vpack.c.bf16 %v3073_v57, %v3073_v57  ;;  %vm9996_vm4 = vmmov %vm9994_vm0  ;;  %v3094_v6 = vpack.c.bf16 %v3077_v18, %v3077_v18  ;;  %vm9997_vm2 = vcmask 1044352  }
 0x3b7   : > { %v3091_v42 = vpack.c.bf16 %v3071_v9, %v3071_v9  ;;  %v3079_v46 = vsel %vm9996_vm4, %v3076_v48, %v3078_v11  ;;  %vm9999_vm4 = vcmask 1045504   ;;  %v3022_v0 = vsel %vm447_vm3, %v8049_v62, 0.0 }
 0x3b8   : > { %v2822_v40 = vpop.permute.xlu0 %2821  ;;  %3112 = vrot.lane.b32.xlu1 %v3092_v31, %s6092_s21  ;;  %v3095_v14 = vpack.c.bf16 %v3079_v46, %v3079_v46  ;;  %v3141_v28 = vsel %vm9999_vm4, %v9998_v63, %v3140_v47  ;;  %vm10000_vm0 = vmmov %vm9999_vm4  ;;  %vm10003_vm4 = vcmask 1046528   ;;  %v3023_v9 = vsel %vm447_vm3, %v8117_v10, 0.0 }
 0x3b9   : > { %v2345_v37 = vpop.permute.xlu2 %2344  ;;  %3110 = vrot.lane.b32.xlu0 %v3091_v42, %s6092_s21  ;;  %v3139_v59 = vsel %vm10000_vm0, %v3136_v38, %v3138_v23  ;;  %v3162_v7 = vpack.c.bf16 %v3141_v28, %v3141_v28  ;;  %v3069_v21 = vsel %vm10003_vm4, %v9992_v50, %v3068_v51  ;;  %v3147_v20 = vsel %vm10000_vm0, %v3144_v12, %v3146_v13  ;;  %v10005_v50 = vld [vmem:[#allocation7_spill] sm:$0xff] }
 0x3ba   : > { %2347 = vst.msk [vmem:[#allocation3 + $0x8] sm:$0xf0] %vm9909_vm10, %v2345_v37  ;;  %v3161_v53 = vpack.c.bf16 %v3139_v59, %v3139_v59  ;;  %v3090_v27 = vpack.c.bf16 %v3069_v21, %v3069_v21  ;;  %v3165_v43 = vpack.c.bf16 %v3147_v20, %v3147_v20  ;;  %v3015_v51 = vadd.f32 %v3014_v19, %v3013_v45 }
 0x3bb   : > { %v3032_v31 = vsel %vm447_vm3, %v8074_v60, 0.0  ;;  %v3024_v48 = vadd.f32 %v3023_v9, %v3022_v0  ;;  %v3218_v45 = vrot.slane %v8117_v10, 3 }
 0x3bc   : > { %3108 = vrot.lane.b32.xlu2 %v3090_v27, %s6092_s21 }
 0x3bd   : > { %v3025_v55 = vrot.slane %v3024_v48, 4 }
 0x3be   : > { %v2355_v17 = vpop.permute.xlu1 %2354 }
 0x3bf   : > { %2357 = vst.msk [vmem:[#allocation3 + $0x8] sm:$0xf0] %vm9908_vm15, %v2355_v17  ;;  %v3031_v17 = vsel %vm447_vm3, %v8070_v32, 0.0 }
 0x3c0   : > { %v2875_v58 = vpop.permute.xlu0 %2874  ;;  %3118 = vrot.lane.b32.xlu1 %v3095_v14, %s6092_s21  ;;  %v3033_v11 = vadd.f32 %v3032_v31, %v3031_v17  ;;  %v3212_v14 = vrot.slane %v8053_v16, 3 }
 0x3c1   : > { %v2800_v61 = vpop.permute.xlu2 %2799  ;;  %3116 = vrot.lane.b32.xlu0 %v3094_v6, %s6092_s21  ;;  %v3214_v6 = vrot.slane %v8057_v35, 3 }
 0x3c2   : > { %2802 = vst.msk [vmem:[#allocation3 + $0x10] sm:$0xf] %vm809_vm11, %v2800_v61  ;;  %v3016_v61 = vrot.slane %v3015_v51, 4  ;;  %v3034_v23 = vrot.slane %v3033_v11, 4 }
 0x3c3   : > { %2813 = vst.msk [vmem:[#allocation3 + $0x10] sm:$0xf] %vm884_vm9, %v2811_v5  ;;  %v3075_v5 = vsel %vm10003_vm4, %v3072_v41, %v3074_v26 }
 0x3c4   : > { %2824 = vst.msk [vmem:[#allocation3 + $0x10] sm:$0xf] %vm959_vm7, %v2822_v40  ;;  %v3005_v40 = vsel %vm447_vm3, %v8042_v4, 0.0  ;;  %v3093_v57 = vpack.c.bf16 %v3075_v5, %v3075_v5  ;;  %v3216_v5 = vrot.slane %v8049_v62, 3 }
 0x3c5   : > { %v3006_v41 = vadd.f32 %v3005_v40, %v3004_v39 }
 0x3c6   : > { %3114 = vrot.lane.b32.xlu2 %v3093_v57, %s6092_s21 }
 0x3c8   : > { %v2865_v33 = vpop.permute.xlu0 %2864  ;;  %3180 = vrot.lane.b32.xlu1 %v3162_v7, %s6093_s22 }
 0x3c9   : > { %v2833_v22 = vpop.permute.xlu2 %2832  ;;  %3178 = vrot.lane.b32.xlu0 %v3161_v53, %s6093_s22  ;;  %v3026_v53 = vadd.f32 %v3025_v55, %v3024_v48 }
 0x3ca   : > { %2835 = vst.msk [vmem:[#allocation3 + $0x10] sm:$0xf] %vm9997_vm2, %v2833_v22  ;;  %vm10002_vm2 = vcmask 519552   ;;  %v3017_v22 = vadd.f32 %v3016_v61, %v3015_v51  ;;  %v10011_v51 = vld [vmem:[#allocation8_spill] sm:$0xff] }
 0x3cc   : > { %v3018_v7 = vrot.slane %v3017_v22, 2 }
 0x3d0   : > { %v2886_v54 = vpop.permute.xlu0 %2885  ;;  %3186 = vrot.lane.b32.xlu1 %v3165_v43, %s6093_s22 }
 0x3d1   : > { %v2855_v24 = vpop.permute.xlu2 %2854  ;;  %v2934_v25 = vld [vmem:[#allocation3 + $0x10] sm:$0xff] }
 0x3d2   : > { %2857 = vst.msk [vmem:[#allocation3 + $0x18] sm:$0xf] %vm584_vm12, %v2855_v24  ;;  %2958 = vmatpush.msra.mxu3 %v2934_v25 }
 0x3d3   : > { %2867 = vst.msk [vmem:[#allocation3 + $0x18] sm:$0xf] %vm659_vm14, %v2865_v33 }
 0x3d4   : > { %2877 = vst.msk [vmem:[#allocation3 + $0x18] sm:$0xf] %vm10002_vm2, %v2875_v58  ;;  %2959 = vmatpush.msra.mxu3 %v2932_v56  ;;  %vm10004_vm2 = vmmov %vm10000_vm0  ;;  %vm10006_vm0 = vcmask 1044480   ;;  %v3007_v58 = vrot.slane %v3006_v41, 4 }
 0x3d5   : > { %2888 = vst.msk [vmem:[#allocation3 + $0x18] sm:$0xf] %vm809_vm11, %v2886_v54  ;;  %5653 = vmatmul.msk.f32.vlgmr.msra.gmra.mxu3 %vm447_vm3, %v8105_v1  ;;  %v3145_v52 = vsel %vm10004_vm2, %v9998_v63, %v3144_v12  ;;  %v3209_v8 = vsel %vm10006_vm0, %v10005_v50, %v3208_v2  ;;  %v3151_v37 = vsel %vm10004_vm2, %v3148_v34, %v3150_v15  ;;  %vm10007_vm4 = vmmov %vm10004_vm2  ;;  %v3027_v12 = vrot.slane %v3026_v53, 2 }
 0x3d6   : > { %v3164_v49 = vpack.c.bf16 %v3145_v52, %v3145_v52  ;;  %v3232_v46 = vpack.c.bf16 %v3209_v8, %v3209_v8  ;;  %v3167_v18 = vpack.c.bf16 %v3151_v37, %v3151_v37  ;;  %v3008_v33 = vadd.f32 %v3007_v58, %v3006_v41  ;;  %vm10008_vm2 = vmmov %vm10006_vm0 }
 0x3d7   : > { %v3137_v28 = vsel %vm10007_vm4, %v9998_v63, %v3136_v38  ;;  %v3035_v54 = vadd.f32 %v3034_v23, %v3033_v11  ;;  %v3215_v24 = vsel %vm10006_vm0, %v3212_v14, %v3214_v6  ;;  %v3213_v25 = vsel %vm10008_vm2, %v10005_v50, %v3212_v14  ;;  %v10016_v23 = vld [vmem:[#allocation9_spill] sm:$0xff] }
 0x3d8   : > { %v2897_v3 = vpop.permute.xlu0 %2896  ;;  %3184 = vrot.lane.b32.xlu0 %v3164_v49, %s6093_s22  ;;  %v3009_v59 = vrot.slane %v3008_v33, 2  ;;  %3248 = vrot.lane.b32.xlu1 %v3232_v46, %s6095_s23  ;;  %v3160_v29 = vpack.c.bf16 %v3137_v28, %v3137_v28  ;;  %v3142_v38 = vrot.slane %v8057_v35, 2  ;;  %v3028_v20 = vadd.f32 %v3027_v12, %v3026_v53 }
 0x3d9   : > { %2899 = vst.msk [vmem:[#allocation3 + $0x18] sm:$0xf] %vm884_vm9, %v2897_v3  ;;  %v3019_v3 = vadd.f32 %v3018_v7, %v3017_v22  ;;  %v3036_v13 = vrot.slane %v3035_v54, 2  ;;  %vm10009_vm4 = vcmask 1044352   ;;  %v3235_v15 = vpack.c.bf16 %v3215_v24, %v3215_v24 }
 0x3da   : > { %v3010_v56 = vadd.f32 %v3009_v59, %v3008_v33  ;;  %v3234_v43 = vpack.c.bf16 %v3213_v25, %v3213_v25  ;;  %v3220_v49 = vrot.slane %v8070_v32, 3  ;;  %v3029_v40 = vrot.slane %v3028_v20, 1  ;;  %3176 = vrot.lane.b32.xlu2 %v3160_v29, %s6093_s22 }
 0x3db   : > { %v3020_v26 = vrot.slane %v3019_v3, 1  ;;  %v3037_v52 = vadd.f32 %v3036_v13, %v3035_v54  ;;  %vm10010_vm0 = vcmask 1045504   ;;  %v3282_v14 = vrot.slane %v8042_v4, 4 }
 0x3dc   : > { %v3011_v27 = vrot.slane %v3010_v56, 1  ;;  %v3143_v37 = vsel %vm10010_vm0, %v3140_v47, %v3142_v38  ;;  %v3030_v41 = vadd.f32 %v3029_v40, %v3028_v20  ;;  %v3221_v9 = vsel %vm10008_vm2, %v10005_v50, %v3220_v49  ;;  %v6068_v40 = vld [vmem:[%s9838_s2 + $0x8] sm:$0xff] }
 0x3dd   : > { %v3021_v8 = vadd.f32 %v3020_v26, %v3019_v3  ;;  %v3038_v19 = vrot.slane %v3037_v52, 1  ;;  %v3163_v31 = vpack.c.bf16 %v3143_v37, %v3143_v37  ;;  %vm10013_vm0 = vcmask 1044352   ;;  %v10023_v37 = vld [vmem:[#allocation11_spill] sm:$0xff] }
 0x3de   : > { %v3012_v39 = vadd.f32 %v3011_v27, %v3010_v56  ;;  %v3042_v61 = vmul.f32 %v3030_v41, %v10011_v51  ;;  %v3238_v48 = vpack.c.bf16 %v3221_v9, %v3221_v9  ;;  %v3210_v54 = vrot.slane %v8042_v4, 3 }
 0x3df   : > { %v3041_v57 = vmul.f32 %v3021_v8, %v10011_v51  ;;  %v3039_v47 = vadd.f32 %v3038_v19, %v3037_v52  ;;  %v3284_v25 = vrot.slane %v8053_v16, 4  ;;  %v3286_v56 = vrot.slane %v8057_v35, 4 }
 0x3e0   : > { %v2908_v42 = vpop.permute.xlu0 %2907  ;;  %3190 = vrot.lane.b32.xlu0 %v3167_v18, %s6093_s22  ;;  %3254 = vrot.lane.b32.xlu1 %v3235_v15, %s6095_s23  ;;  %v3040_v0 = vmul.f32 %v3012_v39, %v10011_v51  ;;  %v3280_v18 = vrot.slane %v8038_v44, 4  ;;  %v3294_v27 = vrot.slane %v8074_v60, 4 }
 0x3e1   : > { %2910 = vst.msk [vmem:[#allocation3 + $0x18] sm:$0xf] %vm959_vm7, %v2908_v42  ;;  %v3043_v6 = vmul.f32 %v3039_v47, %v10011_v51  ;;  %v10028_v47 = vld [vmem:[#allocation12_spill] sm:$0xff] }
 0x3e2   : > { %v3592_v46 = vsel %vm1102_vm5, %v3041_v57, %v3040_v0  ;;  %3182 = vrot.lane.b32.xlu2 %v3163_v31, %s6093_s22  ;;  %v3498_v31 = vrot.slane %v8042_v4, 7 }
 0x3e3   : > { %v3593_v22 = vsel %vm1104_vm6, %v3042_v61, %v3592_v46 }
 0x3e4   : > { %v3594_v53 = vsel %vm1106_vm8, %v3043_v6, %v3593_v22  ;;  %v3428_v6 = vrot.slane %v8053_v16, 6  ;;  %v3358_v22 = vrot.slane %v8057_v35, 5 }
 0x3e8   : > { %v2919_v21 = vpop.permute.xlu0 %2918  ;;  %3252 = vrot.lane.b32.xlu0 %v3234_v43, %s6095_s23  ;;  %3260 = vrot.lane.b32.xlu1 %v3238_v48, %s6095_s23  ;;  %v3222_v43 = vrot.slane %v8074_v60, 3 }
 0x3e9   : > { %2921 = vst.msk [vmem:[#allocation3 + $0x18] sm:$0xf] %vm10009_vm4, %v2919_v21  ;;  %vm10012_vm4 = vmmov %vm10008_vm2  ;;  %vm10014_vm2 = vcmask 1045504   ;;  %v6067_v21 = vld [vmem:[%s9838_s2] sm:$0xff] }
 0x3ea   : > { %v3219_v17 = vsel %vm10012_vm4, %v3216_v5, %v3218_v45  ;;  %v3149_v33 = vsel %vm10014_vm2, %v9998_v63, %v3148_v34  ;;  %vm10015_vm4 = vcmask 1043456   ;;  %v3288_v34 = vrot.slane %v8049_v62, 4 }
 0x3eb   : > { %v3237_v11 = vpack.c.bf16 %v3219_v17, %v3219_v17  ;;  %v3283_v55 = vsel %vm10015_vm4, %v3280_v18, %v3282_v14  ;;  %v3166_v59 = vpack.c.bf16 %v3149_v33, %v3149_v33  ;;  %v3354_v45 = vrot.slane %v8042_v4, 5  ;;  %v6069_v17 = vld [vmem:[%s9838_s2 + $0x10] sm:$0xff]  ;;  %v6070_v14 = vld [vmem:[%s9838_s2 + $0x18] sm:$0xff] }
 0x3ec   : > { %v3305_v24 = vpack.c.bf16 %v3283_v55, %v3283_v55  ;;  %v3356_v33 = vrot.slane %v8053_v16, 5 }
 0x3ed   : > { %3188 = vrot.lane.b32.xlu2 %v3166_v59, %s6093_s22 }
 0x3f0   : > { %v1780_v42 = vpop.permute.xlu0 %1779  ;;  %v2935_v58 = vld [vmem:[#allocation3 + $0x18] sm:$0xff]  ;;  %3258 = vrot.lane.b32.xlu0 %v3237_v11, %s6095_s23  ;;  %3322 = vrot.lane.b32.xlu1 %v3305_v24, %s6097_s26  ;;  %v3290_v11 = vrot.slane %v8117_v10, 4  ;;  %v3500_v24 = vrot.slane %v8053_v16, 7 }
 0x3f1   : > { %1782 = vst.msk [vmem:[#allocation3 + $0x8] sm:$0xf] %vm10013_vm0, %v1780_v42  ;;  %2978 = vmatpush.msrb.mxu3 %v2935_v58  ;;  %vm10017_vm0 = vmmov %vm10015_vm4  ;;  %vm10019_vm4 = vcmask 1044480  }
 0x3f2   : > { %v3281_v28 = vsel %vm10017_vm0, %v10016_v23, %v3280_v18  ;;  %vm10018_vm2 = vmmov %vm10017_vm0  ;;  %v3211_v3 = vsel %vm10019_vm4, %v3208_v2, %v3210_v54  ;;  %v3292_v2 = vrot.slane %v8070_v32, 4  ;;  %v3217_v26 = vsel %vm10019_vm4, %v10005_v50, %v3216_v5  ;;  %v6071_v54 = vld [vmem:[%s9838_s2 + $0x20] sm:$0xff] }
 0x3f3   : > { %v3304_v63 = vpack.c.bf16 %v3281_v28, %v3281_v28  ;;  %vm10020_vm15 = vmmov %vm10017_vm0  ;;  %v3233_v13 = vpack.c.bf16 %v3211_v3, %v3211_v3  ;;  %v3236_v15 = vpack.c.bf16 %v3217_v26, %v3217_v26  ;;  %v3424_v50 = vrot.slane %v8038_v44, 6 }
 0x3f4   : > { %v3287_v12 = vsel %vm10020_vm15, %v3284_v25, %v3286_v56  ;;  %vm10022_vm15 = vmmov %vm10017_vm0  ;;  %v3293_v52 = vsel %vm10017_vm0, %v10016_v23, %v3292_v2  ;;  %v3352_v5 = vrot.slane %v8038_v44, 5  ;;  %v3223_v19 = vsel %vm10019_vm4, %v3220_v49, %v3222_v43 }
 0x3f5   : > { %v3307_v38 = vpack.c.bf16 %v3287_v12, %v3287_v12  ;;  %3250 = vrot.lane.b32.xlu2 %v3233_v13, %s6095_s23  ;;  %v3295_v20 = vsel %vm10022_vm15, %v3292_v2, %v3294_v27  ;;  %v3310_v8 = vpack.c.bf16 %v3293_v52, %v3293_v52  ;;  %v3425_v41 = vsel %vm893_vm13, %v10023_v37, %v3424_v50  ;;  %v8310_v27 = vpop.permute.xlu2 %2938 }
 0x3f6   : > { %v3311_v39 = vpack.c.bf16 %v3295_v20, %v3295_v20  ;;  %vm10024_vm15 = vcmask 1042432   ;;  %v3239_v0 = vpack.c.bf16 %v3223_v19, %v3223_v19  ;;  %v3448_v57 = vpack.c.bf16 %v3425_v41, %v3425_v41  ;;  %10036 = vst [vmem:[#allocation28_spill] sm:$0xff] %v8310_v27 }
 0x3f7   : > { %v3355_v51 = vsel %vm10024_vm15, %v3352_v5, %v3354_v45  ;;  %v3496_v49 = vrot.slane %v8038_v44, 7  ;;  %vm10027_vm4 = vcmask 1040384   ;;  %v3426_v12 = vrot.slane %v8042_v4, 6  ;;  %v6073_v44 = vld [vmem:[%s9838_s2 + $0x30] sm:$0x3f] }
 0x3f8   : > { %v2933_v7 = vld [vmem:[#allocation3 + $0x8] sm:$0xff]  ;;  %3320 = vrot.lane.b32.xlu0 %v3304_v63, %s6097_s26  ;;  %v3377_v9 = vpack.c.bf16 %v3355_v51, %v3355_v51  ;;  %vm10029_vm15 = vmmov %vm10027_vm4  ;;  %v3502_v63 = vrot.slane %v8057_v35, 7  ;;  %v3432_v2 = vrot.slane %v8049_v62, 6 }
 0x3f9   : > { %2979 = vmatpush.msrb.mxu3 %v2933_v7  ;;  %v3499_v58 = vsel %vm10027_vm4, %v3496_v49, %v3498_v31  ;;  %v3497_v61 = vsel %vm10029_vm15, %v10028_v47, %v3496_v49  ;;  %vm10030_vm4 = vcmask 1042432   ;;  %v3427_v4 = vsel %vm893_vm13, %v3424_v50, %v3426_v12 }
 0x3fa   : > { %5654 = vmatmul.msk.f32.vlgmr.msrb.gmra.mxu3 %vm447_vm3, %v8105_v1  ;;  %v3289_v1 = vsel %vm10017_vm0, %v10016_v23, %v3288_v34  ;;  %v3521_v46 = vpack.c.bf16 %v3499_v58, %v3499_v58  ;;  %v3520_v18 = vpack.c.bf16 %v3497_v61, %v3497_v61  ;;  %v3359_v28 = vsel %vm10030_vm4, %v3356_v33, %v3358_v22 }
 0x3fb   : > { %5663 = vmatpush.msk.msra.mxu3 %vm10018_vm2, %v3594_v53  ;;  %v3308_v29 = vpack.c.bf16 %v3289_v1, %v3289_v1  ;;  %vm10021_vm2 = vcmask 31744   ;;  %v3379_v53 = vpack.c.bf16 %v3359_v28, %v3359_v28  ;;  %v3449_v43 = vpack.c.bf16 %v3427_v4, %v3427_v4 }
 0x3fc   : > { %vm10025_vm0 = vmmov %vm10021_vm2  ;;  %v3504_v50 = vrot.slane %v8049_v62, 7  ;;  %v3430_v58 = vrot.slane %v8057_v35, 6  ;;  %v3364_v61 = vrot.slane %v8070_v32, 5  ;;  %v3436_v35 = vrot.slane %v8070_v32, 6 }
 0x3fd   : > { %3328 = vrot.lane.b32.xlu1 %v3308_v29, %s6097_s26  ;;  %3256 = vrot.lane.b32.xlu2 %v3236_v15, %s6095_s23  ;;  %vm10031_vm15 = vmmov %vm10025_vm0  ;;  %v3433_v15 = vsel %vm893_vm13, %v10023_v37, %v3432_v2  ;;  %v3510_v4 = vrot.slane %v8074_v60, 7 }
 0x400   : > { %3326 = vrot.lane.b32.xlu0 %v3307_v38, %s6097_s26  ;;  %v6072_v38 = vld [vmem:[%s9838_s2 + $0x28] sm:$0xff] }
 0x402   : > { %5664 = vmatmul.msk.f32.vlgmr.msra.gmra.mxu3 %vm10021_vm2, %v6067_v21  ;;  %v3360_v21 = vrot.slane %v8049_v62, 5 }
 0x405   : > { %3334 = vrot.lane.b32.xlu1 %v3311_v39, %s6097_s26  ;;  %3262 = vrot.lane.b32.xlu2 %v3239_v0, %s6095_s23 }
 0x408   : > { %3332 = vrot.lane.b32.xlu0 %v3310_v8, %s6097_s26  ;;  %v3452_v8 = vpack.c.bf16 %v3433_v15, %v3433_v15 }
 0x40a   : > { %5665 = vmatmul.msk.f32.gmra.mxu3 %vm10021_vm2, %v6068_v40  ;;  %vm10026_vm2 = vcmask 1043456   ;;  %v3434_v40 = vrot.slane %v8117_v10, 6 }
 0x40b   : > { %v3285_v42 = vsel %vm10026_vm2, %v10016_v23, %v3284_v25  ;;  %v3291_v55 = vsel %vm10026_vm2, %v3288_v34, %v3290_v11  ;;  %v3429_v23 = vsel %vm893_vm13, %v10023_v37, %v3428_v6  ;;  %v10032_v34 = vld [vmem:[#allocation10_spill] sm:$0xff]  ;;  %vm10034_vm2 = vcmask 1040384  }
 0x40c   : > { %v3306_v48 = vpack.c.bf16 %v3285_v42, %v3285_v42  ;;  %v3309_v59 = vpack.c.bf16 %v3291_v55, %v3291_v55  ;;  %v3450_v7 = vpack.c.bf16 %v3429_v23, %v3429_v23  ;;  %v3503_v56 = vsel %vm10034_vm2, %v3500_v24, %v3502_v63 }
 0x40d   : > { %3464 = vrot.lane.b32.xlu1 %v3448_v57, %s6099_s19  ;;  %v3523_v13 = vpack.c.bf16 %v3503_v56, %v3503_v56  ;;  %v3435_v62 = vsel %vm893_vm13, %v3432_v2, %v3434_v40  ;;  %v3431_v11 = vsel %vm893_vm13, %v3428_v6, %v3430_v58  ;;  %v3437_v6 = vsel %vm893_vm13, %v10023_v37, %v3436_v35 }
 0x40e   : > { %3324 = vrot.lane.b32.xlu2 %v3306_v48, %s6097_s26  ;;  %v3366_v48 = vrot.slane %v8074_v60, 5  ;;  %v3454_v28 = vpack.c.bf16 %v3437_v6, %v3437_v6 }
 0x410   : > { %3394 = vrot.lane.b32.xlu0 %v3377_v9, %s6098_s11  ;;  %v3453_v9 = vpack.c.bf16 %v3435_v62, %v3435_v62 }
 0x412   : > { %5666 = vmatmul.msk.f32.gmra.mxu3 %vm10025_vm0, %v6069_v17 }
 0x415   : > { %3538 = vrot.lane.b32.xlu1 %v3521_v46, %s6101_s24 }
 0x416   : > { %3330 = vrot.lane.b32.xlu2 %v3309_v59, %s6097_s26  ;;  %v3109_v51 = vpop.permute.xlu2 %3108  ;;  %v3508_v59 = vrot.slane %v8070_v32, 7 }
 0x417   : > { %3130 = vst.msk [vmem:[#allocation2 + $0x10] sm:$0xf] %vm584_vm12, %v3109_v51 }
 0x418   : > { %3536 = vrot.lane.b32.xlu0 %v3520_v18, %s6101_s24  ;;  %v3451_v18 = vpack.c.bf16 %v3431_v11, %v3431_v11 }
 0x41a   : > { %5667 = vmatmul.msk.f32.gmra.mxu3 %vm10025_vm0, %v6070_v14  ;;  %vm10033_vm0 = vmmov %vm10030_vm4  ;;  %v3362_v14 = vrot.slane %v8117_v10, 5 }
 0x41b   : > { %v3353_v25 = vsel %vm10033_vm0, %v10032_v34, %v3352_v5  ;;  %vm10035_vm4 = vmmov %vm10034_vm2  ;;  %v3361_v52 = vsel %vm10033_vm0, %v10032_v34, %v3360_v21  ;;  %v3506_v5 = vrot.slane %v8117_v10, 7  ;;  %v3367_v46 = vsel %vm10033_vm0, %v3364_v61, %v3366_v48 }
 0x41c   : > { %v3501_v3 = vsel %vm10035_vm4, %v10028_v47, %v3500_v24  ;;  %v3376_v1 = vpack.c.bf16 %v3353_v25, %v3353_v25  ;;  %v3380_v39 = vpack.c.bf16 %v3361_v52, %v3361_v52  ;;  %vm10037_vm2 = vmmov %vm10031_vm15  ;;  %v3365_v25 = vsel %vm10033_vm0, %v10032_v34, %v3364_v61 }
 0x41d   : > { %3468 = vrot.lane.b32.xlu1 %v3450_v7, %s6099_s19  ;;  %v3522_v29 = vpack.c.bf16 %v3501_v3, %v3501_v3  ;;  %vm10038_vm4 = vmmov %vm10033_vm0 }
 0x41e   : > { %3392 = vrot.lane.b32.xlu2 %v3376_v1, %s6098_s11  ;;  %v3357_v41 = vsel %vm10038_vm4, %v10032_v34, %v3356_v33  ;;  %v3383_v33 = vpack.c.bf16 %v3367_v46, %v3367_v46  ;;  %v3382_v1 = vpack.c.bf16 %v3365_v25, %v3365_v25 }
 0x41f   : > { %v3378_v57 = vpack.c.bf16 %v3357_v41, %v3357_v41 }
 0x420   : > { %3398 = vrot.lane.b32.xlu0 %v3379_v53, %s6098_s11  ;;  %v3107_v26 = vpop.permute.xlu1 %3106  ;;  %v3115_v42 = vpop.permute.xlu2 %3114 }
 0x421   : > { %v3105_v20 = vpop.permute.xlu0 %3104  ;;  %3129 = vst.msk [vmem:[#allocation2 + $0x8] sm:$0xf] %vm584_vm12, %v3107_v26 }
 0x422   : > { %5668 = vmatmul.msk.f32.gmra.mxu3 %vm10031_vm15, %v6071_v54  ;;  %3128 = vst.msk [vmem:[#allocation2] sm:$0xf] %vm584_vm12, %v3105_v20 }
 0x423   : > { %3133 = vst.msk [vmem:[#allocation2 + $0x28] sm:$0xf] %vm584_vm12, %v3115_v42 }
 0x425   : > { %3542 = vrot.lane.b32.xlu1 %v3523_v13, %s6101_s24  ;;  %v3438_v13 = vrot.slane %v8074_v60, 6 }
 0x426   : > { %3466 = vrot.lane.b32.xlu2 %v3449_v43, %s6099_s19 }
 0x428   : > { %3540 = vrot.lane.b32.xlu0 %v3522_v29, %s6101_s24 }
 0x42a   : > { %5669 = vmatmul.msk.f32.gmra.mxu3 %vm10031_vm15, %v6072_v38  ;;  %v3113_v45 = vpop.permute.xlu1 %3112  ;;  %vm10039_vm15 = vcmask 1040384   ;;  %v3439_v38 = vsel %vm893_vm13, %v3436_v35, %v3438_v13 }
 0x42b   : > { %v3111_v19 = vpop.permute.xlu0 %3110  ;;  %3132 = vst.msk [vmem:[#allocation2 + $0x20] sm:$0xf] %vm584_vm12, %v3113_v45  ;;  %v3507_v0 = vsel %vm10039_vm15, %v3504_v50, %v3506_v5  ;;  %vm10041_vm4 = vmmov %vm10039_vm15  ;;  %v3455_v20 = vpack.c.bf16 %v3439_v38, %v3439_v38 }
 0x42c   : > { %3131 = vst.msk [vmem:[#allocation2 + $0x18] sm:$0xf] %vm584_vm12, %v3111_v19  ;;  %v3525_v17 = vpack.c.bf16 %v3507_v0, %v3507_v0  ;;  %v3505_v7 = vsel %vm10041_vm4, %v10028_v47, %v3504_v50  ;;  %vm10042_vm15 = vmmov %vm10041_vm4 }
 0x42d   : > { %3400 = vrot.lane.b32.xlu1 %v3380_v39, %s6098_s11  ;;  %v3509_v37 = vsel %vm10042_vm15, %v10028_v47, %v3508_v59  ;;  %v3524_v63 = vpack.c.bf16 %v3505_v7, %v3505_v7 }
 0x42e   : > { %3396 = vrot.lane.b32.xlu2 %v3378_v57, %s6098_s11  ;;  %v3526_v32 = vpack.c.bf16 %v3509_v37, %v3509_v37 }
 0x430   : > { %3472 = vrot.lane.b32.xlu0 %v3452_v8, %s6099_s19 }
 0x432   : > { %5670 = vmatmul.msk.f32.gmra.mxu3 %vm10037_vm2, %v6073_v44  ;;  %v3119_v49 = vpop.permute.xlu1 %3118  ;;  %vm10040_vm2 = vmmov %vm10033_vm0 }
 0x433   : > { %v3117_v31 = vpop.permute.xlu0 %3116  ;;  %3135 = vst.msk [vmem:[#allocation2 + $0x38] sm:$0xf] %vm584_vm12, %v3119_v49  ;;  %v3363_v55 = vsel %vm10040_vm2, %v3360_v21, %v3362_v14  ;;  %vm10043_vm2 = vcmask 519552   ;;  %v10052_v49 = vld [vmem:[#allocation15_spill] sm:$0xff] }
 0x434   : > { %3134 = vst.msk [vmem:[#allocation2 + $0x30] sm:$0xf] %vm584_vm12, %v3117_v31  ;;  %v3177_v16 = vpop.permute.xlu2 %3176  ;;  %v3381_v10 = vpack.c.bf16 %v3363_v55, %v3363_v55  ;;  %vm10044_vm4 = vmmov %vm10043_vm2 }
 0x435   : > { %3474 = vrot.lane.b32.xlu1 %v3453_v9, %s6099_s19  ;;  %3200 = vst.msk [vmem:[#allocation2] sm:$0xf] %vm659_vm14, %v3177_v16  ;;  %vm10045_vm15 = vmmov %vm10043_vm2 }
 0x436   : > { %3470 = vrot.lane.b32.xlu2 %v3451_v18, %s6099_s19  ;;  %vm10046_vm0 = vmmov %vm10043_vm2 }
 0x437   : > { %vm10048_vm10 = vmmov %vm10046_vm0 }
 0x438   : > { %3546 = vrot.lane.b32.xlu0 %v3525_v17, %s6101_s24  ;;  %vm10050_vm1 = vmmov %vm10046_vm0 }
 0x43a   : > { %v3181_v22 = vpop.permute.xlu1 %3180 }
 0x43b   : > { %3202 = vst.msk [vmem:[#allocation2 + $0x10] sm:$0xf] %vm659_vm14, %v3181_v22  ;;  %v3179_v23 = vpop.permute.xlu0 %3178 }
 0x43c   : > { %3201 = vst.msk [vmem:[#allocation2 + $0x8] sm:$0xf] %vm659_vm14, %v3179_v23  ;;  %v3183_v53 = vpop.permute.xlu2 %3182 }
 0x43d   : > { %3406 = vrot.lane.b32.xlu1 %v3383_v33, %s6098_s11  ;;  %3203 = vst.msk [vmem:[#allocation2 + $0x18] sm:$0xf] %vm659_vm14, %v3183_v53  ;;  %v10055_v33 = vld [vmem:[#allocation14_spill] sm:$0xff] }
 0x43e   : > { %3402 = vrot.lane.b32.xlu2 %v3381_v10, %s6098_s11 }
 0x442   : > { %v3187_v54 = vpop.permute.xlu1 %3186 }
 0x443   : > { %3205 = vst.msk [vmem:[#allocation2 + $0x28] sm:$0xf] %vm659_vm14, %v3187_v54 }
 0x445   : > { %3476 = vrot.lane.b32.xlu1 %v3454_v28, %s6099_s19  ;;  %v10056_v28 = vld [vmem:[#allocation16_spill] sm:$0xff] }
 0x446   : > { %3544 = vrot.lane.b32.xlu2 %v3524_v63, %s6101_s24 }
 0x447   : > { %v3189_v56 = vpop.permute.xlu2 %3188 }
 0x448   : > { %3206 = vst.msk [vmem:[#allocation2 + $0x30] sm:$0xf] %vm659_vm14, %v3189_v56 }
 0x44a   : > { %v3185_v24 = vpop.permute.xlu0 %3184  ;;  %v3249_v47 = vpop.permute.xlu1 %3248 }
 0x44b   : > { %3204 = vst.msk [vmem:[#allocation2 + $0x20] sm:$0xf] %vm659_vm14, %v3185_v24 }
 0x44c   : > { %3272 = vst.msk [vmem:[#allocation2] sm:$0xf] %vm10043_vm2, %v3249_v47  ;;  %vm10047_vm2 = vcmask 1040384  }
 0x44d   : > { %3548 = vrot.lane.b32.xlu1 %v3526_v32, %s6101_s24  ;;  %v3511_v52 = vsel %vm10047_vm2, %v3508_v59, %v3510_v4 }
 0x44e   : > { %3404 = vrot.lane.b32.xlu2 %v3382_v1, %s6098_s11  ;;  %v3527_v8 = vpack.c.bf16 %v3511_v52, %v3511_v52 }
 0x44f   : > { %v3251_v21 = vpop.permute.xlu2 %3250 }
 0x450   : > { %3273 = vst.msk [vmem:[#allocation2 + $0x8] sm:$0xf] %vm10044_vm4, %v3251_v21  ;;  %vm10049_vm4 = vmmov %vm10046_vm0 }
 0x452   : > { %v3191_v3 = vpop.permute.xlu0 %3190  ;;  %v3255_v2 = vpop.permute.xlu1 %3254 }
 0x453   : > { %3207 = vst.msk [vmem:[#allocation2 + $0x38] sm:$0xf] %vm659_vm14, %v3191_v3 }
 0x454   : > { %3275 = vst.msk [vmem:[#allocation2 + $0x18] sm:$0xf] %vm10045_vm15, %v3255_v2  ;;  %vm10051_vm15 = vmmov %vm10046_vm0 }
 0x456   : > { %3478 = vrot.lane.b32.xlu2 %v3455_v20, %s6099_s19  ;;  %v10062_v20 = vld [vmem:[#allocation18_spill] sm:$0xff] }
 0x457   : > { %v3257_v15 = vpop.permute.xlu2 %3256 }
 0x458   : > { %v2961_v12 = vpop.f32.mrf.mxu3  ;;  %3276 = vst.msk [vmem:[#allocation2 + $0x20] sm:$0xf] %vm10048_vm10, %v3257_v15 }
 0x459   : > { %v2962_v29 = vadd.f32 %v2961_v12, %v8310_v27 }
 0x45a   : > { %v3253_v26 = vpop.permute.xlu0 %3252  ;;  %v3261_v43 = vpop.permute.xlu1 %3260 }
 0x45b   : > { %v2984_v34 = vmax.f32 %v2962_v29, 0.0  ;;  %3274 = vst.msk [vmem:[#allocation2 + $0x10] sm:$0xf] %vm10046_vm0, %v3253_v26  ;;  %v10061_v29 = vld [vmem:[#allocation19_spill] sm:$0xff] }
 0x45c   : > { %3278 = vst.msk [vmem:[#allocation2 + $0x30] sm:$0xf] %vm10049_vm4, %v3261_v43 }
 0x45d   : > { %2986 = vst [vmem:[%s8386_s29] sm:$0xff] %v2984_v34 }
 0x45e   : > { %3550 = vrot.lane.b32.xlu2 %v3527_v8, %s6101_s24 }
 0x45f   : > { %v3263_v44 = vpop.permute.xlu2 %3262 }
 0x460   : > { %3279 = vst.msk [vmem:[#allocation2 + $0x38] sm:$0xf] %vm10051_vm15, %v3263_v44 }
 0x462   : > { %v3259_v39 = vpop.permute.xlu0 %3258  ;;  %v3323_v60 = vpop.permute.xlu1 %3322 }
 0x463   : > { %3277 = vst.msk [vmem:[#allocation2 + $0x28] sm:$0xf] %vm10050_vm1, %v3259_v39  ;;  %vm10053_vm1 = vcmask 1044352   ;;  %v10063_v39 = vld [vmem:[#allocation17_spill] sm:$0xff] }
 0x464   : > { %3345 = vst.msk [vmem:[#allocation2 + $0x8] sm:$0xf] %vm809_vm11, %v3323_v60  ;;  %vm10054_vm10 = vmmov %vm10053_vm1 }
 0x465   : > { %vm10057_vm0 = vmmov %vm10053_vm1 }
 0x466   : > { %vm10058_vm2 = vmmov %vm10057_vm0 }
 0x467   : > { %vm10059_vm4 = vmmov %vm10057_vm0 }
 0x468   : > { %v3325_v50 = vpop.permute.xlu2 %3324  ;;  %vm10060_vm15 = vmmov %vm10057_vm0 }
 0x469   : > { %3346 = vst.msk [vmem:[#allocation2 + $0x10] sm:$0xf] %vm809_vm11, %v3325_v50 }
 0x46a   : > { %v3321_v40 = vpop.permute.xlu0 %3320 }
 0x46b   : > { %3344 = vst.msk [vmem:[#allocation2] sm:$0xf] %vm809_vm11, %v3321_v40 }
 0x46f   : > { %v3329_v5 = vpop.permute.xlu1 %3328 }
 0x470   : > { %3348 = vst.msk [vmem:[#allocation2 + $0x20] sm:$0xf] %vm809_vm11, %v3329_v5  ;;  %v3331_v41 = vpop.permute.xlu2 %3330 }
 0x471   : > { %3349 = vst.msk [vmem:[#allocation2 + $0x28] sm:$0xf] %vm809_vm11, %v3331_v41 }
 0x472   : > { %v3327_v45 = vpop.permute.xlu0 %3326 }
 0x473   : > { %3347 = vst.msk [vmem:[#allocation2 + $0x18] sm:$0xf] %vm809_vm11, %v3327_v45 }
 0x477   : > { %v3335_v62 = vpop.permute.xlu1 %3334 }
 0x478   : > { %3351 = vst.msk [vmem:[#allocation2 + $0x38] sm:$0xf] %vm809_vm11, %v3335_v62  ;;  %v3393_v17 = vpop.permute.xlu2 %3392 }
 0x479   : > { %3416 = vst.msk [vmem:[#allocation2] sm:$0xf] %vm884_vm9, %v3393_v17 }
 0x47a   : > { %v3333_v0 = vpop.permute.xlu0 %3332 }
 0x47b   : > { %3350 = vst.msk [vmem:[#allocation2 + $0x30] sm:$0xf] %vm809_vm11, %v3333_v0 }
 0x47d   : > { %v2981_v19 = vpop.f32.mrf.mxu3 }
 0x47e   : > { %v2982_v51 = vadd.f32 %v2981_v19, %v8310_v27 }
 0x47f   : > { %v3465_v42 = vpop.permute.xlu1 %3464 }
 0x480   : > { %v2985_v57 = vmax.f32 %v2982_v51, 0.0  ;;  %3488 = vst.msk [vmem:[#allocation2] sm:$0xf] %vm959_vm7, %v3465_v42  ;;  %v3467_v46 = vpop.permute.xlu2 %3466 }
 0x482   : > { %2987 = vst [vmem:[%s8386_s29 + $0x8] sm:$0xff] %v2985_v57  ;;  %v3395_v58 = vpop.permute.xlu0 %3394 }
 0x483   : > { %3417 = vst.msk [vmem:[#allocation2 + $0x8] sm:$0xf] %vm884_vm9, %v3395_v58 }
 0x484   : > { %3489 = vst.msk [vmem:[#allocation2 + $0x8] sm:$0xf] %vm959_vm7, %v3467_v46 }
 0x485   : > { %v3614_v9 = vpop.f32.mrf.mxu3 }
 0x486   : > { %v8413_v31 = vadd.f32 %v3614_v9, %v10052_v49  ;;  %v10066_v49 = vld [vmem:[#allocation20_spill] sm:$0xff] }
 0x487   : > { %v3539_v18 = vpop.permute.xlu1 %3538 }
 0x488   : > { %v3726_v61 = vperm.slane %v8413_v31, 7  ;;  %v3713_v48 = vperm.slane %v8413_v31, 6  ;;  %3561 = vst.msk [vmem:[#allocation2 + $0x8] sm:$0xf] %vm10053_vm1, %v3539_v18  ;;  %v3397_v22 = vpop.permute.xlu2 %3396  ;;  %v3700_v23 = vperm.slane %v8413_v31, 5  ;;  %v3687_v37 = vperm.slane %v8413_v31, 4  ;;  %vm10064_vm1 = vmmov %vm10057_vm0 }
 0x489   : > { %3418 = vst.msk [vmem:[#allocation2 + $0x10] sm:$0xf] %vm884_vm9, %v3397_v22  ;;  %v3674_v32 = vperm.slane %v8413_v31, 3  ;;  %v3661_v3 = vperm.slane %v8413_v31, 2  ;;  %v3648_v13 = vperm.slane %v8413_v31, 1  ;;  %v3635_v45 = vperm.slane %v8413_v31, 0 }
 0x48a   : > { %3737 = vperm.xlu0 %5794, %v3726_v61   ;;  %3731 = vperm.xlu2 %5796, %v3726_v61   ;;  %v3537_v14 = vpop.permute.xlu0 %3536 }
 0x48b   : > { %3718 = vperm.xlu1 %5797, %v3713_v48   ;;  %3560 = vst.msk [vmem:[#allocation2] sm:$0xf] %vm10054_vm10, %v3537_v14  ;;  %vm10065_vm10 = vmmov %vm10057_vm0 }
 0x48d   : > { %v3617_v11 = vpop.f32.mrf.mxu3 }
 0x48e   : > { %v8458_v34 = vadd.f32 %v3617_v11, %v10061_v29 }
 0x48f   : > { %v3469_v55 = vpop.permute.xlu1 %3468 }
 0x490   : > { %3490 = vst.msk [vmem:[#allocation2 + $0x10] sm:$0xf] %vm959_vm7, %v3469_v55  ;;  %v3471_v10 = vpop.permute.xlu2 %3470  ;;  %v4325_v26 = vperm.slane %v8458_v34, 7  ;;  %v9914_v57 = vperm.slane %v8458_v34, 2  ;;  %v3739_v9 = vperm.slane %v8458_v34, 0 }
 0x492   : > { %5799 = vset.pattern.permute.xlu0 %v10001_v30  ;;  %5798 = vset.pattern.permute.xlu2 %v10055_v33  ;;  %v3399_v16 = vpop.permute.xlu0 %3398 }
 0x493   : > { %5800 = vset.pattern.permute.xlu1 %v10055_v33  ;;  %3419 = vst.msk [vmem:[#allocation2 + $0x18] sm:$0xf] %vm884_vm9, %v3399_v16  ;;  %v10067_v16 = vld [vmem:[#allocation25_spill] sm:$0xff] }
 0x494   : > { %3491 = vst.msk [vmem:[#allocation2 + $0x18] sm:$0xf] %vm959_vm7, %v3471_v10 }
 0x495   : > { %v8426_v35 = vpop.f32.mrf.mxu3 }
 0x496   : > { %v8472_v8 = vadd.f32 %v8426_v35, %v10063_v39 }
 0x497   : > { %v3543_v7 = vpop.permute.xlu1 %3542 }
 0x498   : > { %3563 = vst.msk [vmem:[#allocation2 + $0x18] sm:$0xf] %vm10057_vm0, %v3543_v7  ;;  %v3403_v54 = vpop.permute.xlu2 %3402  ;;  %v4849_v5 = vperm.slane %v8472_v8, 5  ;;  %v4836_v19 = vperm.slane %v8472_v8, 4  ;;  %vm10086_vm0 = vcmask 1040384  }
 0x499   : > { %3421 = vst.msk [vmem:[#allocation2 + $0x28] sm:$0xf] %vm884_vm9, %v3403_v54  ;;  %v5719_v54 = vld [vmem:[%s6730_s16 + $0x8] sm:$0xff] }
 0x49a   : > { %3724 = vperm.xlu2 %5798, %v3713_v48   ;;  %3705 = vperm.xlu0 %5799, %v3700_v23   ;;  %v3541_v53 = vpop.permute.xlu0 %3540 }
 0x49b   : > { %3711 = vperm.xlu1 %5800, %v3700_v23   ;;  %3562 = vst.msk [vmem:[#allocation2 + $0x10] sm:$0xf] %vm10058_vm2, %v3541_v53  ;;  %v4312_v53 = vperm.slane %v8458_v34, 6  ;;  %vm10092_vm2 = vcmask 125952  }
 0x49d   : > { %v3623_v6 = vpop.f32.mrf.mxu3 }
 0x49e   : > { %v8433_v59 = vadd.f32 %v3623_v6, %v10056_v28 }
 0x49f   : > { %v3401_v24 = vpop.permute.xlu1 %3400 }
 0x4a0   : > { %3754 = vst [vmem:[#allocation1] sm:$0xff] %v8433_v59  ;;  %v3545_v25 = vpop.permute.xlu2 %3544  ;;  %v9915_v22 = vperm.slane %v8433_v59, 1 }
 0x4a1   : > { %3420 = vst.msk [vmem:[#allocation2 + $0x20] sm:$0xf] %vm884_vm9, %v3401_v24 }
 0x4a2   : > { %5801 = vset.pattern.permute.xlu2 %v10001_v30  ;;  %5802 = vset.pattern.permute.xlu0 %v10055_v33  ;;  %v3473_v63 = vpop.permute.xlu0 %3472 }
 0x4a3   : > { %3698 = vperm.xlu1 %5800, %v3687_v37   ;;  %3492 = vst.msk [vmem:[#allocation2 + $0x20] sm:$0xf] %vm959_vm7, %v3473_v63 }
 0x4a4   : > { %3564 = vst.msk [vmem:[#allocation2 + $0x20] sm:$0xf] %vm10059_vm4, %v3545_v25  ;;  %v4286_v25 = vperm.slane %v8458_v34, 4  ;;  %vm10093_vm4 = vmmov %vm10092_vm2 }
 0x4a5   : > { %v3626_v21 = vpop.f32.mrf.mxu3 }
 0x4a6   : > { %v3627_v4 = vadd.f32 %v3626_v21, %v10062_v20 }
 0x4a7   : > { %v3475_v56 = vpop.permute.xlu1 %3474  ;;  %v8464_v52 = vld [vmem:[#allocation1 + $0x3] ss:$9 sm:$0xff]  ;;  %v8468_v43 = vld [vmem:[#allocation1 + $0x5] ss:$9 sm:$0xff] }
 0x4a8   : > { %3493 = vst.msk [vmem:[#allocation2 + $0x28] sm:$0xf] %vm959_vm7, %v3475_v56  ;;  %v3405_v1 = vpop.permute.xlu2 %3404  ;;  %v8466_v15 = vld [vmem:[#allocation1 + $0x4] ss:$9 sm:$0xff]  ;;  %v8474_v44 = vld [vmem:[#allocation1 + $0x6] ss:$9 sm:$0xff] }
 0x4a9   : > { %3422 = vst.msk [vmem:[#allocation2 + $0x30] sm:$0xf] %vm884_vm9, %v3405_v1  ;;  %v8476_v60 = vld [vmem:[#allocation1 + $0x7] ss:$9 sm:$0xff] }
 0x4aa   : > { %3692 = vperm.xlu2 %5801, %v3687_v37   ;;  %3685 = vperm.xlu0 %5802, %v3674_v32   ;;  %v3547_v47 = vpop.permute.xlu0 %3546  ;;  %3765 = vst [vmem:[#allocation1] sm:$0xff] %v3627_v4 }
 0x4ab   : > { %5803 = vset.pattern.permute.xlu1 %v10001_v30  ;;  %3565 = vst.msk [vmem:[#allocation2 + $0x28] sm:$0xf] %vm10060_vm15, %v3547_v47  ;;  %vm10094_vm15 = vcmask 124928  }
 0x4ad   : > { %v3629_v17 = vpop.f32.mrf.mxu3 }
 0x4ae   : > { %v3630_v31 = vadd.f32 %v3629_v17, %v10066_v49  ;;  %v8575_v17 = vld [vmem:[%s9840_s4 + $0x8] sm:$0xff] }
 0x4af   : > { %v3407_v12 = vpop.permute.xlu1 %3406 }
 0x4b0   : > { %3423 = vst.msk [vmem:[#allocation2 + $0x38] sm:$0xf] %vm884_vm9, %v3407_v12  ;;  %v3479_v38 = vpop.permute.xlu2 %3478  ;;  %v4299_v12 = vperm.slane %v8458_v34, 5 }
 0x4b1   : > { %3495 = vst.msk [vmem:[#allocation2 + $0x38] sm:$0xf] %vm959_vm7, %v3479_v38  ;;  %v3770_v41 = vld [vmem:[#allocation1 + $0x2] ss:$9 sm:$0xff]  ;;  %v8491_v62 = vld [vmem:[#allocation1] ss:$9 sm:$0xff] }
 0x4b2   : > { %5805 = vset.pattern.permute.xlu0 %v10001_v30  ;;  %3679 = vperm.xlu2 %5801, %v3674_v32   ;;  %v8489_v51 = vld [vmem:[#allocation1 + $0x1] ss:$9 sm:$0xff]  ;;  %v8493_v0 = vld [vmem:[#allocation1 + $0x3] ss:$9 sm:$0xff]  ;;  %v3779_v37 = vperm.slane %v3770_v41, 0 }
 0x4b3   : > { %3666 = vperm.xlu1 %5803, %v3661_v3   ;;  %4365 = vst [vmem:[#allocation1] sm:$0xff] %v3627_v4  ;;  %v3778_v63 = vperm.slane %v8489_v51, 0  ;;  %v9913_v4 = vperm.slane %v8433_v59, 2  ;;  %v8566_v41 = vld [vmem:[%s9840_s4] sm:$0xff] }
 0x4b5   : > { %v3632_v55 = vpop.f32.mrf.mxu3 }
 0x4b6   : > { %v3633_v23 = vadd.f32 %v3632_v55, %v10067_v16 }
 0x4b7   : > { %v3477_v2 = vpop.permute.xlu1 %3476 }
 0x4b8   : > { %3494 = vst.msk [vmem:[#allocation2 + $0x30] sm:$0xf] %vm959_vm7, %v3477_v2  ;;  %v3551_v40 = vpop.permute.xlu2 %3550 }
 0x4b9   : > { %3567 = vst.msk [vmem:[#allocation2 + $0x38] sm:$0xf] %vm10064_vm1, %v3551_v40  ;;  %vm10097_vm1 = vcmask 519552  }
 0x4ba   : > { %5804 = vset.pattern.permute.xlu2 %v10055_v33  ;;  %3653 = vperm.xlu0 %5805, %v3648_v13   ;;  %v8501_v42 = vld [vmem:[#allocation1 + $0x4] ss:$9 sm:$0xff]  ;;  %v8505_v61 = vld [vmem:[#allocation1 + $0x6] ss:$9 sm:$0xff] }
 0x4bb   : > { %5806 = vset.pattern.permute.xlu1 %v10055_v33  ;;  %v8503_v58 = vld [vmem:[#allocation1 + $0x5] ss:$9 sm:$0xff]  ;;  %v8507_v48 = vld [vmem:[#allocation1 + $0x7] ss:$9 sm:$0xff] }
 0x4bc   : > { %4374 = vst [vmem:[#allocation1] sm:$0xff] %v3630_v31 }
 0x4bf   : > { %v3549_v50 = vpop.permute.xlu1 %3548 }
 0x4c0   : > { %3566 = vst.msk [vmem:[#allocation2 + $0x30] sm:$0xf] %vm10065_vm10, %v3549_v50  ;;  %vm10100_vm10 = vcmask 1045509  }
 0x4c2   : > { %3672 = vperm.xlu2 %5804, %v3661_v3   ;;  %4330 = vperm.xlu0 %5805, %v4325_v26  }
 0x4c3   : > { %3659 = vperm.xlu1 %5806, %v3648_v13   ;;  %v8511_v11 = vld [vmem:[#allocation1 + $0x2] ss:$9 sm:$0xff]  ;;  %v8513_v46 = vld [vmem:[#allocation1] ss:$9 sm:$0xff] }
 0x4c4   : > { %v8515_v18 = vld [vmem:[#allocation1 + $0x1] ss:$9 sm:$0xff]  ;;  %v8517_v14 = vld [vmem:[#allocation1 + $0x3] ss:$9 sm:$0xff] }
 0x4c5   : > { %v8519_v35 = vld [vmem:[#allocation1 + $0x4] ss:$9 sm:$0xff] }
 0x4c6   : > { %4928 = vst [vmem:[#allocation1] sm:$0xff] %v3630_v31  ;;  %v9912_v31 = vperm.slane %v8458_v34, 1 }
 0x4ca   : > { %5807 = vset.pattern.permute.xlu2 %v10001_v30  ;;  %4854 = vperm.xlu0 %5805, %v4849_v5  }
 0x4cb   : > { %3646 = vperm.xlu1 %5806, %v3635_v45  }
 0x4cd   : > { %v8526_v10 = vld [vmem:[#allocation1 + $0x5] ss:$9 sm:$0xff]  ;;  %v8530_v7 = vld [vmem:[#allocation1 + $0x7] ss:$9 sm:$0xff] }
 0x4ce   : > { %v8528_v28 = vld [vmem:[#allocation1 + $0x6] ss:$9 sm:$0xff] }
 0x4cf   : > { %4935 = vst [vmem:[#allocation1] sm:$0xff] %v3633_v23 }
 0x4d2   : > { %4841 = vperm.xlu0 %5805, %v4836_v19   ;;  %3640 = vperm.xlu2 %5807, %v3635_v45  }
 0x4d3   : > { %5808 = vset.pattern.permute.xlu1 %v10001_v30 }
 0x4d6   : > { %v8537_v56 = vld [vmem:[#allocation1] ss:$9 sm:$0xff]  ;;  %v8543_v1 = vld [vmem:[#allocation1 + $0x2] ss:$9 sm:$0xff] }
 0x4d7   : > { %v8539_v47 = vld [vmem:[#allocation1 + $0x4] ss:$9 sm:$0xff]  ;;  %v8546_v13 = vld [vmem:[#allocation1 + $0x1] ss:$9 sm:$0xff] }
 0x4d8   : > { %v8541_v3 = vld [vmem:[#allocation1 + $0x5] ss:$9 sm:$0xff]  ;;  %v8548_v29 = vld [vmem:[#allocation1 + $0x3] ss:$9 sm:$0xff] }
 0x4d9   : > { %5377 = vst [vmem:[#allocation1 + $0x1] ss:$2 sm:$0xff] %v5719_v54 }
 0x4da   : > { %4265 = vperm.xlu0 %5805, %v9914_v57   ;;  %5809 = vset.pattern.permute.xlu2 %v10055_v33 }
 0x4db   : > { %3744 = vperm.xlu1 %5808, %v3739_v9  }
 0x4e2   : > { %5826 = vset.pattern.permute.xlu0 %v10055_v33  ;;  %3750 = vperm.xlu2 %5809, %v3739_v9  }
 0x4e3   : > { %5810 = vset.pattern.permute.xlu1 %v10055_v33 }
 0x4e4   : > { %v3732_v6 = vpop.permute.xlu2 %3731 }
 0x4e5   : > { %v3804_v24 = vsub.f32 %v3732_v6, %v3779_v37  ;;  %v4273_v6 = vperm.slane %v8458_v34, 3 }
 0x4e7   : > { %5939 = vtanh.f32 %v3804_v24  ;;  %v3777_v24 = vperm.slane %v8491_v62, 0 }
 0x4ea   : > { %4912 = vperm.xlu0 %5826, %v9915_v22   ;;  %5811 = vset.pattern.permute.xlu2 %v10001_v30 }
 0x4eb   : > { %4336 = vperm.xlu1 %5810, %v4325_v26  }
 0x4ed   : > { %v8552_v39 = vpop.eup %5939 }
 0x4ee   : > { %v3899_v50 = vmul.f32 %v8552_v39, %v6793_v36 }
 0x4f0   : > { %v3919_v55 = vadd.f32 %v8566_v41, %v3899_v50 }
 0x4f2   : > { %4323 = vperm.xlu0 %5826, %v4312_v53   ;;  %4317 = vperm.xlu2 %5811, %v4312_v53  }
 0x4f3   : > { %5812 = vset.pattern.permute.xlu1 %v10001_v30 }
 0x4f4   : > { %v3725_v32 = vpop.permute.xlu2 %3724 }
 0x4f5   : > { %v3803_v38 = vsub.f32 %v3725_v32, %v3778_v63 }
 0x4f7   : > { %5941 = vtanh.f32 %v3803_v38 }
 0x4fa   : > { %4297 = vperm.xlu0 %5826, %v4286_v25   ;;  %5813 = vset.pattern.permute.xlu2 %v10055_v33 }
 0x4fb   : > { %4304 = vperm.xlu1 %5812, %v4299_v12  }
 0x4fc   : > { %v3738_v21 = vpop.permute.xlu0 %3737 }
 0x4fd   : > { %v3805_v2 = vsub.f32 %v3738_v21, %v3779_v37  ;;  %v3719_v26 = vpop.permute.xlu1 %3718  ;;  %v8557_v40 = vpop.eup %5941  ;;  %v3776_v21 = vperm.slane %v8476_v60, 0 }
 0x4fe   : > { %v3802_v20 = vsub.f32 %v3719_v26, %v3778_v63  ;;  %v3898_v23 = vmul.f32 %v8557_v40, %v6793_v36 }
 0x4ff   : > { %5943 = vtanh.f32 %v3805_v2 }
 0x500   : > { %5945 = vtanh.f32 %v3802_v20  ;;  %v3918_v32 = vadd.f32 %v8575_v17, %v3898_v23 }
 0x502   : > { %4925 = vperm.xlu0 %5826, %v9913_v4   ;;  %4310 = vperm.xlu2 %5813, %v4299_v12  }
 0x503   : > { %5815 = vset.pattern.permute.xlu1 %v10055_v33 }
 0x504   : > { %v3693_v53 = vpop.permute.xlu2 %3692 }
 0x505   : > { %v8561_v45 = vpop.eup %5943  ;;  %v3798_v20 = vsub.f32 %v3693_v53, %v3776_v21  ;;  %v4338_v53 = vperm.slane %v8472_v8, 0 }
 0x506   : > { %v8568_v51 = vpop.eup %5945  ;;  %v3900_v9 = vmul.f32 %v8561_v45, %v6793_v36 }
 0x507   : > { %v3897_v49 = vmul.f32 %v8568_v51, %v6793_v36 }
 0x508   : > { %v3920_v16 = vadd.f32 %v8575_v17, %v3900_v9  ;;  %v3775_v9 = vperm.slane %v8474_v44, 0 }
 0x509   : > { %v3917_v54 = vadd.f32 %v8566_v41, %v3897_v49 }
 0x50a   : > { %4258 = vperm.xlu0 %5826, %v9912_v31   ;;  %5814 = vset.pattern.permute.xlu2 %v10001_v30  ;;  %v3930_v37 = vpack.c.bf16 %v3920_v16, %v3919_v55 }
 0x50b   : > { %4284 = vperm.xlu1 %5815, %v4273_v6   ;;  %v3929_v26 = vpack.c.bf16 %v3918_v32, %v3917_v54 }
 0x50c   : > { %3980 = vmatpush.bf16.msra.mxu0 %v3930_v37  ;;  %v3706_v63 = vpop.permute.xlu0 %3705  ;;  %v3680_v50 = vpop.permute.xlu2 %3679 }
 0x50d   : > { %v3800_v12 = vsub.f32 %v3706_v63, %v3777_v24  ;;  %v3712_v38 = vpop.permute.xlu1 %3711  ;;  %v3796_v23 = vsub.f32 %v3680_v50, %v3775_v9 }
 0x50e   : > { %v3801_v2 = vsub.f32 %v3712_v38, %v3777_v24 }
 0x50f   : > { %5947 = vtanh.f32 %v3800_v12 }
 0x510   : > { %3981 = vmatpush.bf16.msra.mxu0 %v3929_v26  ;;  %5949 = vtanh.f32 %v3801_v2  ;;  %v3774_v2 = vperm.slane %v8468_v43, 0  ;;  %v5378_v26 = vld.sshfl [vmem:[#allocation1] sm:$0xff pattern:$0x75316420] }
 0x511   : > { %5951 = vtanh.f32 %v3798_v20  ;;  %5382 = vst [vmem:[#allocation3 + $0x10] sm:$0xf0] %v5378_v26 }
 0x512   : > { %4291 = vperm.xlu2 %5814, %v4286_v25  }
 0x513   : > { %5816 = vset.pattern.permute.xlu1 %v10001_v30 }
 0x515   : > { %v8593_v62 = vpop.eup %5947  ;;  %v3699_v49 = vpop.permute.xlu1 %3698 }
 0x516   : > { %v3799_v55 = vsub.f32 %v3699_v49, %v3776_v21  ;;  %v3895_v60 = vmul.f32 %v8593_v62, %v6793_v36  ;;  %v8598_v16 = vpop.eup %5949 }
 0x517   : > { %v3896_v25 = vmul.f32 %v8598_v16, %v6793_v36  ;;  %v8604_v54 = vpop.eup %5951 }
 0x518   : > { %5953 = vtanh.f32 %v3799_v55  ;;  %v3915_v37 = vadd.f32 %v8566_v41, %v3895_v60  ;;  %v3893_v38 = vmul.f32 %v8604_v54, %v6793_v36 }
 0x519   : > { %v3916_v44 = vadd.f32 %v8575_v17, %v3896_v25  ;;  %5955 = vtanh.f32 %v3796_v23 }
 0x51a   : > { %4278 = vperm.xlu2 %5814, %v4273_v6  }
 0x51b   : > { %4343 = vperm.xlu1 %5816, %v4338_v53   ;;  %v3928_v63 = vpack.c.bf16 %v3916_v44, %v3915_v37 }
 0x51c   : > { %v3686_v24 = vpop.permute.xlu0 %3685  ;;  %v3673_v12 = vpop.permute.xlu2 %3672 }
 0x51d   : > { %v3797_v32 = vsub.f32 %v3686_v24, %v3775_v9  ;;  %3982 = vmatpush.bf16.msra.mxu0 %v3928_v63  ;;  %v3795_v20 = vsub.f32 %v3673_v12, %v3774_v2  ;;  %v3913_v9 = vadd.f32 %v8566_v41, %v3893_v38  ;;  %v4875_v63 = vperm.slane %v8472_v8, 7 }
 0x51e   : > { %v8609_v21 = vpop.eup %5953 }
 0x51f   : > { %5957 = vtanh.f32 %v3797_v32  ;;  %v3894_v6 = vmul.f32 %v8609_v21, %v6793_v36  ;;  %v8614_v50 = vpop.eup %5955 }
 0x520   : > { %5959 = vtanh.f32 %v3795_v20  ;;  %v3891_v43 = vmul.f32 %v8614_v50, %v6793_v36 }
 0x521   : > { %v3914_v49 = vadd.f32 %v8575_v17, %v3894_v6  ;;  %v3773_v6 = vperm.slane %v8466_v15, 0  ;;  %v3772_v15 = vperm.slane %v8464_v52, 0 }
 0x522   : > { %5817 = vset.pattern.permute.xlu2 %v10055_v33  ;;  %v3911_v44 = vadd.f32 %v8566_v41, %v3891_v43 }
 0x523   : > { %5819 = vset.pattern.permute.xlu1 %v10055_v33  ;;  %v3927_v55 = vpack.c.bf16 %v3914_v49, %v3913_v9 }
 0x525   : > { %v8622_v60 = vpop.eup %5957  ;;  %3983 = vmatpush.bf16.msra.mxu0 %v3927_v55  ;;  %v3667_v23 = vpop.permute.xlu1 %3666 }
 0x526   : > { %v3794_v25 = vsub.f32 %v3667_v23, %v3774_v2  ;;  %v3892_v37 = vmul.f32 %v8622_v60, %v6793_v36  ;;  %v8629_v32 = vpop.eup %5959 }
 0x527   : > { %v3890_v2 = vmul.f32 %v8629_v32, %v6793_v36 }
 0x528   : > { %5961 = vtanh.f32 %v3794_v25  ;;  %v3912_v24 = vadd.f32 %v8575_v17, %v3892_v37 }
 0x529   : > { %v3910_v55 = vadd.f32 %v8575_v17, %v3890_v2 }
 0x52a   : > { %4349 = vperm.xlu2 %5817, %v4338_v53   ;;  %v3926_v12 = vpack.c.bf16 %v3912_v24, %v3911_v44  ;;  %v4862_v24 = vperm.slane %v8472_v8, 6 }
 0x52b   : > { %4886 = vperm.xlu1 %5819, %v4875_v63  }
 0x52c   : > { %v3654_v38 = vpop.permute.xlu0 %3653  ;;  %3984 = vmatpush.bf16.msra.mxu0 %v3926_v12  ;;  %v3641_v23 = vpop.permute.xlu2 %3640 }
 0x52d   : > { %v3792_v9 = vsub.f32 %v3654_v38, %v3773_v6  ;;  %v3790_v44 = vsub.f32 %v3641_v23, %v3772_v15  ;;  %v9911_v38 = vperm.slane %v8537_v56, 0 }
 0x52e   : > { %v5962_v26 = vpop.eup %5961 }
 0x52f   : > { %v3889_v20 = vmul.f32 %v5962_v26, %v6793_v36  ;;  %5963 = vtanh.f32 %v3792_v9 }
 0x531   : > { %v3909_v49 = vadd.f32 %v8566_v41, %v3889_v20 }
 0x532   : > { %5818 = vset.pattern.permute.xlu2 %v10001_v30 }
 0x533   : > { %5820 = vset.pattern.permute.xlu1 %v10001_v30  ;;  %v3925_v53 = vpack.c.bf16 %v3910_v55, %v3909_v49 }
 0x534   : > { %v8639_v43 = vpop.permute.xlu0 %4330 }
 0x535   : > { %3985 = vmatpush.bf16.msra.mxu0 %v3925_v53  ;;  %v3660_v25 = vpop.permute.xlu1 %3659  ;;  %v5964_v12 = vpop.eup %5963 }
 0x536   : > { %v3793_v37 = vsub.f32 %v3660_v25, %v3773_v6  ;;  %v3887_v49 = vmul.f32 %v5964_v12, %v6793_v36  ;;  %v9916_v25 = vperm.slane %v8530_v7, 0 }
 0x538   : > { %5965 = vtanh.f32 %v3793_v37  ;;  %v3907_v53 = vadd.f32 %v8566_v41, %v3887_v49 }
 0x539   : > { %5967 = vtanh.f32 %v3790_v44 }
 0x53a   : > { %4880 = vperm.xlu2 %5818, %v4875_v63  }
 0x53b   : > { %4867 = vperm.xlu1 %5820, %v4862_v24  }
 0x53c   : > { %v4855_v2 = vpop.permute.xlu0 %4854 }
 0x53d   : > { %v8646_v20 = vsub.f32 %v4855_v2, %v9911_v38  ;;  %v3647_v9 = vpop.permute.xlu1 %3646  ;;  %v3828_v38 = vmul.f32 %v5964_v12, %v5964_v12  ;;  %v3830_v12 = vmul.f32 %v5962_v26, %v5962_v26 }
 0x53e   : > { %v5966_v52 = vpop.eup %5965  ;;  %v3791_v6 = vsub.f32 %v3647_v9, %v3772_v15  ;;  %v3751_v9 = vpop.permute.xlu2 %3750 }
 0x53f   : > { %v3888_v55 = vmul.f32 %v5966_v52, %v6793_v36  ;;  %v5968_v23 = vpop.eup %5967 }
 0x540   : > { %5969 = vtanh.f32 %v3791_v6  ;;  %v3826_v2 = vmul.f32 %v5968_v23, %v5968_v23  ;;  %v3885_v49 = vmul.f32 %v5968_v23, %v6793_v36  ;;  %v3847_v23 = vsel %vm447_vm3, %v3828_v38, 0.0 }
 0x541   : > { %v3908_v63 = vadd.f32 %v8575_v17, %v3888_v55  ;;  %v3780_v55 = vperm.slane %v8493_v0, 0  ;;  %v9917_v0 = vperm.slane %v8503_v58, 0 }
 0x542   : > { %5821 = vset.pattern.permute.xlu2 %v10055_v33  ;;  %v3844_v57 = vsel %vm447_vm3, %v3826_v2, 0.0 }
 0x543   : > { %5822 = vset.pattern.permute.xlu1 %v10055_v33  ;;  %v3924_v37 = vpack.c.bf16 %v3908_v63, %v3907_v53  ;;  %v3807_v53 = vsub.f32 %v3751_v9, %v3780_v55  ;;  %v3829_v63 = vmul.f32 %v5966_v52, %v5966_v52  ;;  %v5673_v9 = vld [vmem:[#allocation2] sm:$0xf]  ;;  %v5740_v52 = vld [vmem:[#allocation2 + $0x4] sm:$0xf0] }
 0x544   : > { %v4842_v44 = vpop.permute.xlu0 %4841  ;;  %v8677_v38 = vor.u32 %v5740_v52, %v5673_v9 }
 0x545   : > { %v8657_v15 = vsub.f32 %v4842_v44, %v9916_v25  ;;  %3986 = vmatpush.bf16.msra.mxu0 %v3924_v37  ;;  %v3905_v44 = vadd.f32 %v8566_v41, %v3885_v49  ;;  %5971 = vtanh.f32 %v3807_v53  ;;  %v3832_v49 = vmul.f32 %v8614_v50, %v8614_v50 }
 0x546   : > { %v5970_v6 = vpop.eup %5969  ;;  %10068 = vst [vmem:[#allocation27_spill] sm:$0xff] %v8677_v38  ;;  %v4351_v53 = vperm.slane %v8472_v8, 1  ;;  %v3834_v50 = vmul.f32 %v8604_v54, %v8604_v54 }
 0x547   : > { %v3827_v31 = vmul.f32 %v5970_v6, %v5970_v6  ;;  %v3886_v4 = vmul.f32 %v5970_v6, %v6793_v36 }
 0x549   : > { %v3845_v22 = vsel %vm447_vm3, %v3827_v31, 0.0  ;;  %v3906_v37 = vadd.f32 %v8575_v17, %v3886_v4 }
 0x54a   : > { %4873 = vperm.xlu2 %5821, %v4862_v24   ;;  %v3846_v25 = vadd.f32 %v3845_v22, %v3844_v57  ;;  %v3831_v57 = vmul.f32 %v8629_v32, %v8629_v32  ;;  %v3833_v32 = vmul.f32 %v8622_v60, %v8622_v60 }
 0x54b   : > { %4860 = vperm.xlu1 %5822, %v4849_v5   ;;  %v3923_v2 = vpack.c.bf16 %v3906_v37, %v3905_v44  ;;  %v3849_v5 = vsel %vm447_vm3, %v3829_v63, 0.0 }
 0x54c   : > { %v4266_v6 = vpop.permute.xlu0 %4265  ;;  %v3848_v31 = vadd.f32 %v3847_v23, %v3846_v25  ;;  %v3851_v25 = vsel %vm447_vm3, %v3830_v12, 0.0  ;;  %v3853_v63 = vsel %vm447_vm3, %v3831_v57, 0.0  ;;  %v3855_v12 = vsel %vm447_vm3, %v3832_v49, 0.0  ;;  %v5675_v49 = vld [vmem:[#allocation2 + $0x8] sm:$0xf0] }
 0x54d   : > { %v8672_v24 = vsub.f32 %v4266_v6, %v9917_v0  ;;  %v3745_v4 = vpop.permute.xlu1 %3744  ;;  %3987 = vmatpush.bf16.msra.mxu0 %v3923_v2  ;;  %v3835_v6 = vmul.f32 %v8609_v21, %v8609_v21  ;;  %v3857_v2 = vsel %vm447_vm3, %v3833_v32, 0.0  ;;  %v3837_v57 = vmul.f32 %v8598_v16, %v8598_v16  ;;  %v5681_v16 = vld [vmem:[#allocation2 + $0x10] sm:$0xf] }
 0x54e   : > { %v3806_v22 = vsub.f32 %v3745_v4, %v3780_v55  ;;  %v3850_v26 = vadd.f32 %v3849_v5, %v3848_v31  ;;  %v5972_v55 = vpop.eup %5971  ;;  %v3859_v31 = vsel %vm447_vm3, %v3834_v50, 0.0 }
 0x54f   : > { %v3902_v60 = vmul.f32 %v5972_v55, %v6793_v36  ;;  %v3861_v5 = vsel %vm447_vm3, %v3835_v6, 0.0 }
 0x550   : > { %v3852_v44 = vadd.f32 %v3851_v25, %v3850_v26  ;;  %5973 = vtanh.f32 %v3806_v22  ;;  %3988 = vmatmul.bf16.vlgmr.msra.gmra.mxu0 %v8677_v38  ;;  %v5739_v26 = vld [vmem:[#allocation2 + $0x4] sm:$0xf] }
 0x551   : > { %v3922_v22 = vadd.f32 %v8575_v17, %v3902_v60  ;;  %v8710_v50 = vor.u32 %v5739_v26, %v5675_v49  ;;  %v3865_v17 = vsel %vm447_vm3, %v3837_v57, 0.0  ;;  %v8952_v38 = vld [vmem:[%s6174_s20 + $0x48] sm:$0xff] }
 0x552   : > { %4362 = vperm.xlu2 %5821, %v4351_v53   ;;  %v3854_v37 = vadd.f32 %v3853_v63, %v3852_v44  ;;  %v5742_v63 = vld [vmem:[#allocation2 + $0x14] sm:$0xf0]  ;;  %10083 = vst [vmem:[#allocation31_spill] sm:$0xff] %v8952_v38 }
 0x553   : > { %4847 = vperm.xlu1 %5822, %v4836_v19   ;;  %v3836_v19 = vmul.f32 %v8593_v62, %v8593_v62  ;;  %v3838_v62 = vmul.f32 %v8568_v51, %v8568_v51  ;;  %v3840_v51 = vmul.f32 %v8552_v39, %v8552_v39 }
 0x554   : > { %v3856_v23 = vadd.f32 %v3855_v12, %v3854_v37 }
 0x555   : > { %v3863_v44 = vsel %vm447_vm3, %v3836_v19, 0.0  ;;  %v3867_v6 = vsel %vm447_vm3, %v3838_v62, 0.0  ;;  %v3871_v39 = vsel %vm447_vm3, %v3840_v51, 0.0  ;;  %v5683_v62 = vld [vmem:[#allocation2 + $0x18] sm:$0xf0] }
 0x556   : > { %v5974_v9 = vpop.eup %5973  ;;  %v3858_v52 = vadd.f32 %v3857_v2, %v3856_v23  ;;  %v8715_v23 = vor.u32 %v5742_v63, %v5681_v16  ;;  %v4823_v63 = vperm.slane %v8472_v8, 3  ;;  %v5697_v51 = vld [vmem:[#allocation2 + $0x30] sm:$0xf] }
 0x557   : > { %v3901_v4 = vmul.f32 %v5974_v9, %v6793_v36 }
 0x558   : > { %v3860_v54 = vadd.f32 %v3859_v31, %v3858_v52  ;;  %10069 = vst [vmem:[#allocation32_spill] sm:$0xff] %v8715_v23  ;;  %v10070_v52 = vperm.slane %v8433_v59, 1  ;;  %v8728_v31 = vpop.permute.xlu2 %4317 }
 0x559   : > { %v3921_v21 = vadd.f32 %v8566_v41, %v3901_v4  ;;  %v3839_v41 = vmul.f32 %v8557_v40, %v8557_v40  ;;  %v3841_v40 = vmul.f32 %v8561_v45, %v8561_v45  ;;  %v3842_v4 = vmul.f32 %v5974_v9, %v5974_v9  ;;  %v5689_v9 = vld [vmem:[#allocation2 + $0x20] sm:$0xf] }
 0x55a   : > { %5824 = vset.pattern.permute.xlu2 %v10001_v30  ;;  %v3862_v25 = vadd.f32 %v3861_v5, %v3860_v54  ;;  %v3843_v5 = vmul.f32 %v5972_v55, %v5972_v55  ;;  %v4888_v45 = vperm.slane %v8433_v59, 0 }
 0x55b   : > { %5823 = vset.pattern.permute.xlu1 %v10001_v30  ;;  %v3931_v32 = vpack.c.bf16 %v3922_v22, %v3921_v21  ;;  %v3869_v60 = vsel %vm447_vm3, %v3839_v41, 0.0  ;;  %v3873_v57 = vsel %vm447_vm3, %v3841_v40, 0.0  ;;  %v3875_v22 = vsel %vm447_vm3, %v3842_v4, 0.0 }
 0x55c   : > { %v3864_v37 = vadd.f32 %v3863_v44, %v3862_v25  ;;  %v3877_v49 = vsel %vm447_vm3, %v3843_v5, 0.0  ;;  %v5741_v25 = vld [vmem:[#allocation2 + $0x14] sm:$0xf] }
 0x55d   : > { %4016 = vmatpush.bf16.msrb.mxu2 %v3931_v32  ;;  %v5744_v32 = vld [vmem:[#allocation2 + $0x24] sm:$0xf0]  ;;  %v8738_v16 = vor.u32 %v5741_v25, %v5683_v62  ;;  %v4337_v41 = vpop.permute.xlu1 %4336 }
 0x55e   : > { %v3866_v12 = vadd.f32 %v3865_v17, %v3864_v37  ;;  %v8740_v55 = vor.u32 %v5744_v32, %v5689_v9  ;;  %v5743_v17 = vld [vmem:[#allocation2 + $0x24] sm:$0xf] }
 0x560   : > { %v3868_v2 = vadd.f32 %v3867_v6, %v3866_v12  ;;  %3993 = vmatmul.bf16.gmra.mxu0 %v8715_v23  ;;  %5703 = vmatmul.msk.bf16.vlgmr.msrb.gmra.mxu2 %vm447_vm3, %v8710_v50  ;;  %v4311_v44 = vpop.permute.xlu2 %4310  ;;  %10071 = vst [vmem:[#allocation23_spill] sm:$0xff] %v8740_v55  ;;  %v5691_v12 = vld [vmem:[#allocation2 + $0x28] sm:$0xf0]  ;;  %v5746_v6 = vld [vmem:[#allocation2 + $0x34] sm:$0xf0] }
 0x561   : > { %v8749_v40 = vor.u32 %v5743_v17, %v5691_v12  ;;  %v4386_v17 = vperm.slane %v8507_v48, 0 }
 0x562   : > { %4906 = vperm.xlu2 %5824, %v10070_v52   ;;  %v3870_v19 = vadd.f32 %v3869_v60, %v3868_v2  ;;  %v8751_v52 = vpop.permute.xlu0 %4912 }
 0x563   : > { %4356 = vperm.xlu1 %5823, %v4351_v53  }
 0x564   : > { %v3872_v54 = vadd.f32 %v3871_v39, %v3870_v19  ;;  %v8753_v19 = vor.u32 %v5746_v6, %v5697_v51 }
 0x566   : > { %v3874_v21 = vadd.f32 %v3873_v57, %v3872_v54  ;;  %10072 = vst [vmem:[#allocation22_spill] sm:$0xff] %v8753_v19  ;;  %v4390_v54 = vperm.slane %v8517_v14, 0  ;;  %v4389_v57 = vperm.slane %v8511_v11, 0 }
 0x568   : > { %v3876_v26 = vadd.f32 %v3875_v22, %v3874_v21  ;;  %v4810_v22 = vperm.slane %v8472_v8, 2  ;;  %v4413_v25 = vsub.f32 %v8639_v43, %v4389_v57  ;;  %v4387_v8 = vperm.slane %v8513_v46, 0 }
 0x56a   : > { %5825 = vset.pattern.permute.xlu2 %v10055_v33  ;;  %v8736_v53 = vadd.f32 %v3877_v49, %v3876_v26  ;;  %v4324_v5 = vpop.permute.xlu0 %4323  ;;  %v4414_v26 = vsub.f32 %v4337_v41, %v4389_v57  ;;  %v5699_v49 = vld [vmem:[#allocation2 + $0x38] sm:$0xf0]  ;;  %v10074_v41 = vperm.slane %v8433_v59, 2 }
 0x56b   : > { %4893 = vperm.xlu1 %5823, %v4888_v45  }
 0x56c   : > { %v4292_v37 = vpop.permute.xlu2 %4291 }
 0x56d   : > { %v4305_v2 = vpop.permute.xlu1 %4304 }
 0x570   : > { %3998 = vmatmul.bf16.gmra.mxu0 %v8740_v55  ;;  %5704 = vmatmul.msk.bf16.gmra.mxu2 %vm447_vm3, %v8738_v16 }
 0x572   : > { %4899 = vperm.xlu2 %5825, %v4888_v45   ;;  %v5745_v45 = vld [vmem:[#allocation2 + $0x34] sm:$0xf] }
 0x573   : > { %4828 = vperm.xlu1 %5823, %v4823_v63   ;;  %v8766_v9 = vor.u32 %v5745_v45, %v5699_v49 }
 0x574   : > { %v8747_v60 = vpop.permute.xlu2 %4278 }
 0x57a   : > { %4834 = vperm.xlu2 %5825, %v4823_v63   ;;  %v4409_v63 = vsub.f32 %v4305_v2, %v4387_v8 }
 0x57b   : > { %5827 = vset.pattern.permute.xlu1 %v10055_v33  ;;  %v10073_v33 = vperm.slane %v8458_v34, 2 }
 0x57d   : > { %v4285_v39 = vpop.permute.xlu1 %4284 }
 0x580   : > { %4003 = vmatmul.bf16.gmra.mxu0 %v8753_v19  ;;  %5705 = vmatmul.msk.bf16.gmra.mxu2 %vm447_vm3, %v8749_v40 }
 0x582   : > { %5828 = vset.pattern.permute.xlu2 %v10001_v30  ;;  %v4388_v30 = vperm.slane %v8515_v18, 0  ;;  %v4298_v18 = vpop.permute.xlu0 %4297 }
 0x583   : > { %4271 = vperm.xlu1 %5827, %v10073_v33   ;;  %v4408_v46 = vsub.f32 %v4298_v18, %v4386_v17 }
 0x584   : > { %v4350_v4 = vpop.permute.xlu2 %4349  ;;  %v4412_v14 = vsub.f32 %v4324_v5, %v4388_v30  ;;  %v4411_v32 = vsub.f32 %v8728_v31, %v4388_v30  ;;  %v4410_v31 = vsub.f32 %v4311_v44, %v4387_v8  ;;  %v4385_v44 = vperm.slane %v8505_v61, 0 }
 0x585   : > { %v4416_v21 = vsub.f32 %v4350_v4, %v4390_v54  ;;  %v4407_v4 = vsub.f32 %v4292_v37, %v4386_v17  ;;  %v8800_v37 = vld [vmem:[%s9840_s4 + $0x18] sm:$0xff] }
 0x586   : > { %v4406_v61 = vsub.f32 %v4285_v39, %v4385_v44 }
 0x587   : > { %5975 = vtanh.f32 %v4416_v21 }
 0x588   : > { %5977 = vtanh.f32 %v4414_v26  ;;  %v10075_v26 = vperm.slane %v8458_v34, 1 }
 0x589   : > { %5979 = vtanh.f32 %v4413_v25 }
 0x58a   : > { %4815 = vperm.xlu2 %5828, %v4810_v22  }
 0x58b   : > { %4821 = vperm.xlu1 %5827, %v4810_v22  }
 0x58d   : > { %v4344_v62 = vpop.permute.xlu1 %4343  ;;  %v8772_v43 = vpop.eup %5975 }
 0x58e   : > { %v4415_v11 = vsub.f32 %v4344_v62, %v4390_v54  ;;  %v8777_v12 = vpop.eup %5977  ;;  %v4511_v6 = vmul.f32 %v8772_v43, %v6793_v36  ;;  %v8795_v54 = vld [vmem:[%s9840_s4 + $0x10] sm:$0xff]  ;;  %v4405_v62 = vsub.f32 %v8747_v60, %v4385_v44 }
 0x58f   : > { %v8779_v51 = vpop.eup %5979  ;;  %v4509_v48 = vmul.f32 %v8777_v12, %v6793_v36 }
 0x590   : > { %5981 = vtanh.f32 %v4415_v11  ;;  %5706 = vmatmul.msk.bf16.gmra.mxu2 %vm447_vm3, %v8766_v9  ;;  %v4531_v5 = vadd.f32 %v8800_v37, %v4511_v6  ;;  %v4508_v21 = vmul.f32 %v8779_v51, %v6793_v36 }
 0x591   : > { %5983 = vtanh.f32 %v4412_v14  ;;  %v4529_v49 = vadd.f32 %v8800_v37, %v4509_v48 }
 0x592   : > { %4919 = vperm.xlu2 %5828, %v10074_v41   ;;  %5985 = vtanh.f32 %v4411_v32  ;;  %v4528_v14 = vadd.f32 %v8795_v54, %v4508_v21 }
 0x593   : > { %5987 = vtanh.f32 %v4409_v63 }
 0x594   : > { %5989 = vtanh.f32 %v4410_v31  ;;  %v4540_v32 = vpack.c.bf16 %v4529_v49, %v4528_v14  ;;  %v4881_v17 = vpop.permute.xlu2 %4880 }
 0x595   : > { %5991 = vtanh.f32 %v4408_v46 }
 0x596   : > { %v8783_v33 = vpop.eup %5981  ;;  %5993 = vtanh.f32 %v4407_v4 }
 0x597   : > { %v4510_v59 = vmul.f32 %v8783_v33, %v6793_v36  ;;  %v8789_v2 = vpop.eup %5983  ;;  %5995 = vtanh.f32 %v4406_v61 }
 0x598   : > { %v8806_v22 = vpop.eup %5985  ;;  %v4507_v25 = vmul.f32 %v8789_v2, %v6793_v36  ;;  %5997 = vtanh.f32 %v4405_v62 }
 0x599   : > { %v4530_v57 = vadd.f32 %v8795_v54, %v4510_v59  ;;  %v8813_v30 = vpop.eup %5987  ;;  %v4506_v11 = vmul.f32 %v8806_v22, %v6793_v36 }
 0x59a   : > { %4252 = vperm.xlu2 %5828, %v10075_v26   ;;  %v8819_v39 = vpop.eup %5989  ;;  %v4527_v8 = vadd.f32 %v8800_v37, %v4507_v25  ;;  %v4504_v18 = vmul.f32 %v8813_v30, %v6793_v36 }
 0x59b   : > { %v4541_v45 = vpack.c.bf16 %v4531_v5, %v4530_v57  ;;  %v8821_v34 = vpop.eup %5991  ;;  %v4526_v60 = vadd.f32 %v8795_v54, %v4506_v11  ;;  %v4505_v41 = vmul.f32 %v8819_v39, %v6793_v36 }
 0x59c   : > { %v8826_v63 = vpop.eup %5993  ;;  %v4524_v46 = vadd.f32 %v8795_v54, %v4504_v18  ;;  %v4503_v4 = vmul.f32 %v8821_v34, %v6793_v36 }
 0x59d   : > { %4543 = vmatpush.bf16.msra.mxu1 %v4541_v45  ;;  %v4539_v31 = vpack.c.bf16 %v4527_v8, %v4526_v60  ;;  %v4502_v6 = vmul.f32 %v8826_v63, %v6793_v36  ;;  %v8836_v59 = vpop.eup %5995  ;;  %v4525_v48 = vadd.f32 %v8800_v37, %v4505_v41  ;;  %v4887_v11 = vpop.permute.xlu1 %4886  ;;  %v4953_v8 = vperm.slane %v8539_v47, 0 }
 0x59e   : > { %v8839_v44 = vpop.eup %5997  ;;  %v4523_v21 = vadd.f32 %v8800_v37, %v4503_v4  ;;  %v4501_v61 = vmul.f32 %v8836_v59, %v6793_v36 }
 0x59f   : > { %v4538_v57 = vpack.c.bf16 %v4525_v48, %v4524_v46  ;;  %v4522_v5 = vadd.f32 %v8795_v54, %v4502_v6  ;;  %v4500_v26 = vmul.f32 %v8839_v44, %v6793_v36  ;;  %v4979_v18 = vsub.f32 %v8751_v52, %v4953_v8  ;;  %v8867_v52 = vld [vmem:[%s9840_s4 + $0x20] sm:$0xff] }
 0x5a0   : > { %v4521_v25 = vadd.f32 %v8800_v37, %v4501_v61 }
 0x5a1   : > { %4544 = vmatpush.bf16.msra.mxu1 %v4540_v32  ;;  %v4537_v49 = vpack.c.bf16 %v4523_v21, %v4522_v5  ;;  %v4520_v62 = vadd.f32 %v8795_v54, %v4500_v26  ;;  %5999 = vtanh.f32 %v4979_v18 }
 0x5a3   : > { %v4536_v14 = vpack.c.bf16 %v4521_v25, %v4520_v62 }
 0x5a4   : > { %v4874_v45 = vpop.permute.xlu2 %4873 }
 0x5a5   : > { %4545 = vmatpush.bf16.msra.mxu1 %v4539_v31 }
 0x5a7   : > { %v8851_v46 = vpop.eup %5999 }
 0x5a8   : > { %v5074_v4 = vmul.f32 %v8851_v46, %v6793_v36 }
 0x5a9   : > { %4546 = vmatpush.bf16.msra.mxu1 %v4538_v57  ;;  %v8860_v57 = vld [vmem:[%s9840_s4 + $0x28] sm:$0xff] }
 0x5aa   : > { %v5094_v21 = vadd.f32 %v8860_v57, %v5074_v4 }
 0x5ac   : > { %v4363_v32 = vpop.permute.xlu2 %4362 }
 0x5ad   : > { %4547 = vmatpush.bf16.msra.mxu1 %v4537_v49  ;;  %v4868_v60 = vpop.permute.xlu1 %4867  ;;  %v4391_v49 = vperm.slane %v8519_v35, 0 }
 0x5af   : > { %v4418_v25 = vsub.f32 %v4363_v32, %v4391_v49 }
 0x5b1   : > { %4548 = vmatpush.bf16.msra.mxu1 %v4536_v14 }
 0x5bc   : > { %v4907_v41 = vpop.permute.xlu2 %4906 }
 0x5bd   : > { %v4978_v31 = vsub.f32 %v4907_v41, %v4953_v8  ;;  %v4861_v6 = vpop.permute.xlu1 %4860  ;;  %v4952_v8 = vperm.slane %v8548_v29, 0  ;;  %v4951_v41 = vperm.slane %v8543_v1, 0 }
 0x5bf   : > { %6001 = vtanh.f32 %v4978_v31  ;;  %v4974_v4 = vsub.f32 %v4881_v17, %v4951_v41 }
 0x5c0   : > { %6003 = vtanh.f32 %v4418_v25 }
 0x5c5   : > { %v8855_v48 = vpop.eup %6001  ;;  %v4848_v26 = vpop.permute.xlu1 %4847 }
 0x5c6   : > { %10076 = vst [vmem:[#allocation24_spill] sm:$0xff] %v8855_v48  ;;  %v5073_v47 = vmul.f32 %v8855_v48, %v6793_v36  ;;  %v8874_v0 = vpop.eup %6003 }
 0x5c7   : > { %v4513_v35 = vmul.f32 %v8874_v0, %v6793_v36 }
 0x5c8   : > { %v5093_v5 = vadd.f32 %v8867_v52, %v5073_v47  ;;  %v4975_v47 = vsub.f32 %v4887_v11, %v4951_v41 }
 0x5ca   : > { %v5104_v61 = vpack.c.bf16 %v5094_v21, %v5093_v5  ;;  %v4950_v5 = vperm.slane %v8546_v13, 0 }
 0x5cc   : > { %5106 = vmatpush.bf16.msrb.mxu0 %v5104_v61  ;;  %v4900_v62 = vpop.permute.xlu2 %4899  ;;  %v4972_v29 = vsub.f32 %v4868_v60, %v4950_v5  ;;  %v4973_v17 = vsub.f32 %v4874_v45, %v4950_v5 }
 0x5cd   : > { %v4977_v31 = vsub.f32 %v4900_v62, %v4952_v8  ;;  %v3989_v11 = vpop.f32.mrf.mxu0  ;;  %v8888_v62 = vpop.permute.xlu0 %4925 }
 0x5d4   : > { %v8877_v21 = vpop.permute.xlu2 %4834 }
 0x5d5   : > { %v4357_v14 = vpop.permute.xlu1 %4356 }
 0x5d6   : > { %v4417_v18 = vsub.f32 %v4357_v14, %v4391_v49  ;;  %v10077_v49 = vperm.slane %v8537_v56, 0 }
 0x5d8   : > { %6005 = vtanh.f32 %v4417_v18  ;;  %v4971_v25 = vsub.f32 %v4861_v6, %v10077_v49  ;;  %v4533_v18 = vadd.f32 %v8800_v37, %v4513_v35 }
 0x5d9   : > { %6007 = vtanh.f32 %v4977_v31 }
 0x5da   : > { %6009 = vtanh.f32 %v4975_v47  ;;  %v10080_v47 = vperm.slane %v8530_v7, 0  ;;  %v3991_v7 = vpop.f32.mrf.mxu0 }
 0x5db   : > { %6011 = vtanh.f32 %v4974_v4 }
 0x5dc   : > { %v4969_v4 = vsub.f32 %v4848_v26, %v10080_v47  ;;  %v4383_v47 = vperm.slane %v8501_v42, 0 }
 0x5dd   : > { %v4894_v32 = vpop.permute.xlu1 %4893 }
 0x5de   : > { %v8881_v61 = vpop.eup %6005  ;;  %v4976_v1 = vsub.f32 %v4894_v32, %v4952_v8 }
 0x5df   : > { %v4512_v13 = vmul.f32 %v8881_v61, %v6793_v36  ;;  %v8892_v60 = vpop.eup %6007 }
 0x5e0   : > { %6013 = vtanh.f32 %v4976_v1  ;;  %10078 = vst [vmem:[#allocation26_spill] sm:$0xff] %v8892_v60  ;;  %v8894_v6 = vpop.eup %6009 }
 0x5e1   : > { %6015 = vtanh.f32 %v8646_v20  ;;  %v4532_v14 = vadd.f32 %v8795_v54, %v4512_v13  ;;  %v8898_v45 = vpop.eup %6011  ;;  %v5072_v20 = vmul.f32 %v8892_v60, %v6793_v36 }
 0x5e2   : > { %6017 = vtanh.f32 %v4972_v29  ;;  %v5070_v29 = vmul.f32 %v8894_v6, %v6793_v36 }
 0x5e3   : > { %6019 = vtanh.f32 %v4971_v25  ;;  %v4542_v56 = vpack.c.bf16 %v4533_v18, %v4532_v14  ;;  %v4018_v8 = vpop.f32.mrf.mxu2  ;;  %v5092_v25 = vadd.f32 %v8860_v57, %v5072_v20  ;;  %v4259_v14 = vpop.permute.xlu0 %4258  ;;  %v8930_v18 = vld [vmem:[%s6174_s20 + $0x40] sm:$0xff] }
 0x5e4   : > { %6021 = vtanh.f32 %v4973_v17  ;;  %v8896_v41 = vpop.permute.xlu2 %4815  ;;  %v8908_v35 = vadd.f32 %v4018_v8, %v3989_v11  ;;  %v5069_v11 = vmul.f32 %v8898_v45, %v6793_v36  ;;  %10082 = vst [vmem:[#allocation30_spill] sm:$0xff] %v8930_v18  ;;  %v5090_v8 = vadd.f32 %v8860_v57, %v5070_v29 }
 0x5e5   : > { %4579 = vmatpush.bf16.msrb.mxu3 %v4542_v56  ;;  %6023 = vtanh.f32 %v8657_v15  ;;  %v8940_v19 = vpop.permute.xlu1 %4828 }
 0x5e6   : > { %v8902_v31 = vpop.eup %6013  ;;  %10081 = vst [vmem:[#allocation29_spill] sm:$0xff] %v8908_v35  ;;  %6025 = vtanh.f32 %v4969_v4  ;;  %v4038_v15 = vsub.f32 %v8908_v35, %v8930_v18 }
 0x5e7   : > { %10079 = vst [vmem:[#allocation21_spill] sm:$0xff] %v8902_v31  ;;  %v8906_v5 = vpop.eup %6015  ;;  %v5071_v32 = vmul.f32 %v8902_v31, %v6793_v36 }
 0x5e8   : > { %v8914_v1 = vpop.eup %6017  ;;  %5709 = vmatmul.msk.bf16.vlgmr.msrb.gmra.mxu3 %vm447_vm3, %v8710_v50  ;;  %v5065_v17 = vmul.f32 %v8906_v5, %v6793_v36  ;;  %v4046_v35 = vmul.f32 %v4038_v15, %v4038_v15 }
 0x5e9   : > { %v8918_v49 = vpop.eup %6019  ;;  %v5091_v26 = vadd.f32 %v8867_v52, %v5071_v32  ;;  %v5067_v20 = vmul.f32 %v8914_v1, %v6793_v36 }
 0x5ea   : > { %v8925_v13 = vpop.eup %6021  ;;  %v5066_v27 = vmul.f32 %v8918_v49, %v6793_v36  ;;  %v5085_v18 = vadd.f32 %v8867_v52, %v5065_v17  ;;  %v4054_v15 = vsel %vm447_vm3, %v4046_v35, 0.0 }
 0x5eb   : > { %v5103_v56 = vpack.c.bf16 %v5092_v25, %v5091_v26  ;;  %v4020_v32 = vpop.f32.mrf.mxu2  ;;  %v5089_v26 = vadd.f32 %v8867_v52, %v5069_v11  ;;  %v5068_v29 = vmul.f32 %v8925_v13, %v6793_v36  ;;  %v4402_v25 = vsub.f32 %v4259_v14, %v4383_v47  ;;  %v8949_v23 = vpop.eup %6023 }
 0x5ec   : > { %v4920_v4 = vpop.permute.xlu2 %4919  ;;  %v8942_v55 = vadd.f32 %v4020_v32, %v3991_v7  ;;  %v5086_v42 = vadd.f32 %v8860_v57, %v5066_v27  ;;  %v8957_v11 = vpop.eup %6025  ;;  %v5063_v27 = vmul.f32 %v8949_v23, %v6793_v36 }
 0x5ed   : > { %5107 = vmatpush.bf16.msrb.mxu0 %v5103_v56  ;;  %v5102_v32 = vpack.c.bf16 %v5090_v8, %v5089_v26  ;;  %v5087_v56 = vadd.f32 %v8867_v52, %v5067_v20  ;;  %v5088_v17 = vadd.f32 %v8860_v57, %v5068_v29  ;;  %6027 = vtanh.f32 %v4402_v25  ;;  %v3994_v14 = vpop.f32.mrf.mxu0 }
 0x5ee   : > { %v4039_v7 = vsub.f32 %v8942_v55, %v8952_v38  ;;  %v5100_v60 = vpack.c.bf16 %v5086_v42, %v5085_v18  ;;  %v5064_v18 = vmul.f32 %v8957_v11, %v6793_v36  ;;  %6029 = vtanh.f32 %v8672_v24 }
 0x5ef   : > { %v5101_v8 = vpack.c.bf16 %v5088_v17, %v5087_v56  ;;  %v5083_v35 = vadd.f32 %v8867_v52, %v5063_v27  ;;  %v4954_v17 = vperm.slane %v8541_v3, 0 }
 0x5f0   : > { %v4047_v48 = vmul.f32 %v4039_v7, %v4039_v7  ;;  %v10084_v7 = vperm.slane %v8503_v58, 0 }
 0x5f1   : > { %5108 = vmatpush.bf16.msrb.mxu0 %v5102_v32 }
 0x5f2   : > { %v4055_v38 = vsel %vm447_vm3, %v4047_v48, 0.0  ;;  %v5084_v48 = vadd.f32 %v8860_v57, %v5064_v18 }
 0x5f3   : > { %v4056_v26 = vadd.f32 %v4055_v38, %v4054_v15  ;;  %v4023_v20 = vpop.f32.mrf.mxu2  ;;  %v8974_v38 = vld [vmem:[%s6174_s20 + $0x50] sm:$0xff] }
 0x5f4   : > { %v4253_v31 = vpop.permute.xlu2 %4252  ;;  %v8967_v29 = vadd.f32 %v4023_v20, %v3994_v14  ;;  %v5099_v24 = vpack.c.bf16 %v5084_v48, %v5083_v35  ;;  %v4981_v20 = vsub.f32 %v8888_v62, %v4954_v17  ;;  %v4441_v35 = vmul.f32 %v8839_v44, %v8839_v44 }
 0x5f5   : > { %v4401_v42 = vsub.f32 %v4253_v31, %v4383_v47  ;;  %5109 = vmatpush.bf16.msrb.mxu0 %v5101_v8  ;;  %v4272_v25 = vpop.permute.xlu1 %4271  ;;  %v8980_v31 = vpop.eup %6027 }
 0x5f6   : > { %v4404_v32 = vsub.f32 %v4272_v25, %v10084_v7  ;;  %v4040_v56 = vsub.f32 %v8967_v29, %v8974_v38  ;;  %v8982_v58 = vpop.eup %6029  ;;  %v4438_v14 = vmul.f32 %v8980_v31, %v8980_v31 }
 0x5f7   : > { %6031 = vtanh.f32 %v4401_v42  ;;  %v4980_v42 = vsub.f32 %v4920_v4, %v4954_v17  ;;  %v4947_v4 = vperm.slane %v8528_v28, 0 }
 0x5f8   : > { %6033 = vtanh.f32 %v4404_v32  ;;  %5710 = vmatmul.msk.bf16.gmra.mxu3 %vm447_vm3, %v8738_v16  ;;  %v4048_v47 = vmul.f32 %v4040_v56, %v4040_v56  ;;  %v4456_v25 = vsel %vm447_vm3, %v4438_v14, 0.0  ;;  %v4442_v56 = vmul.f32 %v8836_v59, %v8836_v59 }
 0x5f9   : > { %5110 = vmatpush.bf16.msrb.mxu0 %v5100_v60  ;;  %v4439_v60 = vmul.f32 %v8982_v58, %v8982_v58  ;;  %6035 = vtanh.f32 %v4981_v20  ;;  %v4462_v14 = vsel %vm447_vm3, %v4441_v35, 0.0  ;;  %v4966_v44 = vsub.f32 %v8940_v19, %v4947_v4 }
 0x5fa   : > { %v4057_v27 = vsel %vm447_vm3, %v4048_v47, 0.0  ;;  %6037 = vtanh.f32 %v4980_v42  ;;  %v4967_v47 = vsub.f32 %v8877_v21, %v4947_v4  ;;  %v4444_v59 = vmul.f32 %v8821_v34, %v8821_v34 }
 0x5fb   : > { %v8988_v15 = vadd.f32 %v4057_v27, %v4056_v26  ;;  %v4458_v62 = vsel %vm447_vm3, %v4439_v60, 0.0  ;;  %v4443_v27 = vmul.f32 %v8826_v63, %v8826_v63  ;;  %v4464_v42 = vsel %vm447_vm3, %v4442_v56, 0.0  ;;  %v4025_v56 = vpop.f32.mrf.mxu2 }
 0x5fc   : > { %6039 = vtanh.f32 %v4967_v47  ;;  %v4946_v63 = vperm.slane %v8526_v10, 0  ;;  %v4445_v19 = vmul.f32 %v8813_v30, %v8813_v30  ;;  %v4468_v10 = vsel %vm447_vm3, %v4444_v59, 0.0 }
 0x5fd   : > { %v8990_v8 = vpop.eup %6031  ;;  %5111 = vmatpush.bf16.msrb.mxu0 %v5099_v24  ;;  %6041 = vtanh.f32 %v4966_v44  ;;  %v4447_v35 = vmul.f32 %v8806_v22, %v8806_v22  ;;  %v4822_v22 = vpop.permute.xlu1 %4821  ;;  %v4449_v44 = vmul.f32 %v8779_v51, %v8779_v51  ;;  %v4450_v51 = vmul.f32 %v8777_v12, %v8777_v12 }
 0x5fe   : > { %v8993_v18 = vpop.eup %6033  ;;  %v4437_v3 = vmul.f32 %v8990_v8, %v8990_v8  ;;  %v4470_v30 = vsel %vm447_vm3, %v4445_v19, 0.0 }
 0x5ff   : > { %v4440_v26 = vmul.f32 %v8993_v18, %v8993_v18  ;;  %v9014_v20 = vpop.eup %6035 }
 0x600   : > { %v4455_v7 = vsel %vm447_vm3, %v4437_v3, 0.0  ;;  %v9017_v28 = vpop.eup %6037  ;;  %v4466_v3 = vsel %vm447_vm3, %v4443_v27, 0.0 }
 0x601   : > { %v4457_v32 = vadd.f32 %v4456_v25, %v4455_v7  ;;  %v4460_v24 = vsel %vm447_vm3, %v4440_v26, 0.0  ;;  %v5076_v25 = vmul.f32 %v9014_v20, %v6793_v36  ;;  %v4964_v7 = vsub.f32 %v8896_v41, %v4946_v63  ;;  %v3996_v41 = vpop.f32.mrf.mxu0 }
 0x602   : > { %v5075_v34 = vmul.f32 %v9017_v28, %v6793_v36  ;;  %v6040_v4 = vpop.eup %6039  ;;  %v9044_v27 = vadd.f32 %v4025_v56, %v3996_v41  ;;  %v4452_v56 = vmul.f32 %v8772_v43, %v8772_v43  ;;  %v4453_v43 = vmul.f32 %v8881_v61, %v8881_v61 }
 0x603   : > { %v4459_v48 = vadd.f32 %v4458_v62, %v4457_v32  ;;  %v4446_v32 = vmul.f32 %v8819_v39, %v8819_v39  ;;  %6043 = vtanh.f32 %v4964_v7  ;;  %v5096_v47 = vadd.f32 %v8860_v57, %v5076_v25 }
 0x604   : > { %v5062_v25 = vmul.f32 %v6040_v4, %v6793_v36  ;;  %v5006_v61 = vmul.f32 %v8906_v5, %v8906_v5  ;;  %v4498_v5 = vmul.f32 %v8982_v58, %v6793_v36 }
 0x605   : > { %v4461_v17 = vadd.f32 %v4460_v24, %v4459_v48  ;;  %v5095_v24 = vadd.f32 %v8867_v52, %v5075_v34  ;;  %v4472_v39 = vsel %vm447_vm3, %v4446_v32, 0.0 }
 0x606   : > { %v4518_v58 = vadd.f32 %v8795_v54, %v4498_v5 }
 0x607   : > { %v4463_v60 = vadd.f32 %v4462_v14, %v4461_v17  ;;  %v4448_v17 = vmul.f32 %v8789_v2, %v8789_v2  ;;  %v6042_v14 = vpop.eup %6041  ;;  %v5105_v59 = vpack.c.bf16 %v5096_v47, %v5095_v24  ;;  %v3879_v2 = vrot.slane %v8736_v53, 4 }
 0x608   : > { %5711 = vmatmul.msk.bf16.gmra.mxu3 %vm447_vm3, %v8749_v40 }
 0x609   : > { %v4465_v21 = vadd.f32 %v4464_v42, %v4463_v60  ;;  %v4965_v42 = vsub.f32 %v4822_v22, %v4946_v63  ;;  %5142 = vmatpush.bf16.msra.mxu2 %v5105_v59  ;;  %v4476_v34 = vsel %vm447_vm3, %v4448_v17, 0.0  ;;  %v9060_v32 = vpop.eup %6043  ;;  %v3880_v12 = vadd.f32 %v3879_v2, %v8736_v53 }
 0x60a   : > { %v4484_v59 = vsel %vm447_vm3, %v4452_v56, 0.0  ;;  %v3999_v56 = vpop.f32.mrf.mxu0 }
 0x60b   : > { %v4467_v26 = vadd.f32 %v4466_v3, %v4465_v21  ;;  %v4474_v21 = vsel %vm447_vm3, %v4447_v35, 0.0  ;;  %v9050_v3 = vld [vmem:[%s6174_s20 + $0x58] sm:$0xff]  ;;  %6045 = vtanh.f32 %v4965_v42  ;;  %v4451_v35 = vmul.f32 %v8783_v33, %v8783_v33 }
 0x60c   : > { %v4041_v19 = vsub.f32 %v9044_v27, %v9050_v3  ;;  %5715 = vmatmul.msk.bf16.vlgmr.msra.gmra.mxu2 %vm447_vm3, %v8710_v50  ;;  %v4480_v33 = vsel %vm447_vm3, %v4450_v51, 0.0 }
 0x60d   : > { %v4469_v62 = vadd.f32 %v4468_v10, %v4467_v26  ;;  %v5061_v26 = vmul.f32 %v6042_v14, %v6793_v36  ;;  %v4478_v10 = vsel %vm447_vm3, %v4449_v44, 0.0  ;;  %v4482_v53 = vsel %vm447_vm3, %v4451_v35, 0.0 }
 0x60e   : > { %v4049_v63 = vmul.f32 %v4041_v19, %v4041_v19  ;;  %v5002_v44 = vmul.f32 %v6042_v14, %v6042_v14  ;;  %v5003_v19 = vmul.f32 %v6040_v4, %v6040_v4  ;;  %v5004_v14 = vmul.f32 %v8949_v23, %v8949_v23 }
 0x60f   : > { %v4471_v48 = vadd.f32 %v4470_v30, %v4469_v62  ;;  %v5081_v41 = vadd.f32 %v8867_v52, %v5061_v26  ;;  %v5029_v23 = vsel %vm447_vm3, %v5006_v61, 0.0 }
 0x610   : > { %v4059_v30 = vsel %vm447_vm3, %v4049_v63, 0.0  ;;  %v5021_v63 = vsel %vm447_vm3, %v5002_v44, 0.0  ;;  %v5023_v35 = vsel %vm447_vm3, %v5003_v19, 0.0  ;;  %v4214_v44 = vrot.slane %v8942_v55, 5 }
 0x611   : > { %v4473_v60 = vadd.f32 %v4472_v39, %v4471_v48  ;;  %v5082_v48 = vadd.f32 %v8860_v57, %v5062_v25  ;;  %v9074_v47 = vadd.f32 %v4059_v30, %v8988_v15  ;;  %v5000_v39 = vmul.f32 %v9060_v32, %v9060_v32  ;;  %v9081_v22 = vpop.eup %6045 }
 0x612   : > { %v5001_v15 = vmul.f32 %v9081_v22, %v9081_v22  ;;  %v4001_v5 = vpop.f32.mrf.mxu0 }
 0x613   : > { %v4475_v7 = vadd.f32 %v4474_v21, %v4473_v60  ;;  %v5098_v17 = vpack.c.bf16 %v5082_v48, %v5081_v41  ;;  %v3881_v60 = vrot.slane %v3880_v12, 2  ;;  %v4454_v21 = vmul.f32 %v8874_v0, %v8874_v0 }
 0x614   : > { %v5018_v25 = vsel %vm447_vm3, %v5000_v39, 0.0  ;;  %v5019_v2 = vsel %vm447_vm3, %v5001_v15, 0.0  ;;  %v5025_v48 = vsel %vm447_vm3, %v5004_v14, 0.0  ;;  %v4215_v15 = vrot.slane %v9044_v27, 4 }
 0x615   : > { %v4477_v62 = vadd.f32 %v4476_v34, %v4475_v7  ;;  %5112 = vmatpush.bf16.msrb.mxu0 %v5098_v17  ;;  %v5020_v51 = vadd.f32 %v5019_v2, %v5018_v25  ;;  %v4486_v34 = vsel %vm447_vm3, %v4453_v43, 0.0  ;;  %v3882_v26 = vadd.f32 %v3881_v60, %v3880_v12  ;;  %v4028_v25 = vpop.f32.mrf.mxu2 }
 0x616   : > { %v4488_v4 = vsel %vm447_vm3, %v4454_v21, 0.0  ;;  %v4499_v17 = vmul.f32 %v8993_v18, %v6793_v36  ;;  %v5008_v60 = vmul.f32 %v8914_v1, %v8914_v1  ;;  %v4497_v18 = vmul.f32 %v8980_v31, %v6793_v36 }
 0x617   : > { %v4479_v24 = vadd.f32 %v4478_v10, %v4477_v62  ;;  %v5022_v0 = vadd.f32 %v5021_v63, %v5020_v51  ;;  %v5005_v62 = vmul.f32 %v8957_v11, %v8957_v11  ;;  %v3883_v12 = vrot.slane %v3882_v26, 1 }
 0x618   : > { %5712 = vmatmul.msk.bf16.gmra.mxu3 %vm447_vm3, %v8766_v9  ;;  %v9128_v19 = vsel %vm1102_vm5, %v4215_v15, %v4214_v44  ;;  %v4225_v2 = vrot.slane %v8942_v55, 6  ;;  %v5010_v31 = vmul.f32 %v8898_v45, %v8898_v45  ;;  %v9135_v61 = vadd.f32 %v4028_v25, %v3999_v56  ;;  %v10089_v15 = vld [vmem:[#allocation27_spill] sm:$0xff] }
 0x619   : > { %v4481_v50 = vadd.f32 %v4480_v33, %v4479_v24  ;;  %v5024_v41 = vadd.f32 %v5023_v35, %v5022_v0  ;;  %v5007_v24 = vmul.f32 %v8918_v49, %v8918_v49  ;;  %v5027_v11 = vsel %vm447_vm3, %v5005_v62, 0.0 }
 0x61a   : > { %v5009_v49 = vmul.f32 %v8925_v13, %v8925_v13  ;;  %v5033_v14 = vsel %vm447_vm3, %v5008_v60, 0.0  ;;  %v5059_v63 = vmul.f32 %v9060_v32, %v6793_v36  ;;  %v5015_v35 = vmul.f32 %v8851_v46, %v8851_v46 }
 0x61b   : > { %v4483_v42 = vadd.f32 %v4482_v53, %v4481_v50  ;;  %v5026_v39 = vadd.f32 %v5025_v48, %v5024_v41  ;;  %v4496_v50 = vmul.f32 %v8990_v8, %v6793_v36  ;;  %v5031_v8 = vsel %vm447_vm3, %v5007_v24, 0.0  ;;  %v10085_v24 = vld [vmem:[#allocation21_spill] sm:$0xff] }
 0x61c   : > { %5716 = vmatmul.msk.bf16.gmra.mxu2 %vm447_vm3, %v8738_v16  ;;  %v3884_v41 = vadd.f32 %v3883_v12, %v3882_v26  ;;  %v5037_v56 = vsel %vm447_vm3, %v5010_v31, 0.0  ;;  %v10087_v26 = vld [vmem:[#allocation24_spill] sm:$0xff]  ;;  %v5047_v60 = vsel %vm447_vm3, %v5015_v35, 0.0  ;;  %v5016_v25 = vmul.f32 %v9017_v28, %v9017_v28 }
 0x61d   : > { %v4485_v7 = vadd.f32 %v4484_v59, %v4483_v42  ;;  %v5028_v43 = vadd.f32 %v5027_v11, %v5026_v39  ;;  %v4519_v59 = vadd.f32 %v8800_v37, %v4499_v17  ;;  %v4516_v1 = vadd.f32 %v8795_v54, %v4496_v50 }
 0x61e   : > { %v5079_v39 = vadd.f32 %v8867_v52, %v5059_v63  ;;  %v5014_v12 = vmul.f32 %v10087_v26, %v10087_v26  ;;  %v4030_v52 = vpop.f32.mrf.mxu2  ;;  %v4108_v31 = vrot.slane %v8967_v29, 2 }
 0x61f   : > { %v4487_v10 = vadd.f32 %v4486_v34, %v4485_v7  ;;  %v5030_v21 = vadd.f32 %v5029_v23, %v5028_v43  ;;  %v4535_v13 = vpack.c.bf16 %v4519_v59, %v4518_v58  ;;  %v4226_v7 = vrot.slane %v9044_v27, 5  ;;  %v10088_v58 = vld [vmem:[#allocation26_spill] sm:$0xff] }
 0x620   : > { %v4517_v34 = vadd.f32 %v8800_v37, %v4497_v18  ;;  %v5035_v37 = vsel %vm447_vm3, %v5009_v49, 0.0  ;;  %v5013_v50 = vmul.f32 %v10088_v58, %v10088_v58  ;;  %v9171_v44 = vadd.f32 %v4030_v52, %v4001_v5 }
 0x621   : > { %v4489_v30 = vadd.f32 %v4488_v4, %v4487_v10  ;;  %v5032_v51 = vadd.f32 %v5031_v8, %v5030_v21  ;;  %4549 = vmatpush.bf16.msra.mxu1 %v4535_v13  ;;  %v9142_v54 = vsel %vm1102_vm5, %v4226_v7, %v4225_v2  ;;  %v5011_v10 = vmul.f32 %v8894_v6, %v8894_v6  ;;  %v9147_v4 = vld [vmem:[%s6174_s20 + $0x60] sm:$0xff]  ;;  %v9179_v8 = vld [vmem:[%s6174_s20 + $0x68] sm:$0xff] }
 0x622   : > { %v4042_v62 = vsub.f32 %v9135_v61, %v9147_v4  ;;  %v4534_v32 = vpack.c.bf16 %v4517_v34, %v4516_v1  ;;  %v5017_v59 = vmul.f32 %v9014_v20, %v9014_v20  ;;  %v5043_v21 = vsel %vm447_vm3, %v5013_v50, 0.0  ;;  %v10090_v20 = vld [vmem:[#allocation29_spill] sm:$0xff] }
 0x623   : > { %v4490_v33 = vrot.slane %v4489_v30, 4  ;;  %v5034_v45 = vadd.f32 %v5033_v14, %v5032_v51  ;;  %v5039_v11 = vsel %vm447_vm3, %v5011_v10, 0.0  ;;  %v4217_v13 = vrot.slane %v9171_v44, 3 }
 0x624   : > { %v4050_v48 = vmul.f32 %v4042_v62, %v4042_v62  ;;  %v4107_v7 = vrot.slane %v10090_v20, 3  ;;  %v4110_v51 = vrot.slane %v9135_v61, 1  ;;  %v4151_v14 = vrot.slane %v8967_v29, 6 }
 0x625   : > { %v4491_v53 = vadd.f32 %v4490_v33, %v4489_v30  ;;  %v5060_v30 = vmul.f32 %v9081_v22, %v6793_v36  ;;  %v5036_v6 = vadd.f32 %v5035_v37, %v5034_v45  ;;  %v5012_v33 = vmul.f32 %v10085_v24, %v10085_v24  ;;  %4550 = vmatpush.bf16.msra.mxu1 %v4534_v32 }
 0x626   : > { %v4061_v22 = vsel %vm447_vm3, %v4050_v48, 0.0  ;;  %v9197_v28 = vsel %vm1104_vm6, %v4217_v13, %v9128_v19  ;;  %v4228_v34 = vrot.slane %v9171_v44, 4  ;;  %v4237_v45 = vrot.slane %v9044_v27, 6  ;;  %v4033_v35 = vpop.f32.mrf.mxu2 }
 0x627   : > { %v4492_v42 = vrot.slane %v4491_v53, 2  ;;  %v5080_v46 = vadd.f32 %v8860_v57, %v5060_v30  ;;  %v5038_v36 = vadd.f32 %v5037_v56, %v5036_v6  ;;  %v5041_v49 = vsel %vm447_vm3, %v5012_v33, 0.0  ;;  %v9220_v33 = vld [vmem:[%s6174_s20 + $0x70] sm:$0xff] }
 0x628   : > { %4551 = vmatmul.bf16.vlgmr.msra.gmra.mxu1 %v10089_v15  ;;  %v4150_v37 = vrot.slane %v10090_v20, 7  ;;  %v9207_v19 = vsel %vm1104_vm6, %v4228_v34, %v9142_v54  ;;  %v4109_v30 = vsel %vm1102_vm5, %v4108_v31, %v4107_v7  ;;  %v4079_v56 = vrot.slane %v8967_v29, 7 }
 0x629   : > { %v4493_v16 = vadd.f32 %v4492_v42, %v4491_v53  ;;  %v4062_v53 = vadd.f32 %v4061_v22, %v9074_v47  ;;  %v5097_v43 = vpack.c.bf16 %v5080_v46, %v5079_v39  ;;  %v5040_v57 = vadd.f32 %v5039_v11, %v5038_v36 }
 0x62a   : > { %v4043_v47 = vsub.f32 %v9171_v44, %v9179_v8  ;;  %v5045_v42 = vsel %vm447_vm3, %v5014_v12, 0.0  ;;  %v4111_v6 = vsel %vm1104_vm6, %v4110_v51, %v4109_v30  ;;  %v4152_v48 = vsel %vm1102_vm5, %v4151_v14, %v4150_v37  ;;  %v9252_v51 = vld [vmem:[%s6174_s20 + $0x78] sm:$0xff] }
 0x62b   : > { %v4494_v0 = vrot.slane %v4493_v16, 1  ;;  %5113 = vmatpush.bf16.msrb.mxu0 %v5097_v43  ;;  %v5042_v18 = vadd.f32 %v5041_v49, %v5040_v57  ;;  %v5051_v11 = vsel %vm447_vm3, %v5017_v59, 0.0  ;;  %v4081_v22 = vrot.slane %v9135_v61, 6 }
 0x62c   : > { %v4051_v2 = vmul.f32 %v4043_v47, %v4043_v47  ;;  %5717 = vmatmul.msk.bf16.gmra.mxu2 %vm447_vm3, %v8749_v40  ;;  %v4153_v40 = vrot.slane %v9135_v61, 5  ;;  %v4087_v50 = vrot.slane %v10090_v20, 1  ;;  %v4080_v52 = vsel %vm1102_vm5, %v4079_v56, %v10090_v20 }
 0x62d   : > { %v4495_v23 = vadd.f32 %v4494_v0, %v4493_v16  ;;  %v5044_v1 = vadd.f32 %v5043_v21, %v5042_v18  ;;  %v4004_v16 = vpop.f32.mrf.mxu0  ;;  %v4236_v0 = vrot.slane %v8942_v55, 7  ;;  %v4165_v21 = vrot.slane %v9044_v27, 7 }
 0x62e   : > { %5114 = vmatmul.bf16.vlgmr.msrb.gmra.mxu0 %v10089_v15  ;;  %v4063_v10 = vsel %vm447_vm3, %v4051_v2, 0.0  ;;  %v9209_v32 = vadd.f32 %v4033_v35, %v4004_v16  ;;  %v4154_v36 = vsel %vm1104_vm6, %v4153_v40, %v4152_v48  ;;  %v4035_v18 = vpop.f32.mrf.mxu2  ;;  %v4088_v47 = vsel %vm1102_vm5, %v8967_v29, %v4087_v50 }
 0x62f   : > { %v9163_v17 = vsel %vm10086_vm0, %v3884_v41, %v4495_v23  ;;  %v5046_v63 = vadd.f32 %v5045_v42, %v5044_v1  ;;  %v4064_v62 = vadd.f32 %v4063_v10, %v4062_v53  ;;  %v9213_v41 = vsel %vm1102_vm5, %v4237_v45, %v4236_v0  ;;  %v10091_v1 = vld [vmem:[#allocation32_spill] sm:$0xff]  ;;  %vm10101_vm0 = vmmov %vm10100_vm10 }
 0x630   : > { %v5049_v23 = vsel %vm447_vm3, %v5016_v25, 0.0  ;;  %v4044_v54 = vsub.f32 %v9209_v32, %v9220_v33  ;;  %v4112_v39 = vsel %vm1106_vm8, %v9209_v32, %v4111_v6  ;;  %v4155_v46 = vrot.slane %v9209_v32, 4 }
 0x631   : > { %v5048_v5 = vadd.f32 %v5047_v60, %v5046_v63  ;;  %4113 = vrot.lane.b32.xlu1 %v4112_v39, %s6095_s23  ;;  %v4089_v53 = vrot.slane %v9135_v61, 7  ;;  %v4091_v15 = vrot.slane %v9209_v32, 6  ;;  %v4083_v49 = vrot.slane %v9209_v32, 5 }
 0x632   : > { %v4052_v12 = vmul.f32 %v4044_v54, %v4044_v54  ;;  %v4156_v58 = vsel %vm1106_vm8, %v4155_v46, %v4154_v36  ;;  %v4082_v42 = vsel %vm1104_vm6, %v4081_v22, %v4080_v52  ;;  %v4167_v7 = vrot.slane %v9171_v44, 6 }
 0x633   : > { %v5050_v24 = vadd.f32 %v5049_v23, %v5048_v5  ;;  %4157 = vrot.lane.b32.xlu0 %v4156_v58, %s6101_s24  ;;  %v4084_v2 = vsel %vm1106_vm8, %v4083_v49, %v4082_v42  ;;  %v4090_v31 = vsel %vm1104_vm6, %v4089_v53, %v4088_v47  ;;  %v4098_v63 = vrot.slane %v8967_v29, 1  ;;  %v10095_v58 = vld [vmem:[#allocation23_spill] sm:$0xff] }
 0x634   : > { %v4065_v57 = vsel %vm447_vm3, %v4052_v12, 0.0  ;;  %4086 = vst.msk [vmem:[#allocation3] sm:$0xf] %vm10092_vm2, %v4084_v2  ;;  %v4092_v34 = vsel %vm1106_vm8, %v4091_v15, %v4090_v31  ;;  %v4166_v0 = vsel %vm1102_vm5, %v4165_v21, %v8942_v55  ;;  %v4097_v5 = vrot.slane %v10090_v20, 2  ;;  %v10096_v2 = vld [vmem:[#allocation22_spill] sm:$0xff]  ;;  %vm10102_vm2 = vmmov %vm10101_vm0 }
 0x635   : > { %v5052_v26 = vadd.f32 %v5051_v11, %v5050_v24  ;;  %v4006_v60 = vpop.f32.mrf.mxu0  ;;  %v4066_v59 = vadd.f32 %v4065_v57, %v4064_v62  ;;  %v4168_v37 = vsel %vm1104_vm6, %v4167_v7, %v4166_v0  ;;  %v4101_v30 = vrot.slane %v9209_v32, 7 }
 0x636   : > { %v9244_v13 = vadd.f32 %v4035_v18, %v4006_v60  ;;  %v4239_v54 = vrot.slane %v9171_v44, 5  ;;  %v4099_v46 = vsel %vm1102_vm5, %v4098_v63, %v4097_v5  ;;  %v4117_v12 = vrot.slane %v10090_v20, 4 }
 0x637   : > { %v5053_v43 = vrot.slane %v5052_v26, 4  ;;  %v4100_v11 = vsel %vm1104_vm6, %v9135_v61, %v4099_v46  ;;  %v4129_v52 = vrot.slane %v8967_v29, 4  ;;  %v4128_v15 = vrot.slane %v10090_v20, 5 }
 0x638   : > { %4556 = vmatmul.bf16.gmra.mxu1 %v10091_v1  ;;  %v4045_v14 = vsub.f32 %v9244_v13, %v9252_v51  ;;  %v4219_v10 = vrot.slane %v9244_v13, 2  ;;  %v4169_v45 = vrot.slane %v9244_v13, 5  ;;  %v4230_v40 = vrot.slane %v9244_v13, 3 }
 0x639   : > { %v5054_v25 = vadd.f32 %v5053_v43, %v5052_v26  ;;  %4093 = vrot.lane.b32.xlu1 %v4092_v34, %s6092_s21  ;;  %v4102_v22 = vsel %vm1106_vm8, %v4101_v30, %v4100_v11  ;;  %v4120_v26 = vrot.slane %v9135_v61, 2  ;;  %v4131_v43 = vrot.slane %v9135_v61, 3 }
 0x63a   : > { %v4053_v35 = vmul.f32 %v4045_v14, %v4045_v14  ;;  %v9272_v23 = vsel %vm1106_vm8, %v4219_v10, %v9197_v28  ;;  %v4170_v6 = vsel %vm1106_vm8, %v4169_v45, %v4168_v37  ;;  %v9279_v24 = vsel %vm1106_vm8, %v4230_v40, %v9207_v19 }
 0x63b   : > { %v5055_v16 = vrot.slane %v5054_v25, 2  ;;  %4172 = vst.msk [vmem:[#allocation3 + $0x8] sm:$0xf] %vm10093_vm4, %v4170_v6  ;;  %v4240_v28 = vsel %vm1104_vm6, %v4239_v54, %v9213_v41  ;;  %v4118_v19 = vrot.slane %v8967_v29, 3  ;;  %v4122_v41 = vrot.slane %v9209_v32, 1 }
 0x63c   : > { %5718 = vmatmul.msk.bf16.gmra.mxu2 %vm447_vm3, %v8766_v9  ;;  %v4067_v56 = vsel %vm447_vm3, %v4053_v35, 0.0  ;;  %v4241_v57 = vrot.slane %v9244_v13, 4  ;;  %v4133_v49 = vrot.slane %v9209_v32, 2  ;;  %v4140_v42 = vrot.slane %v8967_v29, 5 }
 0x63d   : > { %v5056_v62 = vadd.f32 %v5055_v16, %v5054_v25  ;;  %v9282_v39 = vadd.f32 %v4067_v56, %v4066_v59  ;;  %v4119_v50 = vsel %vm1102_vm5, %v4118_v19, %v4117_v12  ;;  %v4130_v59 = vsel %vm1102_vm5, %v4129_v52, %v4128_v15 }
 0x63e   : > { %5119 = vmatmul.bf16.gmra.mxu0 %v10091_v1  ;;  %v9311_v60 = vsel %vm1106_vm8, %v4241_v57, %v4240_v28  ;;  %v4132_v18 = vsel %vm1104_vm6, %v4131_v43, %v4130_v59  ;;  %v4142_v21 = vrot.slane %v9135_v61, 4  ;;  %v4139_v25 = vrot.slane %v10090_v20, 6 }
 0x63f   : > { %v5057_v48 = vrot.slane %v5056_v62, 1  ;;  %v4134_v47 = vsel %vm1106_vm8, %v4133_v49, %v4132_v18  ;;  %v4144_v1 = vrot.slane %v9209_v32, 3  ;;  %v4194_v29 = vrot.slane %v9044_v27, 2 }
 0x640   : > { %v4141_v7 = vsel %vm1102_vm5, %v4140_v42, %v4139_v25  ;;  %v4196_v61 = vrot.slane %v9171_v44, 1  ;;  %v4193_v20 = vrot.slane %v8942_v55, 3  ;;  %v4175_v63 = vrot.slane %v9171_v44, 7  ;;  %v10098_v25 = vld [vmem:[#allocation30_spill] sm:$0xff] }
 0x641   : > { %v5058_v9 = vadd.f32 %v5057_v48, %v5056_v62  ;;  %4103 = vrot.lane.b32.xlu1 %v4102_v22, %s6093_s22  ;;  %v4143_v31 = vsel %vm1104_vm6, %v4142_v21, %v4141_v7  ;;  %v4173_v10 = vrot.slane %v8942_v55, 1  ;;  %v4177_v0 = vrot.slane %v9244_v13, 6 }
 0x642   : > { %v4145_v16 = vsel %vm1106_vm8, %v4144_v1, %v4143_v31  ;;  %v4195_v32 = vsel %vm1102_vm5, %v4194_v29, %v4193_v20  ;;  %v4184_v37 = vrot.slane %v9044_v27, 1  ;;  %v4183_v40 = vrot.slane %v8942_v55, 2  ;;  %v10099_v29 = vld [vmem:[#allocation31_spill] sm:$0xff] }
 0x643   : > { %v5438_v36 = vsel %vm893_vm13, %v9163_v17, %v5058_v9  ;;  %v4121_v17 = vsel %vm1104_vm6, %v4120_v26, %v4119_v50  ;;  %v4197_v14 = vsel %vm1104_vm6, %v4196_v61, %v4195_v32  ;;  %v4174_v45 = vsel %vm1102_vm5, %v9044_v27, %v4173_v10 }
 0x644   : > { %5725 = vst.msk [vmem:[%s7551_s30 + $0x4] sm:$0x7] %vm10094_vm15, %v5438_v36  ;;  %v4123_v53 = vsel %vm1106_vm8, %v4122_v41, %v4121_v17  ;;  %v4198_v34 = vsel %vm1106_vm8, %v9244_v13, %v4197_v14  ;;  %v4176_v62 = vsel %vm1104_vm6, %v4175_v63, %v4174_v45  ;;  %v4187_v5 = vrot.slane %v9244_v13, 7  ;;  %vm10104_vm15 = vmmov %vm10101_vm0 }
 0x645   : > { %v4178_v35 = vsel %vm1106_vm8, %v4177_v0, %v4176_v62  ;;  %v4185_v30 = vsel %vm1102_vm5, %v4184_v37, %v4183_v40  ;;  %v4204_v56 = vrot.slane %v9044_v27, 3  ;;  %v4206_v54 = vrot.slane %v9171_v44, 2 }
 0x646   : > { %v4186_v6 = vsel %vm1104_vm6, %v9171_v44, %v4185_v30  ;;  %v4203_v9 = vrot.slane %v8942_v55, 4  ;;  %v4208_v46 = vrot.slane %v9244_v13, 1  ;;  %v4069_v52 = vrot.slane %v9282_v39, 4 }
 0x647   : > { %v4188_v48 = vsel %vm1106_vm8, %v4187_v5, %v4186_v6  ;;  %vm10103_vm4 = vcmask 1044352  }
 0x648   : > { %4561 = vmatmul.bf16.gmra.mxu1 %v10095_v58  ;;  %v4205_v28 = vsel %vm1102_vm5, %v4204_v56, %v4203_v9 }
 0x649   : > { %4124 = vrot.lane.b32.xlu1 %v4123_v53, %s6097_s26  ;;  %v4207_v11 = vsel %vm1104_vm6, %v4206_v54, %v4205_v28 }
 0x64a   : > { %v4209_v36 = vsel %vm1106_vm8, %v4208_v46, %v4207_v11 }
 0x64e   : > { %5124 = vmatmul.bf16.gmra.mxu0 %v10095_v58 }
 0x651   : > { %4135 = vrot.lane.b32.xlu1 %v4134_v47, %s6098_s11 }
 0x658   : > { %4566 = vmatmul.bf16.gmra.mxu1 %v10096_v2 }
 0x659   : > { %4146 = vrot.lane.b32.xlu1 %v4145_v16, %s6099_s19 }
 0x65e   : > { %5129 = vmatmul.bf16.gmra.mxu0 %v10096_v2 }
 0x661   : > { %4199 = vrot.lane.b32.xlu1 %v4198_v34, %s6095_s23 }
 0x669   : > { %4179 = vrot.lane.b32.xlu1 %v4178_v35, %s6092_s21 }
 0x66b   : > { %v4581_v22 = vpop.f32.mrf.mxu3 }
 0x671   : > { %4189 = vrot.lane.b32.xlu1 %v4188_v48, %s6093_s22 }
 0x673   : > { %v4583_v27 = vpop.f32.mrf.mxu3 }
 0x679   : > { %4210 = vrot.lane.b32.xlu1 %v4209_v36, %s6097_s26 }
 0x67b   : > { %v4586_v55 = vpop.f32.mrf.mxu3 }
 0x681   : > { %4221 = vrot.lane.b32.xlu1 %v9272_v23, %s6098_s11  ;;  %v4070_v23 = vadd.f32 %v4069_v52, %v9282_v39 }
 0x683   : > { %v4588_v53 = vpop.f32.mrf.mxu3  ;;  %v4071_v18 = vrot.slane %v4070_v23, 2 }
 0x685   : > { %v9377_v39 = vadd.f32 %v4071_v18, %v4070_v23 }
 0x687   : > { %v4073_v10 = vrot.slane %v9377_v39, 1 }
 0x68b   : > { %v4591_v21 = vpop.f32.mrf.mxu3 }
 0x68f   : > { %v5144_v19 = vpop.f32.mrf.mxu2 }
 0x697   : > { %v5146_v26 = vpop.f32.mrf.mxu2 }
 0x69f   : > { %v5149_v50 = vpop.f32.mrf.mxu2 }
 0x6a3   : > { %v4114_v12 = vpop.permute.xlu1 %4113 }
 0x6a5   : > { %v4552_v44 = vpop.f32.mrf.mxu1 }
 0x6a6   : > { %v9366_v49 = vadd.f32 %v4581_v22, %v4552_v44 }
 0x6a7   : > { %v5151_v15 = vpop.f32.mrf.mxu2 }
 0x6a8   : > { %v4601_v1 = vsub.f32 %v9366_v49, %v10098_v25  ;;  %v4714_v62 = vrot.slane %v9366_v49, 3  ;;  %v4651_v37 = vrot.slane %v9366_v49, 5  ;;  %v4662_v40 = vrot.slane %v9366_v49, 6 }
 0x6a9   : > { %v4673_v5 = vrot.slane %v9366_v49, 7 }
 0x6aa   : > { %v4609_v20 = vmul.f32 %v4601_v1, %v4601_v1 }
 0x6ab   : > { %v5115_v41 = vpop.f32.mrf.mxu0  ;;  %v4094_v58 = vpop.permute.xlu1 %4093 }
 0x6ac   : > { %4096 = vst.msk [vmem:[#allocation3] sm:$0xf] %vm584_vm12, %v4094_v58  ;;  %v9368_v47 = vadd.f32 %v5144_v19, %v5115_v41  ;;  %v4617_v30 = vsel %vm447_vm3, %v4609_v20, 0.0 }
 0x6ad   : > { %v4554_v13 = vpop.f32.mrf.mxu1 }
 0x6ae   : > { %v9370_v42 = vadd.f32 %v4583_v27, %v4554_v13  ;;  %v5164_v16 = vsub.f32 %v9368_v47, %v10098_v25  ;;  %v5233_v9 = vrot.slane %v9368_v47, 3  ;;  %v5213_v28 = vrot.slane %v9368_v47, 1  ;;  %v4593_v27 = vpop.f32.mrf.mxu3 }
 0x6af   : > { %v9387_v63 = vpop.f32.mrf.mxu2  ;;  %v5243_v11 = vrot.slane %v9368_v47, 4  ;;  %v5254_v36 = vrot.slane %v9368_v47, 5  ;;  %v5265_v44 = vrot.slane %v9368_v47, 6  ;;  %v5223_v23 = vrot.slane %v9368_v47, 2 }
 0x6b0   : > { %v4602_v61 = vsub.f32 %v9370_v42, %v10099_v29  ;;  %v5172_v0 = vmul.f32 %v5164_v16, %v5164_v16  ;;  %v4780_v13 = vrot.slane %v9370_v42, 1  ;;  %v4642_v25 = vrot.slane %v9366_v49, 4 }
 0x6b2   : > { %v4610_v45 = vmul.f32 %v4602_v61, %v4602_v61  ;;  %v5180_v22 = vsel %vm447_vm3, %v5172_v0, 0.0 }
 0x6b3   : > { %v5117_v17 = vpop.f32.mrf.mxu0  ;;  %v4104_v57 = vpop.permute.xlu1 %4103 }
 0x6b4   : > { %4106 = vst.msk [vmem:[#allocation3] sm:$0xf] %vm659_vm14, %v4104_v57  ;;  %v9374_v2 = vadd.f32 %v5146_v26, %v5117_v17  ;;  %v4618_v19 = vsel %vm447_vm3, %v4610_v45, 0.0  ;;  %v4800_v26 = vrot.slane %v9370_v42, 3 }
 0x6b5   : > { %v4557_v43 = vpop.f32.mrf.mxu1  ;;  %4116 = vst.msk [vmem:[#allocation3] sm:$0xf] %vm10097_vm1, %v4114_v12  ;;  %vm10105_vm1 = vmmov %vm10101_vm0 }
 0x6b6   : > { %v5165_v32 = vsub.f32 %v9374_v2, %v10099_v29  ;;  %v9385_v34 = vadd.f32 %v4586_v55, %v4557_v43  ;;  %v4619_v43 = vadd.f32 %v4618_v19, %v4617_v30  ;;  %v5362_v18 = vrot.slane %v9374_v2, 7  ;;  %v4158_v30 = vpop.permute.xlu0 %4157 }
 0x6b7   : > { %v5156_v16 = vpop.f32.mrf.mxu2 }
 0x6b8   : > { %v5173_v6 = vmul.f32 %v5165_v32, %v5165_v32  ;;  %v4603_v46 = vsub.f32 %v9385_v34, %v8974_v38  ;;  %v4715_v41 = vrot.slane %v9385_v34, 2  ;;  %v4663_v52 = vrot.slane %v9385_v34, 5 }
 0x6ba   : > { %v5181_v58 = vsel %vm447_vm3, %v5173_v6, 0.0  ;;  %v4611_v57 = vmul.f32 %v4603_v46, %v4603_v46  ;;  %v4716_v29 = vsel %vm10100_vm10, %v4715_v41, %v4714_v62  ;;  %v9434_v45 = vsel %vm10102_vm2, %v4663_v52, %v4662_v40  ;;  %vm10106_vm10 = vmmov %vm10101_vm0 }
 0x6bb   : > { %v5120_v59 = vpop.f32.mrf.mxu0  ;;  %v4125_v31 = vpop.permute.xlu1 %4124  ;;  %v5182_v1 = vadd.f32 %v5181_v58, %v5180_v22  ;;  %vm10107_vm2 = vmmov %vm10101_vm0 }
 0x6bc   : > { %4127 = vst.msk [vmem:[#allocation3] sm:$0xf] %vm809_vm11, %v4125_v31  ;;  %v9391_v35 = vadd.f32 %v5149_v50, %v5120_v59  ;;  %v4684_v59 = vrot.slane %v9385_v34, 7  ;;  %v4620_v6 = vsel %vm447_vm3, %v4611_v57, 0.0  ;;  %v4596_v58 = vpop.f32.mrf.mxu3 }
 0x6bd   : > { %v4559_v7 = vpop.f32.mrf.mxu1 }
 0x6be   : > { %v9397_v48 = vadd.f32 %v4588_v53, %v4559_v7  ;;  %v5166_v12 = vsub.f32 %v9391_v35, %v8974_v38  ;;  %v4652_v53 = vrot.slane %v9385_v34, 4  ;;  %v5351_v38 = vrot.slane %v9374_v2, 6 }
 0x6bf   : > { %v5255_v62 = vrot.slane %v9391_v35, 4  ;;  %v9455_v19 = vsel %vm1102_vm5, %v9391_v35, %v5213_v28 }
 0x6c0   : > { %v4604_v50 = vsub.f32 %v9397_v48, %v9050_v3  ;;  %v5174_v7 = vmul.f32 %v5166_v12, %v5166_v12  ;;  %v4653_v0 = vsel %vm10101_vm0, %v4652_v53, %v4651_v37  ;;  %v4801_v40 = vrot.slane %v9397_v48, 2 }
 0x6c1   : > { %v4621_v12 = vadd.f32 %v4620_v6, %v4619_v43  ;;  %v5266_v53 = vrot.slane %v9391_v35, 5 }
 0x6c2   : > { %v4612_v61 = vmul.f32 %v4604_v50, %v4604_v50  ;;  %v5183_v46 = vsel %vm447_vm3, %v5174_v7, 0.0  ;;  %v9474_v7 = vsel %vm10106_vm10, %v4801_v40, %v4800_v26 }
 0x6c3   : > { %v5122_v14 = vpop.f32.mrf.mxu0  ;;  %v4136_v54 = vpop.permute.xlu1 %4135  ;;  %v5184_v43 = vadd.f32 %v5183_v46, %v5182_v1 }
 0x6c4   : > { %4138 = vst.msk [vmem:[#allocation3] sm:$0xf] %vm884_vm9, %v4136_v54  ;;  %v9412_v55 = vadd.f32 %v5151_v15, %v5122_v14  ;;  %v4674_v15 = vrot.slane %v9385_v34, 6  ;;  %v5244_v54 = vrot.slane %v9391_v35, 3  ;;  %v4622_v41 = vsel %vm447_vm3, %v4612_v61, 0.0 }
 0x6c5   : > { %v4562_v56 = vpop.f32.mrf.mxu1  ;;  %v4623_v61 = vadd.f32 %v4622_v41, %v4621_v12 }
 0x6c6   : > { %v5167_v31 = vsub.f32 %v9412_v55, %v9050_v3  ;;  %v9430_v20 = vadd.f32 %v4591_v21, %v4562_v56  ;;  %v5234_v3 = vrot.slane %v9391_v35, 2  ;;  %v9445_v37 = vsel %vm10104_vm15, %v4674_v15, %v4673_v5 }
 0x6c7   : > { %v9450_v56 = vsel %vm10105_vm1, %v4684_v59, %v9366_v49  ;;  %v9467_v28 = vsel %vm1102_vm5, %v5244_v54, %v5243_v11  ;;  %v9470_v15 = vsel %vm1102_vm5, %v5255_v62, %v5254_v36  ;;  %v9482_v11 = vsel %vm10107_vm2, %v9397_v48, %v4780_v13  ;;  %v5159_v54 = vpop.f32.mrf.mxu2 }
 0x6c8   : > { %v5175_v22 = vmul.f32 %v5167_v31, %v5167_v31  ;;  %v4605_v5 = vsub.f32 %v9430_v20, %v9147_v4  ;;  %v5235_v57 = vsel %vm1102_vm5, %v5234_v3, %v5233_v9  ;;  %v4717_v59 = vrot.slane %v9430_v20, 1 }
 0x6c9   : > { %v4654_v26 = vrot.slane %v9430_v20, 3  ;;  %v4665_v46 = vrot.slane %v9430_v20, 4  ;;  %vm10110_vm1 = vcmask 1047559   ;;  %v4676_v12 = vrot.slane %v9430_v20, 5 }
 0x6ca   : > { %v4613_v36 = vmul.f32 %v4605_v5, %v4605_v5 }
 0x6cb   : > { %v5125_v17 = vpop.f32.mrf.mxu0  ;;  %v4147_v14 = vpop.permute.xlu1 %4146 }
 0x6cc   : > { %4149 = vst.msk [vmem:[#allocation3] sm:$0xf] %vm959_vm7, %v4147_v14  ;;  %v9463_v52 = vadd.f32 %v9387_v63, %v5125_v17  ;;  %v5185_v63 = vsel %vm447_vm3, %v5175_v22, 0.0  ;;  %v5352_v14 = vrot.slane %v9412_v55, 5  ;;  %v4624_v41 = vsel %vm447_vm3, %v4613_v36, 0.0 }
 0x6cd   : > { %v4564_v32 = vpop.f32.mrf.mxu1  ;;  %4160 = vst.msk [vmem:[#allocation3] sm:$0xf] %vm10103_vm4, %v4158_v30  ;;  %vm10108_vm4 = vcmask 1046534  }
 0x6ce   : > { %v9441_v21 = vadd.f32 %v4593_v27, %v4564_v32  ;;  %v4770_v27 = vrot.slane %v9397_v48, 7  ;;  %v5168_v30 = vsub.f32 %v9463_v52, %v9147_v4  ;;  %vm10109_vm15 = vmmov %vm10108_vm4  ;;  %v5236_v40 = vrot.slane %v9463_v52, 1 }
 0x6cf   : > { %v4718_v62 = vsel %vm10109_vm15, %v4717_v59, %v4716_v29  ;;  %vm10111_vm10 = vmmov %vm10108_vm4 }
 0x6d0   : > { %v4772_v31 = vrot.slane %v9441_v21, 6  ;;  %v4771_v9 = vsel %vm10101_vm0, %v4770_v27, %v9370_v42  ;;  %v4606_v6 = vsub.f32 %v9441_v21, %v9179_v8  ;;  %vm10112_vm0 = vmmov %vm10110_vm1  ;;  %v5237_v36 = vsel %vm1104_vm6, %v5236_v40, %v5235_v57 }
 0x6d1   : > { %vm10113_vm2 = vmmov %vm10108_vm4 }
 0x6d2   : > { %v9497_v13 = vsel %vm10108_vm4, %v4772_v31, %v4771_v9  ;;  %v4614_v59 = vmul.f32 %v4606_v6, %v4606_v6  ;;  %v4666_v6 = vsel %vm10113_vm2, %v4665_v46, %v9434_v45  ;;  %vm10114_vm4 = vmmov %vm10112_vm0 }
 0x6d3   : > { %v5127_v50 = vpop.f32.mrf.mxu0  ;;  %v9486_v32 = vpop.permute.xlu1 %4199  ;;  %vm10115_vm15 = vmmov %vm10113_vm2 }
 0x6d4   : > { %v9484_v17 = vadd.f32 %v5156_v16, %v5127_v50  ;;  %v5186_v16 = vadd.f32 %v5185_v63, %v5184_v43  ;;  %v5215_v50 = vrot.slane %v9463_v52, 7  ;;  %v5176_v43 = vmul.f32 %v5168_v30, %v5168_v30 }
 0x6d5   : > { %v4567_v1 = vpop.f32.mrf.mxu1 }
 0x6d6   : > { %v9494_v3 = vadd.f32 %v4596_v58, %v4567_v1  ;;  %v5169_v5 = vsub.f32 %v9484_v17, %v9179_v8  ;;  %v4655_v58 = vsel %vm10111_vm10, %v4654_v26, %v4653_v0  ;;  %v4598_v1 = vpop.f32.mrf.mxu3  ;;  %v5246_v8 = vrot.slane %v9463_v52, 2 }
 0x6d7   : > { %v5216_v40 = vsel %vm1104_vm6, %v5215_v50, %v9455_v19  ;;  %v5354_v19 = vrot.slane %v9484_v17, 4  ;;  %vm10117_vm10 = vcmask 519552  }
 0x6d8   : > { %v4607_v22 = vsub.f32 %v9494_v3, %v9220_v33  ;;  %v4719_v4 = vsel %vm10110_vm1, %v9494_v3, %v4718_v62  ;;  %v4656_v27 = vrot.slane %v9494_v3, 2  ;;  %v4686_v62 = vrot.slane %v9430_v20, 6  ;;  %vm10116_vm1 = vmmov %vm10113_vm2 }
 0x6d9   : > { %4720 = vrot.lane.b32.xlu1 %v4719_v4, %s6101_s24  ;;  %v4667_v45 = vrot.slane %v9494_v3, 3  ;;  %v5247_v46 = vsel %vm1104_vm6, %v5246_v8, %v9467_v28  ;;  %v5353_v8 = vsel %vm1102_vm5, %v5352_v14, %v5351_v38  ;;  %vm10118_vm2 = vmmov %vm10116_vm1 }
 0x6da   : > { %v4657_v63 = vsel %vm10112_vm0, %v4656_v27, %v4655_v58  ;;  %v4615_v9 = vmul.f32 %v4607_v22, %v4607_v22  ;;  %v5177_v22 = vmul.f32 %v5169_v5, %v5169_v5  ;;  %v5257_v27 = vrot.slane %v9463_v52, 3 }
 0x6db   : > { %v5130_v29 = vpop.f32.mrf.mxu0  ;;  %4658 = vrot.lane.b32.xlu2 %v4657_v63, %s6092_s21  ;;  %v4180_v57 = vpop.permute.xlu1 %4179 }
 0x6dc   : > { %v9514_v31 = vadd.f32 %v5159_v54, %v5130_v29  ;;  %v4625_v54 = vadd.f32 %v4624_v41, %v4623_v61  ;;  %v4626_v29 = vsel %vm447_vm3, %v4614_v59, 0.0  ;;  %4182 = vst.msk [vmem:[#allocation3 + $0x8] sm:$0xf] %vm584_vm12, %v4180_v57  ;;  %v4628_v61 = vsel %vm447_vm3, %v4615_v9, 0.0  ;;  %v5161_v9 = vpop.f32.mrf.mxu2 }
 0x6dd   : > { %v4569_v4 = vpop.f32.mrf.mxu1  ;;  %v4803_v41 = vrot.slane %v9441_v21, 1 }
 0x6de   : > { %v5170_v0 = vsub.f32 %v9514_v31, %v9220_v33  ;;  %v5238_v26 = vsel %vm1106_vm8, %v9514_v31, %v5237_v36  ;;  %v5217_v30 = vrot.slane %v9514_v31, 6  ;;  %v5187_v33 = vsel %vm447_vm3, %v5176_v43, 0.0 }
 0x6df   : > { %5239 = vrot.lane.b32.xlu0 %v5238_v26, %s6095_s23  ;;  %v9534_v58 = vadd.f32 %v4598_v1, %v4569_v4  ;;  %v5248_v59 = vrot.slane %v9514_v31, 1  ;;  %v5188_v63 = vadd.f32 %v5187_v33, %v5186_v16  ;;  %v4627_v1 = vadd.f32 %v4626_v29, %v4625_v54 }
 0x6e0   : > { %v5178_v5 = vmul.f32 %v5170_v0, %v5170_v0  ;;  %v5218_v43 = vsel %vm1106_vm8, %v5217_v30, %v5216_v40  ;;  %v5189_v36 = vsel %vm447_vm3, %v5177_v22, 0.0  ;;  %v4668_v4 = vsel %vm10114_vm4, %v4667_v45, %v4666_v6  ;;  %vm10119_vm4 = vmmov %vm10112_vm0 }
 0x6e1   : > { %v4608_v50 = vsub.f32 %v9534_v58, %v9252_v51  ;;  %5219 = vrot.lane.b32.xlu1 %v5218_v43, %s6092_s21  ;;  %v4678_v30 = vrot.slane %v9494_v3, 4  ;;  %v4629_v57 = vadd.f32 %v4628_v61, %v4627_v1  ;;  %v5259_v16 = vrot.slane %v9514_v31, 2 }
 0x6e2   : > { %v9559_v54 = vsel %vm1104_vm6, %v5354_v19, %v5353_v8  ;;  %v4782_v22 = vrot.slane %v9441_v21, 7  ;;  %v5191_v40 = vsel %vm447_vm3, %v5178_v5, 0.0  ;;  %v5249_v6 = vsel %vm1106_vm8, %v5248_v59, %v5247_v46 }
 0x6e3   : > { %v5132_v28 = vpop.f32.mrf.mxu0  ;;  %v4616_v0 = vmul.f32 %v4608_v50, %v4608_v50  ;;  %4669 = vrot.lane.b32.xlu2 %v4668_v4, %s6093_s22  ;;  %v5190_v33 = vadd.f32 %v5189_v36, %v5188_v63  ;;  %v4190_v45 = vpop.permute.xlu1 %4189  ;;  %v4677_v61 = vsel %vm10115_vm15, %v4676_v12, %v9445_v37  ;;  %v5268_v19 = vrot.slane %v9463_v52, 4 }
 0x6e4   : > { %v9552_v26 = vadd.f32 %v5161_v9, %v5132_v28  ;;  %4192 = vst.msk [vmem:[#allocation3 + $0x8] sm:$0xf] %vm659_vm14, %v4190_v45  ;;  %v4804_v46 = vsel %vm10116_vm1, %v4803_v41, %v9474_v7  ;;  %v4688_v50 = vrot.slane %v9494_v3, 5  ;;  %v4679_v37 = vsel %vm10112_vm0, %v4678_v30, %v4677_v61 }
 0x6e5   : > { %v4630_v38 = vsel %vm447_vm3, %v4616_v0, 0.0  ;;  %v5192_v43 = vadd.f32 %v5191_v40, %v5190_v33  ;;  %4202 = vst.msk [vmem:[#allocation3 + $0x8] sm:$0xf] %vm10117_vm10, %v9486_v32  ;;  %v4783_v12 = vsel %vm10118_vm2, %v4782_v22, %v9482_v11  ;;  %v5363_v7 = vrot.slane %v9412_v55, 6  ;;  %vm10121_vm10 = vmmov %vm10112_vm0 }
 0x6e6   : > { %v5171_v14 = vsub.f32 %v9552_v26, %v9252_v51  ;;  %v4631_v29 = vadd.f32 %v4630_v38, %v4629_v57  ;;  %v5258_v51 = vsel %vm1104_vm6, %v5257_v27, %v9470_v15  ;;  %v4784_v15 = vrot.slane %v9534_v58, 6 }
 0x6e7   : > { %5250 = vrot.lane.b32.xlu0 %v5249_v6, %s6097_s26  ;;  %v5260_v1 = vsel %vm1106_vm8, %v5259_v16, %v5258_v51  ;;  %v5365_v32 = vrot.slane %v9484_v17, 5  ;;  %v5367_v36 = vrot.slane %v9552_v26, 4  ;;  %v5364_v11 = vsel %vm1102_vm5, %v5363_v7, %v5362_v18 }
 0x6e8   : > { %v5179_v5 = vmul.f32 %v5171_v14, %v5171_v14  ;;  %v4632_v59 = vrot.slane %v4631_v29, 4  ;;  %v9593_v9 = vsel %vm10119_vm4, %v4784_v15, %v4783_v12  ;;  %v5224_v28 = vrot.slane %v9391_v35, 1  ;;  %vm10123_vm4 = vmmov %vm10116_vm1 }
 0x6e9   : > { %4232 = vrot.lane.b32.xlu1 %v9279_v24, %s6099_s19  ;;  %v5227_v8 = vrot.slane %v9514_v31, 7  ;;  %v5366_v24 = vsel %vm1104_vm6, %v5365_v32, %v5364_v11  ;;  %v4643_v30 = vrot.slane %v9385_v34, 3  ;;  %v4645_v18 = vrot.slane %v9430_v20, 2 }
 0x6ea   : > { %v5193_v63 = vsel %vm447_vm3, %v5179_v5, 0.0  ;;  %v4633_v27 = vadd.f32 %v4632_v59, %v4631_v29  ;;  %v9604_v57 = vsel %vm1106_vm8, %v5367_v36, %v5366_v24  ;;  %v5225_v16 = vsel %vm1102_vm5, %v5224_v28, %v5223_v23 }
 0x6eb   : > { %v5194_v41 = vadd.f32 %v5193_v63, %v5192_v43  ;;  %4680 = vrot.lane.b32.xlu2 %v4679_v37, %s6095_s23  ;;  %v4647_v22 = vrot.slane %v9494_v3, 1  ;;  %v4211_v14 = vpop.permute.xlu1 %4210  ;;  %v5226_v6 = vsel %vm1104_vm6, %v9463_v52, %v5225_v16  ;;  %vm10120_vm15 = vcmask 1045509  }
 0x6ec   : > { %v4634_v0 = vrot.slane %v4633_v27, 2  ;;  %v4644_v33 = vsel %vm10120_vm15, %v4643_v30, %v4642_v25  ;;  %4213 = vst.msk [vmem:[#allocation3 + $0x8] sm:$0xf] %vm809_vm11, %v4211_v14  ;;  %v9619_v23 = vsel %vm1106_vm8, %v5227_v8, %v5226_v6  ;;  %v5299_v45 = vrot.slane %v9374_v2, 1  ;;  %vm10124_vm15 = vmmov %vm10112_vm0 }
 0x6ed   : > { %v5195_v4 = vrot.slane %v5194_v41, 4  ;;  %v4646_v29 = vsel %vm10116_vm1, %v4645_v18, %v4644_v33  ;;  %v5301_v61 = vrot.slane %v9484_v17, 7  ;;  %v5270_v43 = vrot.slane %v9514_v31, 3 }
 0x6ee   : > { %v4635_v40 = vadd.f32 %v4634_v0, %v4633_v27  ;;  %v4648_v59 = vsel %vm10121_vm10, %v4647_v22, %v4646_v29  ;;  %v4805_v25 = vsel %vm10112_vm0, %v9534_v58, %v4804_v46  ;;  %vm10122_vm2 = vcmask 130052   ;;  %vm10126_vm10 = vmmov %vm10123_vm4 }
 0x6ef   : > { %v5196_v38 = vadd.f32 %v5195_v4, %v5194_v41  ;;  %5261 = vrot.lane.b32.xlu0 %v5260_v1, %s6098_s11  ;;  %4650 = vst.msk [vmem:[#allocation3] sm:$0xf0] %vm10122_vm2, %v4648_v59  ;;  %v5300_v37 = vsel %vm1102_vm5, %v9412_v55, %v5299_v45  ;;  %v4790_v12 = vrot.slane %v9370_v42, 2  ;;  %v4791_v63 = vrot.slane %v9397_v48, 1 }
 0x6f0   : > { %v4636_v5 = vrot.slane %v4635_v40, 1  ;;  %v4687_v15 = vsel %vm10123_vm4, %v4686_v62, %v9450_v56  ;;  %v5302_v7 = vsel %vm1104_vm6, %v5301_v61, %v5300_v37  ;;  %v5267_v41 = vsel %vm1102_vm5, %v5266_v53, %v5265_v44 }
 0x6f1   : > { %v5197_v51 = vrot.slane %v5196_v38, 2  ;;  %4806 = vrot.lane.b32.xlu1 %v4805_v25, %s6101_s24  ;;  %v4689_v27 = vsel %vm10124_vm15, %v4688_v50, %v4687_v15  ;;  %vm10125_vm1 = vcmask 1045509   ;;  %v5269_v56 = vsel %vm1104_vm6, %v5268_v19, %v5267_v41  ;;  %vm10130_vm15 = vmmov %vm10126_vm10 }
 0x6f2   : > { %v4637_v46 = vadd.f32 %v4636_v5, %v4635_v40  ;;  %v4792_v32 = vsel %vm10125_vm1, %v4791_v63, %v4790_v12  ;;  %v4074_v50 = vadd.f32 %v4073_v10, %v9377_v39  ;;  %v5271_v11 = vsel %vm1106_vm8, %v5270_v43, %v5269_v56  ;;  %vm10129_vm4 = vmmov %vm10125_vm1 }
 0x6f3   : > { %v5198_v1 = vadd.f32 %v5197_v51, %v5196_v38  ;;  %4690 = vrot.lane.b32.xlu2 %v4689_v27, %s6097_s26  ;;  %v4793_v62 = vsel %vm10126_vm10, %v9441_v21, %v4792_v32  ;;  %v4222_v53 = vpop.permute.xlu1 %4221  ;;  %v4696_v28 = vrot.slane %v9430_v20, 7  ;;  %vm10127_vm0 = vcmask 1040384   ;;  %vm10133_vm10 = vmmov %vm10129_vm4 }
 0x6f4   : > { %v5433_v8 = vsel %vm10127_vm0, %v4074_v50, %v4637_v46  ;;  %4224 = vst.msk [vmem:[#allocation3 + $0x8] sm:$0xf] %vm884_vm9, %v4222_v53  ;;  %v4694_v19 = vrot.slane %v9366_v49, 1  ;;  %v4698_v0 = vrot.slane %v9494_v3, 6  ;;  %v5277_v4 = vrot.slane %v9391_v35, 6  ;;  %vm10134_vm0 = vmmov %vm10130_vm15 }
 0x6f5   : > { %v5199_v36 = vrot.slane %v5198_v1, 1  ;;  %v5279_v10 = vrot.slane %v9463_v52, 5  ;;  %v5205_v24 = vrot.slane %v9391_v35, 7  ;;  %vm10128_vm2 = vcmask 124928  }
 0x6f6   : > { %v4695_v30 = vsel %vm10129_vm4, %v9385_v34, %v4694_v19  ;;  %v5276_v16 = vrot.slane %v9368_v47, 7  ;;  %v5281_v18 = vrot.slane %v9514_v31, 4  ;;  %v5207_v22 = vrot.slane %v9463_v52, 6 }
 0x6f7   : > { %v5200_v44 = vadd.f32 %v5199_v36, %v5198_v1  ;;  %5272 = vrot.lane.b32.xlu0 %v5271_v11, %s6099_s19  ;;  %v4697_v40 = vsel %vm10130_vm15, %v4696_v28, %v4695_v30  ;;  %vm10131_vm1 = vcmask 1047559   ;;  %v4705_v6 = vrot.slane %v9385_v34, 1 }
 0x6f8   : > { %v4699_v38 = vsel %vm10131_vm1, %v4698_v0, %v4697_v40  ;;  %v5278_v14 = vsel %vm1102_vm5, %v5277_v4, %v5276_v16  ;;  %v5206_v33 = vsel %vm1102_vm5, %v5205_v24, %v9368_v47  ;;  %v5209_v29 = vrot.slane %v9514_v31, 5  ;;  %vm10136_vm15 = vmmov %vm10131_vm1 }
 0x6f9   : > { %v5434_v39 = vsel %vm893_vm13, %v5433_v8, %v5200_v44  ;;  %v5280_v35 = vsel %vm1104_vm6, %v5279_v10, %v5278_v14  ;;  %v5208_v52 = vsel %vm1104_vm6, %v5207_v22, %v5206_v33  ;;  %v4704_v61 = vrot.slane %v9366_v49, 2 }
 0x6fa   : > { %5724 = vst.msk [vmem:[%s7864_s14 + $0x4] sm:$0x7] %vm10128_vm2, %v5434_v39  ;;  %v5282_v45 = vsel %vm1106_vm8, %v5281_v18, %v5280_v35  ;;  %v5210_v5 = vsel %vm1106_vm8, %v5209_v29, %v5208_v52  ;;  %v4729_v51 = vrot.slane %v9397_v48, 3  ;;  %v4708_v43 = vrot.slane %v9494_v3, 7  ;;  %vm10135_vm2 = vmmov %vm10131_vm1 }
 0x6fb   : > { %4700 = vrot.lane.b32.xlu2 %v4699_v38, %s6098_s11  ;;  %v5320_v34 = vrot.slane %v9412_v55, 2  ;;  %v5303_v47 = vrot.slane %v9552_v26, 6  ;;  %vm10132_vm13 = vcmask 125952   ;;  %v4731_v31 = vrot.slane %v9441_v21, 2  ;;  %vm10137_vm1 = vmmov %vm10134_vm0 }
 0x6fc   : > { %5212 = vst.msk [vmem:[#allocation3 + $0x10] sm:$0xf] %vm10132_vm13, %v5210_v5  ;;  %v4706_v59 = vsel %vm10133_vm10, %v4705_v6, %v4704_v61  ;;  %v5322_v25 = vrot.slane %v9484_v17, 1  ;;  %v4794_v49 = vrot.slane %v9534_v58, 7  ;;  %v4728_v37 = vrot.slane %v9370_v42, 4  ;;  %vm10138_vm13 = vmmov %vm10135_vm2 }
 0x6fd   : > { %v4707_v12 = vsel %vm10134_vm0, %v9430_v20, %v4706_v59  ;;  %v5319_v3 = vrot.slane %v9374_v2, 3  ;;  %v9701_v63 = vsel %vm1106_vm8, %v5303_v47, %v5302_v7  ;;  %v4733_v46 = vrot.slane %v9534_v58, 1  ;;  %vm10140_vm0 = vmmov %vm10129_vm4 }
 0x6fe   : > { %v9704_v1 = vsel %vm10135_vm2, %v4794_v49, %v4793_v62  ;;  %v4730_v15 = vsel %vm10129_vm4, %v4729_v51, %v4728_v37  ;;  %v5291_v27 = vrot.slane %v9412_v55, 7  ;;  %v4709_v41 = vsel %vm10136_vm15, %v4708_v43, %v4707_v12  ;;  %vm10142_vm4 = vmmov %vm10137_vm1 }
 0x6ff   : > { %5283 = vrot.lane.b32.xlu0 %v5282_v45, %s6101_s24  ;;  %v5321_v32 = vsel %vm1102_vm5, %v5320_v34, %v5319_v3  ;;  %v4732_v20 = vsel %vm10137_vm1, %v4731_v31, %v4730_v15  ;;  %v5293_v36 = vrot.slane %v9484_v17, 6  ;;  %v4738_v50 = vrot.slane %v9397_v48, 4  ;;  %vm10143_vm15 = vmmov %vm10138_vm13 }
 0x700   : > { %v5323_v7 = vsel %vm1104_vm6, %v5322_v25, %v5321_v32  ;;  %v4734_v56 = vsel %vm10138_vm13, %v4733_v46, %v4732_v20  ;;  %vm10139_vm10 = vcmask 130052   ;;  %v4740_v11 = vrot.slane %v9441_v21, 3  ;;  %vm10144_vm1 = vmmov %vm10140_vm0 }
 0x701   : > { %v5324_v62 = vsel %vm1106_vm8, %v9552_v26, %v5323_v7  ;;  %4736 = vst.msk [vmem:[#allocation3 + $0x8] sm:$0xf0] %vm10139_vm10, %v4734_v56  ;;  %v5292_v44 = vsel %vm1102_vm5, %v5291_v27, %v9374_v2  ;;  %v5295_v53 = vrot.slane %v9552_v26, 5  ;;  %v4737_v28 = vrot.slane %v9370_v42, 5  ;;  %vm10145_vm13 = vmmov %vm10142_vm4 }
 0x702   : > { %v4742_v8 = vrot.slane %v9534_v58, 2  ;;  %v5310_v19 = vrot.slane %v9412_v55, 1  ;;  %v5294_v0 = vsel %vm1104_vm6, %v5293_v36, %v5292_v44  ;;  %v5309_v10 = vrot.slane %v9374_v2, 2  ;;  %vm10146_vm10 = vmmov %vm10143_vm15 }
 0x703   : > { %4710 = vrot.lane.b32.xlu2 %v4709_v41, %s6099_s19  ;;  %v5296_v4 = vsel %vm1106_vm8, %v5295_v53, %v5294_v0  ;;  %v4739_v39 = vsel %vm10140_vm0, %v4738_v50, %v4737_v28  ;;  %v5313_v24 = vrot.slane %v9552_v26, 7  ;;  %vm10141_vm2 = vcmask 125952   ;;  %v5379_v0 = vld.sshfl [vmem:[#allocation1 + $0x8] sm:$0xff pattern:$0x75316420] }
 0x704   : > { %5298 = vst.msk [vmem:[#allocation3 + $0x18] sm:$0xf] %vm10141_vm2, %v5296_v4  ;;  %v4741_v30 = vsel %vm10142_vm4, %v4740_v11, %v4739_v39  ;;  %v5311_v18 = vsel %vm1102_vm5, %v5310_v19, %v5309_v10  ;;  %v4749_v38 = vrot.slane %v9397_v48, 5  ;;  %v4751_v14 = vrot.slane %v9441_v21, 4  ;;  %vm10147_vm2 = vmmov %vm10142_vm4 }
 0x705   : > { %v4743_v16 = vsel %vm10143_vm15, %v4742_v8, %v4741_v30  ;;  %v5312_v22 = vsel %vm1104_vm6, %v9484_v17, %v5311_v18  ;;  %v4748_v35 = vrot.slane %v9370_v42, 6  ;;  %v4753_v6 = vrot.slane %v9534_v58, 3  ;;  %vm10148_vm4 = vmmov %vm10146_vm10  ;;  %5383 = vst [vmem:[#allocation3 + $0x18] sm:$0xf0] %v5379_v0 }
 0x706   : > { %v5314_v40 = vsel %vm1106_vm8, %v5313_v24, %v5312_v22  ;;  %v5330_v33 = vrot.slane %v9412_v55, 3  ;;  %v5332_v29 = vrot.slane %v9484_v17, 2  ;;  %v5329_v52 = vrot.slane %v9374_v2, 4  ;;  %vm10149_vm15 = vmmov %vm10148_vm4 }
 0x707   : > { %5325 = vrot.lane.b32.xlu0 %v5324_v62, %s6095_s23  ;;  %v4750_v45 = vsel %vm10144_vm1, %v4749_v38, %v4748_v35  ;;  %v5334_v61 = vrot.slane %v9552_v26, 1  ;;  %v4760_v31 = vrot.slane %v9397_v48, 6  ;;  %v4762_v59 = vrot.slane %v9441_v21, 5 }
 0x708   : > { %v4752_v5 = vsel %vm10145_vm13, %v4751_v14, %v4750_v45  ;;  %v5331_v43 = vsel %vm1102_vm5, %v5330_v33, %v5329_v52  ;;  %v4759_v25 = vrot.slane %v9370_v42, 7  ;;  %v4764_v49 = vrot.slane %v9534_v58, 4 }
 0x709   : > { %v4754_v51 = vsel %vm10146_vm10, %v4753_v6, %v4752_v5  ;;  %v5333_v34 = vsel %vm1104_vm6, %v5332_v29, %v5331_v43  ;;  %v5341_v37 = vrot.slane %v9412_v55, 4  ;;  %v5343_v12 = vrot.slane %v9484_v17, 3  ;;  %v10168_v29 = vld [vmem:[#allocation28_spill] sm:$0xff] }
 0x70a   : > { %v5335_v47 = vsel %vm1106_vm8, %v5334_v61, %v5333_v34  ;;  %v4761_v3 = vsel %vm10140_vm0, %v4760_v31, %v4759_v25  ;;  %v5340_v15 = vrot.slane %v9374_v2, 5  ;;  %v5345_v46 = vrot.slane %v9552_v26, 2 }
 0x70b   : > { %4744 = vrot.lane.b32.xlu2 %v4743_v16, %s6092_s21  ;;  %v4763_v48 = vsel %vm10147_vm2, %v4762_v59, %v4761_v3  ;;  %v4774_v17 = vrot.slane %v9534_v58, 5  ;;  %v5356_v2 = vrot.slane %v9552_v26, 3  ;;  %vm10153_vm1 = vcmask 654852  }
 0x70c   : > { %v4765_v27 = vsel %vm10148_vm4, %v4764_v49, %v4763_v48  ;;  %v5342_v21 = vsel %vm1102_vm5, %v5341_v37, %v5340_v15  ;;  %vm10150_vm5 = vcmask 261252   ;;  %vm10154_vm13 = vcmask 786052  }
 0x70d   : > { %v5344_v42 = vsel %vm1104_vm6, %v5343_v12, %v5342_v21  ;;  %v4775_v41 = vsel %vm10149_vm15, %v4774_v17, %v9497_v13  ;;  %v5357_v32 = vsel %vm1106_vm8, %v5356_v2, %v9559_v54  ;;  %vm10151_vm6 = vcmask 392452   ;;  %vm10157_vm2 = vmmov %vm10150_vm5 }
 0x70e   : > { %v5346_v55 = vsel %vm1106_vm8, %v5345_v46, %v5344_v42  ;;  %vm10152_vm8 = vcmask 523652   ;;  %vm10155_vm10 = vcmask 917252   ;;  %vm10156_vm0 = vcmask 1048452   ;;  %vm10158_vm4 = vmmov %vm10151_vm6 }
 0x70f   : > { %5315 = vrot.lane.b32.xlu0 %v5314_v40, %s6093_s22  ;;  %vm10159_vm15 = vmmov %vm10152_vm8  ;;  %v6082_v40 = vld [vmem:[%s9841_s5] sm:$0xff] }
 0x713   : > { %4755 = vrot.lane.b32.xlu2 %v4754_v51, %s6093_s22 }
 0x717   : > { %5336 = vrot.lane.b32.xlu0 %v5335_v47, %s6097_s26 }
 0x71b   : > { %4766 = vrot.lane.b32.xlu2 %v4765_v27, %s6095_s23 }
 0x71f   : > { %5347 = vrot.lane.b32.xlu0 %v5346_v55, %s6098_s11 }
 0x723   : > { %4776 = vrot.lane.b32.xlu2 %v4775_v41, %s6097_s26 }
 0x727   : > { %5358 = vrot.lane.b32.xlu0 %v5357_v32, %s6099_s19 }
 0x72b   : > { %4786 = vrot.lane.b32.xlu2 %v9593_v9, %s6098_s11 }
 0x72f   : > { %5369 = vrot.lane.b32.xlu0 %v9604_v57, %s6101_s24 }
 0x733   : > { %5229 = vrot.lane.b32.xlu2 %v9619_v23, %s6093_s22 }
 0x735   : > { %v4659_v58 = vpop.permute.xlu2 %4658 }
 0x736   : > { %4661 = vst.msk [vmem:[#allocation3] sm:$0xf0] %vm10150_vm5, %v4659_v58  ;;  %vm10160_vm5 = vmmov %vm10153_vm1 }
 0x737   : > { %4243 = vrot.lane.b32.xlu0 %v9311_v60, %s6101_s24 }
 0x73b   : > { %5305 = vrot.lane.b32.xlu2 %v9701_v63, %s6092_s21 }
 0x73d   : > { %v4670_v13 = vpop.permute.xlu2 %4669 }
 0x73e   : > { %4672 = vst.msk [vmem:[#allocation3] sm:$0xf0] %vm10151_vm6, %v4670_v13  ;;  %vm10161_vm6 = vmmov %vm10154_vm13 }
 0x743   : > { %4796 = vrot.lane.b32.xlu2 %v9704_v1, %s6099_s19 }
 0x745   : > { %v4681_v26 = vpop.permute.xlu2 %4680 }
 0x746   : > { %4683 = vst.msk [vmem:[#allocation3] sm:$0xf0] %vm10152_vm8, %v4681_v26  ;;  %vm10162_vm8 = vcmask 519552  }
 0x74b   : > { %v4721_v54 = vpop.permute.xlu1 %4720 }
 0x74d   : > { %v4691_v9 = vpop.permute.xlu2 %4690 }
 0x74e   : > { %4693 = vst.msk [vmem:[#allocation3] sm:$0xf0] %vm10153_vm1, %v4691_v9  ;;  %vm10163_vm1 = vcmask 1044352  }
 0x751   : > { %v5240_v57 = vpop.permute.xlu0 %5239 }
 0x753   : > { %v5220_v60 = vpop.permute.xlu1 %5219 }
 0x754   : > { %5222 = vst.msk [vmem:[#allocation3 + $0x10] sm:$0xf] %vm584_vm12, %v5220_v60 }
 0x755   : > { %v4701_v23 = vpop.permute.xlu2 %4700 }
 0x756   : > { %4703 = vst.msk [vmem:[#allocation3] sm:$0xf0] %vm10154_vm13, %v4701_v23  ;;  %vm10164_vm13 = vmmov %vm10162_vm8 }
 0x759   : > { %v5251_v63 = vpop.permute.xlu0 %5250 }
 0x75b   : > { %v4233_v20 = vpop.permute.xlu1 %4232 }
 0x75c   : > { %4235 = vst.msk [vmem:[#allocation3 + $0x8] sm:$0xf] %vm959_vm7, %v4233_v20 }
 0x75d   : > { %v4711_v36 = vpop.permute.xlu2 %4710 }
 0x75e   : > { %4713 = vst.msk [vmem:[#allocation3] sm:$0xf0] %vm10155_vm10, %v4711_v36 }
 0x75f   : > { %4723 = vst.msk [vmem:[#allocation3] sm:$0xf0] %vm10156_vm0, %v4721_v54 }
 0x761   : > { %v5262_v1 = vpop.permute.xlu0 %5261 }
 0x763   : > { %v4807_v22 = vpop.permute.xlu1 %4806 }
 0x765   : > { %v4745_v7 = vpop.permute.xlu2 %4744 }
 0x766   : > { %4747 = vst.msk [vmem:[#allocation3 + $0x8] sm:$0xf0] %vm10157_vm2, %v4745_v7  ;;  %v5384_v16 = vld [vmem:[#allocation3] sm:$0xff] }
 0x769   : > { %v5273_v56 = vpop.permute.xlu0 %5272 }
 0x76d   : > { %v4756_v62 = vpop.permute.xlu2 %4755 }
 0x76e   : > { %4758 = vst.msk [vmem:[#allocation3 + $0x8] sm:$0xf0] %vm10158_vm4, %v4756_v62 }
 0x771   : > { %v5284_v50 = vpop.permute.xlu0 %5283 }
 0x775   : > { %v4767_v11 = vpop.permute.xlu2 %4766 }
 0x776   : > { %4769 = vst.msk [vmem:[#allocation3 + $0x8] sm:$0xf0] %vm10159_vm15, %v4767_v11 }
 0x779   : > { %v5326_v44 = vpop.permute.xlu0 %5325 }
 0x77d   : > { %v4777_v53 = vpop.permute.xlu2 %4776 }
 0x77e   : > { %4779 = vst.msk [vmem:[#allocation3 + $0x8] sm:$0xf0] %vm10160_vm5, %v4777_v53 }
 0x781   : > { %v5316_v28 = vpop.permute.xlu0 %5315 }
 0x785   : > { %v4787_v8 = vpop.permute.xlu2 %4786 }
 0x786   : > { %4789 = vst.msk [vmem:[#allocation3 + $0x8] sm:$0xf0] %vm10161_vm6, %v4787_v8 }
 0x789   : > { %v5337_v19 = vpop.permute.xlu0 %5336 }
 0x78d   : > { %v5230_v4 = vpop.permute.xlu2 %5229 }
 0x78e   : > { %5232 = vst.msk [vmem:[#allocation3 + $0x10] sm:$0xf] %vm659_vm14, %v5230_v4 }
 0x78f   : > { %5242 = vst.msk [vmem:[#allocation3 + $0x10] sm:$0xf] %vm10162_vm8, %v5240_v57 }
 0x790   : > { %5253 = vst.msk [vmem:[#allocation3 + $0x10] sm:$0xf] %vm809_vm11, %v5251_v63 }
 0x791   : > { %v5348_v39 = vpop.permute.xlu0 %5347  ;;  %5264 = vst.msk [vmem:[#allocation3 + $0x10] sm:$0xf] %vm884_vm9, %v5262_v1 }
 0x792   : > { %5275 = vst.msk [vmem:[#allocation3 + $0x10] sm:$0xf] %vm959_vm7, %v5273_v56 }
 0x793   : > { %5286 = vst.msk [vmem:[#allocation3 + $0x10] sm:$0xf] %vm10163_vm1, %v5284_v50 }
 0x795   : > { %v5306_v10 = vpop.permute.xlu2 %5305 }
 0x796   : > { %5308 = vst.msk [vmem:[#allocation3 + $0x18] sm:$0xf] %vm584_vm12, %v5306_v10 }
 0x797   : > { %5318 = vst.msk [vmem:[#allocation3 + $0x18] sm:$0xf] %vm659_vm14, %v5316_v28 }
 0x798   : > { %5328 = vst.msk [vmem:[#allocation3 + $0x18] sm:$0xf] %vm10164_vm13, %v5326_v44 }
 0x799   : > { %v5359_v24 = vpop.permute.xlu0 %5358  ;;  %5339 = vst.msk [vmem:[#allocation3 + $0x18] sm:$0xf] %vm809_vm11, %v5337_v19  ;;  %vm10165_vm11 = vmmov %vm10156_vm0 }
 0x79a   : > { %5350 = vst.msk [vmem:[#allocation3 + $0x18] sm:$0xf] %vm884_vm9, %v5348_v39  ;;  %v5386_v30 = vld [vmem:[#allocation3 + $0x10] sm:$0xff]  ;;  %vm10166_vm9 = vmmov %vm10163_vm1 }
 0x79b   : > { %5361 = vst.msk [vmem:[#allocation3 + $0x18] sm:$0xf] %vm959_vm7, %v5359_v24  ;;  %5402 = vmatpush.msrb.mxu1 %v5386_v30  ;;  %vm10167_vm7 = vmmov %vm10163_vm1 }
 0x79d   : > { %v4797_v18 = vpop.permute.xlu2 %4796  ;;  %5403 = vmatpush.msrb.mxu1 %v5384_v16 }
 0x79e   : > { %4799 = vst.msk [vmem:[#allocation3 + $0x8] sm:$0xf0] %vm10155_vm10, %v4797_v18  ;;  %5720 = vmatmul.msk.f32.vlgmr.msrb.gmra.mxu1 %vm447_vm3, %v6082_v40 }
 0x79f   : > { %4809 = vst.msk [vmem:[#allocation3 + $0x8] sm:$0xf0] %vm10165_vm11, %v4807_v22 }
 0x7a1   : > { %v5370_v38 = vpop.permute.xlu0 %5369 }
 0x7a2   : > { %5372 = vst.msk [vmem:[#allocation3 + $0x18] sm:$0xf] %vm10166_vm9, %v5370_v38 }
 0x7a9   : > { %v4244_v14 = vpop.permute.xlu0 %4243  ;;  %v5387_v35 = vld [vmem:[#allocation3 + $0x18] sm:$0xff] }
 0x7aa   : > { %4246 = vst.msk [vmem:[#allocation3 + $0x8] sm:$0xf] %vm10167_vm7, %v4244_v14  ;;  %5422 = vmatpush.msra.mxu1 %v5387_v35 }
 0x7b1   : > { %v5385_v6 = vld [vmem:[#allocation3 + $0x8] sm:$0xff] }
 0x7b2   : > { %5423 = vmatpush.msra.mxu1 %v5385_v6 }
 0x7b3   : > { %5721 = vmatmul.msk.f32.vlgmr.msra.gmra.mxu1 %vm447_vm3, %v6082_v40 }
 0x81b   : > { %v5405_v33 = vpop.f32.mrf.mxu1 }
 0x81c   : > { %v5406_v45 = vadd.f32 %v5405_v33, %v10168_v29 }
 0x81e   : > { %v5428_v52 = vmax.f32 %v5406_v45, 0.0 }
 0x820   : > { %5722 = vst [vmem:[%s8386_s29 + $0x10] sm:$0xff] %v5428_v52 }
 0x830   : > { %v5425_v61 = vpop.f32.mrf.mxu1 }
 0x831   : > { %v5426_v5 = vadd.f32 %v5425_v61, %v10168_v29 }
 0x833   : > { %v5429_v51 = vmax.f32 %v5426_v5, 0.0 }
 0x835   : > { %5723 = vst [vmem:[%s8386_s29 + $0x18] sm:$0xff] %v5429_v51 }
 0x836 PF: > { %s22_s15 = sadd.s32 1, %s6089_s15  }
 0x837   : > { %p19_p4 = scmp.ge.s32.totalorder %s22_s15, 4  }
 0x839   :  { %21 = sbr.rel (!%p19_p4) target bundleno = 2 (0x2), region = 160 }

</bundles_post_ra>
